<compile_context>
chip_gen: v7x
topology: tpu7x:2x2x1
jax: 0.10.0
libtpu: 0.0.40
codegen_flags: <defaults>
</compile_context>

<pallas_src>
import math

import jax
import jax.numpy as jnp
from jax.experimental import pallas as pl
from jax.experimental.pallas import tpu as pltpu

# ----------------------------- configuration ---------------------------------
HIDDEN = 32
NUM_HEADS = 4
HEAD_DIM = HIDDEN // NUM_HEADS
SIGMA_D = 0.2
SIGMA_A = 15.0
FACTOR_A = 180.0 / (SIGMA_A * math.pi)
BLOCKS = ("self", "cross")          # RPEConditionalTransformer block list
LN_EPS = 1e-5                       # torch.nn.LayerNorm default eps

# TODO(synk): activations/weights stay f32 for fidelity with the torch module; a bf16
# MXU-input variant (review item for v6e/v7x) would only change matmul operand dtypes.


# ----------------------------- in-kernel helpers ------------------------------
def _layer_norm(x, gamma, beta):
    mean = jnp.mean(x, axis=-1, keepdims=True)
    var = jnp.mean((x - mean) ** 2, axis=-1, keepdims=True)
    return (x - mean) * jax.lax.rsqrt(var + LN_EPS) * gamma + beta


def _sinusoid(idx_2d, div_row):
    # idx_2d: (R, L); div_row: (C//2,) -> (R, L, C), NON-interleaved [sin..., cos...].
    # The projection weights are row-permuted in the wrapper so the product equals
    # the torch interleaved sinusoidal embedding followed by nn.Linear.
    om = idx_2d[:, :, None] * div_row[None, None, :]
    return jnp.concatenate([jnp.sin(om), jnp.cos(om)], axis=-1)


def _mh_attention(q, k, v, hmask, hmask_t, pp=None):
    """Multi-head attention without per-head loops.

    q: (N, C); k, v: (M, C); hmask: (C, H) block-diagonal head-sum mask;
    pp: optional (N*M, C) relative positional embedding (RPE) projection.
    Scores per head h: s[i,j,h] = sum_{c in head h} q[i,c] * (k[j,c] + pp[i,j,c]).
    """
    N, C = q.shape
    M = k.shape[0]
    H = NUM_HEADS
    scale = 1.0 / math.sqrt(HEAD_DIM)

    q_b = jnp.broadcast_to(q[:, None, :], (N, M, C)).reshape(N * M, C)
    k_b = jnp.broadcast_to(k[None, :, :], (N, M, C)).reshape(N * M, C)
    kp = k_b if pp is None else k_b + pp

    s = jnp.dot(q_b * kp, hmask, preferred_element_type=jnp.float32) * scale  # (N*M, H)
    s = s.reshape(N, M, H)
    s = s - jnp.max(s, axis=1, keepdims=True)                                 # softmax over keys
    e = jnp.exp(s)
    attn = e * pl.reciprocal(jnp.sum(e, axis=1, keepdims=True), approx=True)  # (N, M, H)

    # expand per-head weights back to channels and contract with V
    attn_c = jnp.dot(attn.reshape(N * M, H), hmask_t,
                     preferred_element_type=jnp.float32)                       # (N*M, C)
    ctx = jnp.sum(attn_c.reshape(N, M, C) * v[None, :, :], axis=1)             # (N, C)
    return ctx


def _ffn_block(y, w1, b1, w2, b2, gamma, beta):
    h = jnp.maximum(jnp.dot(y, w1, preferred_element_type=jnp.float32) + b1, 0.0)
    h = jnp.dot(h, w2, preferred_element_type=jnp.float32) + b2
    return _layer_norm(y + h, gamma, beta)


# ----------------------------- Pallas kernels ---------------------------------
def rpe_self_layer_kernel(pts_ref, x_ref,
                          div_ref, hm_ref, hmt_ref,
                          wgeo_ref, bgeo_ref,
                          wqkv_ref, bqkv_ref, wp_ref, bp_ref, wo_ref, bo_ref,
                          g1_ref, be1_ref,
                          w1_ref, bf1_ref, w2_ref, bf2_ref,
                          g2_ref, be2_ref,
                          out_ref):
    """Fused: SelfGeometricStructureEmbedding + RPE MHA + residual LN + FFN + LN."""
    _, N, C = x_ref.shape
    pts = pts_ref[0]                                                 # (N, 3)
    x = x_ref[0]                                                     # (N, C)
    div = div_ref[0]                                                 # (C//2,)
    hm, hmt = hm_ref[...], hmt_ref[...]

    # --- self geometric structure embedding (pairwise-distance sinusoid + proj_d) ---
    diff = pts[:, None, :] - pts[None, :, :]                         # (N, N, 3)
    d_idx = jnp.sqrt(jnp.sum(diff * diff, axis=-1)) / SIGMA_D        # (N, N)
    emb = _sinusoid(d_idx, div).reshape(N * N, C)                    # (N*N, C)
    geo = jnp.dot(emb, wgeo_ref[...], preferred_element_type=jnp.float32) + bgeo_ref[...]
    # RPE projection inside the attention (proj_p), applied to the geometric embedding.
    pp = jnp.dot(geo, wp_ref[...], preferred_element_type=jnp.float32) + bp_ref[...]

    # --- fused q/k/v projection ---
    qkv = jnp.dot(x, wqkv_ref[...], preferred_element_type=jnp.float32) + bqkv_ref[...]
    q, k, v = qkv[:, :C], qkv[:, C:2 * C], qkv[:, 2 * C:]

    ctx = _mh_attention(q, k, v, hm, hmt, pp=pp)
    hidden = jnp.dot(ctx, wo_ref[...], preferred_element_type=jnp.float32) + bo_ref[...]
    y = _layer_norm(hidden + x, g1_ref[...], be1_ref[...])
    out_ref[0] = _ffn_block(y, w1_ref[...], bf1_ref[...], w2_ref[...], bf2_ref[...],
                            g2_ref[...], be2_ref[...])


def cross_layer_kernel(x_ref, xe_ref, mem_ref, me_ref,
                       hm_ref, hmt_ref,
                       wq_ref, bq_ref, wkv_ref, bkv_ref, wo_ref, bo_ref,
                       g1_ref, be1_ref,
                       w1_ref, bf1_ref, w2_ref, bf2_ref,
                       g2_ref, be2_ref,
                       wpr_ref, bpr_ref,
                       out_ref, proj_ref):
    """Fused: (+cross geometric embedding) + cross MHA + LN + FFN + LN + out_proj."""
    _, N, C = x_ref.shape
    x = x_ref[0] + xe_ref[0]                                         # query side + emb
    m = mem_ref[0] + me_ref[0]                                       # memory side + emb
    hm, hmt = hm_ref[...], hmt_ref[...]

    q = jnp.dot(x, wq_ref[...], preferred_element_type=jnp.float32) + bq_ref[...]
    kv = jnp.dot(m, wkv_ref[...], preferred_element_type=jnp.float32) + bkv_ref[...]
    k, v = kv[:, :C], kv[:, C:]

    ctx = _mh_attention(q, k, v, hm, hmt)
    hidden = jnp.dot(ctx, wo_ref[...], preferred_element_type=jnp.float32) + bo_ref[...]
    y = _layer_norm(hidden + x, g1_ref[...], be1_ref[...])
    z = _ffn_block(y, w1_ref[...], bf1_ref[...], w2_ref[...], bf2_ref[...],
                   g2_ref[...], be2_ref[...])
    out_ref[0] = z
    # fused final out_proj (BLOCKS ends with a cross block).
    proj_ref[0] = jnp.dot(z, wpr_ref[...], preferred_element_type=jnp.float32) + bpr_ref[...]


def cross_geo_kernel(d_ref, a_ref, div_ref, wdt_ref, bd_ref, wat_ref, ba_ref, out_ref):
    """CrossGeometricStructureEmbedding (reduction_a='max'): indices (B,N,K) -> (B,N,C)."""
    _, N, K = d_ref.shape
    C = out_ref.shape[2]
    div = div_ref[0]
    d_emb = _sinusoid(d_ref[0], div).reshape(N * K, C)
    a_emb = _sinusoid(a_ref[0], div).reshape(N * K, C)
    pd = jnp.dot(d_emb, wdt_ref[...], preferred_element_type=jnp.float32) + bd_ref[...]
    pa = jnp.dot(a_emb, wat_ref[...], preferred_element_type=jnp.float32) + ba_ref[...]
    out_ref[0] = (jnp.max(pd.reshape(N, K, C), axis=1)
                  + jnp.max(pa.reshape(N, K, C), axis=1))


# ----------------------------- pallas_call glue -------------------------------
def _batch_spec(a):
    nd = a.ndim
    return pl.BlockSpec((1,) + tuple(a.shape[1:]),
                        lambda b, _nd=nd: (b,) + (0,) * (_nd - 1))


def _const_spec(a):
    nd = a.ndim
    return pl.BlockSpec(tuple(a.shape), lambda b, _nd=nd: (0,) * _nd)


def _layer_call(kernel, out_shape, out_specs, batched, consts, batch):
    return pl.pallas_call(
        kernel,
        out_shape=out_shape,
        grid=(batch,),
        in_specs=[_batch_spec(a) for a in batched] + [_const_spec(c) for c in consts],
        out_specs=out_specs,
        compiler_params=pltpu.CompilerParams(dimension_semantics=("parallel",)),
    )(*batched, *consts)


def rpe_self_layer(params, lp, points, feats):
    B, N, C = feats.shape
    es = params["embed_self"]
    consts = (params["div"], params["hmask"], params["hmask_t"],
              es["wdt"], es["bd"],
              lp["wqkv"], lp["bqkv"], lp["wp"], lp["bp"], lp["wo"], lp["bo"],
              lp["ln1_g"], lp["ln1_b"],
              lp["w1"], lp["b1"], lp["w2"], lp["b2"],
              lp["ln2_g"], lp["ln2_b"])
    out_spec = pl.BlockSpec((1, N, C), lambda b: (b, 0, 0))
    return _layer_call(rpe_self_layer_kernel,
                       jax.ShapeDtypeStruct((B, N, C), jnp.float32),
                       out_spec, (points, feats), consts, B)


def cross_layer_call(params, lp, feats, feats_emb, mem, mem_emb):
    B, N, C = feats.shape
    consts = (params["hmask"], params["hmask_t"],
              lp["wq"], lp["bq"], lp["wkv"], lp["bkv"], lp["wo"], lp["bo"],
              lp["ln1_g"], lp["ln1_b"],
              lp["w1"], lp["b1"], lp["w2"], lp["b2"],
              lp["ln2_g"], lp["ln2_b"],
              params["out_proj"][0], params["out_proj"][1])
    out_shape = (jax.ShapeDtypeStruct((B, N, C), jnp.float32),
                 jax.ShapeDtypeStruct((B, N, C), jnp.float32))
    out_specs = (pl.BlockSpec((1, N, C), lambda b: (b, 0, 0)),
                 pl.BlockSpec((1, N, C), lambda b: (b, 0, 0)))
    return _layer_call(cross_layer_kernel, out_shape, out_specs,
                       (feats, feats_emb, mem, mem_emb), consts, B)


def _cross_indices(points, anchor_points):
    # pairwise distance indices (plain JAX glue)
    x2 = jnp.sum(points ** 2, axis=-1)[:, :, None]
    y2 = jnp.sum(anchor_points ** 2, axis=-1)[:, None, :]
    xy = jnp.einsum("bnd,bkd->bnk", points, anchor_points)
    sq = jnp.maximum(x2 - 2.0 * xy + y2, 0.0)
    d_idx = jnp.sqrt(sq) / SIGMA_D
    # triplet angular indices (3-vector geometry: cross product + atan2 kept in JAX glue)
    ref_vec = points[:, :, None, :] - anchor_points[:, None, :, :]      # (B, N, K, 3)
    anc_vec = jnp.roll(ref_vec, shift=-1, axis=2)                       # sta_indices = [1..K-1, 0]
    cx = ref_vec[..., 1] * anc_vec[..., 2] - ref_vec[..., 2] * anc_vec[..., 1]
    cy = ref_vec[..., 2] * anc_vec[..., 0] - ref_vec[..., 0] * anc_vec[..., 2]
    cz = ref_vec[..., 0] * anc_vec[..., 1] - ref_vec[..., 1] * anc_vec[..., 0]
    sin_v = jnp.sqrt(cx * cx + cy * cy + cz * cz)
    cos_v = jnp.sum(ref_vec * anc_vec, axis=-1)
    a_idx = jnp.arctan2(sin_v, cos_v) * FACTOR_A
    return d_idx, a_idx


def cross_geo_embed(params, points, anchor_points, cor_score):
    del cor_score                       # only used for reduction_a='sum'; default is 'max'
    d_idx, a_idx = _cross_indices(points, anchor_points)
    ec = params["embed_cross"]
    B, N, _ = points.shape
    consts = (params["div"], ec["wdt"], ec["bd"], ec["wat"], ec["ba"])
    out_spec = pl.BlockSpec((1, N, HIDDEN), lambda b: (b, 0, 0))
    return _layer_call(cross_geo_kernel,
                       jax.ShapeDtypeStruct((B, N, HIDDEN), jnp.float32),
                       out_spec, (d_idx, a_idx), consts, B)


def run_geometric_transformer(params, ref_points, src_points, ref_feats, src_feats,
                              ref_anchor_indices, src_anchor_indices, cor_score,
                              ref_masks=None, src_masks=None):
    # TODO(synk): ref_masks/src_masks are not used in this synthetic setup (None).
    assert BLOCKS[-1] == "cross", "final out_proj is fused into the last cross block"
    ref_anchor_points = ref_points[:, ref_anchor_indices, :]
    src_anchor_points = src_points[:, src_anchor_indices, :]

    ref_emb_cross = cross_geo_embed(params, ref_points, ref_anchor_points, cor_score)
    src_emb_cross = cross_geo_embed(params, src_points, src_anchor_points, cor_score)

    feats0, feats1 = ref_feats, src_feats
    ref_out = src_out = None
    for blk, lp in zip(BLOCKS, params["layers"]):
        if blk == "self":
            # self geometric embedding is recomputed inside the fused kernel (never in HBM)
            feats0 = rpe_self_layer(params, lp, ref_points, feats0)
            feats1 = rpe_self_layer(params, lp, src_points, feats1)
        else:
            # TODO(synk): the custom RPEConditionalTransformer variant that consumes the
            # cross anchor embeddings is library-specific; as before they are added to the
            # cross-attention inputs (positional conditioning), now fused into the kernel.
            feats0, ref_out = cross_layer_call(params, lp, feats0, ref_emb_cross,
                                               feats1, src_emb_cross)
            feats1, src_out = cross_layer_call(params, lp, feats1, src_emb_cross,
                                               feats0, ref_emb_cross)
    return ref_out, src_out


# ----------------------------- parameter init ---------------------------------
def init_params(key):
    C = HIDDEN
    half = C // 2
    keys = iter(jax.random.split(key, 80))

    def lin(fi, fo):
        k1, k2 = next(keys), next(keys)
        w = jax.random.normal(k1, (fi, fo), jnp.float32) * 0.05     # stored as W.T
        b = jax.random.normal(k2, (1, fo), jnp.float32) * 0.05
        return w, b

    def ln():
        return jnp.ones((1, C), jnp.float32), jnp.zeros((1, C), jnp.float32)

    # sinusoidal embedding frequencies
    div_term = jnp.exp(
        jnp.arange(0, C, 2, dtype=jnp.float32) * (-math.log(10000.0) / C)
    ).reshape(1, half)
    # permutation turning torch's interleaved [sin0,cos0,...] layout into the kernels'
    # concatenated [sin..., cos...] layout (applied to projection-weight rows).
    perm = jnp.concatenate([jnp.arange(0, C, 2), jnp.arange(1, C, 2)])

    # block-diagonal head mask: hmask[c, h] = 1 iff channel c belongs to head h.
    hmask = (jnp.arange(C)[:, None] // HEAD_DIM
             == jnp.arange(NUM_HEADS)[None, :]).astype(jnp.float32)

    wd_s, bd_s = lin(C, C)                                           # embedding_self.proj_d
    wa_c, ba_c = lin(C, C)                                           # embedding_cross.proj_a
    wd_c, bd_c = lin(C, C)                                           # embedding_cross.proj_d

    def rpe_layer_params():
        wq, bq = lin(C, C); wk, bk = lin(C, C); wv, bv = lin(C, C)
        wp, bp = lin(C, C); wo, bo = lin(C, C)
        w1, b1 = lin(C, 2 * C); w2, b2 = lin(2 * C, C)
        g1, be1 = ln(); g2, be2 = ln()
        return {
            "wqkv": jnp.concatenate([wq, wk, wv], axis=1),
            "bqkv": jnp.concatenate([bq, bk, bv], axis=1),
            "wp": wp, "bp": bp, "wo": wo, "bo": bo,
            "ln1_g": g1, "ln1_b": be1,
            "w1": w1, "b1": b1, "w2": w2, "b2": b2,
            "ln2_g": g2, "ln2_b": be2,
        }

    def cross_layer_params():
        wq, bq = lin(C, C); wk, bk = lin(C, C); wv, bv = lin(C, C)
        wo, bo = lin(C, C)
        w1, b1 = lin(C, 2 * C); w2, b2 = lin(2 * C, C)
        g1, be1 = ln(); g2, be2 = ln()
        return {
            "wq": wq, "bq": bq,
            "wkv": jnp.concatenate([wk, wv], axis=1),
            "bkv": jnp.concatenate([bk, bv], axis=1),
            "wo": wo, "bo": bo,
            "ln1_g": g1, "ln1_b": be1,
            "w1": w1, "b1": b1, "w2": w2, "b2": b2,
            "ln2_g": g2, "ln2_b": be2,
        }

    layers = [rpe_layer_params() if blk == "self" else cross_layer_params()
              for blk in BLOCKS]

    return {
        "div": div_term,
        "hmask": hmask,
        "hmask_t": hmask.T,
        "embed_self": {"wdt": wd_s[perm, :], "bd": bd_s},
        "embed_cross": {"wdt": wd_c[perm, :], "bd": bd_c,
                        "wat": wa_c[perm, :], "ba": ba_c},
        "layers": layers,
        "out_proj": lin(C, C),
    }


# ----------------------------------- main --------------------------------------
if __name__ == "__main__":
    key = jax.random.PRNGKey(0)
    B, N, M, K = 2, 16, 16, 4

    kp, k1, k2, k3, k4, k5 = jax.random.split(key, 6)
    params = init_params(kp)

    ref_points = jax.random.normal(k1, (B, N, 3), jnp.float32)
    src_points = jax.random.normal(k2, (B, M, 3), jnp.float32)
    ref_feats = jax.random.normal(k3, (B, N, HIDDEN), jnp.float32)
    src_feats = jax.random.normal(k4, (B, M, HIDDEN), jnp.float32)
    cor_score = jax.nn.softmax(jax.random.normal(k5, (K,), jnp.float32))
    ref_anchor_indices = jnp.array([0, 5, 10, 15], dtype=jnp.int32)
    src_anchor_indices = jnp.array([1, 4, 8, 12], dtype=jnp.int32)

    ref_out, src_out = run_geometric_transformer(
        params, ref_points, src_points, ref_feats, src_feats,
        ref_anchor_indices, src_anchor_indices, cor_score,
    )
    jax.block_until_ready((ref_out, src_out))

    assert ref_out.shape == (B, N, HIDDEN) and src_out.shape == (B, M, HIDDEN)
    assert bool(jnp.all(jnp.isfinite(ref_out))) and bool(jnp.all(jnp.isfinite(src_out)))
    print("KERNEL_OK")
</pallas_src>

<mosaic_0001>
module attributes {stable_mosaic.version = 11 : i64} {
  func.func @cross_geo_kernel(%arg0: i32, %arg1: memref<1x16x4xf32, #tpu.memory_space<vmem>>, %arg2: memref<1x16x4xf32, #tpu.memory_space<vmem>>, %arg3: memref<1x16xf32, #tpu.memory_space<vmem>>, %arg4: memref<32x32xf32, #tpu.memory_space<vmem>>, %arg5: memref<1x32xf32, #tpu.memory_space<vmem>>, %arg6: memref<32x32xf32, #tpu.memory_space<vmem>>, %arg7: memref<1x32xf32, #tpu.memory_space<vmem>>, %arg8: memref<1x16x32xf32, #tpu.memory_space<vmem>>) attributes {dimension_semantics = [#tpu.dimension_semantics<parallel>], iteration_bounds = array<i64: 2>, scalar_prefetch = 0 : i64, scratch_operands = 0 : i64, tpu.core_type = #tpu.core_type<tc>, window_params = [{transform_indices = @transform_0, window_bounds = array<i64: 1, 16, 4>}, {transform_indices = @transform_1, window_bounds = array<i64: 1, 16, 4>}, {pipeline_mode = #tpu.pipeline_mode<synchronous>, transform_indices = @transform_2, window_bounds = array<i64: 1, 16>}, {pipeline_mode = #tpu.pipeline_mode<synchronous>, transform_indices = @transform_3, window_bounds = array<i64: 32, 32>}, {pipeline_mode = #tpu.pipeline_mode<synchronous>, transform_indices = @transform_4, window_bounds = array<i64: 1, 32>}, {pipeline_mode = #tpu.pipeline_mode<synchronous>, transform_indices = @transform_5, window_bounds = array<i64: 32, 32>}, {pipeline_mode = #tpu.pipeline_mode<synchronous>, transform_indices = @transform_6, window_bounds = array<i64: 1, 32>}, {transform_indices = @transform_7, window_bounds = array<i64: 1, 16, 32>}]} {
    %c0 = arith.constant 0 : index
    %c0_0 = arith.constant 0 : index
    %0 = vector.load %arg3[%c0, %c0_0] : memref<1x16xf32, #tpu.memory_space<vmem>>, vector<1x16xf32>
    %1 = vector.shape_cast %0 : vector<1x16xf32> to vector<16xf32>
    %c0_1 = arith.constant 0 : index
    %c0_2 = arith.constant 0 : index
    %c0_3 = arith.constant 0 : index
    %2 = vector.load %arg1[%c0_1, %c0_2, %c0_3] : memref<1x16x4xf32, #tpu.memory_space<vmem>>, vector<1x16x4xf32>
    %3 = vector.shape_cast %2 : vector<1x16x4xf32> to vector<16x4xf32>
    %4 = vector.shape_cast %3 : vector<16x4xf32> to vector<16x4x1xf32>
    %5 = vector.shape_cast %1 : vector<16xf32> to vector<1x1x16xf32>
    %6 = vector.broadcast %4 : vector<16x4x1xf32> to vector<16x4x16xf32>
    %7 = vector.broadcast %5 : vector<1x1x16xf32> to vector<16x4x16xf32>
    %8 = arith.mulf %6, %7 : vector<16x4x16xf32>
    %9 = math.sin %8 : vector<16x4x16xf32>
    %10 = math.cos %8 : vector<16x4x16xf32>
    %11 = tpu.concatenate %9, %10 in 2 : vector<16x4x16xf32>, vector<16x4x16xf32> -> vector<16x4x32xf32>
    %12 = vector.shape_cast %11 : vector<16x4x32xf32> to vector<64x32xf32>
    %c0_4 = arith.constant 0 : index
    %c0_5 = arith.constant 0 : index
    %c0_6 = arith.constant 0 : index
    %13 = vector.load %arg2[%c0_4, %c0_5, %c0_6] : memref<1x16x4xf32, #tpu.memory_space<vmem>>, vector<1x16x4xf32>
    %14 = vector.shape_cast %13 : vector<1x16x4xf32> to vector<16x4xf32>
    %15 = vector.shape_cast %14 : vector<16x4xf32> to vector<16x4x1xf32>
    %16 = vector.shape_cast %1 : vector<16xf32> to vector<1x1x16xf32>
    %17 = vector.broadcast %15 : vector<16x4x1xf32> to vector<16x4x16xf32>
    %18 = vector.broadcast %16 : vector<1x1x16xf32> to vector<16x4x16xf32>
    %19 = arith.mulf %17, %18 : vector<16x4x16xf32>
    %20 = math.sin %19 : vector<16x4x16xf32>
    %21 = math.cos %19 : vector<16x4x16xf32>
    %22 = tpu.concatenate %20, %21 in 2 : vector<16x4x16xf32>, vector<16x4x16xf32> -> vector<16x4x32xf32>
    %23 = vector.shape_cast %22 : vector<16x4x32xf32> to vector<64x32xf32>
    %c0_7 = arith.constant 0 : index
    %c0_8 = arith.constant 0 : index
    %24 = vector.load %arg4[%c0_7, %c0_8] : memref<32x32xf32, #tpu.memory_space<vmem>>, vector<32x32xf32>
    %cst = arith.constant dense<0.000000e+00> : vector<64x32xf32>
    %25 = tpu.matmul %12, %24, %cst {dimension_numbers = #tpu.dot_dimension_numbers<[1], [0], [0], [1], [0, 0, 1, 1], [], []>} : vector<64x32xf32>, vector<32x32xf32>, vector<64x32xf32> -> vector<64x32xf32>
    %c0_9 = arith.constant 0 : index
    %c0_10 = arith.constant 0 : index
    %26 = vector.load %arg5[%c0_9, %c0_10] : memref<1x32xf32, #tpu.memory_space<vmem>>, vector<1x32xf32>
    %27 = vector.broadcast %26 : vector<1x32xf32> to vector<64x32xf32>
    %28 = arith.addf %25, %27 : vector<64x32xf32>
    %c0_11 = arith.constant 0 : index
    %c0_12 = arith.constant 0 : index
    %29 = vector.load %arg6[%c0_11, %c0_12] : memref<32x32xf32, #tpu.memory_space<vmem>>, vector<32x32xf32>
    %cst_13 = arith.constant dense<0.000000e+00> : vector<64x32xf32>
    %30 = tpu.matmul %23, %29, %cst_13 {dimension_numbers = #tpu.dot_dimension_numbers<[1], [0], [0], [1], [0, 0, 1, 1], [], []>} : vector<64x32xf32>, vector<32x32xf32>, vector<64x32xf32> -> vector<64x32xf32>
    %c0_14 = arith.constant 0 : index
    %c0_15 = arith.constant 0 : index
    %31 = vector.load %arg7[%c0_14, %c0_15] : memref<1x32xf32, #tpu.memory_space<vmem>>, vector<1x32xf32>
    %32 = vector.broadcast %31 : vector<1x32xf32> to vector<64x32xf32>
    %33 = arith.addf %30, %32 : vector<64x32xf32>
    %34 = vector.shape_cast %28 : vector<64x32xf32> to vector<16x4x32xf32>
    %cst_16 = arith.constant dense<0xFF800000> : vector<16x32xf32>
    %35 = vector.multi_reduction <maximumf>, %34, %cst_16 [1] : vector<16x4x32xf32> to vector<16x32xf32>
    %36 = vector.shape_cast %33 : vector<64x32xf32> to vector<16x4x32xf32>
    %cst_17 = arith.constant dense<0xFF800000> : vector<16x32xf32>
    %37 = vector.multi_reduction <maximumf>, %36, %cst_17 [1] : vector<16x4x32xf32> to vector<16x32xf32>
    %38 = arith.addf %35, %37 : vector<16x32xf32>
    %c0_18 = arith.constant 0 : index
    %c0_19 = arith.constant 0 : index
    %c0_20 = arith.constant 0 : index
    %39 = vector.load %arg8[%c0_18, %c0_19, %c0_20] : memref<1x16x32xf32, #tpu.memory_space<vmem>>, vector<1x16x32xf32>
    %40 = vector.shape_cast %39 : vector<1x16x32xf32> to vector<16x32xf32>
    %41 = vector.shape_cast %38 : vector<16x32xf32> to vector<1x16x32xf32>
    tpu.vector_store %arg8[%c0_18, %c0_19, %c0_20], %41 {strides = array<i32>} : memref<1x16x32xf32, #tpu.memory_space<vmem>>, vector<1x16x32xf32>,
    return
  }
  func.func @transform_0(%arg0: i32) -> (i32, i32, i32) {
    %c0_i32 = arith.constant 0 : i32
    %c0_i32_0 = arith.constant 0 : i32
    %c0_i32_1 = arith.constant 0 : i32
    return %arg0, %c0_i32, %c0_i32_0 : i32, i32, i32
  }
  func.func @transform_1(%arg0: i32) -> (i32, i32, i32) {
    %c0_i32 = arith.constant 0 : i32
    %c0_i32_0 = arith.constant 0 : i32
    %c0_i32_1 = arith.constant 0 : i32
    return %arg0, %c0_i32, %c0_i32_0 : i32, i32, i32
  }
  func.func @transform_2(%arg0: i32) -> (i32, i32) {
    %c0_i32 = arith.constant 0 : i32
    %c0_i32_0 = arith.constant 0 : i32
    %c0_i32_1 = arith.constant 0 : i32
    return %c0_i32, %c0_i32_0 : i32, i32
  }
  func.func @transform_3(%arg0: i32) -> (i32, i32) {
    %c0_i32 = arith.constant 0 : i32
    %c0_i32_0 = arith.constant 0 : i32
    %c0_i32_1 = arith.constant 0 : i32
    return %c0_i32, %c0_i32_0 : i32, i32
  }
  func.func @transform_4(%arg0: i32) -> (i32, i32) {
    %c0_i32 = arith.constant 0 : i32
    %c0_i32_0 = arith.constant 0 : i32
    %c0_i32_1 = arith.constant 0 : i32
    return %c0_i32, %c0_i32_0 : i32, i32
  }
  func.func @transform_5(%arg0: i32) -> (i32, i32) {
    %c0_i32 = arith.constant 0 : i32
    %c0_i32_0 = arith.constant 0 : i32
    %c0_i32_1 = arith.constant 0 : i32
    return %c0_i32, %c0_i32_0 : i32, i32
  }
  func.func @transform_6(%arg0: i32) -> (i32, i32) {
    %c0_i32 = arith.constant 0 : i32
    %c0_i32_0 = arith.constant 0 : i32
    %c0_i32_1 = arith.constant 0 : i32
    return %c0_i32, %c0_i32_0 : i32, i32
  }
  func.func @transform_7(%arg0: i32) -> (i32, i32, i32) {
    %c0_i32 = arith.constant 0 : i32
    %c0_i32_0 = arith.constant 0 : i32
    %c0_i32_1 = arith.constant 0 : i32
    return %arg0, %c0_i32, %c0_i32_0 : i32, i32, i32
  }
}

</mosaic_0001>

<bundles_post_ra>
// kernel: tpu_custom_call.1
= control target key start
LH: loop header
LB: loop body
LE: loop exit
PB: predicated region body
PF: predicated region fallthrough
CT: control target
= control target key end

     0   :  { %12 = vsyncpa [#allocation3], 0  ;;  %s12220_s0 = inlined_call_operand.vmem [shape: f32[2,16,4], index: 0, kind: input, shape index: {}]   ;;  %s12221_s1 = inlined_call_operand.vmem [shape: f32[2,16,4], index: 1, kind: input, shape index: {}]   ;;  %s12222_s2 = inlined_call_operand.vmem [shape: f32[1,16], index: 2, kind: input, shape index: {}]   ;;  %s12223_s3 = inlined_call_operand.vmem [shape: f32[32,32], index: 3, kind: input, shape index: {}]   ;;  %s12224_s4 = inlined_call_operand.vmem [shape: f32[1,32], index: 4, kind: input, shape index: {}]   ;;  %s12225_s5 = inlined_call_operand.vmem [shape: f32[32,32], index: 5, kind: input, shape index: {}]   ;;  %s12226_s6 = inlined_call_operand.vmem [shape: f32[1,32], index: 6, kind: input, shape index: {}]   ;;  %s12227_s7 = inlined_call_operand.hbm [shape: f32[2,16,32], index: 7, kind: output, shape index: {}]  }
   0x1   :  { %14 = vsyncpa [#allocation3 + $0x1], 0  ;;  %s8874_s24 = smov 0   ;;  %s8876_s25 = smov 0  }
   0x2   :  { %s8878_s26 = smov 0   ;;  %s8880_s27 = smov 0  }
   0x3 LB: > { %s8895_s28 = sadd.s32 4294967295, %s8822_s27   ;;  %s8080_s29 = sadd.s32 4294967294, %s8822_s27   ;;  %s8822_s27 = sphi %s8880_s27, %s12675_s27   ;;  %s8818_s26 = sphi %s8878_s26, %s12674_s26   ;;  %s8814_s25 = sphi %s8876_s25, %s12673_s25   ;;  %s8810_s24 = sphi %s8874_s24, %s12672_s24  }
   0x4   : > { %s8899_s30 = sadd.s32 1, %s8822_s27   ;;  %s184_s8 = sadd.s32 1, %s8818_s26 }
   0x5   : > { %s181_s9 = ssub.s32 %s8822_s27, %s8899_s30  ;;  %p194_p0 = scmp.ne.s32.totalorder %s8818_s26, %s8814_s25 }
   0x6   : > { %p182_p1 = scmp.eq.s32.totalorder %s181_s9, 0  ;;  %p195_p2 = scmp.eq.s32.totalorder %s8895_s28, 1 }
   0x7   : > { %p200_p3 = scmp.ne.s32.totalorder %s8814_s25, %s8810_s24  ;;  %p201_p4 = scmp.eq.s32.totalorder %s8080_s29, 1 }
   0x8   : > { %s8910_s10 = scalar_select %p182_p1, %s8818_s26, %s184_s8  }
   0x9   : > { %p8912_p5 = por %p195_p2, %p194_p0  ;;  %p8916_p6 = por %p201_p4, %p200_p3 }
   0xa   : > { %p8083_p7 = scmp.ge.s32.totalorder %s8822_s27, 1  ;;  %p250_p8 = scmp.lt.s32.totalorder %s8822_s27, 3 }
   0xc   : > { %p251_p9 = pnand %p8083_p7, %p250_p8 }
   0xe   : > { %254 = sbr.rel (%p251_p9) target bundleno = 1395 (0x573), region = 48 }
  0x15   : > { %p287_p10 = scmp.lt.s32.totalorder %s8895_s28, 1  ;;  %v300_v0 = vlaneseq  ;;  %v8941_v46 = vld [vmem:[%s12222_s2] ss:$0 sm:$0xff]  ;;  %s284_s29 = sand.u32 1, %s8814_s25  }
  0x16   : > { %s8084_s8 = sshll.u32 %s284_s29, 4 }
  0x17   : > { %s288_s13 = scalar_select %p287_p10, %s8895_s28, 1  ;;  %v301_v1 = vshrl.u32 %v300_v0, 7 }
  0x18   : > { %s12128_s9 = scalar_lea.vmem [#allocation2], %s8084_s8 }
  0x19   : > { %s8369_s14 = sshll.u32 %s288_s13, 4  ;;  %v302_v2 = vsub.s32 0, %v301_v1  ;;  %v309_v3 = vsub.s32 1, %v301_v1  ;;  %v323_v10 = vsub.s32 3, %v301_v1  ;;  %v316_v11 = vsub.s32 2, %v301_v1  ;;  %s8371_s13 = sshll.u32 %s8895_s28, 8 }
  0x1a   : > { %s8927_s17 = scalar_lea.vmem %s12221_s1, %s8369_s14  ;;  %s8932_s20 = scalar_lea.vmem %s12220_s0, %s8369_s14  ;;  %v337_v16 = vsub.s32 5, %v301_v1  ;;  %v330_v17 = vsub.s32 4, %v301_v1  ;;  %v351_v22 = vsub.s32 7, %v301_v1  ;;  %v344_v23 = vsub.s32 6, %v301_v1 }
  0x1b   : > { %v3827_v4 = vld [vmem:[%s8927_s17] sm:$0xff]  ;;  %v299_v28 = vld [vmem:[%s8932_s20 + $0x8] sm:$0xff]  ;;  %s8006_s14 = sshll.u32 %s12128_s9, 4  ;;  %s12169_s18 = scalar_lea.hbm %s12227_s7, %s8371_s13  ;;  %s12171_s14 = int_to_ptr.vmem [resolvable:$true] %s8006_s14 }
  0x1c   : > { %v298_v5 = vld [vmem:[%s8932_s20] sm:$0xff]  ;;  %v3832_v6 = vrot.slane %v3827_v4, %v302_v2  ;;  %v3839_v8 = vrot.slane %v3827_v4, %v309_v3  ;;  %v3853_v14 = vrot.slane %v3827_v4, %v323_v10  ;;  %v3846_v15 = vrot.slane %v3827_v4, %v316_v11  ;;  %v3828_v31 = vld [vmem:[%s8927_s17 + $0x8] sm:$0xff]  ;;  %s8830_s17 = smov 16   ;;  %s12179_s28 = scalar_lea.sflag [#allocation3], %s284_s29 }
  0x1d   : > { %v303_v7 = vrot.slane %v298_v5, %v302_v2  ;;  %v310_v9 = vrot.slane %v298_v5, %v309_v3  ;;  %v324_v12 = vrot.slane %v298_v5, %v323_v10  ;;  %v317_v13 = vrot.slane %v298_v5, %v316_v11  ;;  %s8760_s19 = scalar_lea.vmem %s12171_s14, 256  ;;  %s8831_s20 = smov [#allocation2]  }
  0x1e   : > { %3834 = vbcast.lane.b32.xlu1 %v3832_v6, 256  ;;  %v338_v18 = vrot.slane %v298_v5, %v337_v16  ;;  %v331_v19 = vrot.slane %v298_v5, %v330_v17  ;;  %v3867_v20 = vrot.slane %v3827_v4, %v337_v16  ;;  %v3860_v21 = vrot.slane %v3827_v4, %v330_v17  ;;  %p8761_p11 = scmp.ne.s32.totalorder %s12171_s14, %s8760_s19 }
  0x1f   : > { %305 = vbcast.lane.b32.xlu0 %v303_v7, 256  ;;  %v352_v24 = vrot.slane %v298_v5, %v351_v22  ;;  %v345_v25 = vrot.slane %v298_v5, %v344_v23  ;;  %v3881_v26 = vrot.slane %v3827_v4, %v351_v22  ;;  %v3874_v27 = vrot.slane %v3827_v4, %v344_v23 }
  0x20   : > { %v366_v29 = vrot.slane %v299_v28, %v309_v3  ;;  %v359_v30 = vrot.slane %v299_v28, %v302_v2  ;;  %v3895_v32 = vrot.slane %v3828_v31, %v309_v3  ;;  %v3888_v33 = vrot.slane %v3828_v31, %v302_v2  ;;  %p8762_p12 = pnand %p8761_p11, %p8912_p5 }
  0x21   : > { %v380_v34 = vrot.slane %v299_v28, %v323_v10  ;;  %v373_v35 = vrot.slane %v299_v28, %v316_v11  ;;  %v3909_v36 = vrot.slane %v3828_v31, %v323_v10  ;;  %v3902_v37 = vrot.slane %v3828_v31, %v316_v11 }
  0x22   : > { %3841 = vbcast.lane.b32.xlu1 %v3839_v8, 256  ;;  %v394_v38 = vrot.slane %v299_v28, %v337_v16  ;;  %v387_v39 = vrot.slane %v299_v28, %v330_v17  ;;  %v3923_v40 = vrot.slane %v3828_v31, %v337_v16  ;;  %v3916_v41 = vrot.slane %v3828_v31, %v330_v17  ;;  %p8763_p13 = pneg %p8762_p12 }
  0x23   : > { %312 = vbcast.lane.b32.xlu0 %v310_v9, 256  ;;  %v408_v42 = vrot.slane %v299_v28, %v351_v22  ;;  %v401_v43 = vrot.slane %v299_v28, %v344_v23  ;;  %v3937_v44 = vrot.slane %v3828_v31, %v351_v22  ;;  %v3930_v45 = vrot.slane %v3828_v31, %v344_v23 }
  0x24   : > { %v12236_v22 = vmov 2475754826   ;;  %v12265_v28 = vmov 920167782  }
  0x26   : > { %326 = vbcast.lane.b32.xlu1 %v324_v12, 256 }
  0x27   : > { %319 = vbcast.lane.b32.xlu0 %v317_v13, 256 }
  0x2a   : > { %3855 = vbcast.lane.b32.xlu1 %v3853_v14, 256 }
  0x2b   : > { %3848 = vbcast.lane.b32.xlu0 %v3846_v15, 256 }
  0x2e   : > { %340 = vbcast.lane.b32.xlu1 %v338_v18, 256 }
  0x2f   : > { %333 = vbcast.lane.b32.xlu0 %v331_v19, 256 }
  0x32   : > { %3869 = vbcast.lane.b32.xlu1 %v3867_v20, 256  ;;  %v12245_v20 = vmov 683565275  }
  0x33   : > { %3862 = vbcast.lane.b32.xlu0 %v3860_v21, 256 }
  0x36   : > { %354 = vbcast.lane.b32.xlu1 %v352_v24, 256  ;;  %v12238_v24 = vmov 2131351028  }
  0x37   : > { %347 = vbcast.lane.b32.xlu0 %v345_v25, 256 }
  0x3a   : > { %3883 = vbcast.lane.b32.xlu1 %v3881_v26, 256  ;;  %v12240_v26 = vmov 2102212464  }
  0x3b   : > { %3876 = vbcast.lane.b32.xlu0 %v3874_v27, 256 }
  0x3e   : > { %368 = vbcast.lane.b32.xlu1 %v366_v29, 256 }
  0x3f   : > { %361 = vbcast.lane.b32.xlu0 %v359_v30, 256 }
  0x42   : > { %3897 = vbcast.lane.b32.xlu1 %v3895_v32, 256 }
  0x43   : > { %3890 = vbcast.lane.b32.xlu0 %v3888_v33, 256 }
  0x46   : > { %382 = vbcast.lane.b32.xlu1 %v380_v34, 256 }
  0x47   : > { %375 = vbcast.lane.b32.xlu0 %v373_v35, 256 }
  0x4a   : > { %3911 = vbcast.lane.b32.xlu1 %v3909_v36, 256 }
  0x4b   : > { %3904 = vbcast.lane.b32.xlu0 %v3902_v37, 256  ;;  %v12243_v37 = vmov 1326507024  }
  0x4e   : > { %396 = vbcast.lane.b32.xlu1 %v394_v38, 256 }
  0x4f   : > { %389 = vbcast.lane.b32.xlu0 %v387_v39, 256 }
  0x52   : > { %3925 = vbcast.lane.b32.xlu1 %v3923_v40, 256 }
  0x53   : > { %3918 = vbcast.lane.b32.xlu0 %v3916_v41, 256 }
  0x56   : > { %410 = vbcast.lane.b32.xlu1 %v408_v42, 256 }
  0x57   : > { %403 = vbcast.lane.b32.xlu0 %v401_v43, 256 }
  0x5a   : > { %3939 = vbcast.lane.b32.xlu1 %v3937_v44, 256 }
  0x5b   : > { %3932 = vbcast.lane.b32.xlu0 %v3930_v45, 256 }
  0x90   : > { %v3835_v47 = vpop.permute.xlu1 %3834 }
  0x91   : > { %v306_v48 = vpop.permute.xlu0 %305  ;;  %v8944_v49 = vmul.f32 %v8941_v46, %v3835_v47 }
  0x92   : > { %v8947_v50 = vmul.f32 %v8941_v46, %v306_v48 }
  0x93   : > { %v12232_v51 = vand.u32 2147483647, %v8944_v49  ;;  %v3960_v52 = vand.u32 2139095040, %v8944_v49 }
  0x94   : > { %v12235_v53 = vand.u32 2147483647, %v8947_v50  ;;  %v437_v54 = vand.u32 2139095040, %v8947_v50  ;;  %v3842_v55 = vpop.permute.xlu1 %3841 }
  0x95   : > { %v313_v56 = vpop.permute.xlu0 %312  ;;  %v3961_v57 = vshrl.u32 %v3960_v52, 23  ;;  %v3964_v58 = vand.u32 8388607, %v12232_v51  ;;  %v8958_v60 = vmul.f32 %v8941_v46, %v3842_v55 }
  0x96   : > { %v441_v59 = vand.u32 8388607, %v12235_v53  ;;  %v438_v61 = vshrl.u32 %v437_v54, 23  ;;  %v8961_v62 = vmul.f32 %v8941_v46, %v313_v56 }
  0x97   : > { %12380 = vst [vmem:[#allocation5_spill] sm:$0xff] %v8958_v60  ;;  %v8218_v63 = vadd.s32 4294967169, %v3961_v57  ;;  %v4064_v1 = vand.u32 2139095040, %v8958_v60  ;;  %v3965_v2 = vor.u32 8388608, %v3964_v58  ;;  %v12230_v6 = vand.u32 2147483647, %v8958_v60 }
  0x98   : > { %12381 = vst [vmem:[#allocation6_spill] sm:$0xff] %v8961_v62  ;;  %v8090_v0 = vadd.s32 4294967169, %v438_v61  ;;  %v442_v4 = vor.u32 8388608, %v441_v59  ;;  %v541_v8 = vand.u32 2139095040, %v8961_v62 }
  0x99   : > { %v3967_v3 = vadd.s32 1, %v8218_v63  ;;  %v4065_v7 = vshrl.u32 %v4064_v1, 23  ;;  %v8966_v12 = vshll.u32 %v3965_v2, 8  ;;  %v8974_v17 = vand.u32 8388607, %v12230_v6 }
  0x9a   : > { %v444_v5 = vadd.s32 1, %v8090_v0  ;;  %v8968_v14 = vshll.u32 %v442_v4, 8  ;;  %v8976_v18 = vshrl.u32 %v541_v8, 23 }
  0x9b   : > { %vm3968_vm0 = vcmp.gt.s32.totalorder %v3967_v3, 0  ;;  %v8222_v10 = vadd.s32 4294967169, %v4065_v7 }
  0x9c   : > { %v3969_v9 = vsel %vm3968_vm0, %v3967_v3, 0  ;;  %vm445_vm1 = vcmp.gt.s32.totalorder %v444_v5, 0 }
  0x9d   : > { %v3971_v11 = vand.u32 31, %v3969_v9  ;;  %v446_v13 = vsel %vm445_vm1, %v444_v5, 0  ;;  %v3970_v15 = vshrl.u32 %v3969_v9, 5  ;;  %v8985_v31 = vadd.s32 1, %v8222_v10 }
  0x9e   : > { %v8970_v16 = vand.u32 31, %v446_v13  ;;  %v8983_v30 = vshrl.u32 %v446_v13, 5 }
  0x9f   : > { %v3972_v19 = vsub.s32 32, %v3971_v11  ;;  %v3974_v21 = vshll.u32 %v12245_v20, %v3971_v11  ;;  %v3977_v23 = vshll.u32 %v12236_v22, %v3971_v11  ;;  %v3980_v25 = vshll.u32 %v12238_v24, %v3971_v11 }
  0xa0   : > { %v3983_v27 = vshll.u32 %v12240_v26, %v3971_v11  ;;  %v3986_v29 = vshll.u32 %v12265_v28, %v3971_v11  ;;  %vm3989_vm2 = vcmp.lt.s32.totalorder %v3970_v15, 1  ;;  %vm3990_vm3 = vcmp.lt.s32.totalorder %v3970_v15, 2 }
  0xa1   : > { %v3973_v32 = vshrl.u32 %v12245_v20, %v3972_v19  ;;  %v3975_v33 = vshrl.u32 %v12236_v22, %v3972_v19  ;;  %v3978_v34 = vshrl.u32 %v12238_v24, %v3972_v19  ;;  %v3981_v35 = vshrl.u32 %v12240_v26, %v3972_v19 }
  0xa2   : > { %v3984_v36 = vshrl.u32 %v12265_v28, %v3972_v19  ;;  %v3987_v38 = vshrl.u32 %v12243_v37, %v3972_v19  ;;  %v449_v42 = vsub.s32 32, %v8970_v16  ;;  %vm3991_vm4 = vcmp.lt.s32.totalorder %v3970_v15, 3 }
  0xa3   : > { %v3976_v39 = vor.u32 %v3975_v33, %v3974_v21  ;;  %v3979_v40 = vor.u32 %v3978_v34, %v3977_v23  ;;  %v3982_v41 = vor.u32 %v3981_v35, %v3980_v25  ;;  %vm3992_vm5 = vcmp.lt.s32.totalorder %v3970_v15, 4 }
  0xa4   : > { %v3985_v43 = vor.u32 %v3984_v36, %v3983_v27  ;;  %v3988_v44 = vor.u32 %v3987_v38, %v3986_v29  ;;  %v451_v57 = vshll.u32 %v12245_v20, %v8970_v16  ;;  %v452_v61 = vshrl.u32 %v12236_v22, %v449_v42 }
  0xa5   : > { %v3993_v45 = vsel %vm3989_vm2, %v3973_v32, %v3976_v39  ;;  %v3994_v47 = vsel %vm3992_vm5, %v3982_v41, 2102212464  ;;  %v3997_v48 = vsel %vm3989_vm2, %v3976_v39, %v3979_v40  ;;  %v4001_v52 = vsel %vm3989_vm2, %v3979_v40, %v3982_v41 }
  0xa6   : > { %v3995_v54 = vsel %vm3991_vm4, %v3979_v40, %v3994_v47  ;;  %v3998_v55 = vsel %vm3992_vm5, %v3985_v43, 920167782  ;;  %v4002_v56 = vsel %vm3992_vm5, %v3988_v44, 1326507024  ;;  %v454_v63 = vshll.u32 %v12236_v22, %v8970_v16 }
  0xa7   : > { %v3999_v58 = vsel %vm3991_vm4, %v3982_v41, %v3998_v55  ;;  %v4003_v59 = vsel %vm3991_vm4, %v3985_v43, %v4002_v56  ;;  %v3996_v0 = vsel %vm3990_vm3, %v3993_v45, %v3995_v54  ;;  %v455_v3 = vshrl.u32 %v12238_v24, %v449_v42 }
  0xa8   : > { %v4000_v1 = vsel %vm3990_vm3, %v3997_v48, %v3999_v58  ;;  %v4004_v2 = vsel %vm3990_vm3, %v4001_v52, %v4003_v59  ;;  %v453_v9 = vor.u32 %v452_v61, %v451_v57  ;;  %v457_v11 = vshll.u32 %v12238_v24, %v8970_v16 }
  0xa9   : > { %v9004_v4 = vmul.u32.u64.low %v8966_v12, %v4004_v2  ;;  %v9005_v5 = vmul.u32.u64.high %v8966_v12, %v4004_v2, %v9004_v4  ;;  %v9008_v7 = vmul.u32.u64.low %v8966_v12, %v4000_v1  ;;  %v9009_v8 = vmul.u32.u64.high %v8966_v12, %v4000_v1, %v9008_v7 }
  0xaa   : > { %v456_v10 = vor.u32 %v455_v3, %v454_v63  ;;  %v458_v13 = vshrl.u32 %v12240_v26, %v449_v42  ;;  %v450_v15 = vshrl.u32 %v12245_v20, %v449_v42  ;;  %v460_v19 = vshll.u32 %v12240_v26, %v8970_v16 }
  0xab   : > { %v461_v21 = vshrl.u32 %v12265_v28, %v449_v42  ;;  %v464_v23 = vshrl.u32 %v12243_v37, %v449_v42  ;;  %v4012_v25 = vmul.u32 %v8966_v12, %v3996_v0  ;;  %v463_v29 = vshll.u32 %v12265_v28, %v8970_v16 }
  0xac   : > { %v459_v27 = vor.u32 %v458_v13, %v457_v11  ;;  %vm466_vm6 = vcmp.lt.s32.totalorder %v8983_v30, 1  ;;  %vm4014_vm7 = vc.u32 %v9005_v5, %v9008_v7  ;;  %v4015_v32 = vadd.s32 1, %v9009_v8 }
  0xad   : > { %v462_v33 = vor.u32 %v461_v21, %v460_v19  ;;  %vm467_vm8 = vcmp.lt.s32.totalorder %v8983_v30, 2  ;;  %v465_v34 = vor.u32 %v464_v23, %v463_v29  ;;  %vm468_vm9 = vcmp.lt.s32.totalorder %v8983_v30, 3 }
  0xae   : > { %vm469_vm10 = vcmp.lt.s32.totalorder %v8983_v30, 4  ;;  %v474_v12 = vsel %vm466_vm6, %v453_v9, %v456_v10  ;;  %v4016_v35 = vsel %vm4014_vm7, %v4015_v32, %v9009_v8  ;;  %v478_v38 = vsel %vm466_vm6, %v456_v10, %v459_v27 }
  0xaf   : > { %v471_v36 = vsel %vm469_vm10, %v459_v27, 2102212464  ;;  %v475_v16 = vsel %vm469_vm10, %v462_v33, 920167782  ;;  %v4017_v39 = vadd.s32 %v4016_v35, %v4012_v25  ;;  %v470_v40 = vsel %vm466_vm6, %v450_v15, %v453_v9 }
  0xb0   : > { %v476_v41 = vsel %vm468_vm9, %v459_v27, %v475_v16  ;;  %v479_v42 = vsel %vm469_vm10, %v465_v34, 1326507024  ;;  %v472_v43 = vsel %vm468_vm9, %v456_v10, %v471_v36  ;;  %vm4072_vm11 = vcmp.gt.s32.totalorder %v8985_v31, 0 }
  0xb1   : > { %v477_v44 = vsel %vm467_vm8, %v474_v12, %v476_v41  ;;  %v480_v45 = vsel %vm468_vm9, %v462_v33, %v479_v42  ;;  %v4018_v47 = vadd.s32 536870912, %v4017_v39  ;;  %v4073_v57 = vsel %vm4072_vm11, %v8985_v31, 0 }
  0xb2   : > { %v481_v48 = vsel %vm467_vm8, %v478_v38, %v480_v45  ;;  %v9037_v52 = vmul.u32.u64.low %v8968_v14, %v477_v44  ;;  %v9038_v54 = vmul.u32.u64.high %v8968_v14, %v477_v44, %v9037_v52  ;;  %v473_v59 = vsel %vm467_vm8, %v470_v40, %v472_v43 }
  0xb3   : > { %v9042_v55 = vmul.u32.u64.low %v8968_v14, %v481_v48  ;;  %v9043_v56 = vmul.u32.u64.high %v8968_v14, %v481_v48, %v9042_v55  ;;  %v9046_v58 = vshrl.u32 %v4018_v47, 30  ;;  %v4075_v61 = vand.u32 31, %v4073_v57 }
  0xb4   : > { %v4069_v63 = vor.u32 8388608, %v8974_v17  ;;  %v8094_v0 = vadd.s32 4294967169, %v8976_v18  ;;  %v492_v2 = vadd.s32 1, %v9038_v54  ;;  %v489_v8 = vmul.u32 %v8968_v14, %v473_v59 }
  0xb5   : > { %v4020_v1 = vshll.u32 %v9046_v58, 30  ;;  %v4076_v3 = vsub.s32 32, %v4075_v61  ;;  %v4078_v4 = vshll.u32 %v12245_v20, %v4075_v61  ;;  %vm491_vm12 = vc.u32 %v9043_v56, %v9037_v52 }
  0xb6   : > { %v4081_v30 = vshll.u32 %v12236_v22, %v4075_v61  ;;  %v4084_v31 = vshll.u32 %v12238_v24, %v4075_v61  ;;  %v493_v17 = vsel %vm491_vm12, %v492_v2, %v9038_v54  ;;  %v4074_v18 = vshrl.u32 %v4073_v57, 5 }
  0xb7   : > { %v9060_v9 = vsub.s32 %v4017_v39, %v4020_v1  ;;  %v4079_v10 = vshrl.u32 %v12236_v22, %v4076_v3  ;;  %v494_v11 = vadd.s32 %v493_v17, %v489_v8  ;;  %v4082_v13 = vshrl.u32 %v12238_v24, %v4076_v3 }
  0xb8   : > { %v4085_v15 = vshrl.u32 %v12240_v26, %v4076_v3  ;;  %v4087_v14 = vshll.u32 %v12240_v26, %v4075_v61  ;;  %v4088_v23 = vshrl.u32 %v12265_v28, %v4076_v3  ;;  %v4090_v25 = vshll.u32 %v12265_v28, %v4075_v61 }
  0xb9   : > { %v4023_v19 = vsub.s32 0, %v9060_v9  ;;  %v4080_v21 = vor.u32 %v4079_v10, %v4078_v4  ;;  %v495_v27 = vadd.s32 536870912, %v494_v11  ;;  %v4083_v29 = vor.u32 %v4082_v13, %v4081_v30  ;;  %v327_v13 = vpop.permute.xlu1 %326 }
  0xba   : > { %v4086_v32 = vor.u32 %v4085_v15, %v4084_v31  ;;  %v4091_v33 = vshrl.u32 %v12243_v37, %v4076_v3  ;;  %v4077_v34 = vshrl.u32 %v12245_v20, %v4076_v3  ;;  %v4089_v12 = vor.u32 %v4088_v23, %v4087_v14 }
  0xbb   : > { %v4109_v35 = vshll.u32 %v4069_v63, 8  ;;  %v9072_v36 = vshrl.u32 %v495_v27, 30  ;;  %vm4093_vm13 = vcmp.lt.s32.totalorder %v4074_v18, 1  ;;  %vm4096_vm14 = vcmp.lt.s32.totalorder %v4074_v18, 4 }
  0xbc   : > { %v4092_v16 = vor.u32 %v4091_v33, %v4090_v25  ;;  %v8219_v38 = vmin.u32 %v4023_v19, %v9060_v9  ;;  %v4098_v39 = vsel %vm4096_vm14, %v4086_v32, 2102212464  ;;  %v4101_v40 = vsel %vm4093_vm13, %v4080_v21, %v4083_v29 }
  0xbd   : > { %v548_v41 = vadd.s32 1, %v8094_v0  ;;  %v497_v42 = vshll.u32 %v9072_v36, 30  ;;  %vm4095_vm15 = vcmp.lt.s32.totalorder %v4074_v18, 3  ;;  %v4102_v43 = vsel %vm4096_vm14, %v4089_v12, 920167782 }
  0xbe   : > { %v4105_v44 = vsel %vm4093_vm13, %v4083_v29, %v4086_v32  ;;  %vm4094_vm0 = vcmp.lt.s32.totalorder %v4074_v18, 2  ;;  %v4097_v45 = vsel %vm4093_vm13, %v4077_v34, %v4080_v21  ;;  %v4103_v47 = vsel %vm4095_vm15, %v4086_v32, %v4102_v43 }
  0xbf   : > { %v4106_v48 = vsel %vm4096_vm14, %v4092_v16, 1326507024  ;;  %v9076_v54 = vsub.s32 %v494_v11, %v497_v42  ;;  %v4099_v55 = vsel %vm4095_vm15, %v4083_v29, %v4098_v39  ;;  %v4104_v57 = vsel %vm4094_vm0, %v4101_v40, %v4103_v47 }
  0xc0   : > { %v4107_v59 = vsel %vm4095_vm15, %v4089_v12, %v4106_v48  ;;  %v4025_v61 = vclz %v8219_v38  ;;  %v9078_v1 = vmul.u32.u64.low %v4109_v35, %v4104_v57  ;;  %v9079_v2 = vmul.u32.u64.high %v4109_v35, %v4104_v57, %v9078_v1 }
  0xc1   : > { %v4108_v63 = vsel %vm4094_vm0, %v4105_v44, %v4107_v59  ;;  %v500_v0 = vsub.s32 0, %v9076_v54  ;;  %v4100_v8 = vsel %vm4094_vm0, %v4097_v45, %v4099_v55  ;;  %vm549_vm1 = vcmp.gt.s32.totalorder %v548_v41, 0 }
  0xc2   : > { %v9083_v3 = vmul.u32.u64.low %v4109_v35, %v4108_v63  ;;  %v9084_v4 = vmul.u32.u64.high %v4109_v35, %v4108_v63, %v9083_v3  ;;  %v550_v30 = vsel %vm549_vm1, %v548_v41, 0  ;;  %v8220_v31 = vadd.s32 4294967294, %v4025_v61 }
  0xc3   : > { %v4119_v17 = vadd.s32 1, %v9079_v2  ;;  %v8091_v18 = vmin.u32 %v500_v0, %v9076_v54  ;;  %v4116_v10 = vmul.u32 %v4109_v35, %v4100_v8  ;;  %v552_v11 = vand.u32 31, %v550_v30 }
  0xc4   : > { %vm4118_vm2 = vc.u32 %v9084_v4, %v9078_v1  ;;  %v12231_v21 = vand.u32 2147483647, %v8961_v62  ;;  %v9093_v23 = vmul.f32 %v8941_v46, %v327_v13  ;;  %vm8221_vm3 = vcmp.lt.s32.totalorder %v8220_v31, 0 }
  0xc5   : > { %v4120_v15 = vsel %vm4118_vm2, %v4119_v17, %v9079_v2  ;;  %v553_v19 = vsub.s32 32, %v552_v11  ;;  %v502_v25 = vclz %v8091_v18  ;;  %v555_v34 = vshll.u32 %v12245_v20, %v552_v11 }
  0xc6   : > { %v4121_v14 = vadd.s32 %v4120_v15, %v4116_v10  ;;  %12382 = vst [vmem:[#allocation7_spill] sm:$0xff] %v9093_v23  ;;  %v558_v12 = vshll.u32 %v12236_v22, %v552_v11  ;;  %v9102_v16 = vsel %vm8221_vm3, 0, %v8220_v31  ;;  %v545_v38 = vand.u32 8388607, %v12231_v21 }
  0xc7   : > { %v556_v29 = vshrl.u32 %v12236_v22, %v553_v19  ;;  %v559_v32 = vshrl.u32 %v12238_v24, %v553_v19  ;;  %v562_v35 = vshrl.u32 %v12240_v26, %v553_v19  ;;  %v551_v39 = vshrl.u32 %v550_v30, 5 }
  0xc8   : > { %v4122_v27 = vadd.s32 536870912, %v4121_v14  ;;  %v749_v40 = vand.u32 2139095040, %v9093_v23  ;;  %v8092_v41 = vadd.s32 4294967294, %v502_v25  ;;  %v561_v44 = vshll.u32 %v12238_v24, %v552_v11 }
  0xc9   : > { %v557_v42 = vor.u32 %v556_v29, %v555_v34  ;;  %v560_v43 = vor.u32 %v559_v32, %v558_v12  ;;  %v564_v45 = vshll.u32 %v12240_v26, %v552_v11  ;;  %v565_v47 = vshrl.u32 %v12265_v28, %v553_v19 }
  0xca   : > { %v9097_v33 = vshrl.u32 %v4122_v27, 30  ;;  %v567_v48 = vshll.u32 %v12265_v28, %v552_v11  ;;  %v568_v55 = vshrl.u32 %v12243_v37, %v553_v19  ;;  %v563_v59 = vor.u32 %v562_v35, %v561_v44 }
  0xcb   : > { %v546_v61 = vor.u32 8388608, %v545_v38  ;;  %v566_v63 = vor.u32 %v565_v47, %v564_v45  ;;  %v4029_v0 = vsub.s32 32, %v9102_v16  ;;  %vm570_vm4 = vcmp.lt.s32.totalorder %v551_v39, 1 }
  0xcc   : > { %12383 = vst [vmem:[#allocation8_spill] sm:$0xff] %v9097_v33  ;;  %v4124_v57 = vshll.u32 %v9097_v33, 30  ;;  %v569_v2 = vor.u32 %v568_v55, %v567_v48  ;;  %vm573_vm5 = vcmp.lt.s32.totalorder %v551_v39, 4  ;;  %v750_v3 = vshrl.u32 %v749_v40, 23 }
  0xcd   : > { %vm8093_vm6 = vcmp.lt.s32.totalorder %v8092_v41, 0  ;;  %vm572_vm7 = vcmp.lt.s32.totalorder %v551_v39, 3  ;;  %v578_v8 = vsel %vm570_vm4, %v557_v42, %v560_v43  ;;  %v579_v30 = vsel %vm573_vm5, %v566_v63, 920167782 }
  0xce   : > { %v4033_v31 = vsub.s32 4294967266, %v9102_v16  ;;  %v9117_v17 = vsub.s32 %v4121_v14, %v4124_v57  ;;  %vm571_vm8 = vcmp.lt.s32.totalorder %v551_v39, 2  ;;  %v580_v18 = vsel %vm572_vm7, %v563_v59, %v579_v30 }
  0xcf   : > { %v581_v10 = vsel %vm571_vm8, %v578_v8, %v580_v18  ;;  %v582_v11 = vsel %vm570_vm4, %v560_v43, %v563_v59  ;;  %v583_v13 = vsel %vm573_vm5, %v569_v2, 1326507024  ;;  %v586_v15 = vshll.u32 %v546_v61, 8 }
  0xd0   : > { %v9123_v25 = vsel %vm8093_vm6, 0, %v8092_v41  ;;  %v554_v27 = vshrl.u32 %v12245_v20, %v553_v19  ;;  %v575_v29 = vsel %vm573_vm5, %v563_v59, 2102212464  ;;  %v584_v32 = vsel %vm572_vm7, %v566_v63, %v583_v13 }
  0xd1   : > { %v585_v14 = vsel %vm571_vm8, %v582_v11, %v584_v32  ;;  %v9129_v34 = vmul.u32.u64.low %v586_v15, %v581_v10  ;;  %v9130_v12 = vmul.u32.u64.high %v586_v15, %v581_v10, %v9129_v34  ;;  %v8102_v35 = vadd.s32 4294967169, %v750_v3 }
  0xd2   : > { %v4034_v38 = vadd.s32 127, %v4033_v31  ;;  %v4127_v40 = vsub.s32 0, %v9117_v17  ;;  %v9134_v44 = vmul.u32.u64.low %v586_v15, %v585_v14  ;;  %v9135_v45 = vmul.u32.u64.high %v586_v15, %v585_v14, %v9134_v44 }
  0xd3   : > { %v574_v41 = vsel %vm570_vm4, %v554_v27, %v557_v42  ;;  %v576_v19 = vsel %vm572_vm7, %v560_v43, %v575_v29  ;;  %v756_v47 = vadd.s32 1, %v8102_v35  ;;  %v4013_v48 = vadd.s32 %v9008_v7, %v9005_v5 }
  0xd4   : > { %v510_v55 = vsub.s32 4294967266, %v9123_v25  ;;  %v12228_v57 = vand.u32 2147483647, %v9093_v23  ;;  %v596_v59 = vadd.s32 1, %v9130_v12  ;;  %v4035_v63 = vshll.u32 %v4034_v38, 23 }
  0xd5   : > { %vm757_vm9 = vcmp.gt.s32.totalorder %v756_v47, 0  ;;  %v4031_v61 = vshrl.u32 %v4013_v48, %v4029_v0  ;;  %v8223_v2 = vmin.u32 %v4127_v40, %v9117_v17  ;;  %v577_v3 = vsel %vm571_vm8, %v574_v41, %v576_v19 }
  0xd6   : > { %vm595_vm10 = vc.u32 %v9135_v45, %v9129_v34  ;;  %v758_v42 = vsel %vm757_vm9, %v756_v47, 0  ;;  %v4030_v5 = vshll.u32 %v9060_v9, %v9102_v16  ;;  %v9150_v7 = vadd.s32 127, %v510_v55  ;;  %v320_v9 = vpop.permute.xlu0 %319 }
  0xd7   : > { %v597_v43 = vsel %vm595_vm10, %v596_v59, %v9130_v12  ;;  %v753_v8 = vand.u32 8388607, %v12228_v57  ;;  %v490_v0 = vadd.s32 %v9037_v52, %v9043_v56  ;;  %v593_v30 = vmul.u32 %v586_v15, %v577_v3 }
  0xd8   : > { %v760_v39 = vand.u32 31, %v758_v42  ;;  %v9157_v31 = vor.u32 %v4031_v61, %v4030_v5  ;;  %v9159_v18 = vor.u32 4788187, %v4035_v63  ;;  %v506_v10 = vsub.s32 32, %v9123_v25 }
  0xd9   : > { %v4129_v11 = vclz %v8223_v2  ;;  %v9162_v16 = vadd.s32 %v597_v43, %v593_v30  ;;  %v512_v32 = vshll.u32 %v9150_v7, 23  ;;  %v754_v52 = vor.u32 8388608, %v753_v8  ;;  %v3856_v7 = vpop.permute.xlu1 %3855 }
  0xda   : > { %v761_v13 = vsub.s32 32, %v760_v39  ;;  %v763_v27 = vshll.u32 %v12245_v20, %v760_v39  ;;  %v766_v29 = vshll.u32 %v12236_v22, %v760_v39  ;;  %v769_v56 = vshll.u32 %v12238_v24, %v760_v39 }
  0xdb   : > { %v772_v15 = vshll.u32 %v12240_v26, %v760_v39  ;;  %v759_v14 = vshrl.u32 %v758_v42, 5  ;;  %v9172_v38 = vmul.f32 %v8941_v46, %v320_v9  ;;  %v8224_v40 = vadd.s32 4294967294, %v4129_v11 }
  0xdc   : > { %v764_v12 = vshrl.u32 %v12236_v22, %v761_v13  ;;  %v767_v35 = vshrl.u32 %v12238_v24, %v761_v13  ;;  %v770_v44 = vshrl.u32 %v12240_v26, %v761_v13  ;;  %v773_v41 = vshrl.u32 %v12265_v28, %v761_v13 }
  0xdd   : > { %12384 = vst [vmem:[#allocation9_spill] sm:$0xff] %v9172_v38  ;;  %v775_v19 = vshll.u32 %v12265_v28, %v760_v39  ;;  %v599_v47 = vadd.s32 536870912, %v9162_v16  ;;  %v776_v59 = vshrl.u32 %v12243_v37, %v761_v13  ;;  %v762_v61 = vshrl.u32 %v12245_v20, %v761_v13 }
  0xde   : > { %v765_v48 = vor.u32 %v764_v12, %v763_v27  ;;  %v768_v55 = vor.u32 %v767_v35, %v766_v29  ;;  %v771_v63 = vor.u32 %v770_v44, %v769_v56  ;;  %v774_v2 = vor.u32 %v773_v41, %v772_v15 }
  0xdf   : > { %v794_v3 = vshll.u32 %v754_v52, 8  ;;  %v777_v42 = vor.u32 %v776_v59, %v775_v19  ;;  %vm778_vm11 = vcmp.lt.s32.totalorder %v759_v14, 1  ;;  %vm781_vm12 = vcmp.lt.s32.totalorder %v759_v14, 4 }
  0xe0   : > { %v645_v5 = vand.u32 2139095040, %v9172_v38  ;;  %vm780_vm13 = vcmp.lt.s32.totalorder %v759_v14, 3  ;;  %v783_v43 = vsel %vm781_vm12, %v771_v63, 2102212464  ;;  %v786_v8 = vsel %vm778_vm11, %v765_v48, %v768_v55 }
  0xe1   : > { %v787_v30 = vsel %vm781_vm12, %v774_v2, 920167782  ;;  %v9181_v39 = vshrl.u32 %v599_v47, 30  ;;  %vm779_vm14 = vcmp.lt.s32.totalorder %v759_v14, 2  ;;  %v790_v9 = vsel %vm778_vm11, %v768_v55, %v771_v63 }
  0xe2   : > { %v788_v11 = vsel %vm780_vm13, %v771_v63, %v787_v30  ;;  %v782_v27 = vsel %vm778_vm11, %v762_v61, %v765_v48  ;;  %v791_v29 = vsel %vm781_vm12, %v777_v42, 1326507024  ;;  %v9185_v52 = vmul.f32 %v8941_v46, %v3856_v7 }
  0xe3   : > { %12385 = vst [vmem:[#allocation10_spill] sm:$0xff] %v9181_v39  ;;  %v789_v13 = vsel %vm779_vm14, %v786_v8, %v788_v11  ;;  %v784_v56 = vsel %vm780_vm13, %v768_v55, %v783_v43  ;;  %v792_v15 = vsel %vm780_vm13, %v774_v2, %v791_v29  ;;  %v508_v44 = vshrl.u32 %v490_v0, %v506_v10 }
  0xe4   : > { %12386 = vst [vmem:[#allocation11_spill] sm:$0xff] %v9185_v52  ;;  %v9187_v12 = vmul.u32.u64.low %v794_v3, %v789_v13  ;;  %v9188_v35 = vmul.u32.u64.high %v794_v3, %v789_v13, %v9187_v12  ;;  %v793_v41 = vsel %vm779_vm14, %v790_v9, %v792_v15  ;;  %v646_v19 = vshrl.u32 %v645_v5, 23  ;;  %v3849_v9 = vpop.permute.xlu0 %3848 }
  0xe5   : > { %v4037_v47 = vand.u32 2147483647, %v9159_v18  ;;  %v601_v48 = vshll.u32 %v9181_v39, 30  ;;  %v9194_v59 = vmul.u32.u64.low %v794_v3, %v793_v41  ;;  %v9195_v61 = vmul.u32.u64.high %v794_v3, %v793_v41, %v9194_v59 }
  0xe6   : > { %v507_v63 = vshll.u32 %v9076_v54, %v9123_v25  ;;  %v513_v55 = vor.u32 4788187, %v512_v32  ;;  %v785_v2 = vsel %vm779_vm14, %v782_v27, %v784_v56  ;;  %v8098_v42 = vadd.s32 4294967169, %v646_v19 }
  0xe7   : > { %v4039_v7 = vcvt.s32.f32 %v9157_v31  ;;  %vm8225_vm15 = vcmp.lt.s32.totalorder %v8224_v40, 0  ;;  %v804_v0 = vadd.s32 1, %v9188_v35  ;;  %v4272_v10 = vand.u32 2139095040, %v9185_v52 }
  0xe8   : > { %v509_v18 = vor.u32 %v508_v44, %v507_v63  ;;  %v652_v5 = vadd.s32 1, %v8098_v42  ;;  %v9206_v8 = vsub.s32 %v9162_v16, %v601_v48  ;;  %v801_v30 = vmul.u32 %v794_v3, %v785_v2 }
  0xe9   : > { %v9203_v43 = vmul.f32 %v4039_v7, %v4037_v47  ;;  %vm803_vm0 = vc.u32 %v9195_v61, %v9187_v12  ;;  %v514_v54 = vand.u32 2147483647, %v513_v55  ;;  %v9210_v25 = vsel %vm8225_vm15, 0, %v8224_v40 }
  0xea   : > { %v805_v31 = vsel %vm803_vm0, %v804_v0, %v9188_v35  ;;  %vm653_vm1 = vcmp.gt.s32.totalorder %v652_v5, 0  ;;  %v12229_v14 = vand.u32 2147483647, %v9172_v38  ;;  %v4273_v11 = vshrl.u32 %v4272_v10, 23 }
  0xeb   : > { %v806_v32 = vadd.s32 %v805_v31, %v801_v30  ;;  %v516_v27 = vcvt.s32.f32 %v509_v18  ;;  %v654_v13 = vsel %vm653_vm1, %v652_v5, 0  ;;  %v4117_v16 = vadd.s32 %v9078_v1, %v9084_v4 }
  0xec   : > { %v4133_v3 = vsub.s32 32, %v9210_v25  ;;  %v604_v29 = vsub.s32 0, %v9206_v8  ;;  %v4041_v40 = vxor.u32 2147483648, %v9203_v43  ;;  %v656_v35 = vand.u32 31, %v654_v13 }
  0xed   : > { %v807_v56 = vadd.s32 536870912, %v806_v32  ;;  %v9219_v15 = vmul.f32 %v516_v27, %v514_v54  ;;  %v9222_v44 = vmul.f32 %v8941_v46, %v3849_v9  ;;  %v4137_v41 = vsub.s32 4294967266, %v9210_v25 }
  0xee   : > { %v649_v1 = vand.u32 8388607, %v12229_v14  ;;  %v8230_v4 = vadd.s32 4294967169, %v4273_v11  ;;  %v657_v47 = vsub.s32 32, %v656_v35  ;;  %v659_v48 = vshll.u32 %v12245_v20, %v656_v35 }
  0xef   : > { %v9225_v19 = vshrl.u32 %v807_v56, 30  ;;  %v662_v59 = vshll.u32 %v12236_v22, %v656_v35  ;;  %v665_v63 = vshll.u32 %v12238_v24, %v656_v35  ;;  %v4135_v55 = vshrl.u32 %v4117_v16, %v4133_v3 }
  0xf0   : > { %v8095_v2 = vmin.u32 %v604_v29, %v9206_v8  ;;  %v668_v7 = vshll.u32 %v12240_v26, %v656_v35  ;;  %v655_v0 = vshrl.u32 %v654_v13, 5  ;;  %v660_v10 = vshrl.u32 %v12236_v22, %v657_v47 }
  0xf1   : > { %12387 = vst [vmem:[#allocation12_spill] sm:$0xff] %v9225_v19  ;;  %v809_v42 = vshll.u32 %v9225_v19, 30  ;;  %v663_v18 = vshrl.u32 %v12238_v24, %v657_v47  ;;  %v666_v5 = vshrl.u32 %v12240_v26, %v657_v47  ;;  %v650_v30 = vor.u32 8388608, %v649_v1 }
  0xf2   : > { %v669_v54 = vshrl.u32 %v12265_v28, %v657_v47  ;;  %v671_v31 = vshll.u32 %v12265_v28, %v656_v35  ;;  %v4279_v11 = vadd.s32 1, %v8230_v4  ;;  %vm3959_vm2 = vcmp.lt.s32.totalorder %v8944_v49, 0 }
  0xf3   : > { %v661_v9 = vor.u32 %v660_v10, %v659_v48  ;;  %v664_v27 = vor.u32 %v663_v18, %v662_v59  ;;  %v667_v16 = vor.u32 %v666_v5, %v665_v63  ;;  %v672_v3 = vshrl.u32 %v12243_v37, %v657_v47 }
  0xf4   : > { %v606_v13 = vclz %v8095_v2  ;;  %v9242_v29 = vsub.s32 %v806_v32, %v809_v42  ;;  %v658_v56 = vshrl.u32 %v12245_v20, %v657_v47  ;;  %v670_v57 = vor.u32 %v669_v54, %v668_v7 }
  0xf5   : > { %v673_v14 = vor.u32 %v672_v3, %v671_v31  ;;  %vm674_vm3 = vcmp.lt.s32.totalorder %v655_v0, 1  ;;  %vm677_vm4 = vcmp.lt.s32.totalorder %v655_v0, 4  ;;  %v12233_v1 = vand.u32 2147483647, %v9185_v52 }
  0xf6   : > { %v679_v35 = vsel %vm677_vm4, %v667_v16, 2102212464  ;;  %v682_v4 = vsel %vm674_vm3, %v661_v9, %v664_v27  ;;  %v690_v6 = vshll.u32 %v650_v30, 8  ;;  %vm4280_vm5 = vcmp.gt.s32.totalorder %v4279_v11, 0 }
  0xf7   : > { %vm676_vm6 = vcmp.lt.s32.totalorder %v655_v0, 3  ;;  %v683_v48 = vsel %vm677_vm4, %v670_v57, 920167782  ;;  %v686_v59 = vsel %vm674_vm3, %v664_v27, %v667_v16  ;;  %v687_v63 = vsel %vm677_vm4, %v673_v14, 1326507024 }
  0xf8   : > { %v812_v2 = vsub.s32 0, %v9242_v29  ;;  %vm675_vm7 = vcmp.lt.s32.totalorder %v655_v0, 2  ;;  %v678_v32 = vsel %vm674_vm3, %v658_v56, %v661_v9  ;;  %v684_v42 = vsel %vm676_vm6, %v667_v16, %v683_v48 }
  0xf9   : > { %v680_v47 = vsel %vm676_vm6, %v664_v27, %v679_v35  ;;  %v685_v7 = vsel %vm675_vm7, %v682_v4, %v684_v42  ;;  %v688_v10 = vsel %vm676_vm6, %v670_v57, %v687_v63  ;;  %v4281_v18 = vsel %vm4280_vm5, %v4279_v11, 0 }
  0xfa   : > { %v4138_v5 = vadd.s32 127, %v4137_v41  ;;  %v689_v54 = vsel %vm675_vm7, %v686_v59, %v688_v10  ;;  %v9247_v31 = vmul.u32.u64.low %v690_v6, %v685_v7  ;;  %v9248_v3 = vmul.u32.u64.high %v690_v6, %v685_v7, %v9247_v31 }
  0xfb   : > { %v4134_v30 = vshll.u32 %v9117_v17, %v9210_v25  ;;  %v9253_v21 = vmul.u32.u64.low %v690_v6, %v689_v54  ;;  %v9254_v14 = vmul.u32.u64.high %v690_v6, %v689_v54, %v9253_v21  ;;  %v4283_v51 = vand.u32 31, %v4281_v18 }
  0xfc   : > { %v9259_v0 = vsel %vm3959_vm2, %v4041_v40, %v9203_v43  ;;  %v8096_v57 = vadd.s32 4294967294, %v606_v13  ;;  %v681_v11 = vsel %vm675_vm7, %v678_v32, %v680_v47  ;;  %v4276_v41 = vand.u32 8388607, %v12233_v1 }
  0xfd   : > { %v9264_v27 = vor.u32 %v4135_v55, %v4134_v30  ;;  %v8103_v17 = vmin.u32 %v812_v2, %v9242_v29  ;;  %v4284_v25 = vsub.s32 32, %v4283_v51  ;;  %v4139_v16 = vshll.u32 %v4138_v5, 23 }
  0xfe   : > { %v700_v21 = vadd.s32 1, %v9248_v3  ;;  %v4286_v56 = vshll.u32 %v12245_v20, %v4283_v51  ;;  %v4168_v43 = vand.u32 2139095040, %v9222_v44  ;;  %v697_v40 = vmul.u32 %v690_v6, %v681_v11 }
  0xff   : > { %vm699_vm8 = vc.u32 %v9254_v14, %v9247_v31  ;;  %v4287_v13 = vshrl.u32 %v12236_v22, %v4284_v25  ;;  %v4289_v35 = vshll.u32 %v12236_v22, %v4283_v51  ;;  %vm8097_vm9 = vcmp.lt.s32.totalorder %v8096_v57, 0 }
 0x100   : > { %v701_v55 = vsel %vm699_vm8, %v700_v21, %v9248_v3  ;;  %v4277_v4 = vor.u32 8388608, %v4276_v41  ;;  %v4290_v48 = vshrl.u32 %v12238_v24, %v4284_v25  ;;  %v814_v59 = vclz %v8103_v17 }
 0x101   : > { %v702_v63 = vadd.s32 %v701_v55, %v697_v40  ;;  %v4292_v2 = vshll.u32 %v12238_v24, %v4283_v51  ;;  %v4293_v32 = vshrl.u32 %v12240_v26, %v4284_v25  ;;  %v4282_v6 = vshrl.u32 %v4281_v18, 5 }
 0x102   : > { %v4288_v42 = vor.u32 %v4287_v13, %v4286_v56  ;;  %v4295_v47 = vshll.u32 %v12240_v26, %v4283_v51  ;;  %v4169_v7 = vshrl.u32 %v4168_v43, 23  ;;  %v4291_v5 = vor.u32 %v4290_v48, %v4289_v35 }
 0x103   : > { %v703_v10 = vadd.s32 536870912, %v702_v63  ;;  %v4296_v54 = vshrl.u32 %v12265_v28, %v4284_v25  ;;  %v4298_v3 = vshll.u32 %v12265_v28, %v4283_v51  ;;  %v9281_v30 = vor.u32 4788187, %v4139_v16 }
 0x104   : > { %v9284_v11 = vsel %vm8097_vm9, 0, %v8096_v57  ;;  %v4294_v41 = vor.u32 %v4293_v32, %v4292_v2  ;;  %v4299_v17 = vshrl.u32 %v12243_v37, %v4284_v25  ;;  %v8104_v21 = vadd.s32 4294967294, %v814_v59 }
 0x105   : > { %v9287_v18 = vshrl.u32 %v703_v10, 30  ;;  %v4297_v56 = vor.u32 %v4296_v54, %v4295_v47  ;;  %v4317_v40 = vshll.u32 %v4277_v4, 8  ;;  %vm4301_vm10 = vcmp.lt.s32.totalorder %v4282_v6, 1 }
 0x106   : > { %v4300_v43 = vor.u32 %v4299_v17, %v4298_v3  ;;  %vm4304_vm11 = vcmp.lt.s32.totalorder %v4282_v6, 4  ;;  %v8226_v13 = vadd.s32 4294967169, %v4169_v7  ;;  %vm4303_vm12 = vcmp.lt.s32.totalorder %v4282_v6, 3 }
 0x107   : > { %12388 = vst [vmem:[#allocation13_spill] sm:$0xff] %v9287_v18  ;;  %v705_v35 = vshll.u32 %v9287_v18, 30  ;;  %v4309_v51 = vsel %vm4301_vm10, %v4288_v42, %v4291_v5  ;;  %v4310_v16 = vsel %vm4304_vm11, %v4297_v56, 920167782  ;;  %v4285_v57 = vshrl.u32 %v12245_v20, %v4284_v25  ;;  %v341_v25 = vpop.permute.xlu1 %340 }
 0x108   : > { %vm4302_vm13 = vcmp.lt.s32.totalorder %v4282_v6, 2  ;;  %v4311_v55 = vsel %vm4303_vm12, %v4294_v41, %v4310_v16  ;;  %v4313_v48 = vsel %vm4301_vm10, %v4291_v5, %v4294_v41  ;;  %v4306_v4 = vsel %vm4304_vm11, %v4294_v41, 2102212464 }
 0x109   : > { %v9294_v59 = vsub.s32 %v702_v63, %v705_v35  ;;  %v4312_v2 = vsel %vm4302_vm13, %v4309_v51, %v4311_v55  ;;  %v4314_v32 = vsel %vm4304_vm11, %v4300_v43, 1326507024  ;;  %v610_v47 = vsub.s32 32, %v9284_v11 }
 0x10a   : > { %v4315_v7 = vsel %vm4303_vm12, %v4297_v56, %v4314_v32  ;;  %v9299_v10 = vmul.u32.u64.low %v4317_v40, %v4312_v2  ;;  %v9300_v54 = vmul.u32.u64.high %v4317_v40, %v4312_v2, %v9299_v10  ;;  %v614_v3 = vsub.s32 4294967266, %v9284_v11 }
 0x10b   : > { %vm8105_vm14 = vcmp.lt.s32.totalorder %v8104_v21, 0  ;;  %v4316_v17 = vsel %vm4302_vm13, %v4313_v48, %v4315_v7  ;;  %v4175_v63 = vadd.s32 1, %v8226_v13  ;;  %v4305_v41 = vsel %vm4301_vm10, %v4285_v57, %v4288_v42 }
 0x10c   : > { %v4307_v35 = vsel %vm4303_vm12, %v4291_v5, %v4306_v4  ;;  %v9307_v43 = vmul.u32.u64.low %v4317_v40, %v4316_v17  ;;  %v9308_v51 = vmul.u32.u64.high %v4317_v40, %v4316_v17, %v9307_v43  ;;  %v708_v56 = vsub.s32 0, %v9294_v59 }
 0x10d   : > { %v12234_v16 = vand.u32 2147483647, %v9222_v44  ;;  %vm4176_vm15 = vcmp.gt.s32.totalorder %v4175_v63, 0  ;;  %v9313_v55 = vmul.f32 %v8941_v46, %v341_v25  ;;  %v594_v13 = vadd.s32 %v9129_v34, %v9135_v45 }
 0x10e   : > { %v4327_v42 = vadd.s32 1, %v9300_v54  ;;  %v4177_v57 = vsel %vm4176_vm15, %v4175_v63, 0  ;;  %v4141_v5 = vand.u32 2147483647, %v9281_v30  ;;  %v9321_v48 = vsel %vm8105_vm14, 0, %v8104_v21 }
 0x10f   : > { %12389 = vst [vmem:[#allocation14_spill] sm:$0xff] %v9313_v55  ;;  %v4308_v4 = vsel %vm4302_vm13, %v4305_v41, %v4307_v35  ;;  %v4179_v32 = vand.u32 31, %v4177_v57  ;;  %v611_v46 = vshll.u32 %v9206_v8, %v9284_v11  ;;  %v612_v7 = vshrl.u32 %v594_v13, %v610_v47 }
 0x110   : > { %v615_v25 = vadd.s32 127, %v614_v3  ;;  %vm4326_vm0 = vc.u32 %v9308_v51, %v9299_v10  ;;  %v8099_v34 = vmin.u32 %v708_v56, %v9294_v59  ;;  %v4172_v17 = vand.u32 8388607, %v12234_v16 }
 0x111   : > { %v4328_v45 = vsel %vm4326_vm0, %v4327_v42, %v9300_v54  ;;  %v4180_v21 = vsub.s32 32, %v4179_v32  ;;  %v822_v6 = vsub.s32 4294967266, %v9321_v48  ;;  %v4324_v63 = vmul.u32 %v4317_v40, %v4308_v4 }
 0x112   : > { %v4182_v41 = vshll.u32 %v12245_v20, %v4179_v32  ;;  %v4185_v8 = vshll.u32 %v12236_v22, %v4179_v32  ;;  %v4188_v3 = vshll.u32 %v12238_v24, %v4179_v32  ;;  %v4191_v35 = vshll.u32 %v12240_v26, %v4179_v32 }
 0x113   : > { %v4183_v11 = vshrl.u32 %v12236_v22, %v4180_v21  ;;  %v4186_v47 = vshrl.u32 %v12238_v24, %v4180_v21  ;;  %v616_v54 = vshll.u32 %v615_v25, 23  ;;  %v9339_v43 = vadd.s32 %v4328_v45, %v4324_v63 }
 0x114   : > { %v4189_v56 = vshrl.u32 %v12240_v26, %v4180_v21  ;;  %v4192_v13 = vshrl.u32 %v12265_v28, %v4180_v21  ;;  %v9343_v40 = vor.u32 %v612_v7, %v611_v46  ;;  %v710_v42 = vclz %v8099_v34 }
 0x115   : > { %v4173_v4 = vor.u32 8388608, %v4172_v17  ;;  %v4178_v1 = vshrl.u32 %v4177_v57, 5  ;;  %v823_v16 = vadd.s32 127, %v822_v6  ;;  %v4184_v53 = vor.u32 %v4183_v11, %v4182_v41 }
 0x116   : > { %v4187_v9 = vor.u32 %v4186_v47, %v4185_v8  ;;  %v957_v22 = vand.u32 2139095040, %v9313_v55  ;;  %v4190_v24 = vor.u32 %v4189_v56, %v4188_v3  ;;  %v4193_v2 = vor.u32 %v4192_v13, %v4191_v35 }
 0x117   : > { %v4194_v25 = vshll.u32 %v12265_v28, %v4179_v32  ;;  %v4195_v45 = vshrl.u32 %v12243_v37, %v4180_v21  ;;  %v9348_v63 = vor.u32 4788187, %v616_v54  ;;  %v818_v26 = vsub.s32 32, %v9321_v48 }
 0x118   : > { %v4330_v46 = vadd.s32 536870912, %v9339_v43  ;;  %v12242_v7 = vand.u32 2147483647, %v9313_v55  ;;  %v8100_v57 = vadd.s32 4294967294, %v710_v42  ;;  %v4181_v34 = vshrl.u32 %v12245_v20, %v4180_v21 }
 0x119   : > { %v4196_v17 = vor.u32 %v4195_v45, %v4194_v25  ;;  %vm4197_vm1 = vcmp.lt.s32.totalorder %v4178_v1, 1  ;;  %v824_v6 = vshll.u32 %v823_v16, 23  ;;  %vm4200_vm3 = vcmp.lt.s32.totalorder %v4178_v1, 4 }
 0x11a   : > { %v4205_v41 = vsel %vm4197_vm1, %v4184_v53, %v4187_v9  ;;  %v4213_v8 = vshll.u32 %v4173_v4, 8  ;;  %vm4199_vm4 = vcmp.lt.s32.totalorder %v4178_v1, 3  ;;  %v4202_v32 = vsel %vm4200_vm3, %v4190_v24, 2102212464 }
 0x11b   : > { %v4206_v11 = vsel %vm4200_vm3, %v4193_v2, 920167782  ;;  %v958_v47 = vshrl.u32 %v957_v22, 23  ;;  %v9354_v3 = vshrl.u32 %v4330_v46, 30  ;;  %vm4198_vm5 = vcmp.lt.s32.totalorder %v4178_v1, 2 }
 0x11c   : > { %v4207_v35 = vsel %vm4199_vm4, %v4190_v24, %v4206_v11  ;;  %v4209_v54 = vsel %vm4197_vm1, %v4187_v9, %v4190_v24  ;;  %vm8101_vm6 = vcmp.lt.s32.totalorder %v8100_v57, 0  ;;  %v4201_v56 = vsel %vm4197_vm1, %v4181_v34, %v4184_v53 }
 0x11d   : > { %12390 = vst [vmem:[#allocation15_spill] sm:$0xff] %v9354_v3  ;;  %v4208_v13 = vsel %vm4198_vm5, %v4205_v41, %v4207_v35  ;;  %v4210_v21 = vsel %vm4200_vm3, %v4196_v17, 1326507024  ;;  %v4203_v42 = vsel %vm4199_vm4, %v4187_v9, %v4202_v32  ;;  %v12391_v22 = vcvt.s32.f32 %v9264_v27 }
 0x11e   : > { %v4211_v25 = vsel %vm4199_vm4, %v4193_v2, %v4210_v21  ;;  %v9357_v16 = vmul.u32.u64.low %v4213_v8, %v4208_v13  ;;  %v9358_v45 = vmul.u32.u64.high %v4213_v8, %v4208_v13, %v9357_v16  ;;  %v802_v24 = vadd.s32 %v9187_v12, %v9195_v61 }
 0x11f   : > { %v9365_v4 = vmul.f32 %v12391_v22, %v4141_v5  ;;  %v4212_v53 = vsel %vm4198_vm5, %v4209_v54, %v4211_v25  ;;  %v8110_v46 = vadd.s32 4294967169, %v958_v47  ;;  %v9370_v34 = vsel %vm8101_vm6, 0, %v8100_v57  ;;  %v334_v57 = vpop.permute.xlu0 %333 }
 0x120   : > { %v4332_v9 = vshll.u32 %v9354_v3, 30  ;;  %v9373_v2 = vmul.u32.u64.low %v4213_v8, %v4212_v53  ;;  %v9374_v17 = vmul.u32.u64.high %v4213_v8, %v4212_v53, %v9373_v2  ;;  %v820_v30 = vshrl.u32 %v802_v24, %v818_v26 }
 0x121   : > { %v4204_v27 = vsel %vm4198_vm5, %v4201_v56, %v4203_v42  ;;  %v964_v5 = vadd.s32 1, %v8110_v46  ;;  %v9379_v11 = vor.u32 4788187, %v824_v6  ;;  %v4223_v12 = vadd.s32 1, %v9358_v45 }
 0x122   : > { %v961_v61 = vand.u32 8388607, %v12242_v7  ;;  %v819_v47 = vshll.u32 %v9242_v29, %v9321_v48  ;;  %v698_v35 = vadd.s32 %v9247_v31, %v9254_v14  ;;  %v718_v26 = vsub.s32 4294967266, %v9370_v34  ;;  %v9400_v29 = vld [vmem:[%s12222_s2] ss:$0 sm:$0xff] }
 0x123   : > { %vm965_vm7 = vcmp.gt.s32.totalorder %v964_v5, 0  ;;  %v9390_v1 = vsub.s32 %v9339_v43, %v4332_v9  ;;  %v4220_v6 = vmul.u32 %v4213_v8, %v4204_v27  ;;  %vm4222_vm8 = vc.u32 %v9374_v17, %v9357_v16 }
 0x124   : > { %v966_v54 = vsel %vm965_vm7, %v964_v5, 0  ;;  %v9394_v56 = vor.u32 %v820_v30, %v819_v47  ;;  %v4224_v13 = vsel %vm4222_vm8, %v4223_v12, %v9358_v45  ;;  %v9403_v31 = vmul.f32 %v9400_v29, %v334_v57 }
 0x125   : > { %v968_v21 = vand.u32 31, %v966_v54  ;;  %v714_v48 = vsub.s32 32, %v9370_v34  ;;  %v4225_v43 = vadd.s32 %v4224_v13, %v4220_v6  ;;  %v962_v8 = vor.u32 8388608, %v961_v61 }
 0x126   : > { %12392 = vst [vmem:[#allocation16_spill] sm:$0xff] %v9403_v31  ;;  %v12393_v22 = vmov 2475754826   ;;  %v12394_v24 = vmov 2131351028   ;;  %v719_v46 = vadd.s32 127, %v718_v26  ;;  %v715_v47 = vshll.u32 %v9294_v59, %v9370_v34 }
 0x127   : > { %v969_v42 = vsub.s32 32, %v968_v21  ;;  %v971_v25 = vshll.u32 %v12245_v20, %v968_v21  ;;  %v974_v45 = vshll.u32 %v12393_v22, %v968_v21  ;;  %v977_v53 = vshll.u32 %v12394_v24, %v968_v21 }
 0x128   : > { %v4335_v9 = vsub.s32 0, %v9390_v1  ;;  %v4226_v2 = vadd.s32 536870912, %v4225_v43  ;;  %v12395_v30 = vmov 2102212464   ;;  %v853_v61 = vand.u32 2139095040, %v9403_v31 }
 0x129   : > { %v980_v27 = vshll.u32 %v12395_v30, %v968_v21  ;;  %v972_v5 = vshrl.u32 %v12393_v22, %v969_v42  ;;  %v975_v12 = vshrl.u32 %v12394_v24, %v969_v42  ;;  %v978_v57 = vshrl.u32 %v12395_v30, %v969_v42 }
 0x12a   : > { %v9418_v6 = vshrl.u32 %v4226_v2, 30  ;;  %v967_v13 = vshrl.u32 %v966_v54, 5  ;;  %v981_v26 = vshrl.u32 %v12265_v28, %v969_v42  ;;  %v983_v41 = vshll.u32 %v12265_v28, %v968_v21 }
 0x12b   : > { %v973_v7 = vor.u32 %v972_v5, %v971_v25  ;;  %v976_v14 = vor.u32 %v975_v12, %v974_v45  ;;  %v979_v32 = vor.u32 %v978_v57, %v977_v53  ;;  %v716_v37 = vshrl.u32 %v698_v35, %v714_v48 }
 0x12c   : > { %12396 = vst [vmem:[#allocation17_spill] sm:$0xff] %v9418_v6  ;;  %v8231_v20 = vmin.u32 %v4335_v9, %v9390_v1  ;;  %v4228_v3 = vshll.u32 %v9418_v6, 30  ;;  %v982_v19 = vor.u32 %v981_v26, %v980_v27  ;;  %vm436_vm9 = vcmp.lt.s32.totalorder %v8947_v50, 0 }
 0x12d   : > { %v720_v18 = vshll.u32 %v719_v46, 23  ;;  %v12397_v59 = vmov 683565275   ;;  %v12398_v2 = vmov 1326507024   ;;  %v854_v33 = vshrl.u32 %v853_v61, 23 }
 0x12e   : > { %v970_v34 = vshrl.u32 %v12397_v59, %v969_v42  ;;  %v984_v54 = vshrl.u32 %v12398_v2, %v969_v42  ;;  %v9427_v39 = vsub.s32 %v4225_v43, %v4228_v3  ;;  %vm986_vm10 = vcmp.lt.s32.totalorder %v967_v13, 1 }
 0x12f   : > { %vm988_vm11 = vcmp.lt.s32.totalorder %v967_v13, 3  ;;  %vm989_vm12 = vcmp.lt.s32.totalorder %v967_v13, 4  ;;  %v994_v48 = vsel %vm986_vm10, %v973_v7, %v976_v14  ;;  %v4337_v45 = vclz %v8231_v20 }
 0x130   : > { %v985_v21 = vor.u32 %v984_v54, %v983_v41  ;;  %v991_v35 = vsel %vm989_vm12, %v979_v32, 2102212464  ;;  %v995_v25 = vsel %vm989_vm12, %v982_v19, 920167782  ;;  %vm987_vm13 = vcmp.lt.s32.totalorder %v967_v13, 2 }
 0x131   : > { %v996_v53 = vsel %vm988_vm11, %v979_v32, %v995_v25  ;;  %v1002_v46 = vshll.u32 %v962_v8, 8  ;;  %v4231_v9 = vsub.s32 0, %v9427_v39  ;;  %v998_v3 = vsel %vm986_vm10, %v976_v14, %v979_v32 }
 0x132   : > { %v997_v42 = vsel %vm987_vm13, %v994_v48, %v996_v53  ;;  %v999_v43 = vsel %vm989_vm12, %v985_v21, 1326507024  ;;  %v721_v27 = vor.u32 4788187, %v720_v18  ;;  %v990_v5 = vsel %vm986_vm10, %v970_v34, %v973_v7 }
 0x133   : > { %v992_v41 = vsel %vm988_vm11, %v976_v14, %v991_v35  ;;  %v1000_v12 = vsel %vm988_vm11, %v982_v19, %v999_v43  ;;  %v9438_v57 = vmul.u32.u64.low %v1002_v46, %v997_v42  ;;  %v9439_v61 = vmul.u32.u64.high %v1002_v46, %v997_v42, %v9438_v57  ;;  %v3870_v43 = vpop.permute.xlu1 %3869 }
 0x134   : > { %v1001_v20 = vsel %vm987_vm13, %v998_v3, %v1000_v12  ;;  %v8106_v8 = vadd.s32 4294967169, %v854_v33  ;;  %v828_v26 = vcvt.s32.f32 %v9394_v56  ;;  %v717_v54 = vor.u32 %v716_v37, %v715_v47 }
 0x135   : > { %v9443_v48 = vmul.u32.u64.low %v1002_v46, %v1001_v20  ;;  %v9444_v32 = vmul.u32.u64.high %v1002_v46, %v1001_v20, %v9443_v48  ;;  %v8232_v18 = vadd.s32 4294967294, %v4337_v45  ;;  %v8227_v7 = vmin.u32 %v4231_v9, %v9427_v39 }
 0x136   : > { %v993_v14 = vsel %vm987_vm13, %v990_v5, %v992_v41  ;;  %v860_v34 = vadd.s32 1, %v8106_v8  ;;  %v12399_v19 = vxor.u32 2147483648, %v9219_v15  ;;  %v4145_v33 = vxor.u32 2147483648, %v9365_v4 }
 0x137   : > { %v722_v56 = vand.u32 2147483647, %v721_v27  ;;  %v12257_v37 = vand.u32 2147483647, %v9403_v31  ;;  %v12400_v47 = vand.u32 2147483647, %v9348_v63  ;;  %v12401_v35 = vcvt.s32.f32 %v9343_v40 }
 0x138   : > { %v9453_v21 = vsel %vm436_vm9, %v12399_v19, %v9219_v15  ;;  %v12402_v13 = vand.u32 2147483647, %v9379_v11  ;;  %v1012_v53 = vadd.s32 1, %v9439_v61  ;;  %vm861_vm14 = vcmp.gt.s32.totalorder %v860_v34, 0 }
 0x139   : > { %v9461_v25 = vmul.f32 %v12401_v35, %v12400_v47  ;;  %v724_v15 = vcvt.s32.f32 %v717_v54  ;;  %v1009_v9 = vmul.u32 %v1002_v46, %v993_v14  ;;  %vm1011_vm15 = vc.u32 %v9444_v32, %v9438_v57 }
 0x13a   : > { %v9465_v45 = vmul.f32 %v828_v26, %v12402_v13  ;;  %v862_v42 = vsel %vm861_vm14, %v860_v34, 0  ;;  %vm8233_vm0 = vcmp.lt.s32.totalorder %v8232_v18, 0  ;;  %v4233_v3 = vclz %v8227_v7  ;;  %v3863_v26 = vpop.permute.xlu0 %3862 }
 0x13b   : > { %v1013_v63 = vsel %vm1011_vm15, %v1012_v53, %v9439_v61  ;;  %v864_v40 = vand.u32 31, %v862_v42  ;;  %v9471_v27 = vmul.f32 %v724_v15, %v722_v56  ;;  %v4325_v11 = vadd.s32 %v9299_v10, %v9308_v51 }
 0x13c   : > { %v1014_v5 = vadd.s32 %v1013_v63, %v1009_v9  ;;  %v857_v41 = vand.u32 8388607, %v12257_v37  ;;  %v9480_v61 = vsel %vm8233_vm0, 0, %v8232_v18  ;;  %v9484_v7 = vmul.f32 %v9400_v29, %v3870_v43 }
 0x13d   : > { %v865_v46 = vsub.s32 32, %v864_v40  ;;  %v867_v12 = vshll.u32 %v12397_v59, %v864_v40  ;;  %v870_v20 = vshll.u32 %v12393_v22, %v864_v40  ;;  %v873_v8 = vshll.u32 %v12394_v24, %v864_v40 }
 0x13e   : > { %v1015_v54 = vadd.s32 536870912, %v1014_v5  ;;  %v876_v48 = vshll.u32 %v12395_v30, %v864_v40  ;;  %12403 = vst [vmem:[#allocation18_spill] sm:$0xff] %v9484_v7  ;;  %v8228_v10 = vadd.s32 4294967294, %v4233_v3  ;;  %v863_v56 = vshrl.u32 %v862_v42, 5 }
 0x13f   : > { %v868_v51 = vshrl.u32 %v12393_v22, %v865_v46  ;;  %v871_v14 = vshrl.u32 %v12394_v24, %v865_v46  ;;  %v874_v34 = vshrl.u32 %v12395_v30, %v865_v46  ;;  %v877_v47 = vshrl.u32 %v12265_v28, %v865_v46 }
 0x140   : > { %v9489_v19 = vshrl.u32 %v1015_v54, 30  ;;  %v9493_v18 = vmul.f32 %v9400_v29, %v3863_v26  ;;  %vm4063_vm1 = vcmp.lt.s32.totalorder %v8958_v60, 0  ;;  %v879_v15 = vshll.u32 %v12265_v28, %v864_v40 }
 0x141   : > { %v869_v35 = vor.u32 %v868_v51, %v867_v12  ;;  %v872_v13 = vor.u32 %v871_v14, %v870_v20  ;;  %v875_v53 = vor.u32 %v874_v34, %v873_v8  ;;  %v4341_v9 = vsub.s32 32, %v9480_v61 }
 0x142   : > { %12404 = vst [vmem:[#allocation19_spill] sm:$0xff] %v9489_v19  ;;  %12405 = vst [vmem:[#allocation20_spill] sm:$0xff] %v9493_v18  ;;  %v4345_v3 = vsub.s32 4294967266, %v9480_v61  ;;  %v858_v63 = vor.u32 8388608, %v857_v41  ;;  %v878_v43 = vor.u32 %v877_v47, %v876_v48  ;;  %vm8229_vm3 = vcmp.lt.s32.totalorder %v8228_v10, 0 }
 0x143   : > { %v866_v42 = vshrl.u32 %v12397_v59, %v865_v46  ;;  %v880_v54 = vshrl.u32 %v12398_v2, %v865_v46  ;;  %v4480_v26 = vand.u32 2139095040, %v9484_v7  ;;  %v1017_v37 = vshll.u32 %v9489_v19, 30 }
 0x144   : > { %vm882_vm4 = vcmp.lt.s32.totalorder %v863_v56, 1  ;;  %vm884_vm5 = vcmp.lt.s32.totalorder %v863_v56, 3  ;;  %vm885_vm6 = vcmp.lt.s32.totalorder %v863_v56, 4  ;;  %v4346_v51 = vadd.s32 127, %v4345_v3 }
 0x145   : > { %v881_v12 = vor.u32 %v880_v54, %v879_v15  ;;  %v887_v40 = vsel %vm885_vm6, %v875_v53, 2102212464  ;;  %v890_v20 = vsel %vm882_vm4, %v869_v35, %v872_v13  ;;  %v891_v8 = vsel %vm885_vm6, %v878_v43, 920167782 }
 0x146   : > { %vm883_vm7 = vcmp.lt.s32.totalorder %v863_v56, 2  ;;  %v892_v41 = vsel %vm884_vm5, %v875_v53, %v891_v8  ;;  %v898_v48 = vshll.u32 %v858_v63, 8  ;;  %v9506_v14 = vsel %vm8229_vm3, 0, %v8228_v10 }
 0x147   : > { %v893_v46 = vsel %vm883_vm7, %v890_v20, %v892_v41  ;;  %v894_v34 = vsel %vm882_vm4, %v872_v13, %v875_v53  ;;  %v895_v47 = vsel %vm885_vm6, %v881_v12, 1326507024  ;;  %vm540_vm8 = vcmp.lt.s32.totalorder %v8961_v62, 0 }
 0x148   : > { %vm748_vm10 = vcmp.lt.s32.totalorder %v9093_v23, 0  ;;  %vm644_vm11 = vcmp.lt.s32.totalorder %v9172_v38, 0  ;;  %v9513_v15 = vsub.s32 %v1014_v5, %v1017_v37  ;;  %v886_v3 = vsel %vm882_vm4, %v866_v42, %v869_v35 }
 0x149   : > { %v888_v63 = vsel %vm884_vm5, %v872_v13, %v887_v40  ;;  %v896_v10 = vsel %vm884_vm5, %v878_v43, %v895_v47  ;;  %v9519_v20 = vmul.u32.u64.low %v898_v48, %v893_v46  ;;  %v9520_v8 = vmul.u32.u64.high %v898_v48, %v893_v46, %v9519_v20 }
 0x14a   : > { %v897_v54 = vsel %vm883_vm7, %v894_v34, %v896_v10  ;;  %v4481_v53 = vshrl.u32 %v4480_v26, 23  ;;  %v9528_v37 = vsel %vm4063_vm1, %v4145_v33, %v9365_v4  ;;  %v4376_v13 = vand.u32 2139095040, %v9493_v18 }
 0x14b   : > { %12406 = vst [vmem:[#allocation21_spill] sm:$0xff] %v9528_v37  ;;  %v9530_v5 = vmul.u32.u64.low %v898_v48, %v897_v54  ;;  %v9531_v35 = vmul.u32.u64.high %v898_v48, %v897_v54, %v9530_v5  ;;  %v4343_v43 = vshrl.u32 %v4325_v11, %v4341_v9  ;;  %v4347_v42 = vshll.u32 %v4346_v51, 23 }
 0x14c   : > { %v889_v12 = vsel %vm883_vm7, %v886_v3, %v888_v63  ;;  %v8238_v40 = vadd.s32 4294967169, %v4481_v53  ;;  %v622_v41 = vxor.u32 2147483648, %v9461_v25  ;;  %v830_v26 = vxor.u32 2147483648, %v9465_v45 }
 0x14d   : > { %v4241_v46 = vsub.s32 4294967266, %v9506_v14  ;;  %v1020_v34 = vsub.s32 0, %v9513_v15  ;;  %v726_v4 = vxor.u32 2147483648, %v9471_v27  ;;  %v4342_v33 = vshll.u32 %v9390_v1, %v9480_v61 }
 0x14e   : > { %v908_v47 = vadd.s32 1, %v9520_v8  ;;  %v4487_v11 = vadd.s32 1, %v8238_v40  ;;  %v905_v9 = vmul.u32 %v898_v48, %v889_v12  ;;  %vm907_vm12 = vc.u32 %v9531_v35, %v9519_v20 }
 0x14f   : > { %v12258_v56 = vand.u32 2147483647, %v9484_v7  ;;  %v4377_v51 = vshrl.u32 %v4376_v13, 23  ;;  %v9546_v3 = vor.u32 %v4343_v43, %v4342_v33  ;;  %v9548_v63 = vor.u32 4788187, %v4347_v42 }
 0x150   : > { %v909_v10 = vsel %vm907_vm12, %v908_v47, %v9520_v8  ;;  %vm4488_vm13 = vcmp.gt.s32.totalorder %v4487_v11, 0  ;;  %v4237_v54 = vsub.s32 32, %v9506_v14  ;;  %v9552_v1 = vadd.s32 127, %v4241_v46 }
 0x151   : > { %v8111_v61 = vmin.u32 %v1020_v34, %v9513_v15  ;;  %v910_v48 = vadd.s32 %v909_v10, %v905_v9  ;;  %v9558_v53 = vsel %vm540_vm8, %v622_v41, %v9461_v25  ;;  %v9563_v5 = vsel %vm748_vm10, %v830_v26, %v9465_v45 }
 0x152   : > { %12407 = vst [vmem:[#allocation22_spill] sm:$0xff] %v9558_v53  ;;  %12408 = vst [vmem:[#allocation23_spill] sm:$0xff] %v9563_v5  ;;  %v9568_v8 = vsel %vm644_vm11, %v726_v4, %v9471_v27  ;;  %v4489_v13 = vsel %vm4488_vm13, %v4487_v11, 0  ;;  %v4221_v43 = vadd.s32 %v9357_v16, %v9374_v17  ;;  %v4484_v12 = vand.u32 8388607, %v12258_v56 }
 0x153   : > { %12409 = vst [vmem:[#allocation24_spill] sm:$0xff] %v9568_v8  ;;  %v911_v42 = vadd.s32 536870912, %v910_v48  ;;  %v8234_v25 = vadd.s32 4294967169, %v4377_v51  ;;  %v4349_v40 = vand.u32 2147483647, %v9548_v63  ;;  %v4351_v41 = vcvt.s32.f32 %v9546_v3 }
 0x154   : > { %v4491_v45 = vand.u32 31, %v4489_v13  ;;  %v4239_v46 = vshrl.u32 %v4221_v43, %v4237_v54  ;;  %v4243_v27 = vshll.u32 %v9552_v1, 23  ;;  %v1022_v34 = vclz %v8111_v61 }
 0x155   : > { %v9578_v4 = vshrl.u32 %v911_v42, 30  ;;  %v4485_v9 = vor.u32 8388608, %v4484_v12  ;;  %v4383_v3 = vadd.s32 1, %v8234_v25  ;;  %v4490_v63 = vshrl.u32 %v4489_v13, 5 }
 0x156   : > { %v4492_v33 = vsub.s32 32, %v4491_v45  ;;  %v4494_v16 = vshll.u32 %v12397_v59, %v4491_v45  ;;  %v4497_v17 = vshll.u32 %v12393_v22, %v4491_v45  ;;  %v4500_v47 = vshll.u32 %v12394_v24, %v4491_v45 }
 0x157   : > { %12410 = vst [vmem:[#allocation25_spill] sm:$0xff] %v9578_v4  ;;  %v913_v11 = vshll.u32 %v9578_v4, 30  ;;  %v4503_v51 = vshll.u32 %v12395_v30, %v4491_v45  ;;  %v8112_v61 = vadd.s32 4294967294, %v1022_v34  ;;  %v4506_v56 = vshll.u32 %v12265_v28, %v4491_v45 }
 0x158   : > { %v4495_v10 = vshrl.u32 %v12393_v22, %v4492_v33  ;;  %v4498_v54 = vshrl.u32 %v12394_v24, %v4492_v33  ;;  %v4501_v1 = vshrl.u32 %v12395_v30, %v4492_v33  ;;  %v4504_v42 = vshrl.u32 %v12265_v28, %v4492_v33 }
 0x159   : > { %v9588_v43 = vsub.s32 %v910_v48, %v913_v11  ;;  %v4507_v4 = vshrl.u32 %v12398_v2, %v4492_v33  ;;  %v4493_v13 = vshrl.u32 %v12397_v59, %v4492_v33  ;;  %v12411_v6 = vand.u32 2147483647, %v9493_v18 }
 0x15a   : > { %v4496_v26 = vor.u32 %v4495_v10, %v4494_v16  ;;  %v4499_v19 = vor.u32 %v4498_v54, %v4497_v17  ;;  %v4502_v12 = vor.u32 %v4501_v1, %v4500_v47  ;;  %v4505_v25 = vor.u32 %v4504_v42, %v4503_v51 }
 0x15b   : > { %v4380_v5 = vand.u32 8388607, %v12411_v6  ;;  %vm4384_vm14 = vcmp.gt.s32.totalorder %v4383_v3, 0  ;;  %v916_v34 = vsub.s32 0, %v9588_v43  ;;  %v4508_v48 = vor.u32 %v4507_v4, %v4506_v56 }
 0x15c   : > { %vm4509_vm15 = vcmp.lt.s32.totalorder %v4490_v63, 1  ;;  %vm4512_vm0 = vcmp.lt.s32.totalorder %v4490_v63, 4  ;;  %vm8113_vm3 = vcmp.lt.s32.totalorder %v8112_v61, 0  ;;  %v4525_v16 = vshll.u32 %v4485_v9, 8 }
 0x15d   : > { %v4514_v11 = vsel %vm4512_vm0, %v4502_v12, 2102212464  ;;  %v4517_v45 = vsel %vm4509_vm15, %v4496_v26, %v4499_v19  ;;  %vm4511_vm4 = vcmp.lt.s32.totalorder %v4490_v63, 3  ;;  %v4518_v17 = vsel %vm4512_vm0, %v4505_v25, 920167782 }
 0x15e   : > { %v4521_v47 = vsel %vm4509_vm15, %v4499_v19, %v4502_v12  ;;  %v4522_v10 = vsel %vm4512_vm0, %v4508_v48, 1326507024  ;;  %vm4510_vm5 = vcmp.lt.s32.totalorder %v4490_v63, 2  ;;  %v4513_v33 = vsel %vm4509_vm15, %v4493_v13, %v4496_v26  ;;  %v355_v48 = vpop.permute.xlu1 %354 }
 0x15f   : > { %v4519_v51 = vsel %vm4511_vm4, %v4502_v12, %v4518_v17  ;;  %v4385_v54 = vsel %vm4384_vm14, %v4383_v3, 0  ;;  %v8107_v6 = vmin.u32 %v916_v34, %v9588_v43  ;;  %v4515_v1 = vsel %vm4511_vm4, %v4499_v19, %v4514_v11 }
 0x160   : > { %v4520_v56 = vsel %vm4510_vm5, %v4517_v45, %v4519_v51  ;;  %v4523_v4 = vsel %vm4511_vm4, %v4505_v25, %v4522_v10  ;;  %v4238_v42 = vshll.u32 %v9427_v39, %v9506_v14  ;;  %v9608_v26 = vsel %vm8113_vm3, 0, %v8112_v61 }
 0x161   : > { %v4524_v9 = vsel %vm4510_vm5, %v4521_v47, %v4523_v4  ;;  %v9603_v28 = vmul.u32.u64.low %v4525_v16, %v4520_v56  ;;  %v9604_v23 = vmul.u32.u64.high %v4525_v16, %v4520_v56, %v9603_v28  ;;  %v4387_v19 = vand.u32 31, %v4385_v54 }
 0x162   : > { %v9610_v3 = vmul.u32.u64.low %v4525_v16, %v4524_v9  ;;  %v9611_v12 = vmul.u32.u64.high %v4525_v16, %v4524_v9, %v9610_v3  ;;  %v9613_v13 = vmul.f32 %v4351_v41, %v4349_v40  ;;  %v9615_v25 = vor.u32 %v4239_v46, %v4238_v42 }
 0x163   : > { %v4516_v39 = vsel %vm4510_vm5, %v4513_v33, %v4515_v1  ;;  %v4381_v14 = vor.u32 8388608, %v4380_v5  ;;  %v9618_v34 = vor.u32 4788187, %v4243_v27  ;;  %v918_v11 = vclz %v8107_v6 }
 0x164   : > { %v4388_v45 = vsub.s32 32, %v4387_v19  ;;  %v9621_v17 = vmul.f32 %v9400_v29, %v355_v48  ;;  %v1026_v61 = vsub.s32 32, %v9608_v26  ;;  %v4535_v47 = vadd.s32 1, %v9604_v23 }
 0x165   : > { %v4390_v10 = vshll.u32 %v12397_v59, %v4387_v19  ;;  %v4393_v40 = vshll.u32 %v12393_v22, %v4387_v19  ;;  %v1030_v41 = vsub.s32 4294967266, %v9608_v26  ;;  %v4532_v46 = vmul.u32 %v4525_v16, %v4516_v39 }
 0x166   : > { %12412 = vst [vmem:[#allocation26_spill] sm:$0xff] %v9621_v17  ;;  %vm4534_vm6 = vc.u32 %v9611_v12, %v9603_v28  ;;  %v4391_v5 = vshrl.u32 %v12393_v22, %v4388_v45  ;;  %v4386_v63 = vshrl.u32 %v4385_v54, 5  ;;  %v4394_v33 = vshrl.u32 %v12394_v24, %v4388_v45 }
 0x167   : > { %v4536_v27 = vsel %vm4534_vm6, %v4535_v47, %v9604_v23  ;;  %v9633_v51 = vshll.u32 %v4381_v14, 8  ;;  %v8108_v6 = vadd.s32 4294967294, %v918_v11  ;;  %v4396_v56 = vshll.u32 %v12394_v24, %v4387_v19 }
 0x168   : > { %v4537_v1 = vadd.s32 %v4536_v27, %v4532_v46  ;;  %v4397_v4 = vshrl.u32 %v12395_v30, %v4388_v45  ;;  %v4392_v42 = vor.u32 %v4391_v5, %v4390_v10  ;;  %v4395_v16 = vor.u32 %v4394_v33, %v4393_v40 }
 0x169   : > { %v4399_v9 = vshll.u32 %v12395_v30, %v4387_v19  ;;  %v1165_v48 = vand.u32 2139095040, %v9621_v17  ;;  %v12413_v23 = vmov 920167782   ;;  %v4389_v14 = vshrl.u32 %v12397_v59, %v4388_v45 }
 0x16a   : > { %v4538_v3 = vadd.s32 536870912, %v4537_v1  ;;  %v4398_v39 = vor.u32 %v4397_v4, %v4396_v56  ;;  %v4400_v54 = vshrl.u32 %v12413_v23, %v4388_v45  ;;  %v4402_v47 = vshll.u32 %v12413_v23, %v4387_v19 }
 0x16b   : > { %v4403_v11 = vshrl.u32 %v12398_v2, %v4388_v45  ;;  %vm4405_vm7 = vcmp.lt.s32.totalorder %v4386_v63, 1  ;;  %vm4408_vm12 = vcmp.lt.s32.totalorder %v4386_v63, 4  ;;  %vm8109_vm13 = vcmp.lt.s32.totalorder %v8108_v6, 0 }
 0x16c   : > { %v9643_v46 = vshrl.u32 %v4538_v3, 30  ;;  %v4401_v10 = vor.u32 %v4400_v54, %v4399_v9  ;;  %v4410_v40 = vsel %vm4408_vm12, %v4398_v39, 2102212464  ;;  %vm4406_vm14 = vcmp.lt.s32.totalorder %v4386_v63, 2 }
 0x16d   : > { %v4404_v5 = vor.u32 %v4403_v11, %v4402_v47  ;;  %vm4407_vm15 = vcmp.lt.s32.totalorder %v4386_v63, 3  ;;  %v4413_v27 = vsel %vm4405_vm7, %v4392_v42, %v4395_v16  ;;  %v4417_v56 = vsel %vm4405_vm7, %v4395_v16, %v4398_v39 }
 0x16e   : > { %12414 = vst [vmem:[#allocation27_spill] sm:$0xff] %v9643_v46  ;;  %v4540_v33 = vshll.u32 %v9643_v46, 30  ;;  %v4414_v19 = vsel %vm4408_vm12, %v4401_v10, 920167782  ;;  %v1166_v4 = vshrl.u32 %v1165_v48, 23  ;;  %v4409_v8 = vsel %vm4405_vm7, %v4389_v14, %v4392_v42 }
 0x16f   : > { %v4411_v45 = vsel %vm4407_vm15, %v4395_v16, %v4410_v40  ;;  %v4415_v38 = vsel %vm4407_vm15, %v4398_v39, %v4414_v19  ;;  %v4418_v37 = vsel %vm4408_vm12, %v4404_v5, 1326507024  ;;  %v1031_v11 = vadd.s32 127, %v1030_v41  ;;  %v348_v40 = vpop.permute.xlu0 %347 }
 0x170   : > { %v9649_v3 = vsub.s32 %v4537_v1, %v4540_v33  ;;  %v4416_v9 = vsel %vm4406_vm14, %v4413_v27, %v4415_v38  ;;  %v4419_v54 = vsel %vm4407_vm15, %v4401_v10, %v4418_v37  ;;  %v8118_v47 = vadd.s32 4294967169, %v1166_v4 }
 0x171   : > { %v4420_v60 = vsel %vm4406_vm14, %v4417_v56, %v4419_v54  ;;  %v9654_v46 = vmul.u32.u64.low %v9633_v51, %v4416_v9  ;;  %v9655_v53 = vmul.u32.u64.high %v9633_v51, %v4416_v9, %v9654_v46  ;;  %v1010_v42 = vadd.s32 %v9438_v57, %v9444_v32 }
 0x172   : > { %v4543_v16 = vsub.s32 0, %v9649_v3  ;;  %v9662_v1 = vmul.u32.u64.low %v9633_v51, %v4420_v60  ;;  %v9663_v48 = vmul.u32.u64.high %v9633_v51, %v4420_v60, %v9662_v1  ;;  %v4245_v38 = vand.u32 2147483647, %v9618_v34 }
 0x173   : > { %v9667_v37 = vsel %vm8109_vm13, 0, %v8108_v6  ;;  %v4412_v41 = vsel %vm4406_vm14, %v4409_v8, %v4411_v45  ;;  %v1172_v39 = vadd.s32 1, %v8118_v47  ;;  %v4247_v10 = vcvt.s32.f32 %v9615_v25 }
 0x174   : > { %v1027_v57 = vshll.u32 %v9513_v15, %v9608_v26  ;;  %v1028_v32 = vshrl.u32 %v1010_v42, %v1026_v61  ;;  %v1032_v5 = vshll.u32 %v1031_v11, 23  ;;  %v8239_v60 = vmin.u32 %v4543_v16, %v9649_v3 }
 0x175   : > { %v4431_v34 = vadd.s32 1, %v9655_v53  ;;  %vm1173_vm0 = vcmp.gt.s32.totalorder %v1172_v39, 0  ;;  %v926_v6 = vsub.s32 4294967266, %v9667_v37  ;;  %v4428_v8 = vmul.u32 %v9633_v51, %v4412_v41 }
 0x176   : > { %vm4430_vm3 = vc.u32 %v9663_v48, %v9654_v46  ;;  %v1174_v63 = vsel %vm1173_vm0, %v1172_v39, 0  ;;  %v9680_v25 = vmul.f32 %v4247_v10, %v4245_v38  ;;  %v9684_v61 = vmul.f32 %v9400_v29, %v348_v40 }
 0x177   : > { %v4432_v15 = vsel %vm4430_vm3, %v4431_v34, %v9655_v53  ;;  %v1176_v26 = vand.u32 31, %v1174_v63  ;;  %v9686_v27 = vor.u32 %v1028_v32, %v1027_v57  ;;  %v906_v33 = vadd.s32 %v9519_v20, %v9531_v35 }
 0x178   : > { %12415 = vst [vmem:[#allocation28_spill] sm:$0xff] %v9684_v61  ;;  %v4433_v19 = vadd.s32 %v4432_v15, %v4428_v8  ;;  %v12275_v51 = vand.u32 2147483647, %v9621_v17  ;;  %v9691_v56 = vor.u32 4788187, %v1032_v5  ;;  %v922_v4 = vsub.s32 32, %v9667_v37 }
 0x179   : > { %v4545_v45 = vclz %v8239_v60  ;;  %v1177_v9 = vsub.s32 32, %v1176_v26  ;;  %v927_v54 = vadd.s32 127, %v926_v6  ;;  %v1179_v47 = vshll.u32 %v12397_v59, %v1176_v26 }
 0x17a   : > { %v4434_v53 = vadd.s32 536870912, %v4433_v19  ;;  %v1182_v11 = vshll.u32 %v12393_v22, %v1176_v26  ;;  %v1185_v20 = vshll.u32 %v12394_v24, %v1176_v26  ;;  %v1188_v35 = vshll.u32 %v12395_v30, %v1176_v26 }
 0x17b   : > { %v1180_v42 = vshrl.u32 %v12393_v22, %v1177_v9  ;;  %v1183_v16 = vshrl.u32 %v12394_v24, %v1177_v9  ;;  %v1169_v38 = vand.u32 8388607, %v12275_v51  ;;  %v1191_v41 = vshll.u32 %v12413_v23, %v1176_v26 }
 0x17c   : > { %v9700_v1 = vshrl.u32 %v4434_v53, 30  ;;  %v1061_v39 = vand.u32 2139095040, %v9684_v61  ;;  %v8240_v10 = vadd.s32 4294967294, %v4545_v45  ;;  %v1175_v57 = vshrl.u32 %v1174_v63, 5 }
 0x17d   : > { %v1186_v32 = vshrl.u32 %v12395_v30, %v1177_v9  ;;  %v1189_v40 = vshrl.u32 %v12413_v23, %v1177_v9  ;;  %v1181_v60 = vor.u32 %v1180_v42, %v1179_v47  ;;  %v1184_v34 = vor.u32 %v1183_v16, %v1182_v11 }
 0x17e   : > { %12416 = vst [vmem:[#allocation29_spill] sm:$0xff] %v9700_v1  ;;  %v4436_v5 = vshll.u32 %v9700_v1, 30  ;;  %v1192_v6 = vshrl.u32 %v12398_v2, %v1177_v9  ;;  %v1034_v8 = vand.u32 2147483647, %v9691_v56  ;;  %v923_v15 = vshll.u32 %v9588_v43, %v9667_v37 }
 0x17f   : > { %v1187_v26 = vor.u32 %v1186_v32, %v1185_v20  ;;  %v1190_v53 = vor.u32 %v1189_v40, %v1188_v35  ;;  %vm12286_vm4 = vcmp.lt.s32.totalorder %v9185_v52, 0  ;;  %v924_v63 = vshrl.u32 %v906_v33, %v922_v4  ;;  %v3884_v32 = vpop.permute.xlu1 %3883 }
 0x180   : > { %v9714_v45 = vsub.s32 %v4433_v19, %v4436_v5  ;;  %v1170_v51 = vor.u32 8388608, %v1169_v38  ;;  %v1193_v14 = vor.u32 %v1192_v6, %v1191_v41  ;;  %v928_v62 = vshll.u32 %v927_v54, 23 }
 0x181   : > { %vm8241_vm5 = vcmp.lt.s32.totalorder %v8240_v10, 0  ;;  %vm1194_vm6 = vcmp.lt.s32.totalorder %v1175_v57, 1  ;;  %v1062_v47 = vshrl.u32 %v1061_v39, 23  ;;  %v1178_v11 = vshrl.u32 %v12397_v59, %v1177_v9 }
 0x182   : > { %vm1196_vm7 = vcmp.lt.s32.totalorder %v1175_v57, 3  ;;  %vm1197_vm12 = vcmp.lt.s32.totalorder %v1175_v57, 4  ;;  %v1202_v56 = vsel %vm1194_vm6, %v1181_v60, %v1184_v34  ;;  %v1206_v42 = vsel %vm1194_vm6, %v1184_v34, %v1187_v26 }
 0x183   : > { %v1199_v43 = vsel %vm1197_vm12, %v1187_v26, 2102212464  ;;  %v1203_v37 = vsel %vm1197_vm12, %v1190_v53, 920167782  ;;  %v1207_v16 = vsel %vm1197_vm12, %v1193_v14, 1326507024  ;;  %v9725_v38 = vor.u32 %v924_v63, %v923_v15 }
 0x184   : > { %v4439_v33 = vsub.s32 0, %v9714_v45  ;;  %vm1195_vm13 = vcmp.lt.s32.totalorder %v1175_v57, 2  ;;  %v1204_v19 = vsel %vm1196_vm7, %v1187_v26, %v1203_v37  ;;  %v1210_v4 = vshll.u32 %v1170_v51, 8 }
 0x185   : > { %v9721_v54 = vsel %vm8241_vm5, 0, %v8240_v10  ;;  %v1205_v20 = vsel %vm1195_vm13, %v1202_v56, %v1204_v19  ;;  %v1208_v9 = vsel %vm1196_vm7, %v1190_v53, %v1207_v16  ;;  %v8114_v35 = vadd.s32 4294967169, %v1062_v47 }
 0x186   : > { %v1198_v41 = vsel %vm1194_vm6, %v1178_v11, %v1181_v60  ;;  %v1200_v39 = vsel %vm1196_vm7, %v1184_v34, %v1199_v43  ;;  %v1209_v14 = vsel %vm1195_vm13, %v1206_v42, %v1208_v9  ;;  %v1036_v6 = vcvt.s32.f32 %v9686_v27 }
 0x187   : > { %v9730_v40 = vmul.u32.u64.low %v1210_v4, %v1209_v14  ;;  %v9731_v5 = vmul.u32.u64.high %v1210_v4, %v1209_v14, %v9730_v40  ;;  %v9733_v51 = vmul.u32.u64.low %v1210_v4, %v1205_v20  ;;  %v9734_v10 = vmul.u32.u64.high %v1210_v4, %v1205_v20, %v9733_v51 }
 0x188   : > { %v4553_v26 = vsub.s32 4294967266, %v9721_v54  ;;  %v8235_v15 = vmin.u32 %v4439_v33, %v9714_v45  ;;  %v1068_v53 = vadd.s32 1, %v8114_v35  ;;  %v12417_v60 = vxor.u32 2147483648, %v9613_v13 }
 0x189   : > { %v9747_v63 = vor.u32 4788187, %v928_v62  ;;  %v1201_v47 = vsel %vm1195_vm13, %v1198_v41, %v1200_v39  ;;  %v9751_v11 = vmul.f32 %v9400_v29, %v3884_v32  ;;  %v9754_v56 = vmul.f32 %v1036_v6, %v1034_v8 }
 0x18a   : > { %v9745_v34 = vsel %vm12286_vm4, %v12417_v60, %v9613_v13  ;;  %v12278_v43 = vand.u32 2147483647, %v9684_v61  ;;  %vm1069_vm14 = vcmp.gt.s32.totalorder %v1068_v53, 0  ;;  %v4533_v13 = vadd.s32 %v9603_v28, %v9611_v12 }
 0x18b   : > { %12418 = vst [vmem:[#allocation30_spill] sm:$0xff] %v9745_v34  ;;  %12419 = vst [vmem:[#allocation31_spill] sm:$0xff] %v9751_v11  ;;  %vm1219_vm15 = vc.u32 %v9731_v5, %v9733_v51  ;;  %v1220_v62 = vadd.s32 1, %v9734_v10  ;;  %v4554_v57 = vadd.s32 127, %v4553_v26  ;;  %v4441_v42 = vclz %v8235_v15 }
 0x18c   : > { %v1217_v16 = vmul.u32 %v1210_v4, %v1201_v47  ;;  %v1070_v33 = vsel %vm1069_vm14, %v1068_v53, 0  ;;  %v4688_v9 = vand.u32 2139095040, %v9751_v11  ;;  %v4549_v35 = vsub.s32 32, %v9721_v54 }
 0x18d   : > { %v1221_v19 = vsel %vm1219_vm15, %v1220_v62, %v9734_v10  ;;  %v1072_v20 = vand.u32 31, %v1070_v33  ;;  %v1065_v28 = vand.u32 8388607, %v12278_v43  ;;  %v4555_v40 = vshll.u32 %v4554_v57, 23 }
 0x18e   : > { %v1222_v41 = vadd.s32 %v1221_v19, %v1217_v16  ;;  %v8236_v10 = vadd.s32 4294967294, %v4441_v42  ;;  %v4689_v47 = vshrl.u32 %v4688_v9, 23  ;;  %v1071_v19 = vshrl.u32 %v1070_v33, 5 }
 0x18f   : > { %v1073_v39 = vsub.s32 32, %v1072_v20  ;;  %v1075_v14 = vshll.u32 %v12397_v59, %v1072_v20  ;;  %v1078_v4 = vshll.u32 %v12393_v22, %v1072_v20  ;;  %v1081_v32 = vshll.u32 %v12394_v24, %v1072_v20 }
 0x190   : > { %v1223_v6 = vadd.s32 536870912, %v1222_v41  ;;  %v1084_v26 = vshll.u32 %v12395_v30, %v1072_v20  ;;  %v1066_v16 = vor.u32 8388608, %v1065_v28  ;;  %v1087_v42 = vshll.u32 %v12413_v23, %v1072_v20 }
 0x191   : > { %v1076_v15 = vshrl.u32 %v12393_v22, %v1073_v39  ;;  %v1079_v53 = vshrl.u32 %v12394_v24, %v1073_v39  ;;  %v1082_v60 = vshrl.u32 %v12395_v30, %v1073_v39  ;;  %v1085_v43 = vshrl.u32 %v12413_v23, %v1073_v39 }
 0x192   : > { %v9777_v62 = vshrl.u32 %v1223_v6, 30  ;;  %v4551_v37 = vshrl.u32 %v4533_v13, %v4549_v35  ;;  %v1088_v34 = vshrl.u32 %v12398_v2, %v1073_v39  ;;  %v9783_v52 = vor.u32 4788187, %v4555_v40 }
 0x193   : > { %v1077_v27 = vor.u32 %v1076_v15, %v1075_v14  ;;  %v1080_v12 = vor.u32 %v1079_v53, %v1078_v4  ;;  %v1083_v57 = vor.u32 %v1082_v60, %v1081_v32  ;;  %v1086_v1 = vor.u32 %v1085_v43, %v1084_v26 }
 0x194   : > { %12420 = vst [vmem:[#allocation32_spill] sm:$0xff] %v9777_v62  ;;  %v1225_v8 = vshll.u32 %v9777_v62, 30  ;;  %vm8237_vm0 = vcmp.lt.s32.totalorder %v8236_v10, 0  ;;  %v1074_v9 = vshrl.u32 %v12397_v59, %v1073_v39  ;;  %v8246_v28 = vadd.s32 4294967169, %v4689_v47 }
 0x195   : > { %v1089_v6 = vor.u32 %v1088_v34, %v1087_v42  ;;  %vm1090_vm3 = vcmp.lt.s32.totalorder %v1071_v19, 1  ;;  %vm1093_vm5 = vcmp.lt.s32.totalorder %v1071_v19, 4  ;;  %vm1092_vm6 = vcmp.lt.s32.totalorder %v1071_v19, 3 }
 0x196   : > { %v9786_v33 = vsub.s32 %v1222_v41, %v1225_v8  ;;  %v1095_v14 = vsel %vm1093_vm5, %v1083_v57, 2102212464  ;;  %v1098_v20 = vsel %vm1090_vm3, %v1077_v27, %v1080_v12  ;;  %v1099_v13 = vsel %vm1093_vm5, %v1086_v1, 920167782 }
 0x197   : > { %vm1091_vm7 = vcmp.lt.s32.totalorder %v1071_v19, 2  ;;  %v1100_v35 = vsel %vm1092_vm6, %v1083_v57, %v1099_v13  ;;  %v1102_v43 = vsel %vm1090_vm3, %v1080_v12, %v1083_v57  ;;  %v1106_v4 = vshll.u32 %v1066_v16, 8 }
 0x198   : > { %v9788_v32 = vsel %vm8237_vm0, 0, %v8236_v10  ;;  %v1101_v40 = vsel %vm1091_vm7, %v1098_v20, %v1100_v35  ;;  %v1103_v26 = vsel %vm1093_vm5, %v1089_v6, 1326507024  ;;  %v4695_v39 = vadd.s32 1, %v8246_v28  ;;  %v3877_v28 = vpop.permute.xlu0 %3876  ;;  %v369_v20 = vpop.permute.xlu1 %368 }
 0x199   : > { %v1228_v8 = vsub.s32 0, %v9786_v33  ;;  %v1094_v41 = vsel %vm1090_vm3, %v1074_v9, %v1077_v27  ;;  %v1096_v34 = vsel %vm1092_vm6, %v1080_v12, %v1095_v14  ;;  %v1104_v15 = vsel %vm1092_vm6, %v1086_v1, %v1103_v26 }
 0x19a   : > { %v1105_v53 = vsel %vm1091_vm7, %v1102_v43, %v1104_v15  ;;  %v9793_v60 = vmul.u32.u64.low %v1106_v4, %v1101_v40  ;;  %v9794_v47 = vmul.u32.u64.high %v1106_v4, %v1101_v40, %v9793_v60  ;;  %vm4696_vm12 = vcmp.gt.s32.totalorder %v4695_v39, 0 }
 0x19b   : > { %v4550_v10 = vshll.u32 %v9649_v3, %v9721_v54  ;;  %v9799_v16 = vmul.u32.u64.low %v1106_v4, %v1105_v53  ;;  %v9800_v57 = vmul.u32.u64.high %v1106_v4, %v1105_v53, %v9799_v16  ;;  %v4697_v42 = vsel %vm4696_vm12, %v4695_v39, 0 }
 0x19c   : > { %v12421_v6 = vand.u32 2147483647, %v9747_v63  ;;  %v12422_v27 = vcvt.s32.f32 %v9725_v38  ;;  %v4429_v12 = vadd.s32 %v9654_v46, %v9663_v48  ;;  %v1097_v9 = vsel %vm1091_vm7, %v1094_v41, %v1096_v34 }
 0x19d   : > { %v4699_v14 = vand.u32 31, %v4697_v42  ;;  %v9811_v13 = vor.u32 %v4551_v37, %v4550_v10  ;;  %v4449_v54 = vsub.s32 4294967266, %v9788_v32  ;;  %v12423_v35 = vand.u32 2147483647, %v9751_v11 }
 0x19e   : > { %v9806_v1 = vmul.f32 %v12422_v27, %v12421_v6  ;;  %v8119_v38 = vmin.u32 %v1228_v8, %v9786_v33  ;;  %v1116_v43 = vadd.s32 1, %v9794_v47  ;;  %v9820_v46 = vmul.f32 %v9400_v29, %v3877_v28 }
 0x19f   : > { %v4692_v63 = vand.u32 8388607, %v12423_v35  ;;  %v4700_v40 = vsub.s32 32, %v4699_v14  ;;  %v1113_v48 = vmul.u32 %v1106_v4, %v1097_v9  ;;  %vm1115_vm13 = vc.u32 %v9800_v57, %v9793_v60 }
 0x1a0   : > { %12424 = vst [vmem:[#allocation33_spill] sm:$0xff] %v9820_v46  ;;  %v4702_v37 = vshll.u32 %v12397_v59, %v4699_v14  ;;  %v9826_v19 = vmul.f32 %v9400_v29, %v369_v20  ;;  %v1117_v26 = vsel %vm1115_vm13, %v1116_v43, %v9794_v47  ;;  %v4705_v8 = vshll.u32 %v12393_v22, %v4699_v14 }
 0x1a1   : > { %v4703_v39 = vshrl.u32 %v12393_v22, %v4700_v40  ;;  %v4708_v41 = vshll.u32 %v12394_v24, %v4699_v14  ;;  %v4445_v34 = vsub.s32 32, %v9788_v32  ;;  %v4446_v4 = vshll.u32 %v9714_v45, %v9788_v32 }
 0x1a2   : > { %12425 = vst [vmem:[#allocation34_spill] sm:$0xff] %v9826_v19  ;;  %v4450_v15 = vadd.s32 127, %v4449_v54  ;;  %v1118_v53 = vadd.s32 %v1117_v26, %v1113_v48  ;;  %v1230_v10 = vclz %v8119_v38  ;;  %v4706_v16 = vshrl.u32 %v12394_v24, %v4700_v40 }
 0x1a3   : > { %v4709_v29 = vshrl.u32 %v12395_v30, %v4700_v40  ;;  %v4711_v47 = vshll.u32 %v12395_v30, %v4699_v14  ;;  %v4698_v6 = vshrl.u32 %v4697_v42, 5  ;;  %v4704_v27 = vor.u32 %v4703_v39, %v4702_v37 }
 0x1a4   : > { %v1119_v28 = vadd.s32 536870912, %v1118_v53  ;;  %v4712_v9 = vshrl.u32 %v12413_v23, %v4700_v40  ;;  %vm4167_vm14 = vcmp.lt.s32.totalorder %v9222_v44, 0  ;;  %v4707_v20 = vor.u32 %v4706_v16, %v4705_v8 }
 0x1a5   : > { %v4710_v35 = vor.u32 %v4709_v29, %v4708_v41  ;;  %v4714_v45 = vshll.u32 %v12413_v23, %v4699_v14  ;;  %v4715_v32 = vshrl.u32 %v12398_v2, %v4700_v40  ;;  %v4451_v54 = vshll.u32 %v4450_v15, 23 }
 0x1a6   : > { %v9842_v38 = vshrl.u32 %v1119_v28, 30  ;;  %v4693_v43 = vor.u32 8388608, %v4692_v63  ;;  %v4713_v48 = vor.u32 %v4712_v9, %v4711_v47  ;;  %v4447_v26 = vshrl.u32 %v4429_v12, %v4445_v34 }
 0x1a7   : > { %v8120_v3 = vadd.s32 4294967294, %v1230_v10  ;;  %v4716_v62 = vor.u32 %v4715_v32, %v4714_v45  ;;  %v4584_v42 = vand.u32 2139095040, %v9820_v46  ;;  %v4701_v39 = vshrl.u32 %v12397_v59, %v4700_v40 }
 0x1a8   : > { %12426 = vst [vmem:[#allocation35_spill] sm:$0xff] %v9842_v38  ;;  %v1121_v37 = vshll.u32 %v9842_v38, 30  ;;  %vm4717_vm15 = vcmp.lt.s32.totalorder %v4698_v6, 1  ;;  %vm4720_vm0 = vcmp.lt.s32.totalorder %v4698_v6, 4  ;;  %vm4719_vm3 = vcmp.lt.s32.totalorder %v4698_v6, 3 }
 0x1a9   : > { %v4722_v14 = vsel %vm4720_vm0, %v4710_v35, 2102212464  ;;  %v4725_v8 = vsel %vm4717_vm15, %v4704_v27, %v4707_v20  ;;  %v4726_v41 = vsel %vm4720_vm0, %v4713_v48, 920167782  ;;  %v4452_v15 = vor.u32 4788187, %v4451_v54 }
 0x1aa   : > { %vm4718_vm5 = vcmp.lt.s32.totalorder %v4698_v6, 2  ;;  %v4727_v16 = vsel %vm4719_vm3, %v4710_v35, %v4726_v41  ;;  %v4733_v63 = vshll.u32 %v4693_v43, 8  ;;  %vm8121_vm6 = vcmp.lt.s32.totalorder %v8120_v3, 0 }
 0x1ab   : > { %v4728_v12 = vsel %vm4718_vm5, %v4725_v8, %v4727_v16  ;;  %v4729_v34 = vsel %vm4717_vm15, %v4707_v20, %v4710_v35  ;;  %v4730_v10 = vsel %vm4720_vm0, %v4716_v62, 1326507024  ;;  %v9848_v29 = vsub.s32 %v1118_v53, %v1121_v37 }
 0x1ac   : > { %v4721_v47 = vsel %vm4717_vm15, %v4701_v39, %v4704_v27  ;;  %v4723_v28 = vsel %vm4719_vm3, %v4707_v20, %v4722_v14  ;;  %v4731_v40 = vsel %vm4719_vm3, %v4713_v48, %v4730_v10  ;;  %v4585_v54 = vshrl.u32 %v4584_v42, 23 }
 0x1ad   : > { %v4732_v9 = vsel %vm4718_vm5, %v4729_v34, %v4731_v40  ;;  %v9851_v45 = vmul.u32.u64.low %v4733_v63, %v4728_v12  ;;  %v9852_v32 = vmul.u32.u64.high %v4733_v63, %v4728_v12, %v9851_v45  ;;  %v12427_v43 = vxor.u32 2147483648, %v9680_v25 }
 0x1ae   : > { %v4559_v62 = vcvt.s32.f32 %v9811_v13  ;;  %v9863_v53 = vmul.u32.u64.low %v4733_v63, %v4732_v9  ;;  %v9864_v27 = vmul.u32.u64.high %v4733_v63, %v4732_v9, %v9863_v53  ;;  %v4448_v20 = vor.u32 %v4447_v26, %v4446_v4 }
 0x1af   : > { %v9860_v8 = vsel %vm4167_vm14, %v12427_v43, %v9680_v25  ;;  %v1233_v35 = vsel %vm8121_vm6, 0, %v8120_v3  ;;  %v4724_v48 = vsel %vm4718_vm5, %v4721_v47, %v4723_v28  ;;  %v8242_v37 = vadd.s32 4294967169, %v4585_v54 }
 0x1b0   : > { %v12428_v14 = vand.u32 2147483647, %v9783_v52  ;;  %v1124_v25 = vsub.s32 0, %v9848_v29  ;;  %v4453_v16 = vand.u32 2147483647, %v4452_v15  ;;  %v4743_v13 = vadd.s32 1, %v9852_v32 }
 0x1b1   : > { %v4591_v12 = vadd.s32 1, %v8242_v37  ;;  %v1373_v4 = vand.u32 2139095040, %v9826_v19  ;;  %v1234_v3 = vsub.s32 32, %v1233_v35  ;;  %v1238_v6 = vsub.s32 4294967266, %v1233_v35 }
 0x1b2   : > { %v9871_v41 = vmul.f32 %v4559_v62, %v12428_v14  ;;  %v4740_v26 = vmul.u32 %v4733_v63, %v4724_v48  ;;  %vm4742_vm7 = vc.u32 %v9864_v27, %v9851_v45  ;;  %v4455_v34 = vcvt.s32.f32 %v4448_v20 }
 0x1b3   : > { %v1218_v52 = vadd.s32 %v9733_v51, %v9731_v5  ;;  %v4744_v10 = vsel %vm4742_vm7, %v4743_v13, %v9852_v32  ;;  %vm4592_vm12 = vcmp.gt.s32.totalorder %v4591_v12, 0  ;;  %v8115_v15 = vmin.u32 %v1124_v25, %v9848_v29 }
 0x1b4   : > { %v4745_v47 = vadd.s32 %v4744_v10, %v4740_v26  ;;  %v12285_v28 = vand.u32 2147483647, %v9820_v46  ;;  %v4593_v40 = vsel %vm4592_vm12, %v4591_v12, 0  ;;  %v9884_v54 = vmul.f32 %v4455_v34, %v4453_v16 }
 0x1b5   : > { %v4595_v63 = vand.u32 31, %v4593_v40  ;;  %v1374_v43 = vshrl.u32 %v1373_v4, 23  ;;  %v1236_v62 = vshrl.u32 %v1218_v52, %v1234_v3  ;;  %v1239_v53 = vadd.s32 127, %v1238_v6 }
 0x1b6   : > { %v4746_v20 = vadd.s32 536870912, %v4745_v47  ;;  %v12287_v5 = vand.u32 2147483647, %v9826_v19  ;;  %v1126_v14 = vclz %v8115_v15  ;;  %v4588_v16 = vand.u32 8388607, %v12285_v28 }
 0x1b7   : > { %v4596_v51 = vsub.s32 32, %v4595_v63  ;;  %v4598_v32 = vshll.u32 %v12397_v59, %v4595_v63  ;;  %v4601_v48 = vshll.u32 %v12393_v22, %v4595_v63  ;;  %v4604_v37 = vshll.u32 %v12394_v24, %v4595_v63 }
 0x1b8   : > { %v9890_v25 = vshrl.u32 %v4746_v20, 30  ;;  %v4607_v13 = vshll.u32 %v12395_v30, %v4595_v63  ;;  %v8126_v6 = vadd.s32 4294967169, %v1374_v43  ;;  %v1235_v26 = vshll.u32 %v9786_v33, %v1233_v35 }
 0x1b9   : > { %v4599_v12 = vshrl.u32 %v12393_v22, %v4596_v51  ;;  %v4602_v4 = vshrl.u32 %v12394_v24, %v4596_v51  ;;  %v4605_v3 = vshrl.u32 %v12395_v30, %v4596_v51  ;;  %v4594_v52 = vshrl.u32 %v4593_v40, 5 }
 0x1ba   : > { %12429 = vst [vmem:[#allocation36_spill] sm:$0xff] %v9890_v25  ;;  %v4748_v34 = vshll.u32 %v9890_v25, 30  ;;  %v4608_v10 = vshrl.u32 %v12413_v23, %v4596_v51  ;;  %v4610_v28 = vshll.u32 %v12413_v23, %v4595_v63  ;;  %vm12324_vm13 = vcmp.lt.s32.totalorder %v9313_v55, 0 }
 0x1bb   : > { %v4600_v15 = vor.u32 %v4599_v12, %v4598_v32  ;;  %v4603_v20 = vor.u32 %v4602_v4, %v4601_v48  ;;  %v4606_v9 = vor.u32 %v4605_v3, %v4604_v37  ;;  %vm12375_vm15 = vcmp.lt.s32.totalorder %v9403_v31, 0 }
 0x1bc   : > { %v9904_v42 = vor.u32 %v1236_v62, %v1235_v26  ;;  %v1240_v39 = vshll.u32 %v1239_v53, 23  ;;  %v9906_v43 = vsub.s32 %v4745_v47, %v4748_v34  ;;  %v4609_v33 = vor.u32 %v4608_v10, %v4607_v13 }
 0x1bd   : > { %vm12300_vm0 = vcmp.lt.s32.totalorder %v9484_v7, 0  ;;  %v8116_v35 = vadd.s32 4294967294, %v1126_v14  ;;  %v4589_v40 = vor.u32 8388608, %v4588_v16  ;;  %v4611_v32 = vshrl.u32 %v12398_v2, %v4596_v51 }
 0x1be   : > { %v1380_v48 = vadd.s32 1, %v8126_v6  ;;  %v4597_v37 = vshrl.u32 %v12397_v59, %v4596_v51  ;;  %vm4613_vm3 = vcmp.lt.s32.totalorder %v4594_v52, 1  ;;  %vm4615_vm5 = vcmp.lt.s32.totalorder %v4594_v52, 3 }
 0x1bf   : > { %vm4616_vm6 = vcmp.lt.s32.totalorder %v4594_v52, 4  ;;  %v4612_v63 = vor.u32 %v4611_v32, %v4610_v28  ;;  %v4621_v62 = vsel %vm4613_vm3, %v4600_v15, %v4603_v20  ;;  %v9912_v47 = vor.u32 4788187, %v1240_v39  ;;  %v362_v39 = vpop.permute.xlu0 %361 }
 0x1c0   : > { %v4618_v12 = vsel %vm4616_vm6, %v4606_v9, 2102212464  ;;  %v4622_v53 = vsel %vm4616_vm6, %v4609_v33, 920167782  ;;  %v4751_v13 = vsub.s32 0, %v9906_v43  ;;  %vm4614_vm7 = vcmp.lt.s32.totalorder %v4594_v52, 2 }
 0x1c1   : > { %v4623_v14 = vsel %vm4615_vm5, %v4606_v9, %v4622_v53  ;;  %v4625_v4 = vsel %vm4613_vm3, %v4603_v20, %v4606_v9  ;;  %v4626_v51 = vsel %vm4616_vm6, %v4612_v63, 1326507024  ;;  %v4629_v3 = vshll.u32 %v4589_v40, 8  ;;  %v9949_v53 = vld [vmem:[%s12222_s2] ss:$0 sm:$0xff] }
 0x1c2   : > { %v4624_v16 = vsel %vm4614_vm7, %v4621_v62, %v4623_v14  ;;  %vm8117_vm12 = vcmp.lt.s32.totalorder %v8116_v35, 0  ;;  %v4617_v28 = vsel %vm4613_vm3, %v4597_v37, %v4600_v15  ;;  %v4619_v6 = vsel %vm4615_vm5, %v4603_v20, %v4618_v12 }
 0x1c3   : > { %v4627_v26 = vsel %vm4615_vm5, %v4609_v33, %v4626_v51  ;;  %v9922_v10 = vmul.u32.u64.low %v4629_v3, %v4624_v16  ;;  %v9923_v32 = vmul.u32.u64.high %v4629_v3, %v4624_v16, %v9922_v10  ;;  %vm1381_vm4 = vcmp.gt.s32.totalorder %v1380_v48, 0 }
 0x1c4   : > { %v4628_v34 = vsel %vm4614_vm7, %v4625_v4, %v4627_v26  ;;  %v8247_v62 = vmin.u32 %v4751_v13, %v9906_v43  ;;  %v1377_v15 = vand.u32 8388607, %v12287_v5  ;;  %v12430_v20 = vxor.u32 2147483648, %v9754_v56 }
 0x1c5   : > { %v9927_v9 = vmul.u32.u64.low %v4629_v3, %v4628_v34  ;;  %v9928_v63 = vmul.u32.u64.high %v4629_v3, %v4628_v34, %v9927_v9  ;;  %v12432_v40 = vxor.u32 2147483648, %v9806_v1  ;;  %v1382_v12 = vsel %vm1381_vm4, %v1380_v48, 0 }
 0x1c6   : > { %v9937_v33 = vsel %vm12324_vm13, %v12430_v20, %v9754_v56  ;;  %v9952_v13 = vmul.f32 %v9949_v53, %v362_v39  ;;  %v12435_v56 = vxor.u32 2147483648, %v9871_v41  ;;  %v9962_v16 = vsel %vm8117_vm12, 0, %v8116_v35 }
 0x1c7   : > { %12431 = vst [vmem:[#allocation37_spill] sm:$0xff] %v9937_v33  ;;  %v9944_v37 = vsel %vm12375_vm15, %v12432_v40, %v9806_v1  ;;  %v4620_v1 = vsel %vm4614_vm7, %v4617_v28, %v4619_v6  ;;  %v1384_v48 = vand.u32 31, %v1382_v12  ;;  %v1114_v26 = vadd.s32 %v9793_v60, %v9800_v57 }
 0x1c8   : > { %12433 = vst [vmem:[#allocation38_spill] sm:$0xff] %v9944_v37  ;;  %12434 = vst [vmem:[#allocation39_spill] sm:$0xff] %v9952_v13  ;;  %v9959_v14 = vsel %vm12300_vm0, %v12435_v56, %v9871_v41  ;;  %v4639_v39 = vadd.s32 1, %v9923_v32  ;;  %v4753_v9 = vclz %v8247_v62  ;;  %v1378_v41 = vor.u32 8388608, %v1377_v15 }
 0x1c9   : > { %12436 = vst [vmem:[#allocation40_spill] sm:$0xff] %v9959_v14  ;;  %v1130_v35 = vsub.s32 32, %v9962_v16  ;;  %v4636_v52 = vmul.u32 %v4629_v3, %v4620_v1  ;;  %vm4638_vm4 = vc.u32 %v9928_v63, %v9922_v10  ;;  %v1385_v28 = vsub.s32 32, %v1384_v48 }
 0x1ca   : > { %v4640_v6 = vsel %vm4638_vm4, %v4639_v39, %v9923_v32  ;;  %v1387_v40 = vshll.u32 %v12397_v59, %v1384_v48  ;;  %v1390_v60 = vshll.u32 %v12393_v22, %v1384_v48  ;;  %v1393_v57 = vshll.u32 %v12394_v24, %v1384_v48 }
 0x1cb   : > { %v1134_v62 = vsub.s32 4294967266, %v9962_v16  ;;  %v4641_v15 = vadd.s32 %v4640_v6, %v4636_v52  ;;  %v1388_v56 = vshrl.u32 %v12393_v22, %v1385_v28  ;;  %v1391_v5 = vshrl.u32 %v12394_v24, %v1385_v28 }
 0x1cc   : > { %v8248_v3 = vadd.s32 4294967294, %v4753_v9  ;;  %v1383_v1 = vshrl.u32 %v1382_v12, 5  ;;  %v1394_v20 = vshrl.u32 %v12395_v30, %v1385_v28  ;;  %v1396_v51 = vshll.u32 %v12395_v30, %v1384_v48 }
 0x1cd   : > { %v4642_v32 = vadd.s32 536870912, %v4641_v15  ;;  %v1397_v39 = vshrl.u32 %v12413_v23, %v1385_v28  ;;  %v9985_v34 = vshll.u32 %v1378_v41, 8  ;;  %v1269_v4 = vand.u32 2139095040, %v9952_v13 }
 0x1ce   : > { %v1389_v25 = vor.u32 %v1388_v56, %v1387_v40  ;;  %v1392_v38 = vor.u32 %v1391_v5, %v1390_v60  ;;  %v1395_v52 = vor.u32 %v1394_v20, %v1393_v57  ;;  %v1399_v6 = vshll.u32 %v12413_v23, %v1384_v48 }
 0x1cf   : > { %vm12310_vm3 = vcmp.lt.s32.totalorder %v9493_v18, 0  ;;  %v1132_v9 = vshrl.u32 %v1114_v26, %v1130_v35  ;;  %v9990_v12 = vshrl.u32 %v4642_v32, 30  ;;  %v1398_v14 = vor.u32 %v1397_v39, %v1396_v51 }
 0x1d0   : > { %v1400_v7 = vshrl.u32 %v12398_v2, %v1385_v28  ;;  %v1135_v33 = vadd.s32 127, %v1134_v62  ;;  %vm8249_vm5 = vcmp.lt.s32.totalorder %v8248_v3, 0  ;;  %v1386_v41 = vshrl.u32 %v12397_v59, %v1385_v28 }
 0x1d1   : > { %12437 = vst [vmem:[#allocation41_spill] sm:$0xff] %v9990_v12  ;;  %vm1405_vm6 = vcmp.lt.s32.totalorder %v1383_v1, 4  ;;  %v4644_v55 = vshll.u32 %v9990_v12, 30  ;;  %vm1402_vm7 = vcmp.lt.s32.totalorder %v1383_v1, 1  ;;  %vm1404_vm12 = vcmp.lt.s32.totalorder %v1383_v1, 3 }
 0x1d2   : > { %v1401_v40 = vor.u32 %v1400_v7, %v1399_v6  ;;  %v1407_v5 = vsel %vm1405_vm6, %v1395_v52, 2102212464  ;;  %v1410_v48 = vsel %vm1402_vm7, %v1389_v25, %v1392_v38  ;;  %v1411_v26 = vsel %vm1405_vm6, %v1398_v14, 920167782 }
 0x1d3   : > { %v1270_v20 = vshrl.u32 %v1269_v4, 23  ;;  %v9997_v35 = vsub.s32 %v4641_v15, %v4644_v55  ;;  %vm1403_vm4 = vcmp.lt.s32.totalorder %v1383_v1, 2  ;;  %v1412_v51 = vsel %vm1404_vm12, %v1395_v52, %v1411_v26 }
 0x1d4   : > { %v1414_v60 = vsel %vm1402_vm7, %v1392_v38, %v1395_v52  ;;  %v1406_v57 = vsel %vm1402_vm7, %v1386_v41, %v1389_v25  ;;  %v1408_v62 = vsel %vm1404_vm12, %v1392_v38, %v1407_v5  ;;  %v1413_v28 = vsel %vm1403_vm4, %v1410_v48, %v1412_v51  ;;  %v3898_v25 = vpop.permute.xlu1 %3897 }
 0x1d5   : > { %v1415_v56 = vsel %vm1405_vm6, %v1401_v40, 1326507024  ;;  %v4647_v7 = vsub.s32 0, %v9997_v35  ;;  %v10003_v39 = vmul.u32.u64.low %v9985_v34, %v1413_v28  ;;  %v10004_v6 = vmul.u32.u64.high %v9985_v34, %v1413_v28, %v10003_v39 }
 0x1d6   : > { %v1416_v32 = vsel %vm1404_vm12, %v1398_v14, %v1415_v56  ;;  %v1136_v4 = vshll.u32 %v1135_v33, 23  ;;  %v4756_v55 = vsel %vm8249_vm5, 0, %v8248_v3  ;;  %v8122_v52 = vadd.s32 4294967169, %v1270_v20 }
 0x1d7   : > { %v1417_v15 = vsel %vm1403_vm4, %v1414_v60, %v1416_v32  ;;  %v1131_v38 = vshll.u32 %v9848_v29, %v9962_v16  ;;  %v8243_v41 = vmin.u32 %v4647_v7, %v9997_v35  ;;  %v12438_v5 = vxor.u32 2147483648, %v9884_v54 }
 0x1d8   : > { %v10013_v40 = vmul.u32.u64.low %v9985_v34, %v1417_v15  ;;  %v10014_v14 = vmul.u32.u64.high %v9985_v34, %v1417_v15, %v10013_v40  ;;  %v12440_v3 = vand.u32 2147483647, %v9912_v47  ;;  %v12441_v48 = vcvt.s32.f32 %v9904_v42 }
 0x1d9   : > { %v10021_v33 = vsel %vm12310_vm3, %v12438_v5, %v9884_v54  ;;  %v1409_v29 = vsel %vm1403_vm4, %v1406_v57, %v1408_v62  ;;  %v1276_v16 = vadd.s32 1, %v8122_v52  ;;  %v10030_v20 = vor.u32 %v1132_v9, %v1131_v38 }
 0x1da   : > { %12439 = vst [vmem:[#allocation42_spill] sm:$0xff] %v10021_v33  ;;  %v10027_v26 = vmul.f32 %v12441_v48, %v12440_v3  ;;  %v4761_v51 = vsub.s32 4294967266, %v4756_v55  ;;  %v1428_v60 = vadd.s32 1, %v10004_v6  ;;  %v10034_v28 = vmul.f32 %v9949_v53, %v3898_v25 }
 0x1db   : > { %v10036_v56 = vor.u32 4788187, %v1136_v4  ;;  %v4757_v54 = vsub.s32 32, %v4756_v55  ;;  %v12443_v47 = vand.u32 2147483647, %v9952_v13  ;;  %vm1277_vm5 = vcmp.gt.s32.totalorder %v1276_v16, 0 }
 0x1dc   : > { %12442 = vst [vmem:[#allocation43_spill] sm:$0xff] %v10034_v28  ;;  %v4649_v42 = vclz %v8243_v41  ;;  %v1425_v1 = vmul.u32 %v9985_v34, %v1409_v29  ;;  %vm1427_vm6 = vc.u32 %v10014_v14, %v10003_v39  ;;  %v1278_v9 = vsel %vm1277_vm5, %v1276_v16, 0 }
 0x1dd   : > { %v1273_v7 = vand.u32 8388607, %v12443_v47  ;;  %v4741_v62 = vadd.s32 %v9851_v45, %v9864_v27  ;;  %v1429_v32 = vsel %vm1427_vm6, %v1428_v60, %v10004_v6  ;;  %v1280_v4 = vand.u32 31, %v1278_v9 }
 0x1de   : > { %v4762_v52 = vadd.s32 127, %v4761_v51  ;;  %v1430_v25 = vadd.s32 %v1429_v32, %v1425_v1  ;;  %v4896_v38 = vand.u32 2139095040, %v10034_v28  ;;  %v8244_v3 = vadd.s32 4294967294, %v4649_v42 }
 0x1df   : > { %v4759_v41 = vshrl.u32 %v4741_v62, %v4757_v54  ;;  %v1274_v40 = vor.u32 8388608, %v1273_v7  ;;  %v1281_v5 = vsub.s32 32, %v1280_v4  ;;  %v1283_v29 = vshll.u32 %v12397_v59, %v1280_v4 }
 0x1e0   : > { %v1431_v48 = vadd.s32 536870912, %v1430_v25  ;;  %v1286_v45 = vshll.u32 %v12393_v22, %v1280_v4  ;;  %v4758_v27 = vshll.u32 %v9906_v43, %v4756_v55  ;;  %v1289_v51 = vshll.u32 %v12394_v24, %v1280_v4 }
 0x1e1   : > { %v1284_v6 = vshrl.u32 %v12393_v22, %v1281_v5  ;;  %v1287_v16 = vshrl.u32 %v12394_v24, %v1281_v5  ;;  %v4763_v60 = vshll.u32 %v4762_v52, 23  ;;  %v1290_v54 = vshrl.u32 %v12395_v30, %v1281_v5 }
 0x1e2   : > { %v10056_v47 = vshrl.u32 %v1431_v48, 30  ;;  %v4897_v7 = vshrl.u32 %v4896_v38, 23  ;;  %v10059_v42 = vor.u32 %v4759_v41, %v4758_v27  ;;  %v1279_v1 = vshrl.u32 %v1278_v9, 5 }
 0x1e3   : > { %v1292_v62 = vshll.u32 %v12395_v30, %v1280_v4  ;;  %v1293_v32 = vshrl.u32 %v12413_v23, %v1281_v5  ;;  %vm8245_vm7 = vcmp.lt.s32.totalorder %v8244_v3, 0  ;;  %v1285_v55 = vor.u32 %v1284_v6, %v1283_v29 }
 0x1e4   : > { %12444 = vst [vmem:[#allocation44_spill] sm:$0xff] %v10056_v47  ;;  %v1433_v43 = vshll.u32 %v10056_v47, 30  ;;  %v1288_v15 = vor.u32 %v1287_v16, %v1286_v45  ;;  %vm12309_vm12 = vcmp.lt.s32.totalorder %v9621_v17, 0  ;;  %v1291_v52 = vor.u32 %v1290_v54, %v1289_v51 }
 0x1e5   : > { %v1294_v48 = vor.u32 %v1293_v32, %v1292_v62  ;;  %v1295_v34 = vshll.u32 %v12413_v23, %v1280_v4  ;;  %v1296_v38 = vshrl.u32 %v12398_v2, %v1281_v5  ;;  %v10067_v41 = vor.u32 4788187, %v4763_v60  ;;  %v3891_v32 = vpop.permute.xlu0 %3890 }
 0x1e6   : > { %v10069_v9 = vsub.s32 %v1430_v25, %v1433_v43  ;;  %v12301_v27 = vand.u32 2147483647, %v10034_v28  ;;  %v8254_v57 = vadd.s32 4294967169, %v4897_v7  ;;  %v4652_v12 = vsel %vm8245_vm7, 0, %v8244_v3 }
 0x1e7   : > { %v1282_v47 = vshrl.u32 %v12397_v59, %v1281_v5  ;;  %v1297_v29 = vor.u32 %v1296_v38, %v1295_v34  ;;  %vm1298_vm4 = vcmp.lt.s32.totalorder %v1279_v1, 1  ;;  %vm1300_vm5 = vcmp.lt.s32.totalorder %v1279_v1, 3 }
 0x1e8   : > { %v1436_v45 = vsub.s32 0, %v10069_v9  ;;  %vm1301_vm6 = vcmp.lt.s32.totalorder %v1279_v1, 4  ;;  %v1306_v4 = vsel %vm1298_vm4, %v1285_v55, %v1288_v15  ;;  %v1310_v51 = vsel %vm1298_vm4, %v1288_v15, %v1291_v52 }
 0x1e9   : > { %v1303_v6 = vsel %vm1301_vm6, %v1291_v52, 2102212464  ;;  %v1307_v16 = vsel %vm1301_vm6, %v1294_v48, 920167782  ;;  %v1311_v25 = vsel %vm1301_vm6, %v1297_v29, 1326507024  ;;  %v1302_v38 = vsel %vm1298_vm4, %v1282_v47, %v1285_v55 }
 0x1ea   : > { %vm1299_vm0 = vcmp.lt.s32.totalorder %v1279_v1, 2  ;;  %v1308_v60 = vsel %vm1300_vm5, %v1291_v52, %v1307_v16  ;;  %v1314_v54 = vshll.u32 %v1274_v40, 8  ;;  %v4900_v5 = vand.u32 8388607, %v12301_v27 }
 0x1eb   : > { %v4657_v34 = vsub.s32 4294967266, %v4652_v12  ;;  %v1309_v3 = vsel %vm1299_vm0, %v1306_v4, %v1308_v60  ;;  %v1312_v7 = vsel %vm1300_vm5, %v1294_v48, %v1311_v25  ;;  %v4903_v62 = vadd.s32 1, %v8254_v57 }
 0x1ec   : > { %v8127_v43 = vmin.u32 %v1436_v45, %v10069_v9  ;;  %v1304_v29 = vsel %vm1300_vm5, %v1288_v15, %v1303_v6  ;;  %v1313_v33 = vsel %vm1299_vm0, %v1310_v51, %v1312_v7  ;;  %v12445_v48 = vxor.u32 2147483648, %v10027_v26 }
 0x1ed   : > { %v10085_v52 = vmul.u32.u64.low %v1314_v54, %v1313_v33  ;;  %v10086_v40 = vmul.u32.u64.high %v1314_v54, %v1313_v33, %v10085_v52  ;;  %v10088_v16 = vmul.u32.u64.low %v1314_v54, %v1309_v3  ;;  %v10089_v27 = vmul.u32.u64.high %v1314_v54, %v1309_v3, %v10088_v16 }
 0x1ee   : > { %v10097_v57 = vsel %vm12309_vm12, %v12445_v48, %v10027_v26  ;;  %v4653_v45 = vsub.s32 32, %v4652_v12  ;;  %vm4904_vm7 = vcmp.gt.s32.totalorder %v4903_v62, 0  ;;  %v10100_v15 = vmul.f32 %v9949_v53, %v3891_v32 }
 0x1ef   : > { %12446 = vst [vmem:[#allocation45_spill] sm:$0xff] %v10097_v57  ;;  %v12448_v47 = vand.u32 2147483647, %v10036_v56  ;;  %v12449_v33 = vcvt.s32.f32 %v10030_v20  ;;  %v4637_v4 = vadd.s32 %v9922_v10, %v9928_v63  ;;  %v1305_v6 = vsel %vm1299_vm0, %v1302_v38, %v1304_v29 }
 0x1f0   : > { %12447 = vst [vmem:[#allocation46_spill] sm:$0xff] %v10100_v15  ;;  %v4905_v51 = vsel %vm4904_vm7, %v4903_v62, 0  ;;  %v4658_v25 = vadd.s32 127, %v4657_v34  ;;  %v1438_v60 = vclz %v8127_v43  ;;  %vm1323_vm4 = vc.u32 %v10086_v40, %v10088_v16 }
 0x1f1   : > { %v10106_v55 = vmul.f32 %v12449_v33, %v12448_v47  ;;  %v4907_v3 = vand.u32 31, %v4905_v51  ;;  %v1324_v20 = vadd.s32 1, %v10089_v27  ;;  %v4901_v56 = vor.u32 8388608, %v4900_v5 }
 0x1f2   : > { %v4655_v32 = vshrl.u32 %v4637_v4, %v4653_v45  ;;  %v1321_v52 = vmul.u32 %v1314_v54, %v1305_v6  ;;  %v4792_v10 = vand.u32 2139095040, %v10100_v15  ;;  %v4654_v43 = vshll.u32 %v9997_v35, %v4652_v12 }
 0x1f3   : > { %v4908_v48 = vsub.s32 32, %v4907_v3  ;;  %v1325_v63 = vsel %vm1323_vm4, %v1324_v20, %v10089_v27  ;;  %v4910_v1 = vshll.u32 %v12397_v59, %v4907_v3  ;;  %v4913_v34 = vshll.u32 %v12393_v22, %v4907_v3 }
 0x1f4   : > { %v4916_v62 = vshll.u32 %v12394_v24, %v4907_v3  ;;  %v4659_v38 = vshll.u32 %v4658_v25, 23  ;;  %v8128_v29 = vadd.s32 4294967294, %v1438_v60  ;;  %v1326_v47 = vadd.s32 %v1325_v63, %v1321_v52 }
 0x1f5   : > { %v4911_v5 = vshrl.u32 %v12393_v22, %v4908_v48  ;;  %v4914_v54 = vshrl.u32 %v12394_v24, %v4908_v48  ;;  %v4917_v45 = vshrl.u32 %v12395_v30, %v4908_v48  ;;  %v4919_v33 = vshll.u32 %v12395_v30, %v4907_v3 }
 0x1f6   : > { %v10126_v27 = vor.u32 %v4655_v32, %v4654_v43  ;;  %v1327_v4 = vadd.s32 536870912, %v1326_v47  ;;  %v4906_v6 = vshrl.u32 %v4905_v51, 5  ;;  %v4920_v20 = vshrl.u32 %v12413_v23, %v4908_v48 }
 0x1f7   : > { %v4912_v26 = vor.u32 %v4911_v5, %v4910_v1  ;;  %v4915_v7 = vor.u32 %v4914_v54, %v4913_v34  ;;  %v4918_v12 = vor.u32 %v4917_v45, %v4916_v62  ;;  %v4922_v35 = vshll.u32 %v12413_v23, %v4907_v3 }
 0x1f8   : > { %v4660_v25 = vor.u32 4788187, %v4659_v38  ;;  %v10130_v60 = vshrl.u32 %v1327_v4, 30  ;;  %v4921_v52 = vor.u32 %v4920_v20, %v4919_v33  ;;  %v4941_v63 = vshll.u32 %v4901_v56, 8 }
 0x1f9   : > { %vm8129_vm0 = vcmp.lt.s32.totalorder %v8128_v29, 0  ;;  %v4909_v57 = vshrl.u32 %v12397_v59, %v4908_v48  ;;  %v4923_v32 = vshrl.u32 %v12398_v2, %v4908_v48  ;;  %v4793_v43 = vshrl.u32 %v4792_v10, 23 }
 0x1fa   : > { %12450 = vst [vmem:[#allocation47_spill] sm:$0xff] %v10130_v60  ;;  %v1329_v51 = vshll.u32 %v10130_v60, 30  ;;  %vm4925_vm5 = vcmp.lt.s32.totalorder %v4906_v6, 1  ;;  %vm4927_vm6 = vcmp.lt.s32.totalorder %v4906_v6, 3  ;;  %vm4928_vm7 = vcmp.lt.s32.totalorder %v4906_v6, 4 }
 0x1fb   : > { %v4924_v1 = vor.u32 %v4923_v32, %v4922_v35  ;;  %v4930_v34 = vsel %vm4928_vm7, %v4918_v12, 2102212464  ;;  %v4933_v3 = vsel %vm4925_vm5, %v4912_v26, %v4915_v7  ;;  %v4934_v62 = vsel %vm4928_vm7, %v4921_v52, 920167782 }
 0x1fc   : > { %v1441_v38 = vsel %vm8129_vm0, 0, %v8128_v29  ;;  %v10136_v5 = vsub.s32 %v1326_v47, %v1329_v51  ;;  %vm4926_vm4 = vcmp.lt.s32.totalorder %v4906_v6, 2  ;;  %v4935_v56 = vsel %vm4927_vm6, %v4918_v12, %v4934_v62 }
 0x1fd   : > { %v4936_v54 = vsel %vm4926_vm4, %v4933_v3, %v4935_v56  ;;  %v4937_v48 = vsel %vm4925_vm5, %v4915_v7, %v4918_v12  ;;  %v4938_v10 = vsel %vm4928_vm7, %v4924_v1, 1326507024  ;;  %v8250_v45 = vadd.s32 4294967169, %v4793_v43  ;;  %v383_v3 = vpop.permute.xlu1 %382 }
 0x1fe   : > { %v1332_v33 = vsub.s32 0, %v10136_v5  ;;  %v4929_v4 = vsel %vm4925_vm5, %v4909_v57, %v4912_v26  ;;  %v4931_v20 = vsel %vm4927_vm6, %v4915_v7, %v4930_v34  ;;  %v4939_v35 = vsel %vm4927_vm6, %v4921_v52, %v4938_v10 }
 0x1ff   : > { %v1446_v29 = vsub.s32 4294967266, %v1441_v38  ;;  %v4940_v47 = vsel %vm4926_vm4, %v4937_v48, %v4939_v35  ;;  %v10146_v32 = vmul.u32.u64.low %v4941_v63, %v4936_v54  ;;  %v10147_v51 = vmul.u32.u64.high %v4941_v63, %v4936_v54, %v10146_v32 }
 0x200   : > { %v8123_v43 = vmin.u32 %v1332_v33, %v10136_v5  ;;  %v10152_v1 = vmul.u32.u64.low %v4941_v63, %v4940_v47  ;;  %v10153_v62 = vmul.u32.u64.high %v4941_v63, %v4940_v47, %v10152_v1  ;;  %v12451_v57 = vand.u32 2147483647, %v10067_v41 }
 0x201   : > { %v12452_v26 = vcvt.s32.f32 %v10059_v42  ;;  %v1442_v52 = vsub.s32 32, %v1441_v38  ;;  %v4932_v34 = vsel %vm4926_vm4, %v4929_v4, %v4931_v20  ;;  %v4799_v56 = vadd.s32 1, %v8250_v45 }
 0x202   : > { %v4661_v54 = vand.u32 2147483647, %v4660_v25  ;;  %v1426_v48 = vadd.s32 %v10003_v39, %v10014_v14  ;;  %v12302_v10 = vand.u32 2147483647, %v10100_v15  ;;  %v10166_v33 = vmul.f32 %v9949_v53, %v383_v3 }
 0x203   : > { %v10159_v7 = vmul.f32 %v12452_v26, %v12451_v57  ;;  %v4663_v35 = vcvt.s32.f32 %v10126_v27  ;;  %v1447_v41 = vadd.s32 127, %v1446_v29  ;;  %v4951_v42 = vadd.s32 1, %v10147_v51 }
 0x204   : > { %12453 = vst [vmem:[#allocation48_spill] sm:$0xff] %v10166_v33  ;;  %vm4800_vm0 = vcmp.gt.s32.totalorder %v4799_v56, 0  ;;  %v1334_v47 = vclz %v8123_v43  ;;  %v4948_v1 = vmul.u32 %v4941_v63, %v4932_v34  ;;  %vm4950_vm5 = vc.u32 %v10153_v62, %v10146_v32 }
 0x205   : > { %v4801_v6 = vsel %vm4800_vm0, %v4799_v56, 0  ;;  %v1444_v39 = vshrl.u32 %v1426_v48, %v1442_v52  ;;  %v4952_v14 = vsel %vm4950_vm5, %v4951_v42, %v10147_v51  ;;  %v10174_v4 = vmul.f32 %v4663_v35, %v4661_v54 }
 0x206   : > { %v4803_v45 = vand.u32 31, %v4801_v6  ;;  %v4953_v20 = vadd.s32 %v4952_v14, %v4948_v1  ;;  %v4796_v27 = vand.u32 8388607, %v12302_v10  ;;  %v1581_v29 = vand.u32 2139095040, %v10166_v33 }
 0x207   : > { %v1443_v63 = vshll.u32 %v10069_v9, %v1441_v38  ;;  %v1448_v3 = vshll.u32 %v1447_v41, 23  ;;  %v8124_v26 = vadd.s32 4294967294, %v1334_v47  ;;  %v4802_v1 = vshrl.u32 %v4801_v6, 5 }
 0x208   : > { %v4804_v43 = vsub.s32 32, %v4803_v45  ;;  %v4954_v34 = vadd.s32 536870912, %v4953_v20  ;;  %v4806_v52 = vshll.u32 %v12397_v59, %v4803_v45  ;;  %v4809_v51 = vshll.u32 %v12393_v22, %v4803_v45 }
 0x209   : > { %v10183_v56 = vor.u32 %v1444_v39, %v1443_v63  ;;  %v4812_v35 = vshll.u32 %v12394_v24, %v4803_v45  ;;  %v4797_v9 = vor.u32 8388608, %v4796_v27  ;;  %v1582_v41 = vshrl.u32 %v1581_v29, 23 }
 0x20a   : > { %v4807_v54 = vshrl.u32 %v12393_v22, %v4804_v43  ;;  %v4810_v48 = vshrl.u32 %v12394_v24, %v4804_v43  ;;  %v10188_v42 = vshrl.u32 %v4954_v34, 30  ;;  %v4813_v38 = vshrl.u32 %v12395_v30, %v4804_v43 }
 0x20b   : > { %v10191_v47 = vor.u32 4788187, %v1448_v3  ;;  %v4815_v14 = vshll.u32 %v12395_v30, %v4803_v45  ;;  %v4816_v39 = vshrl.u32 %v12413_v23, %v4804_v43  ;;  %vm8125_vm6 = vcmp.lt.s32.totalorder %v8124_v26, 0 }
 0x20c   : > { %12454 = vst [vmem:[#allocation49_spill] sm:$0xff] %v10188_v42  ;;  %v4956_v63 = vshll.u32 %v10188_v42, 30  ;;  %v4808_v10 = vor.u32 %v4807_v54, %v4806_v52  ;;  %v4811_v25 = vor.u32 %v4810_v48, %v4809_v51  ;;  %vm12323_vm7 = vcmp.lt.s32.totalorder %v9684_v61, 0 }
 0x20d   : > { %vm12321_vm4 = vcmp.lt.s32.totalorder %v9751_v11, 0  ;;  %v4814_v27 = vor.u32 %v4813_v38, %v4812_v35  ;;  %v4817_v34 = vor.u32 %v4816_v39, %v4815_v14  ;;  %v4818_v29 = vshll.u32 %v12413_v23, %v4803_v45 }
 0x20e   : > { %v4819_v3 = vshrl.u32 %v12398_v2, %v4804_v43  ;;  %v10200_v6 = vsub.s32 %v4953_v20, %v4956_v63  ;;  %v4837_v12 = vshll.u32 %v4797_v9, 8  ;;  %v8134_v57 = vadd.s32 4294967169, %v1582_v41 }
 0x20f   : > { %v12455_v60 = vand.u32 2147483647, %v10166_v33  ;;  %v10204_v42 = vsel %vm8125_vm6, 0, %v8124_v26  ;;  %v4805_v52 = vshrl.u32 %v12397_v59, %v4804_v43  ;;  %vm4821_vm0 = vcmp.lt.s32.totalorder %v4802_v1, 1 }
 0x210   : > { %v4820_v51 = vor.u32 %v4819_v3, %v4818_v29  ;;  %v4959_v54 = vsub.s32 0, %v10200_v6  ;;  %vm4823_vm5 = vcmp.lt.s32.totalorder %v4802_v1, 3  ;;  %vm4824_vm12 = vcmp.lt.s32.totalorder %v4802_v1, 4 }
 0x211   : > { %v1585_v17 = vand.u32 8388607, %v12455_v60  ;;  %v4829_v45 = vsel %vm4821_vm0, %v4808_v10, %v4811_v25  ;;  %v4826_v48 = vsel %vm4824_vm12, %v4814_v27, 2102212464  ;;  %v4830_v20 = vsel %vm4824_vm12, %v4817_v34, 920167782 }
 0x212   : > { %v4833_v35 = vsel %vm4821_vm0, %v4811_v25, %v4814_v27  ;;  %v4834_v9 = vsel %vm4824_vm12, %v4820_v51, 1326507024  ;;  %v8255_v38 = vmin.u32 %v4959_v54, %v10200_v6  ;;  %vm4822_vm3 = vcmp.lt.s32.totalorder %v4802_v1, 2 }
 0x213   : > { %v4831_v60 = vsel %vm4823_vm5, %v4814_v27, %v4830_v20  ;;  %v1586_v26 = vor.u32 8388608, %v1585_v17  ;;  %v1342_v43 = vsub.s32 4294967266, %v10204_v42  ;;  %v4835_v14 = vsel %vm4823_vm5, %v4817_v34, %v4834_v9  ;;  %v376_v17 = vpop.permute.xlu0 %375 }
 0x214   : > { %v4832_v41 = vsel %vm4822_vm3, %v4829_v45, %v4831_v60  ;;  %v1588_v39 = vadd.s32 1, %v8134_v57  ;;  %v4961_v63 = vclz %v8255_v38  ;;  %v4825_v29 = vsel %vm4821_vm0, %v4805_v52, %v4808_v10 }
 0x215   : > { %v4827_v3 = vsel %vm4823_vm5, %v4811_v25, %v4826_v48  ;;  %v4836_v51 = vsel %vm4822_vm3, %v4833_v35, %v4835_v14  ;;  %v10221_v37 = vmul.u32.u64.low %v4837_v12, %v4832_v41  ;;  %v10222_v27 = vmul.u32.u64.high %v4837_v12, %v4832_v41, %v10221_v37 }
 0x216   : > { %v10218_v18 = vmul.u32.u64.low %v4837_v12, %v4836_v51  ;;  %v10219_v54 = vmul.u32.u64.high %v4837_v12, %v4836_v51, %v10218_v18  ;;  %v12456_v45 = vxor.u32 2147483648, %v10106_v55  ;;  %v12458_v10 = vxor.u32 2147483648, %v10159_v7 }
 0x217   : > { %v8256_v18 = vadd.s32 4294967294, %v4961_v63  ;;  %vm1589_vm12 = vcmp.gt.s32.totalorder %v1588_v39, 0  ;;  %v1322_v52 = vadd.s32 %v10088_v16, %v10086_v40  ;;  %v4828_v48 = vsel %vm4822_vm3, %v4825_v29, %v4827_v3 }
 0x218   : > { %v10230_v57 = vsel %vm12323_vm7, %v12456_v45, %v10106_v55  ;;  %v10237_v25 = vsel %vm12321_vm4, %v12458_v10, %v10159_v7  ;;  %v1590_v20 = vsel %vm1589_vm12, %v1588_v39, 0  ;;  %v1343_v35 = vadd.s32 127, %v1342_v43 }
 0x219   : > { %12457 = vst [vmem:[#allocation50_spill] sm:$0xff] %v10230_v57  ;;  %12459 = vst [vmem:[#allocation51_spill] sm:$0xff] %v10237_v25  ;;  %v1592_v9 = vand.u32 31, %v1590_v20  ;;  %v10245_v38 = vmul.f32 %v9949_v53, %v376_v17  ;;  %v1450_v7 = vand.u32 2147483647, %v10191_v47  ;;  %vm4846_vm6 = vc.u32 %v10219_v54, %v10221_v37 }
 0x21a   : > { %v4847_v60 = vadd.s32 1, %v10222_v27  ;;  %v10251_v41 = vshll.u32 %v1586_v26, 8  ;;  %v1338_v40 = vsub.s32 32, %v10204_v42  ;;  %vm8257_vm3 = vcmp.lt.s32.totalorder %v8256_v18, 0 }
 0x21b   : > { %12460 = vst [vmem:[#allocation52_spill] sm:$0xff] %v10245_v38  ;;  %v4844_v16 = vmul.u32 %v4837_v12, %v4828_v48  ;;  %v1593_v1 = vsub.s32 32, %v1592_v9  ;;  %v1595_v14 = vshll.u32 %v12397_v59, %v1592_v9  ;;  %v1598_v39 = vshll.u32 %v12393_v22, %v1592_v9 }
 0x21c   : > { %v4848_v43 = vsel %vm4846_vm6, %v4847_v60, %v10222_v27  ;;  %v1601_v47 = vshll.u32 %v12394_v24, %v1592_v9  ;;  %v1339_v63 = vshll.u32 %v10136_v5, %v10204_v42  ;;  %v1344_v29 = vshll.u32 %v1343_v35, 23 }
 0x21d   : > { %v4849_v3 = vadd.s32 %v4848_v43, %v4844_v16  ;;  %v1477_v26 = vand.u32 2139095040, %v10245_v38  ;;  %v1596_v51 = vshrl.u32 %v12393_v22, %v1593_v1  ;;  %v1599_v12 = vshrl.u32 %v12394_v24, %v1593_v1 }
 0x21e   : > { %v1602_v17 = vshrl.u32 %v12395_v30, %v1593_v1  ;;  %v1604_v27 = vshll.u32 %v12395_v30, %v1592_v9  ;;  %v10265_v45 = vsel %vm8257_vm3, 0, %v8256_v18  ;;  %v1591_v48 = vshrl.u32 %v1590_v20, 5 }
 0x21f   : > { %v4850_v10 = vadd.s32 536870912, %v4849_v3  ;;  %v1605_v60 = vshrl.u32 %v12413_v23, %v1593_v1  ;;  %v1597_v34 = vor.u32 %v1596_v51, %v1595_v14  ;;  %v1600_v5 = vor.u32 %v1599_v12, %v1598_v39 }
 0x220   : > { %v1603_v42 = vor.u32 %v1602_v17, %v1601_v47  ;;  %v1607_v35 = vshll.u32 %v12413_v23, %v1592_v9  ;;  %v1340_v16 = vshrl.u32 %v1322_v52, %v1338_v40  ;;  %v1345_v43 = vor.u32 4788187, %v1344_v29 }
 0x221   : > { %v10269_v55 = vshrl.u32 %v4850_v10, 30  ;;  %v1606_v25 = vor.u32 %v1605_v60, %v1604_v27  ;;  %v4969_v11 = vsub.s32 4294967266, %v10265_v45  ;;  %v1594_v57 = vshrl.u32 %v12397_v59, %v1593_v1 }
 0x222   : > { %v1608_v18 = vshrl.u32 %v12398_v2, %v1593_v1  ;;  %v1478_v61 = vshrl.u32 %v1477_v26, 23  ;;  %vm1610_vm0 = vcmp.lt.s32.totalorder %v1591_v48, 1  ;;  %vm1612_vm5 = vcmp.lt.s32.totalorder %v1591_v48, 3 }
 0x223   : > { %12461 = vst [vmem:[#allocation53_spill] sm:$0xff] %v10269_v55  ;;  %v4852_v20 = vshll.u32 %v10269_v55, 30  ;;  %vm1613_vm12 = vcmp.lt.s32.totalorder %v1591_v48, 4  ;;  %v1618_v52 = vsel %vm1610_vm0, %v1597_v34, %v1600_v5  ;;  %v4965_v40 = vsub.s32 32, %v10265_v45 }
 0x224   : > { %v1609_v14 = vor.u32 %v1608_v18, %v1607_v35  ;;  %v1615_v39 = vsel %vm1613_vm12, %v1603_v42, 2102212464  ;;  %v1619_v9 = vsel %vm1613_vm12, %v1606_v25, 920167782  ;;  %vm1611_vm6 = vcmp.lt.s32.totalorder %v1591_v48, 2 }
 0x225   : > { %v10277_v47 = vsub.s32 %v4849_v3, %v4852_v20  ;;  %v1620_v29 = vsel %vm1612_vm5, %v1603_v42, %v1619_v9  ;;  %v4970_v51 = vadd.s32 127, %v4969_v11  ;;  %v1622_v26 = vsel %vm1610_vm0, %v1600_v5, %v1603_v42  ;;  %v3912_v20 = vpop.permute.xlu1 %3911 }
 0x226   : > { %v1621_v1 = vsel %vm1611_vm6, %v1618_v52, %v1620_v29  ;;  %v1623_v12 = vsel %vm1613_vm12, %v1609_v14, 1326507024  ;;  %v1614_v27 = vsel %vm1610_vm0, %v1594_v57, %v1597_v34  ;;  %v1616_v10 = vsel %vm1612_vm5, %v1600_v5, %v1615_v39 }
 0x227   : > { %v4855_v17 = vsub.s32 0, %v10277_v47  ;;  %v1624_v60 = vsel %vm1612_vm5, %v1606_v25, %v1623_v12  ;;  %v10288_v35 = vmul.u32.u64.low %v10251_v41, %v1621_v1  ;;  %v10289_v18 = vmul.u32.u64.high %v10251_v41, %v1621_v1, %v10288_v35 }
 0x228   : > { %v1625_v3 = vsel %vm1611_vm6, %v1622_v26, %v1624_v60  ;;  %v8130_v11 = vadd.s32 4294967169, %v1478_v61  ;;  %v12462_v42 = vcvt.s32.f32 %v10183_v56  ;;  %v1341_v25 = vor.u32 %v1340_v16, %v1339_v63 }
 0x229   : > { %v8251_v52 = vmin.u32 %v4855_v17, %v10277_v47  ;;  %v10298_v57 = vmul.u32.u64.low %v10251_v41, %v1625_v3  ;;  %v10299_v34 = vmul.u32.u64.high %v10251_v41, %v1625_v3, %v10298_v57  ;;  %v4949_v5 = vadd.s32 %v10146_v32, %v10153_v62  ;;  %v3905_v62 = vpop.permute.xlu0 %3904 }
 0x22a   : > { %v10294_v14 = vmul.f32 %v12462_v42, %v1450_v7  ;;  %v1617_v39 = vsel %vm1611_vm6, %v1614_v27, %v1616_v10  ;;  %v1484_v9 = vadd.s32 1, %v8130_v11  ;;  %v4971_v29 = vshll.u32 %v4970_v51, 23 }
 0x22b   : > { %v4857_v61 = vclz %v8251_v52  ;;  %v12317_v1 = vand.u32 2147483647, %v10245_v38  ;;  %v10306_v56 = vmul.f32 %v9949_v53, %v3912_v20  ;;  %v1346_v7 = vand.u32 2147483647, %v1345_v43 }
 0x22c   : > { %v4967_v26 = vshrl.u32 %v4949_v5, %v4965_v40  ;;  %v1636_v12 = vadd.s32 1, %v10289_v18  ;;  %vm1485_vm3 = vcmp.gt.s32.totalorder %v1484_v9, 0  ;;  %v1633_v63 = vmul.u32 %v10251_v41, %v1617_v39 }
 0x22d   : > { %12463 = vst [vmem:[#allocation54_spill] sm:$0xff] %v10306_v56  ;;  %v8252_v17 = vadd.s32 4294967294, %v4857_v61  ;;  %vm1635_vm0 = vc.u32 %v10299_v34, %v10288_v35  ;;  %v1486_v32 = vsel %vm1485_vm3, %v1484_v9, 0  ;;  %v1348_v48 = vcvt.s32.f32 %v1341_v25 }
 0x22e   : > { %v4966_v16 = vshll.u32 %v10200_v6, %v10265_v45  ;;  %v1637_v51 = vsel %vm1635_vm0, %v1636_v12, %v10289_v18  ;;  %v1488_v27 = vand.u32 31, %v1486_v32  ;;  %v4972_v43 = vor.u32 4788187, %v4971_v29 }
 0x22f   : > { %vm8253_vm5 = vcmp.lt.s32.totalorder %v8252_v17, 0  ;;  %v1638_v40 = vadd.s32 %v1637_v51, %v1633_v63  ;;  %v5104_v10 = vand.u32 2139095040, %v10306_v56  ;;  %v10316_v60 = vmul.f32 %v1348_v48, %v1346_v7 }
 0x230   : > { %v4968_v41 = vor.u32 %v4967_v26, %v4966_v16  ;;  %v1489_v3 = vsub.s32 32, %v1488_v27  ;;  %v10319_v11 = vmul.f32 %v9949_v53, %v3905_v62  ;;  %v10321_v20 = vsel %vm8253_vm5, 0, %v8252_v17 }
 0x231   : > { %v1639_v42 = vadd.s32 536870912, %v1638_v40  ;;  %v1491_v6 = vshll.u32 %v12397_v59, %v1488_v27  ;;  %v1494_v45 = vshll.u32 %v12393_v22, %v1488_v27  ;;  %v1481_v18 = vand.u32 8388607, %v12317_v1 }
 0x232   : > { %v1492_v52 = vshrl.u32 %v12393_v22, %v1489_v3  ;;  %v1495_v57 = vshrl.u32 %v12394_v24, %v1489_v3  ;;  %v1497_v25 = vshll.u32 %v12394_v24, %v1488_v27  ;;  %v4973_v5 = vand.u32 2147483647, %v4972_v43 }
 0x233   : > { %v10330_v39 = vshrl.u32 %v1639_v42, 30  ;;  %v1498_v53 = vshrl.u32 %v12395_v30, %v1489_v3  ;;  %v5105_v9 = vshrl.u32 %v5104_v10, 23  ;;  %v4865_v29 = vsub.s32 4294967266, %v10321_v20 }
 0x234   : > { %v1487_v61 = vshrl.u32 %v1486_v32, 5  ;;  %v1500_v7 = vshll.u32 %v12395_v30, %v1488_v27  ;;  %v1501_v26 = vshrl.u32 %v12413_v23, %v1489_v3  ;;  %v4975_v12 = vcvt.s32.f32 %v4968_v41 }
 0x235   : > { %12464 = vst [vmem:[#allocation55_spill] sm:$0xff] %v10330_v39  ;;  %v1641_v17 = vshll.u32 %v10330_v39, 30  ;;  %v1493_v63 = vor.u32 %v1492_v52, %v1491_v6  ;;  %v1496_v62 = vor.u32 %v1495_v57, %v1494_v45  ;;  %vm12322_vm12 = vcmp.lt.s32.totalorder %v9820_v46, 0 }
 0x236   : > { %v1499_v48 = vor.u32 %v1498_v53, %v1497_v25  ;;  %v1502_v16 = vor.u32 %v1501_v26, %v1500_v7  ;;  %v1503_v51 = vshll.u32 %v12413_v23, %v1488_v27  ;;  %v1504_v43 = vshrl.u32 %v12398_v2, %v1489_v3 }
 0x237   : > { %v10340_v10 = vmul.f32 %v4975_v12, %v4973_v5  ;;  %v4845_v32 = vadd.s32 %v10221_v37, %v10219_v54  ;;  %v1482_v42 = vor.u32 8388608, %v1481_v18  ;;  %v8262_v1 = vadd.s32 4294967169, %v5105_v9 }
 0x238   : > { %v4866_v41 = vadd.s32 127, %v4865_v29  ;;  %v1490_v39 = vshrl.u32 %v12397_v59, %v1489_v3  ;;  %v1505_v6 = vor.u32 %v1504_v43, %v1503_v51  ;;  %vm1506_vm6 = vcmp.lt.s32.totalorder %v1487_v61, 1 }
 0x239   : > { %v10345_v45 = vsub.s32 %v1638_v40, %v1641_v17  ;;  %vm1508_vm3 = vcmp.lt.s32.totalorder %v1487_v61, 3  ;;  %vm1509_vm0 = vcmp.lt.s32.totalorder %v1487_v61, 4  ;;  %v1514_v27 = vsel %vm1506_vm6, %v1493_v63, %v1496_v62 }
 0x23a   : > { %v1511_v52 = vsel %vm1509_vm0, %v1499_v48, 2102212464  ;;  %v1515_v57 = vsel %vm1509_vm0, %v1502_v16, 920167782  ;;  %v1518_v25 = vsel %vm1506_vm6, %v1496_v62, %v1499_v48  ;;  %v1519_v5 = vsel %vm1509_vm0, %v1505_v6, 1326507024 }
 0x23b   : > { %v4861_v37 = vsub.s32 32, %v10321_v20  ;;  %vm1507_vm5 = vcmp.lt.s32.totalorder %v1487_v61, 2  ;;  %v1516_v54 = vsel %vm1508_vm3, %v1499_v48, %v1515_v57  ;;  %v1522_v18 = vshll.u32 %v1482_v42, 8 }
 0x23c   : > { %v4867_v3 = vshll.u32 %v4866_v41, 23  ;;  %v1517_v53 = vsel %vm1507_vm5, %v1514_v27, %v1516_v54  ;;  %v1520_v40 = vsel %vm1508_vm3, %v1502_v16, %v1519_v5  ;;  %v5111_v9 = vadd.s32 1, %v8262_v1 }
 0x23d   : > { %v1644_v29 = vsub.s32 0, %v10345_v45  ;;  %v1510_v7 = vsel %vm1506_vm6, %v1490_v39, %v1493_v63  ;;  %v1512_v26 = vsel %vm1508_vm3, %v1496_v62, %v1511_v52  ;;  %v1521_v12 = vsel %vm1507_vm5, %v1518_v25, %v1520_v40 }
 0x23e   : > { %v10357_v17 = vmul.u32.u64.low %v1522_v18, %v1521_v12  ;;  %v10358_v51 = vmul.u32.u64.high %v1522_v18, %v1521_v12, %v10357_v17  ;;  %v10360_v43 = vmul.u32.u64.low %v1522_v18, %v1517_v53  ;;  %v10361_v48 = vmul.u32.u64.high %v1522_v18, %v1517_v53, %v10360_v43 }
 0x23f   : > { %v12465_v42 = vxor.u32 2147483648, %v10174_v4  ;;  %v4863_v16 = vshrl.u32 %v4845_v32, %v4861_v37  ;;  %v12320_v39 = vand.u32 2147483647, %v10306_v56  ;;  %vm5112_vm6 = vcmp.gt.s32.totalorder %v5111_v9, 0 }
 0x240   : > { %v1454_v63 = vxor.u32 2147483648, %v10294_v14  ;;  %v1513_v62 = vsel %vm1507_vm5, %v1510_v7, %v1512_v26  ;;  %v5113_v41 = vsel %vm5112_vm6, %v5111_v9, 0  ;;  %v5000_v6 = vand.u32 2139095040, %v10319_v11 }
 0x241   : > { %v10369_v1 = vsel %vm12322_vm12, %v12465_v42, %v10174_v4  ;;  %v4862_v27 = vshll.u32 %v10277_v47, %v10321_v20  ;;  %v4868_v52 = vor.u32 4788187, %v4867_v3  ;;  %v8135_v57 = vmin.u32 %v1644_v29, %v10345_v45 }
 0x242   : > { %12466 = vst [vmem:[#allocation56_spill] sm:$0xff] %v10369_v1  ;;  %v5115_v25 = vand.u32 31, %v5113_v41  ;;  %v1350_v4 = vxor.u32 2147483648, %v10316_v60  ;;  %vm1531_vm3 = vc.u32 %v10358_v51, %v10360_v43  ;;  %v1532_v61 = vadd.s32 1, %v10361_v48 }
 0x243   : > { %v4864_v5 = vor.u32 %v4863_v16, %v4862_v27  ;;  %v1529_v37 = vmul.u32 %v1522_v18, %v1513_v62  ;;  %v5108_v54 = vand.u32 8388607, %v12320_v39  ;;  %v4869_v9 = vand.u32 2147483647, %v4868_v52 }
 0x244   : > { %v5116_v53 = vsub.s32 32, %v5115_v25  ;;  %v1533_v47 = vsel %vm1531_vm3, %v1532_v61, %v10361_v48  ;;  %v5118_v20 = vshll.u32 %v12397_v59, %v5115_v25  ;;  %v5121_v3 = vshll.u32 %v12393_v22, %v5115_v25 }
 0x245   : > { %v5124_v40 = vshll.u32 %v12394_v24, %v5115_v25  ;;  %v1646_v29 = vclz %v8135_v57  ;;  %v1534_v7 = vadd.s32 %v1533_v47, %v1529_v37  ;;  %v5001_v26 = vshrl.u32 %v5000_v6, 23 }
 0x246   : > { %v5119_v12 = vshrl.u32 %v12393_v22, %v5116_v53  ;;  %v5122_v18 = vshrl.u32 %v12394_v24, %v5116_v53  ;;  %v5125_v17 = vshrl.u32 %v12395_v30, %v5116_v53  ;;  %v5127_v42 = vshll.u32 %v12395_v30, %v5115_v25 }
 0x247   : > { %v4871_v16 = vcvt.s32.f32 %v4864_v5  ;;  %v1535_v48 = vadd.s32 536870912, %v1534_v7  ;;  %v5114_v62 = vshrl.u32 %v5113_v41, 5  ;;  %v5128_v27 = vshrl.u32 %v12413_v23, %v5116_v53 }
 0x248   : > { %v5120_v61 = vor.u32 %v5119_v12, %v5118_v20  ;;  %v5123_v39 = vor.u32 %v5122_v18, %v5121_v3  ;;  %v5126_v32 = vor.u32 %v5125_v17, %v5124_v40  ;;  %v5130_v52 = vshll.u32 %v12413_v23, %v5115_v25 }
 0x249   : > { %vm12343_vm0 = vcmp.lt.s32.totalorder %v9826_v19, 0  ;;  %vm12344_vm5 = vcmp.lt.s32.totalorder %v9952_v13, 0  ;;  %v10397_v6 = vmul.f32 %v4871_v16, %v4869_v9  ;;  %v10399_v57 = vshrl.u32 %v1535_v48, 30 }
 0x24a   : > { %v5109_v37 = vor.u32 8388608, %v5108_v54  ;;  %v5129_v47 = vor.u32 %v5128_v27, %v5127_v42  ;;  %vm12342_vm6 = vcmp.lt.s32.totalorder %v10034_v28, 0  ;;  %v8136_v41 = vadd.s32 4294967294, %v1646_v29 }
 0x24b   : > { %12467 = vst [vmem:[#allocation57_spill] sm:$0xff] %v10399_v57  ;;  %v5117_v5 = vshrl.u32 %v12397_v59, %v5116_v53  ;;  %v5131_v20 = vshrl.u32 %v12398_v2, %v5116_v53  ;;  %v8258_v3 = vadd.s32 4294967169, %v5001_v26  ;;  %v1537_v25 = vshll.u32 %v10399_v57, 30 }
 0x24c   : > { %vm5133_vm3 = vcmp.lt.s32.totalorder %v5114_v62, 1  ;;  %vm5135_vm4 = vcmp.lt.s32.totalorder %v5114_v62, 3  ;;  %vm5136_vm12 = vcmp.lt.s32.totalorder %v5114_v62, 4  ;;  %vm5134_vm7 = vcmp.lt.s32.totalorder %v5114_v62, 2 }
 0x24d   : > { %v5132_v40 = vor.u32 %v5131_v20, %v5130_v52  ;;  %v5138_v9 = vsel %vm5136_vm12, %v5126_v32, 2102212464  ;;  %v5141_v12 = vsel %vm5133_vm3, %v5120_v61, %v5123_v39  ;;  %v5142_v18 = vsel %vm5136_vm12, %v5129_v47, 920167782 }
 0x24e   : > { %v10406_v54 = vsub.s32 %v1534_v7, %v1537_v25  ;;  %v5143_v29 = vsel %vm5135_vm4, %v5126_v32, %v5142_v18  ;;  %v5149_v17 = vshll.u32 %v5109_v37, 8  ;;  %v5145_v53 = vsel %vm5133_vm3, %v5123_v39, %v5126_v32 }
 0x24f   : > { %v5144_v42 = vsel %vm5134_vm7, %v5141_v12, %v5143_v29  ;;  %v5146_v26 = vsel %vm5136_vm12, %v5132_v40, 1326507024  ;;  %v5007_v16 = vadd.s32 1, %v8258_v3  ;;  %v5137_v27 = vsel %vm5133_vm3, %v5117_v5, %v5120_v61  ;;  %v397_v5 = vpop.permute.xlu1 %396 }
 0x250   : > { %v1540_v48 = vsub.s32 0, %v10406_v54  ;;  %v5139_v52 = vsel %vm5135_vm4, %v5123_v39, %v5138_v9  ;;  %v5147_v20 = vsel %vm5135_vm4, %v5129_v47, %v5146_v26  ;;  %vm8137_vm13 = vcmp.lt.s32.totalorder %v8136_v41, 0 }
 0x251   : > { %v5148_v7 = vsel %vm5134_vm7, %v5145_v53, %v5147_v20  ;;  %v10416_v25 = vmul.u32.u64.low %v5149_v17, %v5144_v42  ;;  %v10417_v18 = vmul.u32.u64.high %v5149_v17, %v5144_v42, %v10416_v25  ;;  %v12325_v3 = vand.u32 2147483647, %v10319_v11 }
 0x252   : > { %v8131_v37 = vmin.u32 %v1540_v48, %v10406_v54  ;;  %v10421_v32 = vmul.u32.u64.low %v5149_v17, %v5148_v7  ;;  %v10422_v40 = vmul.u32.u64.high %v5149_v17, %v5148_v7, %v10421_v32  ;;  %v10430_v39 = vsel %vm12343_vm0, %v1454_v63, %v10294_v14 }
 0x253   : > { %12468 = vst [vmem:[#allocation58_spill] sm:$0xff] %v10430_v39  ;;  %v10437_v61 = vsel %vm12344_vm5, %v1350_v4, %v10316_v60  ;;  %v5140_v47 = vsel %vm5134_vm7, %v5137_v27, %v5139_v52  ;;  %vm5008_vm4 = vcmp.gt.s32.totalorder %v5007_v16, 0  ;;  %v12470_v9 = vxor.u32 2147483648, %v10340_v10 }
 0x254   : > { %12469 = vst [vmem:[#allocation59_spill] sm:$0xff] %v10437_v61  ;;  %v10447_v14 = vsel %vm8137_vm13, 0, %v8136_v41  ;;  %v1542_v63 = vclz %v8131_v37  ;;  %v5009_v29 = vsel %vm5008_vm4, %v5007_v16, 0  ;;  %v1634_v60 = vadd.s32 %v10288_v35, %v10299_v34  ;;  %v10460_v41 = vld [vmem:[%s12222_s2] ss:$0 sm:$0xff] }
 0x255   : > { %v10445_v12 = vsel %vm12342_vm6, %v12470_v9, %v10340_v10  ;;  %v5159_v4 = vadd.s32 1, %v10417_v18  ;;  %v5011_v62 = vand.u32 31, %v5009_v29  ;;  %v5156_v53 = vmul.u32 %v5149_v17, %v5140_v47 }
 0x256   : > { %12471 = vst [vmem:[#allocation60_spill] sm:$0xff] %v10445_v12  ;;  %vm5158_vm7 = vc.u32 %v10422_v40, %v10416_v25  ;;  %v5004_v10 = vand.u32 8388607, %v12325_v3  ;;  %v10463_v26 = vmul.f32 %v10460_v41, %v397_v5  ;;  %v1650_v35 = vsub.s32 32, %v10447_v14 }
 0x257   : > { %v10468_v34 = vadd.s32 %v10360_v43, %v10358_v51  ;;  %v5160_v17 = vsel %vm5158_vm7, %v5159_v4, %v10417_v18  ;;  %v5012_v16 = vsub.s32 32, %v5011_v62  ;;  %v8132_v48 = vadd.s32 4294967294, %v1542_v63 }
 0x258   : > { %v5161_v27 = vadd.s32 %v5160_v17, %v5156_v53  ;;  %v5014_v52 = vshll.u32 %v12397_v59, %v5011_v62  ;;  %v5017_v20 = vshll.u32 %v12393_v22, %v5011_v62  ;;  %v5020_v32 = vshll.u32 %v12394_v24, %v5011_v62 }
 0x259   : > { %v5015_v7 = vshrl.u32 %v12393_v22, %v5012_v16  ;;  %v5018_v37 = vshrl.u32 %v12394_v24, %v5012_v16  ;;  %v5023_v47 = vshll.u32 %v12395_v30, %v5011_v62  ;;  %v1651_v51 = vshll.u32 %v10345_v45, %v10447_v14 }
 0x25a   : > { %v1654_v43 = vsub.s32 4294967266, %v10447_v14  ;;  %v5162_v18 = vadd.s32 536870912, %v5161_v27  ;;  %v5005_v5 = vor.u32 8388608, %v5004_v10  ;;  %v5010_v9 = vshrl.u32 %v5009_v29, 5 }
 0x25b   : > { %v5021_v63 = vshrl.u32 %v12395_v30, %v5012_v16  ;;  %v5024_v4 = vshrl.u32 %v12413_v23, %v5012_v16  ;;  %v1789_v53 = vand.u32 2139095040, %v10463_v26  ;;  %vm8133_vm13 = vcmp.lt.s32.totalorder %v8132_v48, 0 }
 0x25c   : > { %v10483_v17 = vshrl.u32 %v5162_v18, 30  ;;  %v5016_v3 = vor.u32 %v5015_v7, %v5014_v52  ;;  %v5026_v42 = vshll.u32 %v12413_v23, %v5011_v62  ;;  %v5019_v57 = vor.u32 %v5018_v37, %v5017_v20 }
 0x25d   : > { %v5022_v12 = vor.u32 %v5021_v63, %v5020_v32  ;;  %v5025_v45 = vor.u32 %v5024_v4, %v5023_v47  ;;  %v5027_v14 = vshrl.u32 %v12398_v2, %v5012_v16  ;;  %v1652_v28 = vshrl.u32 %v1634_v60, %v1650_v35  ;;  %v390_v63 = vpop.permute.xlu0 %389 }
 0x25e   : > { %12472 = vst [vmem:[#allocation61_spill] sm:$0xff] %v10483_v17  ;;  %v1655_v10 = vadd.s32 127, %v1654_v43  ;;  %v5164_v29 = vshll.u32 %v10483_v17, 30  ;;  %v5045_v55 = vshll.u32 %v5005_v5, 8  ;;  %v1545_v39 = vsel %vm8133_vm13, 0, %v8132_v48 }
 0x25f   : > { %v5028_v19 = vor.u32 %v5027_v14, %v5026_v42  ;;  %v1790_v13 = vshrl.u32 %v1789_v53, 23  ;;  %v5013_v52 = vshrl.u32 %v12397_v59, %v5012_v16  ;;  %vm5029_vm12 = vcmp.lt.s32.totalorder %v5010_v9, 1 }
 0x260   : > { %v10489_v18 = vsub.s32 %v5161_v27, %v5164_v29  ;;  %vm5032_vm3 = vcmp.lt.s32.totalorder %v5010_v9, 4  ;;  %vm5031_vm4 = vcmp.lt.s32.totalorder %v5010_v9, 3  ;;  %v5037_v20 = vsel %vm5029_vm12, %v5016_v3, %v5019_v57 }
 0x261   : > { %v5034_v62 = vsel %vm5032_vm3, %v5022_v12, 2102212464  ;;  %v5038_v7 = vsel %vm5032_vm3, %v5025_v45, 920167782  ;;  %vm5030_vm7 = vcmp.lt.s32.totalorder %v5010_v9, 2  ;;  %v5041_v37 = vsel %vm5029_vm12, %v5019_v57, %v5022_v12 }
 0x262   : > { %v5167_v60 = vsub.s32 0, %v10489_v18  ;;  %v5039_v35 = vsel %vm5031_vm4, %v5022_v12, %v5038_v7  ;;  %v1546_v48 = vsub.s32 32, %v1545_v39  ;;  %v5042_v32 = vsel %vm5032_vm3, %v5028_v19, 1326507024 }
 0x263   : > { %v5040_v42 = vsel %vm5030_vm7, %v5037_v20, %v5039_v35  ;;  %v8142_v47 = vadd.s32 4294967169, %v1790_v13  ;;  %v5033_v43 = vsel %vm5029_vm12, %v5013_v52, %v5016_v3  ;;  %v5035_v16 = vsel %vm5031_vm4, %v5019_v57, %v5034_v62 }
 0x264   : > { %v8263_v27 = vmin.u32 %v5167_v60, %v10489_v18  ;;  %v5043_v5 = vsel %vm5031_vm4, %v5025_v45, %v5042_v32  ;;  %v10496_v53 = vmul.u32.u64.low %v5045_v55, %v5040_v42  ;;  %v10497_v14 = vmul.u32.u64.high %v5045_v55, %v5040_v42, %v10496_v53 }
 0x265   : > { %v5044_v4 = vsel %vm5030_vm7, %v5041_v37, %v5043_v5  ;;  %v1796_v29 = vadd.s32 1, %v8142_v47  ;;  %v1550_v7 = vsub.s32 4294967266, %v1545_v39  ;;  %v1656_v19 = vshll.u32 %v1655_v10, 23 }
 0x266   : > { %v5169_v12 = vclz %v8263_v27  ;;  %v10500_v61 = vmul.u32.u64.low %v5045_v55, %v5044_v4  ;;  %v10501_v17 = vmul.u32.u64.high %v5045_v55, %v5044_v4, %v10500_v61  ;;  %v5036_v13 = vsel %vm5030_vm7, %v5033_v43, %v5035_v16 }
 0x267   : > { %vm1797_vm13 = vcmp.gt.s32.totalorder %v1796_v29, 0  ;;  %v10505_v57 = vmul.f32 %v10460_v41, %v390_v63  ;;  %v10507_v3 = vor.u32 %v1652_v28, %v1651_v51  ;;  %v1548_v45 = vshrl.u32 %v10468_v34, %v1546_v48 }
 0x268   : > { %v8264_v52 = vadd.s32 4294967294, %v5169_v12  ;;  %v1798_v62 = vsel %vm1797_vm13, %v1796_v29, 0  ;;  %v1547_v20 = vshll.u32 %v10406_v54, %v1545_v39  ;;  %v5055_v60 = vadd.s32 1, %v10497_v14 }
 0x269   : > { %v12473_v35 = vand.u32 2147483647, %v10463_v26  ;;  %v1800_v10 = vand.u32 31, %v1798_v62  ;;  %v1551_v9 = vadd.s32 127, %v1550_v7  ;;  %v5052_v37 = vmul.u32 %v5045_v55, %v5036_v13 }
 0x26a   : > { %vm8265_vm12 = vcmp.lt.s32.totalorder %v8264_v52, 0  ;;  %vm5054_vm3 = vc.u32 %v10501_v17, %v10496_v53  ;;  %v10516_v28 = vor.u32 4788187, %v1656_v19  ;;  %v10520_v54 = vor.u32 %v1548_v45, %v1547_v20 }
 0x26b   : > { %v1793_v61 = vand.u32 8388607, %v12473_v35  ;;  %v5056_v34 = vsel %vm5054_vm3, %v5055_v60, %v10497_v14  ;;  %v1801_v51 = vsub.s32 32, %v1800_v10  ;;  %v5157_v39 = vadd.s32 %v10416_v25, %v10422_v40 }
 0x26c   : > { %v5057_v42 = vadd.s32 %v5056_v34, %v5052_v37  ;;  %v1803_v32 = vshll.u32 %v12397_v59, %v1800_v10  ;;  %v10525_v47 = vsel %vm8265_vm12, 0, %v8264_v52  ;;  %v1806_v27 = vshll.u32 %v12393_v22, %v1800_v10 }
 0x26d   : > { %v1804_v55 = vshrl.u32 %v12393_v22, %v1801_v51  ;;  %v1807_v43 = vshrl.u32 %v12394_v24, %v1801_v51  ;;  %v1552_v16 = vshll.u32 %v1551_v9, 23  ;;  %v1794_v63 = vor.u32 8388608, %v1793_v61 }
 0x26e   : > { %v5058_v5 = vadd.s32 536870912, %v5057_v42  ;;  %v1809_v4 = vshll.u32 %v12394_v24, %v1800_v10  ;;  %v1799_v14 = vshrl.u32 %v1798_v62, 5  ;;  %v1810_v29 = vshrl.u32 %v12395_v30, %v1801_v51 }
 0x26f   : > { %v1812_v25 = vshll.u32 %v12395_v30, %v1800_v10  ;;  %v1685_v40 = vand.u32 2139095040, %v10505_v57  ;;  %v5177_v7 = vsub.s32 4294967266, %v10525_v47  ;;  %v1805_v19 = vor.u32 %v1804_v55, %v1803_v32 }
 0x270   : > { %v10535_v12 = vshrl.u32 %v5058_v5, 30  ;;  %v1813_v13 = vshrl.u32 %v12413_v23, %v1801_v51  ;;  %v1808_v45 = vor.u32 %v1807_v43, %v1806_v27  ;;  %v1811_v52 = vor.u32 %v1810_v29, %v1809_v4 }
 0x271   : > { %v1815_v20 = vshll.u32 %v12413_v23, %v1800_v10  ;;  %v1816_v60 = vshrl.u32 %v12398_v2, %v1801_v51  ;;  %v1553_v62 = vor.u32 4788187, %v1552_v16  ;;  %v1834_v9 = vshll.u32 %v1794_v63, 8 }
 0x272   : > { %12474 = vst [vmem:[#allocation62_spill] sm:$0xff] %v10535_v12  ;;  %v5060_v35 = vshll.u32 %v10535_v12, 30  ;;  %v1814_v61 = vor.u32 %v1813_v13, %v1812_v25  ;;  %v5173_v37 = vsub.s32 32, %v10525_v47  ;;  %v1802_v34 = vshrl.u32 %v12397_v59, %v1801_v51 }
 0x273   : > { %v1817_v5 = vor.u32 %v1816_v60, %v1815_v20  ;;  %v1686_v48 = vshrl.u32 %v1685_v40, 23  ;;  %v5178_v32 = vadd.s32 127, %v5177_v7  ;;  %vm1818_vm4 = vcmp.lt.s32.totalorder %v1799_v14, 1 }
 0x274   : > { %v10543_v55 = vsub.s32 %v5057_v42, %v5060_v35  ;;  %vm1821_vm7 = vcmp.lt.s32.totalorder %v1799_v14, 4  ;;  %vm1820_vm13 = vcmp.lt.s32.totalorder %v1799_v14, 3  ;;  %v1826_v27 = vsel %vm1818_vm4, %v1805_v19, %v1808_v45 }
 0x275   : > { %v1823_v10 = vsel %vm1821_vm7, %v1811_v52, 2102212464  ;;  %v1827_v43 = vsel %vm1821_vm7, %v1814_v61, 920167782  ;;  %vm1819_vm12 = vcmp.lt.s32.totalorder %v1799_v14, 2  ;;  %v1830_v63 = vsel %vm1818_vm4, %v1808_v45, %v1811_v52 }
 0x276   : > { %v5063_v16 = vsub.s32 0, %v10543_v55  ;;  %v1828_v4 = vsel %vm1820_vm13, %v1811_v52, %v1827_v43  ;;  %v5175_v29 = vshrl.u32 %v5157_v39, %v5173_v37  ;;  %v1831_v51 = vsel %vm1821_vm7, %v1817_v5, 1326507024 }
 0x277   : > { %v1829_v25 = vsel %vm1819_vm12, %v1826_v27, %v1828_v4  ;;  %v8138_v13 = vadd.s32 4294967169, %v1686_v48  ;;  %v1822_v42 = vsel %vm1818_vm4, %v1802_v34, %v1805_v19  ;;  %v1824_v7 = vsel %vm1820_vm13, %v1808_v45, %v1823_v10 }
 0x278   : > { %v8259_v40 = vmin.u32 %v5063_v16, %v10543_v55  ;;  %v1832_v20 = vsel %vm1820_vm13, %v1814_v61, %v1831_v51  ;;  %v10549_v35 = vmul.u32.u64.low %v1834_v9, %v1829_v25  ;;  %v10550_v12 = vmul.u32.u64.high %v1834_v9, %v1829_v25, %v10549_v35 }
 0x279   : > { %v1833_v60 = vsel %vm1819_vm12, %v1830_v63, %v1832_v20  ;;  %v1692_v1 = vadd.s32 1, %v8138_v13  ;;  %v5179_v46 = vshll.u32 %v5178_v32, 23  ;;  %v1658_v37 = vand.u32 2147483647, %v10516_v28 }
 0x27a   : > { %v5065_v43 = vclz %v8259_v40  ;;  %v10553_v52 = vmul.u32.u64.low %v1834_v9, %v1833_v60  ;;  %v10554_v39 = vmul.u32.u64.high %v1834_v9, %v1833_v60, %v10553_v52  ;;  %v1554_v48 = vand.u32 2147483647, %v1553_v62 }
 0x27b   : > { %v1825_v5 = vsel %vm1819_vm12, %v1822_v42, %v1824_v7  ;;  %vm1693_vm3 = vcmp.gt.s32.totalorder %v1692_v1, 0  ;;  %v1660_v19 = vcvt.s32.f32 %v10507_v3  ;;  %v5174_v45 = vshll.u32 %v10489_v18, %v10525_v47 }
 0x27c   : > { %v12475_v61 = vand.u32 2147483647, %v10505_v57  ;;  %v1694_v10 = vsel %vm1693_vm3, %v1692_v1, 0  ;;  %v1556_v32 = vcvt.s32.f32 %v10520_v54  ;;  %v8260_v27 = vadd.s32 4294967294, %v5065_v43 }
 0x27d   : > { %v1844_v16 = vadd.s32 1, %v10550_v12  ;;  %v1696_v4 = vand.u32 31, %v1694_v10  ;;  %v5176_v28 = vor.u32 %v5175_v29, %v5174_v45  ;;  %v5180_v62 = vor.u32 4788187, %v5179_v46  ;;  %v3926_v29 = vpop.permute.xlu1 %3925 }
 0x27e   : > { %v1689_v34 = vand.u32 8388607, %v12475_v61  ;;  %v1841_v14 = vmul.u32 %v1834_v9, %v1825_v5  ;;  %vm1843_vm4 = vc.u32 %v10554_v39, %v10549_v35  ;;  %v10567_v3 = vmul.f32 %v1660_v19, %v1658_v37 }
 0x27f   : > { %v10569_v63 = vmul.f32 %v1556_v32, %v1554_v48  ;;  %v1845_v18 = vsel %vm1843_vm4, %v1844_v16, %v10550_v12  ;;  %v1697_v47 = vsub.s32 32, %v1696_v4  ;;  %v5053_v1 = vadd.s32 %v10496_v53, %v10501_v17 }
 0x280   : > { %v1846_v54 = vadd.s32 %v1845_v18, %v1841_v14  ;;  %v1690_v25 = vor.u32 8388608, %v1689_v34  ;;  %v1699_v51 = vshll.u32 %v12397_v59, %v1696_v4  ;;  %vm8261_vm7 = vcmp.lt.s32.totalorder %v8260_v27, 0 }
 0x281   : > { %v1700_v46 = vshrl.u32 %v12393_v22, %v1697_v47  ;;  %v1702_v9 = vshll.u32 %v12393_v22, %v1696_v4  ;;  %v1703_v13 = vshrl.u32 %v12394_v24, %v1697_v47  ;;  %v5181_v40 = vand.u32 2147483647, %v5180_v62 }
 0x282   : > { %v5183_v42 = vcvt.s32.f32 %v5176_v28  ;;  %v1847_v7 = vadd.s32 536870912, %v1846_v54  ;;  %v1705_v12 = vshll.u32 %v12394_v24, %v1696_v4  ;;  %v1695_v20 = vshrl.u32 %v1694_v10, 5 }
 0x283   : > { %v1706_v17 = vshrl.u32 %v12395_v30, %v1697_v47  ;;  %v1708_v53 = vshll.u32 %v12395_v30, %v1696_v4  ;;  %v10582_v60 = vmul.f32 %v10460_v41, %v3926_v29  ;;  %v5068_v43 = vsel %vm8261_vm7, 0, %v8260_v27 }
 0x284   : > { %v10584_v52 = vshrl.u32 %v1847_v7, 30  ;;  %v1701_v37 = vor.u32 %v1700_v46, %v1699_v51  ;;  %v1709_v48 = vshrl.u32 %v12413_v23, %v1697_v47  ;;  %v1704_v5 = vor.u32 %v1703_v13, %v1702_v9  ;;  %v3919_v7 = vpop.permute.xlu0 %3918 }
 0x285   : > { %v1707_v19 = vor.u32 %v1706_v17, %v1705_v12  ;;  %v1711_v45 = vshll.u32 %v12413_v23, %v1696_v4  ;;  %v1712_v61 = vshrl.u32 %v12398_v2, %v1697_v47  ;;  %v10589_v34 = vmul.f32 %v5183_v42, %v5181_v40 }
 0x286   : > { %12476 = vst [vmem:[#allocation63_spill] sm:$0xff] %v10584_v52  ;;  %v1849_v10 = vshll.u32 %v10584_v52, 30  ;;  %v1710_v32 = vor.u32 %v1709_v48, %v1708_v53  ;;  %v1730_v16 = vshll.u32 %v1690_v25, 8  ;;  %vm12374_vm13 = vcmp.lt.s32.totalorder %v10100_v15, 0 }
 0x287   : > { %v5069_v27 = vsub.s32 32, %v5068_v43  ;;  %v5073_v28 = vsub.s32 4294967266, %v5068_v43  ;;  %v1713_v62 = vor.u32 %v1712_v61, %v1711_v45  ;;  %v12345_v14 = vand.u32 2147483647, %v10582_v60 }
 0x288   : > { %v10594_v18 = vsub.s32 %v1846_v54, %v1849_v10  ;;  %v1698_v51 = vshrl.u32 %v12397_v59, %v1697_v47  ;;  %vm1714_vm12 = vcmp.lt.s32.totalorder %v1695_v20, 1  ;;  %vm1717_vm3 = vcmp.lt.s32.totalorder %v1695_v20, 4 }
 0x289   : > { %vm1716_vm4 = vcmp.lt.s32.totalorder %v1695_v20, 3  ;;  %v1719_v4 = vsel %vm1717_vm3, %v1707_v19, 2102212464  ;;  %v1722_v29 = vsel %vm1714_vm12, %v1701_v37, %v1704_v5  ;;  %v1723_v46 = vsel %vm1717_vm3, %v1710_v32, 920167782 }
 0x28a   : > { %v1852_v25 = vsub.s32 0, %v10594_v18  ;;  %vm1715_vm7 = vcmp.lt.s32.totalorder %v1695_v20, 2  ;;  %v1724_v9 = vsel %vm1716_vm4, %v1707_v19, %v1723_v46  ;;  %v1726_v13 = vsel %vm1714_vm12, %v1704_v5, %v1707_v19 }
 0x28b   : > { %vm12367_vm6 = vcmp.lt.s32.totalorder %v10166_v33, 0  ;;  %v5074_v54 = vadd.s32 127, %v5073_v28  ;;  %v1725_v40 = vsel %vm1715_vm7, %v1722_v29, %v1724_v9  ;;  %v1727_v47 = vsel %vm1717_vm3, %v1713_v62, 1326507024 }
 0x28c   : > { %v5312_v42 = vand.u32 2139095040, %v10582_v60  ;;  %vm12373_vm0 = vcmp.lt.s32.totalorder %v10245_v38, 0  ;;  %vm12353_vm5 = vcmp.lt.s32.totalorder %v10306_v56, 0  ;;  %v8143_v12 = vmin.u32 %v1852_v25, %v10594_v18 }
 0x28d   : > { %v1718_v17 = vsel %vm1714_vm12, %v1698_v51, %v1701_v37  ;;  %v1720_v53 = vsel %vm1716_vm4, %v1704_v5, %v1719_v4  ;;  %v1728_v48 = vsel %vm1716_vm4, %v1710_v32, %v1727_v47  ;;  %v5071_v28 = vshrl.u32 %v5053_v1, %v5069_v27 }
 0x28e   : > { %v1729_v19 = vsel %vm1715_vm7, %v1726_v13, %v1728_v48  ;;  %v10611_v45 = vmul.u32.u64.low %v1730_v16, %v1725_v40  ;;  %v10612_v61 = vmul.u32.u64.high %v1730_v16, %v1725_v40, %v10611_v45  ;;  %v5313_v10 = vshrl.u32 %v5312_v42, 23 }
 0x28f   : > { %v10615_v62 = vmul.u32.u64.low %v1730_v16, %v1729_v19  ;;  %v10616_v29 = vmul.u32.u64.high %v1730_v16, %v1729_v19, %v10615_v62  ;;  %v10619_v46 = vmul.f32 %v10460_v41, %v3919_v7  ;;  %v5075_v25 = vshll.u32 %v5074_v54, 23  ;;  %v411_v7 = vpop.permute.xlu1 %410 }
 0x290   : > { %v1854_v37 = vclz %v8143_v12  ;;  %v1721_v5 = vsel %vm1715_vm7, %v1718_v17, %v1720_v53  ;;  %v8270_v51 = vadd.s32 4294967169, %v5313_v10  ;;  %v12477_v32 = vxor.u32 2147483648, %v10397_v6  ;;  %v404_v17 = vpop.permute.xlu0 %403 }
 0x291   : > { %v1662_v1 = vxor.u32 2147483648, %v10567_v3  ;;  %v5070_v27 = vshll.u32 %v10543_v55, %v5068_v43  ;;  %v5316_v9 = vand.u32 8388607, %v12345_v14  ;;  %v1558_v13 = vxor.u32 2147483648, %v10569_v63 }
 0x292   : > { %v10627_v4 = vsel %vm12374_vm13, %v12477_v32, %v10397_v6  ;;  %v5185_v20 = vxor.u32 2147483648, %v10589_v34  ;;  %v1740_v54 = vadd.s32 1, %v10612_v61  ;;  %v5319_v40 = vadd.s32 1, %v8270_v51 }
 0x293   : > { %12478 = vst [vmem:[#allocation64_spill] sm:$0xff] %v10627_v4  ;;  %v10636_v47 = vor.u32 %v5071_v28, %v5070_v27  ;;  %v1737_v42 = vmul.u32 %v1730_v16, %v1721_v5  ;;  %vm1739_vm12 = vc.u32 %v10616_v29, %v10611_v45  ;;  %v5208_v6 = vand.u32 2139095040, %v10619_v46 }
 0x294   : > { %v10641_v55 = vor.u32 4788187, %v5075_v25  ;;  %v8144_v43 = vadd.s32 4294967294, %v1854_v37  ;;  %v1741_v12 = vsel %vm1739_vm12, %v1740_v54, %v10612_v61  ;;  %vm5320_vm3 = vcmp.gt.s32.totalorder %v5319_v40, 0 }
 0x295   : > { %v10647_v53 = vsel %vm12367_vm6, %v1662_v1, %v10567_v3  ;;  %v1742_v48 = vadd.s32 %v1741_v12, %v1737_v42  ;;  %v5317_v16 = vor.u32 8388608, %v5316_v9  ;;  %v12346_v19 = vand.u32 2147483647, %v10619_v46 }
 0x296   : > { %12479 = vst [vmem:[#allocation65_spill] sm:$0xff] %v10647_v53  ;;  %v10653_v10 = vsel %vm12373_vm0, %v1558_v13, %v10569_v63  ;;  %v10658_v61 = vsel %vm12353_vm5, %v5185_v20, %v10589_v34  ;;  %v5321_v28 = vsel %vm5320_vm3, %v5319_v40, 0  ;;  %v10661_v62 = vmul.f32 %v10460_v41, %v411_v7 }
 0x297   : > { %12480 = vst [vmem:[#allocation66_spill] sm:$0xff] %v10653_v10  ;;  %12481 = vst [vmem:[#allocation67_spill] sm:$0xff] %v10658_v61  ;;  %v1842_v3 = vadd.s32 %v10549_v35, %v10554_v39  ;;  %v1743_v25 = vadd.s32 536870912, %v1742_v48  ;;  %v5209_v37 = vshrl.u32 %v5208_v6, 23  ;;  %v10666_v5 = vmul.f32 %v10460_v41, %v404_v17 }
 0x298   : > { %vm8145_vm4 = vcmp.lt.s32.totalorder %v8144_v43, 0  ;;  %v5323_v32 = vand.u32 31, %v5321_v28  ;;  %v10672_v1 = vshll.u32 %v5317_v16, 8  ;;  %v10676_v27 = vand.u32 8388607, %v12346_v19 }
 0x299   : > { %v10670_v34 = vshrl.u32 %v1743_v25, 30  ;;  %v1857_v54 = vsel %vm8145_vm4, 0, %v8144_v43  ;;  %v8266_v6 = vadd.s32 4294967169, %v5209_v37  ;;  %v5322_v7 = vshrl.u32 %v5321_v28, 5 }
 0x29a   : > { %v5324_v39 = vsub.s32 32, %v5323_v32  ;;  %v5326_v9 = vshll.u32 %v12397_v59, %v5323_v32  ;;  %v5329_v13 = vshll.u32 %v12393_v22, %v5323_v32  ;;  %v5332_v20 = vshll.u32 %v12394_v24, %v5323_v32 }
 0x29b   : > { %12482 = vst [vmem:[#allocation68_spill] sm:$0xff] %v10670_v34  ;;  %v1745_v40 = vshll.u32 %v10670_v34, 30  ;;  %v5335_v42 = vshll.u32 %v12395_v30, %v5323_v32  ;;  %v5338_v19 = vshll.u32 %v12413_v23, %v5323_v32  ;;  %v5213_v43 = vor.u32 8388608, %v10676_v27 }
 0x29c   : > { %v5327_v12 = vshrl.u32 %v12393_v22, %v5324_v39  ;;  %v5330_v17 = vshrl.u32 %v12394_v24, %v5324_v39  ;;  %v5333_v16 = vshrl.u32 %v12395_v30, %v5324_v39  ;;  %v5336_v14 = vshrl.u32 %v12413_v23, %v5324_v39 }
 0x29d   : > { %v10687_v25 = vsub.s32 %v1742_v48, %v1745_v40  ;;  %v5339_v37 = vshrl.u32 %v12398_v2, %v5324_v39  ;;  %v1858_v28 = vsub.s32 32, %v1857_v54  ;;  %v5325_v34 = vshrl.u32 %v12397_v59, %v5324_v39 }
 0x29e   : > { %v5328_v35 = vor.u32 %v5327_v12, %v5326_v9  ;;  %v5331_v51 = vor.u32 %v5330_v17, %v5329_v13  ;;  %v5334_v63 = vor.u32 %v5333_v16, %v5332_v20  ;;  %v5337_v61 = vor.u32 %v5336_v14, %v5335_v42  ;;  %v3940_v42 = vpop.permute.xlu1 %3939 }
 0x29f   : > { %v1748_v52 = vsub.s32 0, %v10687_v25  ;;  %v5340_v56 = vor.u32 %v5339_v37, %v5338_v19  ;;  %vm5341_vm7 = vcmp.lt.s32.totalorder %v5322_v7, 1  ;;  %vm5344_vm12 = vcmp.lt.s32.totalorder %v5322_v7, 4 }
 0x2a0   : > { %v5215_v48 = vadd.s32 1, %v8266_v6  ;;  %v5346_v32 = vsel %vm5344_vm12, %v5334_v63, 2102212464  ;;  %v5349_v53 = vsel %vm5341_vm7, %v5328_v35, %v5331_v51  ;;  %v1997_v27 = vand.u32 2139095040, %v10661_v62 }
 0x2a1   : > { %v8139_v40 = vmin.u32 %v1748_v52, %v10687_v25  ;;  %vm5343_vm3 = vcmp.lt.s32.totalorder %v5322_v7, 3  ;;  %v5350_v9 = vsel %vm5344_vm12, %v5337_v61, 920167782  ;;  %v5353_v13 = vsel %vm5341_vm7, %v5331_v51, %v5334_v63 }
 0x2a2   : > { %v5354_v20 = vsel %vm5344_vm12, %v5340_v56, 1326507024  ;;  %vm5342_vm4 = vcmp.lt.s32.totalorder %v5322_v7, 2  ;;  %v5345_v17 = vsel %vm5341_vm7, %v5325_v34, %v5328_v35  ;;  %v5351_v16 = vsel %vm5343_vm3, %v5334_v63, %v5350_v9 }
 0x2a3   : > { %v1750_v12 = vclz %v8139_v40  ;;  %v5347_v39 = vsel %vm5343_vm3, %v5331_v51, %v5346_v32  ;;  %v5352_v14 = vsel %vm5342_vm4, %v5349_v53, %v5351_v16  ;;  %v5355_v19 = vsel %vm5343_vm3, %v5337_v61, %v5354_v20 }
 0x2a4   : > { %vm5216_vm5 = vcmp.gt.s32.totalorder %v5215_v48, 0  ;;  %v1862_v6 = vsub.s32 4294967266, %v1857_v54  ;;  %v5356_v37 = vsel %vm5342_vm4, %v5353_v13, %v5355_v19  ;;  %v1860_v10 = vshrl.u32 %v1842_v3, %v1858_v28 }
 0x2a5   : > { %v10698_v52 = vmul.u32.u64.low %v10672_v1, %v5352_v14  ;;  %v10699_v33 = vmul.u32.u64.high %v10672_v1, %v5352_v14, %v10698_v52  ;;  %v10703_v38 = vmul.u32.u64.low %v10672_v1, %v5356_v37  ;;  %v10704_v56 = vmul.u32.u64.high %v10672_v1, %v5356_v37, %v10703_v38 }
 0x2a6   : > { %v5217_v7 = vsel %vm5216_vm5, %v5215_v48, 0  ;;  %v8140_v34 = vadd.s32 4294967294, %v1750_v12  ;;  %v5348_v63 = vsel %vm5342_vm4, %v5345_v17, %v5347_v39  ;;  %v10707_v53 = vmul.f32 %v10460_v41, %v3940_v42 }
 0x2a7   : > { %v5219_v51 = vand.u32 31, %v5217_v7  ;;  %v12483_v61 = vand.u32 2147483647, %v10641_v55  ;;  %v12484_v35 = vcvt.s32.f32 %v10636_v47  ;;  %v1859_v32 = vshll.u32 %v10594_v18, %v1857_v54 }
 0x2a8   : > { %v10718_v3 = vadd.s32 %v10611_v45, %v10616_v29  ;;  %v1998_v38 = vshrl.u32 %v1997_v27, 23  ;;  %v1863_v28 = vadd.s32 127, %v1862_v6  ;;  %v5367_v48 = vadd.s32 1, %v10699_v33 }
 0x2a9   : > { %v10713_v40 = vmul.f32 %v12484_v35, %v12483_v61  ;;  %v10721_v9 = vshll.u32 %v5213_v43, 8  ;;  %v12485_v41 = vand.u32 2147483647, %v10661_v62  ;;  %v10727_v55 = vor.u32 %v1860_v10, %v1859_v32 }
 0x2aa   : > { %v5364_v47 = vmul.u32 %v10672_v1, %v5348_v63  ;;  %vm5366_vm5 = vc.u32 %v10704_v56, %v10698_v52  ;;  %v5220_v18 = vsub.s32 32, %v5219_v51  ;;  %vm8141_vm7 = vcmp.lt.s32.totalorder %v8140_v34, 0 }
 0x2ab   : > { %v10725_v13 = vand.u32 8388607, %v12485_v41  ;;  %v5368_v45 = vsel %vm5366_vm5, %v5367_v48, %v10699_v33  ;;  %v5222_v29 = vshll.u32 %v12397_v59, %v5219_v51  ;;  %v5225_v54 = vshll.u32 %v12393_v22, %v5219_v51 }
 0x2ac   : > { %v5369_v43 = vadd.s32 %v5368_v45, %v5364_v47  ;;  %v5223_v27 = vshrl.u32 %v12393_v22, %v5220_v18  ;;  %v5226_v20 = vshrl.u32 %v12394_v24, %v5220_v18  ;;  %v8150_v10 = vadd.s32 4294967169, %v1998_v38 }
 0x2ad   : > { %v1864_v12 = vshll.u32 %v1863_v28, 23  ;;  %v5218_v17 = vshrl.u32 %v5217_v7, 5  ;;  %v5228_v1 = vshll.u32 %v12394_v24, %v5219_v51  ;;  %v5229_v16 = vshrl.u32 %v12395_v30, %v5220_v18 }
 0x2ae   : > { %v10739_v39 = vsel %vm8141_vm7, 0, %v8140_v34  ;;  %v5370_v14 = vadd.s32 536870912, %v5369_v43  ;;  %v5221_v33 = vshrl.u32 %v12397_v59, %v5220_v18  ;;  %v5231_v19 = vshll.u32 %v12395_v30, %v5219_v51 }
 0x2af   : > { %v5224_v42 = vor.u32 %v5223_v27, %v5222_v29  ;;  %v5227_v6 = vor.u32 %v5226_v20, %v5225_v54  ;;  %v5230_v37 = vor.u32 %v5229_v16, %v5228_v1  ;;  %v5232_v63 = vshrl.u32 %v12413_v23, %v5220_v18 }
 0x2b0   : > { %v10744_v61 = vshrl.u32 %v5370_v14, 30  ;;  %v5234_v7 = vshll.u32 %v12413_v23, %v5219_v51  ;;  %v5235_v35 = vshrl.u32 %v12398_v2, %v5220_v18  ;;  %v2004_v32 = vadd.s32 1, %v8150_v10 }
 0x2b1   : > { %v1758_v34 = vsub.s32 4294967266, %v10739_v39  ;;  %v5233_v38 = vor.u32 %v5232_v63, %v5231_v19  ;;  %vm5237_vm12 = vcmp.lt.s32.totalorder %v5218_v17, 1  ;;  %vm5238_vm3 = vcmp.lt.s32.totalorder %v5218_v17, 2 }
 0x2b2   : > { %12486 = vst [vmem:[#allocation69_spill] sm:$0xff] %v10744_v61  ;;  %v5372_v28 = vshll.u32 %v10744_v61, 30  ;;  %v5236_v48 = vor.u32 %v5235_v35, %v5234_v7  ;;  %vm5239_vm4 = vcmp.lt.s32.totalorder %v5218_v17, 3  ;;  %vm5240_vm5 = vcmp.lt.s32.totalorder %v5218_v17, 4 }
 0x2b3   : > { %v5241_v41 = vsel %vm5237_vm12, %v5221_v33, %v5224_v42  ;;  %v5242_v47 = vsel %vm5240_vm5, %v5230_v37, 2102212464  ;;  %v5245_v45 = vsel %vm5237_vm12, %v5224_v42, %v5227_v6  ;;  %v5246_v29 = vsel %vm5240_vm5, %v5233_v38, 920167782 }
 0x2b4   : > { %v10750_v54 = vsub.s32 %v5369_v43, %v5372_v28  ;;  %v5243_v51 = vsel %vm5239_vm4, %v5227_v6, %v5242_v47  ;;  %v5247_v27 = vsel %vm5239_vm4, %v5230_v37, %v5246_v29  ;;  %v5249_v18 = vsel %vm5237_vm12, %v5227_v6, %v5230_v37 }
 0x2b5   : > { %v10752_v20 = vor.u32 4788187, %v1864_v12  ;;  %v5248_v1 = vsel %vm5238_vm3, %v5245_v45, %v5247_v27  ;;  %v5250_v16 = vsel %vm5240_vm5, %v5236_v48, 1326507024  ;;  %v1759_v43 = vadd.s32 127, %v1758_v34 }
 0x2b6   : > { %v5375_v14 = vsub.s32 0, %v10750_v54  ;;  %v5251_v19 = vsel %vm5239_vm4, %v5233_v38, %v5250_v16  ;;  %v10758_v33 = vmul.u32.u64.low %v10721_v9, %v5248_v1  ;;  %v10759_v63 = vmul.u32.u64.high %v10721_v9, %v5248_v1, %v10758_v33 }
 0x2b7   : > { %v5244_v42 = vsel %vm5238_vm3, %v5241_v41, %v5243_v51  ;;  %v5252_v6 = vsel %vm5238_vm3, %v5249_v18, %v5251_v19  ;;  %vm2005_vm7 = vcmp.gt.s32.totalorder %v2004_v32, 0  ;;  %v1754_v28 = vsub.s32 32, %v10739_v39 }
 0x2b8   : > { %v8271_v12 = vmin.u32 %v5375_v14, %v10750_v54  ;;  %v10766_v37 = vmul.u32.u64.low %v10721_v9, %v5252_v6  ;;  %v10767_v7 = vmul.u32.u64.high %v10721_v9, %v5252_v6, %v10766_v37  ;;  %v2006_v35 = vsel %vm2005_vm7, %v2004_v32, 0 }
 0x2b9   : > { %v2002_v48 = vor.u32 8388608, %v10725_v13  ;;  %v2008_v47 = vand.u32 31, %v2006_v35  ;;  %v5365_v17 = vadd.s32 %v10698_v52, %v10704_v56  ;;  %v5263_v45 = vadd.s32 1, %v10759_v63 }
 0x2ba   : > { %v5377_v41 = vclz %v8271_v12  ;;  %v1760_v29 = vshll.u32 %v1759_v43, 23  ;;  %v5260_v51 = vmul.u32 %v10721_v9, %v5244_v42  ;;  %vm5262_vm12 = vc.u32 %v10767_v7, %v10758_v33 }
 0x2bb   : > { %v2009_v32 = vsub.s32 32, %v2008_v47  ;;  %v2011_v27 = vshll.u32 %v12397_v59, %v2008_v47  ;;  %v2014_v13 = vshll.u32 %v12393_v22, %v2008_v47  ;;  %v2017_v1 = vshll.u32 %v12394_v24, %v2008_v47 }
 0x2bc   : > { %v8272_v18 = vadd.s32 4294967294, %v5377_v41  ;;  %v5264_v16 = vsel %vm5262_vm12, %v5263_v45, %v10759_v63  ;;  %v2020_v14 = vshll.u32 %v12395_v30, %v2008_v47  ;;  %v1756_v42 = vshrl.u32 %v10718_v3, %v1754_v28 }
 0x2bd   : > { %v2012_v52 = vshrl.u32 %v12393_v22, %v2009_v32  ;;  %v2015_v56 = vshrl.u32 %v12394_v24, %v2009_v32  ;;  %v5265_v9 = vadd.s32 %v5264_v16, %v5260_v51  ;;  %v2018_v19 = vshrl.u32 %v12395_v30, %v2009_v32 }
 0x2be   : > { %vm8273_vm3 = vcmp.lt.s32.totalorder %v8272_v18, 0  ;;  %v2021_v43 = vshrl.u32 %v12413_v23, %v2009_v32  ;;  %v2007_v12 = vshrl.u32 %v2006_v35, 5  ;;  %v2023_v37 = vshll.u32 %v12413_v23, %v2008_v47 }
 0x2bf   : > { %v5380_v6 = vsel %vm8273_vm3, 0, %v8272_v18  ;;  %v5266_v45 = vadd.s32 536870912, %v5265_v9  ;;  %v2013_v10 = vor.u32 %v2012_v52, %v2011_v27  ;;  %v2016_v38 = vor.u32 %v2015_v56, %v2014_v13 }
 0x2c0   : > { %v5381_v41 = vsub.s32 32, %v5380_v6  ;;  %v5385_v63 = vsub.s32 4294967266, %v5380_v6  ;;  %v2019_v34 = vor.u32 %v2018_v19, %v2017_v1  ;;  %v2022_v61 = vor.u32 %v2021_v43, %v2020_v14 }
 0x2c1   : > { %v2024_v4 = vshrl.u32 %v12398_v2, %v2009_v32  ;;  %v10792_v51 = vor.u32 4788187, %v1760_v29  ;;  %v10794_v15 = vshrl.u32 %v5266_v45, 30  ;;  %v2042_v31 = vshll.u32 %v2002_v48, 8 }
 0x2c2   : > { %v5386_v16 = vadd.s32 127, %v5385_v63  ;;  %v5382_v3 = vshll.u32 %v10750_v54, %v5380_v6  ;;  %v2010_v35 = vshrl.u32 %v12397_v59, %v2009_v32  ;;  %v1893_v47 = vand.u32 2139095040, %v10666_v5 }
 0x2c3   : > { %12487 = vst [vmem:[#allocation70_spill] sm:$0xff] %v10794_v15  ;;  %v2025_v28 = vor.u32 %v2024_v4, %v2023_v37  ;;  %v5383_v18 = vshrl.u32 %v5365_v17, %v5381_v41  ;;  %v5268_v27 = vshll.u32 %v10794_v15, 30  ;;  %vm2026_vm4 = vcmp.lt.s32.totalorder %v2007_v12, 1 }
 0x2c4   : > { %vm2029_vm5 = vcmp.lt.s32.totalorder %v2007_v12, 4  ;;  %vm2027_vm7 = vcmp.lt.s32.totalorder %v2007_v12, 2  ;;  %v2034_v29 = vsel %vm2026_vm4, %v2013_v10, %v2016_v38  ;;  %v5387_v52 = vshll.u32 %v5386_v16, 23 }
 0x2c5   : > { %v2031_v13 = vsel %vm2029_vm5, %v2019_v34, 2102212464  ;;  %v2035_v1 = vsel %vm2029_vm5, %v2022_v61, 920167782  ;;  %v10800_v56 = vsub.s32 %v5265_v9, %v5268_v27  ;;  %vm2028_vm12 = vcmp.lt.s32.totalorder %v2007_v12, 3 }
 0x2c6   : > { %v2038_v48 = vsel %vm2026_vm4, %v2016_v38, %v2019_v34  ;;  %v2030_v54 = vsel %vm2026_vm4, %v2010_v35, %v2013_v10  ;;  %v2036_v14 = vsel %vm2028_vm12, %v2019_v34, %v2035_v1  ;;  %v2039_v32 = vsel %vm2029_vm5, %v2025_v28, 1326507024 }
 0x2c7   : > { %v1894_v4 = vshrl.u32 %v1893_v47, 23  ;;  %vm12364_vm3 = vcmp.lt.s32.totalorder %v10319_v11, 0  ;;  %v5271_v17 = vsub.s32 0, %v10800_v56  ;;  %v2032_v19 = vsel %vm2028_vm12, %v2016_v38, %v2031_v13 }
 0x2c8   : > { %v2037_v43 = vsel %vm2027_vm7, %v2034_v29, %v2036_v14  ;;  %v2040_v6 = vsel %vm2028_vm12, %v2022_v61, %v2039_v32  ;;  %v5388_v45 = vor.u32 4788187, %v5387_v52  ;;  %v12488_v35 = vshll.u32 %v10687_v25, %v10739_v39 }
 0x2c9   : > { %v2041_v37 = vsel %vm2027_vm7, %v2038_v48, %v2040_v6  ;;  %v10806_v41 = vmul.u32.u64.low %v2042_v31, %v2037_v43  ;;  %v10807_v63 = vmul.u32.u64.high %v2042_v31, %v2037_v43, %v10806_v41  ;;  %v8146_v9 = vadd.s32 4294967169, %v1894_v4 }
 0x2ca   : > { %v8267_v10 = vmin.u32 %v5271_v17, %v10800_v56  ;;  %v10811_v34 = vmul.u32.u64.low %v2042_v31, %v2041_v37  ;;  %v10812_v16 = vmul.u32.u64.high %v2042_v31, %v2041_v37, %v10811_v34  ;;  %v1757_v38 = vor.u32 %v1756_v42, %v12488_v35 }
 0x2cb   : > { %v2033_v28 = vsel %vm2027_vm7, %v2030_v54, %v2032_v19  ;;  %v12366_v61 = vand.u32 2147483647, %v10666_v5  ;;  %v1900_v47 = vadd.s32 1, %v8146_v9  ;;  %v5081_v27 = vxor.u32 2147483648, %v10713_v40 }
 0x2cc   : > { %v12489_v13 = vand.u32 2147483647, %v10752_v20  ;;  %v12490_v29 = vcvt.s32.f32 %v10727_v55  ;;  %v5384_v52 = vor.u32 %v5383_v18, %v5382_v3  ;;  %v5273_v48 = vclz %v8267_v10 }
 0x2cd   : > { %v1762_v14 = vand.u32 2147483647, %v10792_v51  ;;  %v2052_v25 = vadd.s32 1, %v10807_v63  ;;  %vm1901_vm4 = vcmp.gt.s32.totalorder %v1900_v47, 0  ;;  %v5520_v39 = vand.u32 2139095040, %v10707_v53 }
 0x2ce   : > { %v10824_v1 = vmul.f32 %v12490_v29, %v12489_v13  ;;  %v5389_v42 = vand.u32 2147483647, %v5388_v45  ;;  %v8268_v12 = vadd.s32 4294967294, %v5273_v48  ;;  %v2049_v54 = vmul.u32 %v2042_v31, %v2033_v28 }
 0x2cf   : > { %vm2051_vm5 = vc.u32 %v10812_v16, %v10806_v41  ;;  %v1764_v20 = vcvt.s32.f32 %v1757_v38  ;;  %v1897_v3 = vand.u32 8388607, %v12366_v61  ;;  %v1902_v18 = vsel %vm1901_vm4, %v1900_v47, 0 }
 0x2d0   : > { %v2053_v55 = vsel %vm2051_vm5, %v2052_v25, %v10807_v63  ;;  %v5391_v32 = vcvt.s32.f32 %v5384_v52  ;;  %v1904_v4 = vand.u32 31, %v1902_v18  ;;  %v12365_v17 = vand.u32 2147483647, %v10707_v53 }
 0x2d1   : > { %v2054_v51 = vadd.s32 %v2053_v55, %v2049_v54  ;;  %v10838_v19 = vsel %vm12364_vm3, %v5081_v27, %v10713_v40  ;;  %v1870_v31 = vxor.u32 2147483648, %v10824_v1  ;;  %v10841_v43 = vmul.f32 %v1764_v20, %v1762_v14 }
 0x2d2   : > { %v5521_v6 = vshrl.u32 %v5520_v39, 23  ;;  %v10843_v37 = vmul.f32 %v5391_v32, %v5389_v42  ;;  %v5261_v63 = vadd.s32 %v10758_v33, %v10767_v7  ;;  %vm8269_vm7 = vcmp.lt.s32.totalorder %v8268_v12, 0 }
 0x2d3   : > { %v2055_v9 = vadd.s32 536870912, %v2054_v51  ;;  %v1905_v45 = vsub.s32 32, %v1904_v4  ;;  %v1907_v10 = vshll.u32 %v12397_v59, %v1904_v4  ;;  %v1910_v34 = vshll.u32 %v12393_v22, %v1904_v4 }
 0x2d4   : > { %v1913_v40 = vshll.u32 %v12394_v24, %v1904_v4  ;;  %v1898_v38 = vor.u32 8388608, %v1897_v3  ;;  %v1916_v28 = vshll.u32 %v12395_v30, %v1904_v4  ;;  %v10855_v47 = vand.u32 8388607, %v12365_v17 }
 0x2d5   : > { %v10850_v35 = vshrl.u32 %v2055_v9, 30  ;;  %v1908_v33 = vshrl.u32 %v12393_v22, %v1905_v45  ;;  %v1911_v7 = vshrl.u32 %v12394_v24, %v1905_v45  ;;  %v1914_v27 = vshrl.u32 %v12395_v30, %v1905_v45 }
 0x2d6   : > { %v8278_v13 = vadd.s32 4294967169, %v5521_v6  ;;  %v5276_v29 = vsel %vm8269_vm7, 0, %v8268_v12  ;;  %v1903_v48 = vshrl.u32 %v1902_v18, 5  ;;  %v1917_v14 = vshrl.u32 %v12413_v23, %v1905_v45 }
 0x2d7   : > { %12491 = vst [vmem:[#allocation71_spill] sm:$0xff] %v10850_v35  ;;  %v2057_v52 = vshll.u32 %v10850_v35, 30  ;;  %v1909_v25 = vor.u32 %v1908_v33, %v1907_v10  ;;  %v1912_v39 = vor.u32 %v1911_v7, %v1910_v34  ;;  %v1915_v42 = vor.u32 %v1914_v27, %v1913_v40 }
 0x2d8   : > { %v1919_v54 = vshll.u32 %v12413_v23, %v1904_v4  ;;  %vm12372_vm12 = vcmp.lt.s32.totalorder %v10463_v26, 0  ;;  %v1918_v55 = vor.u32 %v1917_v14, %v1916_v28  ;;  %v1938_v3 = vshll.u32 %v1898_v38, 8 }
 0x2d9   : > { %v10864_v20 = vsub.s32 %v2054_v51, %v2057_v52  ;;  %v5525_v32 = vor.u32 8388608, %v10855_v47  ;;  %v5277_v6 = vsub.s32 32, %v5276_v29  ;;  %v1906_v12 = vshrl.u32 %v12397_v59, %v1905_v45 }
 0x2da   : > { %v1920_v18 = vshrl.u32 %v12398_v2, %v1905_v45  ;;  %v5527_v9 = vadd.s32 1, %v8278_v13  ;;  %vm1922_vm4 = vcmp.lt.s32.totalorder %v1903_v48, 1  ;;  %vm1924_vm5 = vcmp.lt.s32.totalorder %v1903_v48, 3 }
 0x2db   : > { %v2060_v10 = vsub.s32 0, %v10864_v20  ;;  %vm1925_vm7 = vcmp.lt.s32.totalorder %v1903_v48, 4  ;;  %v1930_v51 = vsel %vm1922_vm4, %v1909_v25, %v1912_v39  ;;  %v5281_v28 = vsub.s32 4294967266, %v5276_v29 }
 0x2dc   : > { %v1921_v4 = vor.u32 %v1920_v18, %v1919_v54  ;;  %v1927_v34 = vsel %vm1925_vm7, %v1915_v42, 2102212464  ;;  %v1931_v40 = vsel %vm1925_vm7, %v1918_v55, 920167782  ;;  %vm1923_vm3 = vcmp.lt.s32.totalorder %v1903_v48, 2  ;;  %v3933_v18 = vpop.permute.xlu0 %3932 }
 0x2dd   : > { %v8151_v38 = vmin.u32 %v2060_v10, %v10864_v20  ;;  %v1932_v47 = vsel %vm1924_vm5, %v1915_v42, %v1931_v40  ;;  %v5279_v33 = vshrl.u32 %v5261_v63, %v5277_v6  ;;  %v1934_v7 = vsel %vm1922_vm4, %v1912_v39, %v1915_v42 }
 0x2de   : > { %v1933_v45 = vsel %vm1923_vm3, %v1930_v51, %v1932_v47  ;;  %v1935_v27 = vsel %vm1925_vm7, %v1921_v4, 1326507024  ;;  %v1926_v52 = vsel %vm1922_vm4, %v1906_v12, %v1909_v25  ;;  %v1928_v14 = vsel %vm1924_vm5, %v1912_v39, %v1927_v34  ;;  %v8759_v12 = vld [vmem:[%s12222_s2] ss:$0 sm:$0xff] }
 0x2df   : > { %v2062_v13 = vclz %v8151_v38  ;;  %v1936_v54 = vsel %vm1924_vm5, %v1918_v55, %v1935_v27  ;;  %v10879_v10 = vmul.u32.u64.low %v1938_v3, %v1933_v45  ;;  %v10880_v61 = vmul.u32.u64.high %v1938_v3, %v1933_v45, %v10879_v10 }
 0x2e0   : > { %v1937_v17 = vsel %vm1923_vm3, %v1934_v7, %v1936_v54  ;;  %vm5528_vm6 = vcmp.gt.s32.totalorder %v5527_v9, 0  ;;  %v5282_v63 = vadd.s32 127, %v5281_v28  ;;  %v10891_v25 = vsel %vm12372_vm12, %v1870_v31, %v10824_v1 }
 0x2e1   : > { %v8152_v6 = vadd.s32 4294967294, %v2062_v13  ;;  %v10883_v51 = vmul.u32.u64.low %v1938_v3, %v1937_v17  ;;  %v10884_v42 = vmul.u32.u64.high %v1938_v3, %v1937_v17, %v10883_v51  ;;  %v5529_v55 = vsel %vm5528_vm6, %v5527_v9, 0 }
 0x2e2   : > { %v10897_v4 = vmul.f32 %v8759_v12, %v3933_v18  ;;  %v5278_v34 = vshll.u32 %v10800_v56, %v5276_v29  ;;  %v1929_v17 = vsel %vm1923_vm3, %v1926_v52, %v1928_v14  ;;  %v5531_v40 = vand.u32 31, %v5529_v55 }
 0x2e3   : > { %vm8153_vm4 = vcmp.lt.s32.totalorder %v8152_v6, 0  ;;  %v2050_v1 = vadd.s32 %v10806_v41, %v10812_v16  ;;  %v1948_v9 = vadd.s32 1, %v10880_v61  ;;  %v5283_v47 = vshll.u32 %v5282_v63, 23 }
 0x2e4   : > { %v10904_v31 = vsel %vm8153_vm4, 0, %v8152_v6  ;;  %v10907_v38 = vor.u32 %v5279_v33, %v5278_v34  ;;  %v10909_v45 = vshll.u32 %v5525_v32, 8  ;;  %v1945_v48 = vmul.u32 %v1938_v3, %v1929_v17 }
 0x2e5   : > { %v2070_v29 = vsub.s32 4294967266, %v10904_v31  ;;  %vm1947_vm6 = vc.u32 %v10884_v42, %v10879_v10  ;;  %v5532_v7 = vsub.s32 32, %v5531_v40  ;;  %v5534_v16 = vshll.u32 %v12397_v59, %v5531_v40 }
 0x2e6   : > { %v1949_v41 = vsel %vm1947_vm6, %v1948_v9, %v10880_v61  ;;  %v5537_v27 = vshll.u32 %v12393_v22, %v5531_v40  ;;  %v5540_v33 = vshll.u32 %v12394_v24, %v5531_v40  ;;  %v5416_v14 = vand.u32 2139095040, %v10897_v4 }
 0x2e7   : > { %v1950_v13 = vadd.s32 %v1949_v41, %v1945_v48  ;;  %v5535_v32 = vshrl.u32 %v12393_v22, %v5532_v7  ;;  %v5538_v52 = vshrl.u32 %v12394_v24, %v5532_v7  ;;  %v2066_v3 = vsub.s32 32, %v10904_v31 }
 0x2e8   : > { %v5530_v54 = vshrl.u32 %v5529_v55, 5  ;;  %v5541_v18 = vshrl.u32 %v12395_v30, %v5532_v7  ;;  %v5543_v61 = vshll.u32 %v12395_v30, %v5531_v40  ;;  %v10925_v63 = vor.u32 4788187, %v5283_v47 }
 0x2e9   : > { %v2071_v6 = vadd.s32 127, %v2070_v29  ;;  %v1951_v51 = vadd.s32 536870912, %v1950_v13  ;;  %v5544_v12 = vshrl.u32 %v12413_v23, %v5532_v7  ;;  %v5536_v34 = vor.u32 %v5535_v32, %v5534_v16 }
 0x2ea   : > { %v5539_v17 = vor.u32 %v5538_v52, %v5537_v27  ;;  %v5542_v9 = vor.u32 %v5541_v18, %v5540_v33  ;;  %v5546_v48 = vshll.u32 %v12413_v23, %v5531_v40  ;;  %v5287_v41 = vcvt.s32.f32 %v10907_v38 }
 0x2eb   : > { %v10930_v28 = vshrl.u32 %v1951_v51, 30  ;;  %v5545_v55 = vor.u32 %v5544_v12, %v5543_v61  ;;  %v5547_v39 = vshrl.u32 %v12398_v2, %v5532_v7  ;;  %v2068_v56 = vshrl.u32 %v2050_v1, %v2066_v3 }
 0x2ec   : > { %v5533_v47 = vshrl.u32 %v12397_v59, %v5532_v7  ;;  %vm5552_vm3 = vcmp.lt.s32.totalorder %v5530_v54, 4  ;;  %v5417_v29 = vshrl.u32 %v5416_v14, 23  ;;  %vm5549_vm5 = vcmp.lt.s32.totalorder %v5530_v54, 1 }
 0x2ed   : > { %v1953_v35 = vshll.u32 %v10930_v28, 30  ;;  %v5548_v15 = vor.u32 %v5547_v39, %v5546_v48  ;;  %v5554_v16 = vsel %vm5552_vm3, %v5542_v9, 2102212464  ;;  %v2072_v27 = vshll.u32 %v2071_v6, 23 }
 0x2ee   : > { %vm5551_vm7 = vcmp.lt.s32.totalorder %v5530_v54, 3  ;;  %v5557_v40 = vsel %vm5549_vm5, %v5536_v34, %v5539_v17  ;;  %v5558_v33 = vsel %vm5552_vm3, %v5545_v55, 920167782  ;;  %vm5550_vm4 = vcmp.lt.s32.totalorder %v5530_v54, 2 }
 0x2ef   : > { %v10937_v32 = vsub.s32 %v1950_v13, %v1953_v35  ;;  %v5559_v52 = vsel %vm5551_vm7, %v5542_v9, %v5558_v33  ;;  %v5561_v1 = vsel %vm5549_vm5, %v5539_v17, %v5542_v9  ;;  %v5553_v3 = vsel %vm5549_vm5, %v5533_v47, %v5536_v34 }
 0x2f0   : > { %v5555_v7 = vsel %vm5551_vm7, %v5539_v17, %v5554_v16  ;;  %v5560_v14 = vsel %vm5550_vm4, %v5557_v40, %v5559_v52  ;;  %v5562_v18 = vsel %vm5552_vm3, %v5548_v15, 1326507024  ;;  %v2067_v35 = vshll.u32 %v10864_v20, %v10904_v31 }
 0x2f1   : > { %v1956_v39 = vsub.s32 0, %v10937_v32  ;;  %v5563_v61 = vsel %vm5551_vm7, %v5545_v55, %v5562_v18  ;;  %v10943_v6 = vmul.u32.u64.low %v10909_v45, %v5560_v14  ;;  %v10944_v51 = vmul.u32.u64.high %v10909_v45, %v5560_v14, %v10943_v6 }
 0x2f2   : > { %v5564_v13 = vsel %vm5550_vm4, %v5561_v1, %v5563_v61  ;;  %v8274_v12 = vadd.s32 4294967169, %v5417_v29  ;;  %v12492_v34 = vand.u32 2147483647, %v10897_v4  ;;  %v5285_v9 = vand.u32 2147483647, %v10925_v63 }
 0x2f3   : > { %v8147_v15 = vmin.u32 %v1956_v39, %v10937_v32  ;;  %v10954_v48 = vmul.u32.u64.low %v10909_v45, %v5564_v13  ;;  %v10955_v55 = vmul.u32.u64.high %v10909_v45, %v5564_v13, %v10954_v48  ;;  %v10957_v47 = vor.u32 %v2068_v56, %v2067_v35 }
 0x2f4   : > { %v5420_v17 = vand.u32 8388607, %v12492_v34  ;;  %v5556_v16 = vsel %vm5550_vm4, %v5553_v3, %v5555_v7  ;;  %v5423_v40 = vadd.s32 1, %v8274_v12  ;;  %v520_v20 = vsub.s32 4, %v9072_v36 }
 0x2f5   : > { %v10961_v31 = vor.u32 4788187, %v2072_v27  ;;  %v1958_v29 = vclz %v8147_v15  ;;  %v5575_v33 = vadd.s32 1, %v10944_v51  ;;  %v12493_v52 = vand.u32 2147483647, %v8947_v50 }
 0x2f6   : > { %v10972_v56 = vadd.s32 %v10879_v10, %v10884_v42  ;;  %v5421_v54 = vor.u32 8388608, %v5420_v17  ;;  %vm5424_vm3 = vcmp.gt.s32.totalorder %v5423_v40, 0  ;;  %v5572_v7 = vmul.u32 %v10909_v45, %v5556_v16 }
 0x2f7   : > { %vm10966_vm6 = vcmp.le.f32.partialorder %v12493_v52, 0.7853982  ;;  %v8148_v3 = vadd.s32 4294967294, %v1958_v29  ;;  %vm5574_vm5 = vc.u32 %v10955_v55, %v10943_v6  ;;  %v5425_v14 = vsel %vm5424_vm3, %v5423_v40, 0 }
 0x2f8   : > { %v522_v27 = vsel %vm10966_vm6, %v8947_v50, %v9453_v21  ;;  %v5576_v39 = vsel %vm5574_vm5, %v5575_v33, %v10944_v51  ;;  %v5427_v61 = vand.u32 31, %v5425_v14  ;;  %v521_v10 = vsel %vm436_vm9, %v520_v20, %v9072_v36 }
 0x2f9   : > { %vm8149_vm7 = vcmp.lt.s32.totalorder %v8148_v3, 0  ;;  %v5577_v35 = vadd.s32 %v5576_v39, %v5572_v7  ;;  %8628 = vcosq.f32 %v522_v27  ;;  %v10988_v13 = vshll.u32 %v5421_v54, 8 }
 0x2fa   : > { %v10986_v21 = vsel %vm8149_vm7, 0, %v8148_v3  ;;  %v5428_v45 = vsub.s32 32, %v5427_v61  ;;  %8630 = vsinq.f32 %v522_v27  ;;  %v5430_v34 = vshll.u32 %v12397_v59, %v5427_v61 }
 0x2fb   : > { %v5578_v12 = vadd.s32 536870912, %v5577_v35  ;;  %v5433_v51 = vshll.u32 %v12393_v22, %v5427_v61  ;;  %v523_v17 = vsel %vm10966_vm6, 0, %v521_v10  ;;  %v5436_v48 = vshll.u32 %v12394_v24, %v5427_v61 }
 0x2fc   : > { %v5431_v36 = vshrl.u32 %v12393_v22, %v5428_v45  ;;  %v5434_v15 = vshrl.u32 %v12394_v24, %v5428_v45  ;;  %v4043_v16 = vsub.s32 4, %v9046_v58  ;;  %v1966_v40 = vsub.s32 4294967266, %v10986_v21 }
 0x2fd   : > { %v11000_v20 = vadd.s32 %v10943_v6, %v10955_v55  ;;  %v11002_v29 = vshrl.u32 %v5578_v12, 30  ;;  %v5437_v33 = vshrl.u32 %v12395_v30, %v5428_v45  ;;  %v5426_v52 = vshrl.u32 %v5425_v14, 5 }
 0x2fe   : > { %v5429_v1 = vshrl.u32 %v12397_v59, %v5428_v45  ;;  %v5439_v22 = vshll.u32 %v12395_v30, %v5427_v61  ;;  %v5440_v54 = vshrl.u32 %v12413_v23, %v5428_v45  ;;  %v5432_v27 = vor.u32 %v5431_v36, %v5430_v34 }
 0x2ff   : > { %v5580_v24 = vshll.u32 %v11002_v29, 30  ;;  %v5435_v3 = vor.u32 %v5434_v15, %v5433_v51  ;;  %v5438_v7 = vor.u32 %v5437_v33, %v5436_v48  ;;  %v5442_v6 = vshll.u32 %v12413_v23, %v5427_v61 }
 0x300   : > { %v5441_v39 = vor.u32 %v5440_v54, %v5439_v22  ;;  %v5443_v55 = vshrl.u32 %v12398_v2, %v5428_v45  ;;  %v527_v10 = vadd.s32 3, %v523_v17  ;;  %v1962_v12 = vsub.s32 32, %v10986_v21  ;;  %v12502_v22 = vld [vmem:[#allocation10_spill] sm:$0xff] }
 0x301   : > { %v1967_v14 = vadd.s32 127, %v1966_v40  ;;  %v11012_v18 = vsub.s32 %v5577_v35, %v5580_v24  ;;  %v2191_v59 = vand.u32 3, %v523_v17  ;;  %vm5445_vm9 = vcmp.lt.s32.totalorder %v5426_v52, 1 }
 0x302   : > { %v5444_v30 = vor.u32 %v5443_v55, %v5442_v6  ;;  %vm5447_vm4 = vcmp.lt.s32.totalorder %v5426_v52, 3  ;;  %vm5448_vm6 = vcmp.lt.s32.totalorder %v5426_v52, 4  ;;  %v5449_v51 = vsel %vm5445_vm9, %v5429_v1, %v5432_v27 }
 0x303   : > { %v8629_v42 = vpop.eup %8628  ;;  %v5583_v34 = vsub.s32 0, %v11012_v18  ;;  %v5450_v36 = vsel %vm5448_vm6, %v5438_v7, 2102212464  ;;  %v5453_v15 = vsel %vm5445_vm9, %v5432_v27, %v5435_v3  ;;  %v5454_v61 = vsel %vm5448_vm6, %v5441_v39, 920167782 }
 0x304   : > { %v8631_v23 = vpop.eup %8630  ;;  %v5451_v2 = vsel %vm5447_vm4, %v5435_v3, %v5450_v36  ;;  %v5457_v45 = vsel %vm5445_vm9, %v5435_v3, %v5438_v7  ;;  %v5458_v48 = vsel %vm5448_vm6, %v5444_v30, 1326507024  ;;  %v1968_v40 = vshll.u32 %v1967_v14, 23 }
 0x305   : > { %v8279_v35 = vmin.u32 %v5583_v34, %v11012_v18  ;;  %vm5446_vm3 = vcmp.lt.s32.totalorder %v5426_v52, 2  ;;  %v5455_v17 = vsel %vm5447_vm4, %v5438_v7, %v5454_v61  ;;  %v12496_v33 = vand.u32 2147483647, %v8944_v49 }
 0x306   : > { %v5456_v1 = vsel %vm5446_vm3, %v5453_v15, %v5455_v17  ;;  %v5459_v54 = vsel %vm5447_vm4, %v5441_v39, %v5458_v48  ;;  %vm526_vm7 = vweird.f32 %v8947_v50  ;;  %v528_v24 = vand.u32 3, %v527_v10 }
 0x307   : > { %vm11020_vm5 = vcmp.le.f32.partialorder %v12496_v33, 0.7853982  ;;  %v4044_v27 = vsel %vm3959_vm2, %v4043_v16, %v9046_v58  ;;  %v5585_v3 = vclz %v8279_v35  ;;  %v5452_v6 = vsel %vm5446_vm3, %v5449_v51, %v5451_v2 }
 0x308   : > { %v5460_v55 = vsel %vm5446_vm3, %v5457_v45, %v5459_v54  ;;  %v531_v7 = vxor.u32 2147483648, %v8631_v23  ;;  %v11034_v34 = vmul.u32.u64.low %v10988_v13, %v5456_v1  ;;  %v11035_v36 = vmul.u32.u64.high %v10988_v13, %v5456_v1, %v11034_v34 }
 0x309   : > { %v11030_v14 = vmul.u32.u64.low %v10988_v13, %v5460_v55  ;;  %v11031_v30 = vmul.u32.u64.high %v10988_v13, %v5460_v55, %v11030_v14  ;;  %v1963_v52 = vshll.u32 %v10937_v32, %v10986_v21  ;;  %v1964_v39 = vshrl.u32 %v10972_v56, %v1962_v12 }
 0x30a   : > { %v1969_v10 = vor.u32 4788187, %v1968_v40  ;;  %v8280_v58 = vadd.s32 4294967294, %v5585_v3  ;;  %vm12377_vm2 = vcmp.lt.s32.totalorder %v10505_v57, 0  ;;  %v5468_v16 = vmul.u32 %v10988_v13, %v5452_v6  ;;  %v12503_v14 = vld [vmem:[#allocation6_spill] sm:$0xff] }
 0x30b   : > { %vm530_vm9 = vcmp.eq.s32.totalorder %v528_v24, 0  ;;  %v534_v51 = vxor.u32 2147483648, %v8629_v42  ;;  %vm2193_vm4 = vcmp.eq.s32.totalorder %v2191_v59, 0  ;;  %vm533_vm3 = vcmp.eq.s32.totalorder %v528_v24, 2 }
 0x30c   : > { %vm8281_vm6 = vcmp.lt.s32.totalorder %v8280_v58, 0  ;;  %v2195_v15 = vsel %vm2193_vm4, %v8629_v42, %v531_v7  ;;  %v532_v2 = vsel %vm530_vm9, %v8629_v42, %v531_v7  ;;  %vm5470_vm12 = vc.u32 %v11031_v30, %v11034_v34 }
 0x30d   : > { %v5588_v61 = vsel %vm8281_vm6, 0, %v8280_v58  ;;  %v5471_v32 = vadd.s32 1, %v11035_v36  ;;  %vm2196_vm0 = vcmp.eq.s32.totalorder %v2191_v59, 2  ;;  %vm12376_vm13 = vcmp.lt.s32.totalorder %v10582_v60, 0 }
 0x30e   : > { %v5589_v56 = vsub.s32 32, %v5588_v61  ;;  %v5593_v21 = vsub.s32 4294967266, %v5588_v61  ;;  %vm2192_vm15 = vcmp.lt.s32.totalorder %v2191_v59, 2  ;;  %v2198_v13 = vsel %vm2196_vm0, %v534_v51, %v8631_v23 }
 0x30f   : > { %v5472_v12 = vsel %vm5470_vm12, %v5471_v32, %v11035_v36  ;;  %v2199_v45 = vsel %vm2192_vm15, %v2195_v15, %v2198_v13  ;;  %v535_v48 = vsel %vm533_vm3, %v534_v51, %v8631_v23  ;;  %v4045_v42 = vsel %vm11020_vm5, %v8944_v49, %v9259_v0 }
 0x310   : > { %v1965_v40 = vor.u32 %v1964_v39, %v1963_v52  ;;  %v5473_v35 = vadd.s32 %v5472_v12, %v5468_v16  ;;  %vm529_vm9 = vcmp.lt.s32.totalorder %v528_v24, 2  ;;  %v2200_v17 = vsel %vm526_vm7, nan, %v2199_v45  ;;  %v12507_v45 = vld [vmem:[#allocation8_spill] sm:$0xff] }
 0x311   : > { %v5591_v33 = vshrl.u32 %v11000_v20, %v5589_v56  ;;  %v5594_v1 = vadd.s32 127, %v5593_v21  ;;  %3762 = vrot.lane.b32.xlu0 %v2200_v17, %s8830_s17  ;;  %v536_v59 = vsel %vm529_vm9, %v532_v2, %v535_v48  ;;  %8632 = vcosq.f32 %v4045_v42 }
 0x312   : > { %v11060_v23 = vmul.f32 %v5287_v41, %v5285_v9  ;;  %v5474_v0 = vadd.s32 536870912, %v5473_v35  ;;  %v11064_v54 = vsel %vm526_vm7, nan, %v536_v59  ;;  %v4046_v20 = vsel %vm11020_vm5, 0, %v4044_v27  ;;  %v12512_v59 = vld [vmem:[#allocation21_spill] sm:$0xff] }
 0x313   : > { %v12499_v24 = vand.u32 2147483647, %v10961_v31  ;;  %v12500_v3 = vcvt.s32.f32 %v10957_v47  ;;  %v1970_v55 = vand.u32 2147483647, %v1969_v10  ;;  %v5590_v63 = vshll.u32 %v11012_v18, %v5588_v61 }
 0x314   : > { %8634 = vsinq.f32 %v4045_v42  ;;  %v12501_v38 = vxor.u32 2147483648, %v10841_v43  ;;  %v1972_v41 = vcvt.s32.f32 %v1965_v40  ;;  %v11082_v9 = vshrl.u32 %v5474_v0, 30 }
 0x315   : > { %v11072_v6 = vmul.f32 %v12500_v3, %v12499_v24  ;;  %v624_v31 = vsub.s32 4, %v12502_v22  ;;  %v5592_v27 = vor.u32 %v5591_v33, %v5590_v63  ;;  %v5595_v47 = vshll.u32 %v5594_v1, 23 }
 0x316   : > { %v11080_v50 = vsel %vm12377_vm2, %v12501_v38, %v10841_v43  ;;  %v4050_v7 = vadd.s32 3, %v4046_v20  ;;  %v12504_v36 = vand.u32 2147483647, %v12503_v14  ;;  %v5476_v18 = vshll.u32 %v11082_v9, 30  ;;  %v12505_v43 = vld [vmem:[#allocation22_spill] sm:$0xff] }
 0x317   : > { %v5714_v52 = vand.u32 3, %v4046_v20  ;;  %v625_v39 = vsel %vm540_vm8, %v624_v31, %v12502_v22  ;;  %v12506_v58 = vxor.u32 2147483648, %v10843_v37  ;;  %v5289_v51 = vxor.u32 2147483648, %v11060_v23 }
 0x318   : > { %vm539_vm15 = vcmp.le.f32.partialorder %v12504_v36, 0.7853982  ;;  %v2078_v15 = vxor.u32 2147483648, %v11072_v6  ;;  %v11102_v2 = vmul.f32 %v1972_v41, %v1970_v55  ;;  %v11106_v61 = vadd.s32 %v11034_v34, %v11031_v30  ;;  %v12508_v34 = vld [vmem:[#allocation5_spill] sm:$0xff] }
 0x319   : > { %v626_v10 = vsel %vm539_vm15, %v12503_v14, %v12505_v43  ;;  %v11098_v16 = vsel %vm12376_vm13, %v12506_v58, %v10843_v37  ;;  %v11108_v32 = vsub.s32 %v5473_v35, %v5476_v18  ;;  %v627_v56 = vsel %vm539_vm15, 0, %v625_v39 }
 0x31a   : > { %8636 = vcosq.f32 %v626_v10  ;;  %v5596_v21 = vor.u32 4788187, %v5595_v47  ;;  %vm4049_vm8 = vweird.f32 %v8944_v49  ;;  %v4051_v13 = vand.u32 3, %v4050_v7 }
 0x31b   : > { %8638 = vsinq.f32 %v626_v10  ;;  %v5599_v37 = vcvt.s32.f32 %v5592_v27  ;;  %v5479_v12 = vsub.s32 0, %v11108_v32  ;;  %vm5715_vm0 = vcmp.lt.s32.totalorder %v5714_v52, 2  ;;  %v8633_v42 = vpop.eup %8632 }
 0x31c   : > { %v4147_v48 = vsub.s32 4, %v12507_v45  ;;  %vm5716_vm12 = vcmp.eq.s32.totalorder %v5714_v52, 0  ;;  %vm5719_vm5 = vcmp.eq.s32.totalorder %v5714_v52, 2  ;;  %v631_v30 = vadd.s32 3, %v627_v56 }
 0x31d   : > { %v12509_v40 = vand.u32 2147483647, %v12508_v34  ;;  %v8275_v17 = vmin.u32 %v5479_v12, %v11108_v32  ;;  %v4057_v33 = vxor.u32 2147483648, %v8633_v42  ;;  %v5597_v24 = vand.u32 2147483647, %v5596_v21 }
 0x31e   : > { %v4148_v1 = vsel %vm4063_vm1, %v4147_v48, %v12507_v45  ;;  %v8635_v20 = vpop.eup %8634  ;;  %vm4052_vm4 = vcmp.lt.s32.totalorder %v4051_v13, 2  ;;  %vm4053_vm6 = vcmp.eq.s32.totalorder %v4051_v13, 0  ;;  %vm4056_vm3 = vcmp.eq.s32.totalorder %v4051_v13, 2 }
 0x31f   : > { %vm11115_vm7 = vcmp.le.f32.partialorder %v12509_v40, 0.7853982  ;;  %v5481_v3 = vclz %v8275_v17  ;;  %v4054_v55 = vxor.u32 2147483648, %v8635_v20  ;;  %v4058_v63 = vsel %vm4056_vm3, %v4057_v33, %v8635_v20 }
 0x320   : > { %v4149_v0 = vsel %vm11115_vm7, %v12508_v34, %v12512_v59  ;;  %v5721_v38 = vsel %vm5719_vm5, %v4057_v33, %v8635_v20  ;;  %v632_v41 = vand.u32 3, %v631_v30  ;;  %v2294_v22 = vand.u32 3, %v627_v56  ;;  %v12513_v33 = vld [vmem:[#allocation13_spill] sm:$0xff] }
 0x321   : > { %v4150_v31 = vsel %vm11115_vm7, 0, %v4148_v1  ;;  %8640 = vcosq.f32 %v4149_v0  ;;  %v8276_v27 = vadd.s32 4294967294, %v5481_v3  ;;  %v4055_v47 = vsel %vm4053_vm6, %v8633_v42, %v4054_v55 }
 0x322   : > { %v5718_v7 = vsel %vm5716_vm12, %v8633_v42, %v4054_v55  ;;  %8642 = vsinq.f32 %v4149_v0  ;;  %v11130_v36 = vmul.f32 %v5599_v37, %v5597_v24  ;;  %v4059_v18 = vsel %vm4052_vm4, %v4055_v47, %v4058_v63  ;;  %v12514_v24 = vld [vmem:[#allocation9_spill] sm:$0xff] }
 0x323   : > { %v5722_v39 = vsel %vm5715_vm0, %v5718_v7, %v5721_v38  ;;  %vm630_vm1 = vweird.f32 %v12503_v14  ;;  %vm8277_vm9 = vcmp.lt.s32.totalorder %v8276_v27, 0  ;;  %v11137_v10 = vsel %vm4049_vm8, nan, %v4059_v18  ;;  %v12516_v38 = vld [vmem:[#allocation24_spill] sm:$0xff] }
 0x324   : > { %v8637_v43 = vpop.eup %8636  ;;  %v5723_v58 = vsel %vm4049_vm8, nan, %v5722_v39  ;;  %v4154_v56 = vadd.s32 3, %v4150_v31  ;;  %vm2295_vm15 = vcmp.lt.s32.totalorder %v2294_v22, 2  ;;  %vm2296_vm12 = vcmp.eq.s32.totalorder %v2294_v22, 0 }
 0x325   : > { %v8639_v21 = vpop.eup %8638  ;;  %7285 = vrot.lane.b32.xlu0 %v5723_v58, %s8830_s17  ;;  %v638_v37 = vxor.u32 2147483648, %v8637_v43  ;;  %vm2299_vm5 = vcmp.eq.s32.totalorder %v2294_v22, 2  ;;  %v5484_v52 = vsel %vm8277_vm9, 0, %v8276_v27  ;;  %vm633_vm0 = vcmp.lt.s32.totalorder %v632_v41, 2 }
 0x326   : > { %v635_v13 = vxor.u32 2147483648, %v8639_v21  ;;  %vm637_vm7 = vcmp.eq.s32.totalorder %v632_v41, 2  ;;  %vm634_vm4 = vcmp.eq.s32.totalorder %v632_v41, 0  ;;  %v5817_v48 = vand.u32 3, %v4150_v31 }
 0x327   : > { %v2301_v12 = vsel %vm2299_vm5, %v638_v37, %v8639_v21  ;;  %v639_v45 = vsel %vm637_vm7, %v638_v37, %v8639_v21  ;;  %vm4153_vm8 = vweird.f32 %v12508_v34  ;;  %v4155_v49 = vand.u32 3, %v4154_v56  ;;  %v12522_v34 = vld [vmem:[#allocation17_spill] sm:$0xff] }
 0x328   : > { %v2298_v42 = vsel %vm2296_vm12, %v8637_v43, %v635_v13  ;;  %v636_v30 = vsel %vm634_vm4, %v8637_v43, %v635_v13  ;;  %v5485_v40 = vsub.s32 32, %v5484_v52  ;;  %v728_v1 = vsub.s32 4, %v12513_v33 }
 0x329   : > { %v2302_v35 = vsel %vm2295_vm15, %v2298_v42, %v2301_v12  ;;  %v640_v17 = vsel %vm633_vm0, %v636_v30, %v639_v45  ;;  %v5489_v59 = vsub.s32 4294967266, %v5484_v52  ;;  %v12515_v3 = vand.u32 2147483647, %v12514_v24 }
 0x32a   : > { %v2303_v0 = vsel %vm630_vm1, nan, %v2302_v35  ;;  %v11149_v20 = vsel %vm630_vm1, nan, %v640_v17  ;;  %vm5818_vm3 = vcmp.lt.s32.totalorder %v5817_v48, 2  ;;  %vm5819_vm9 = vcmp.eq.s32.totalorder %v5817_v48, 0 }
 0x32b   : > { %vm643_vm6 = vcmp.le.f32.partialorder %v12515_v3, 0.7853982  ;;  %v8641_v55 = vpop.eup %8640  ;;  %3764 = vrot.lane.b32.xlu1 %v2303_v0, %s8830_s17  ;;  %v729_v63 = vsel %vm644_vm11, %v728_v1, %v12513_v33  ;;  %vm4157_vm15 = vcmp.eq.s32.totalorder %v4155_v49, 0  ;;  %vm4160_vm12 = vcmp.eq.s32.totalorder %v4155_v49, 2  ;;  %v12520_v33 = vld [vmem:[#allocation23_spill] sm:$0xff] }
 0x32c   : > { %v730_v41 = vsel %vm643_vm6, %v12514_v24, %v12516_v38  ;;  %v8643_v22 = vpop.eup %8642  ;;  %v4161_v14 = vxor.u32 2147483648, %v8641_v55  ;;  %v731_v31 = vsel %vm643_vm6, 0, %v729_v63  ;;  %v5487_v27 = vshrl.u32 %v11106_v61, %v5485_v40 }
 0x32d   : > { %v4158_v47 = vxor.u32 2147483648, %v8643_v22  ;;  %vm5822_vm1 = vcmp.eq.s32.totalorder %v5817_v48, 2  ;;  %8644 = vcosq.f32 %v730_v41  ;;  %v11160_v7 = vadd.s32 127, %v5489_v59  ;;  %v12519_v48 = vld [vmem:[#allocation12_spill] sm:$0xff] }
 0x32e   : > { %v4162_v18 = vsel %vm4160_vm12, %v4161_v14, %v8643_v22  ;;  %v5824_v39 = vsel %vm5822_vm1, %v4161_v14, %v8643_v22  ;;  %8646 = vsinq.f32 %v730_v41  ;;  %vm4156_vm5 = vcmp.lt.s32.totalorder %v4155_v49, 2 }
 0x32f   : > { %v4159_v43 = vsel %vm4157_vm15, %v8641_v55, %v4158_v47  ;;  %v5821_v58 = vsel %vm5819_vm9, %v8641_v55, %v4158_v47  ;;  %v735_v56 = vadd.s32 3, %v731_v31  ;;  %v5486_v21 = vshll.u32 %v11108_v32, %v5484_v52  ;;  %v12517_v32 = vld [vmem:[#allocation7_spill] sm:$0xff] }
 0x330   : > { %v4163_v37 = vsel %vm4156_vm5, %v4159_v43, %v4162_v18  ;;  %v5825_v13 = vsel %vm5818_vm3, %v5821_v58, %v5824_v39  ;;  %v2397_v12 = vand.u32 3, %v731_v31  ;;  %v1974_v61 = vxor.u32 2147483648, %v11102_v2 }
 0x331   : > { %v5601_v45 = vxor.u32 2147483648, %v11130_v36  ;;  %v11169_v42 = vsel %vm4153_vm8, nan, %v4163_v37  ;;  %v5826_v30 = vsel %vm4153_vm8, nan, %v5825_v13  ;;  %v11173_v49 = vor.u32 %v5487_v27, %v5486_v21 }
 0x332   : > { %v5491_v40 = vshll.u32 %v11160_v7, 23  ;;  %7287 = vrot.lane.b32.xlu1 %v5826_v30, %s8830_s17  ;;  %v12518_v52 = vand.u32 2147483647, %v12517_v32  ;;  %v832_v35 = vsub.s32 4, %v12519_v48  ;;  %v736_v17 = vand.u32 3, %v735_v56  ;;  %v12523_v56 = vld [vmem:[#allocation11_spill] sm:$0xff] }
 0x333   : > { %v12521_v59 = vand.u32 2147483647, %v9222_v44  ;;  %v4251_v0 = vsub.s32 4, %v12522_v34  ;;  %vm734_vm7 = vweird.f32 %v12514_v24  ;;  %vm2398_vm4 = vcmp.lt.s32.totalorder %v2397_v12, 2  ;;  %v12527_v24 = vld [vmem:[#allocation15_spill] sm:$0xff] }
 0x334   : > { %vm747_vm11 = vcmp.le.f32.partialorder %v12518_v52, 0.7853982  ;;  %v833_v3 = vsel %vm748_vm10, %v832_v35, %v12519_v48  ;;  %vm2399_vm8 = vcmp.eq.s32.totalorder %v2397_v12, 0  ;;  %vm737_vm6 = vcmp.lt.s32.totalorder %v736_v17, 2 }
 0x335   : > { %v834_v1 = vsel %vm747_vm11, %v12517_v32, %v12520_v33  ;;  %vm4166_vm0 = vcmp.le.f32.partialorder %v12521_v59, 0.7853982  ;;  %v835_v63 = vsel %vm747_vm11, 0, %v833_v3  ;;  %v4252_v38 = vsel %vm4167_vm14, %v4251_v0, %v12522_v34  ;;  %v12528_v34 = vld [vmem:[#allocation30_spill] sm:$0xff] }
 0x336   : > { %8648 = vcosq.f32 %v834_v1  ;;  %v4253_v55 = vsel %vm4166_vm0, %v9222_v44, %v9860_v8  ;;  %v839_v41 = vadd.s32 3, %v835_v63  ;;  %v11194_v22 = vand.u32 3, %v835_v63  ;;  %v12529_v63 = vld [vmem:[#allocation16_spill] sm:$0xff] }
 0x337   : > { %8650 = vsinq.f32 %v834_v1  ;;  %v4254_v14 = vsel %vm4166_vm0, 0, %v4252_v38  ;;  %v8645_v31 = vpop.eup %8644  ;;  %vm738_vm3 = vcmp.eq.s32.totalorder %v736_v17, 0  ;;  %vm741_vm10 = vcmp.eq.s32.totalorder %v736_v17, 2 }
 0x338   : > { %8652 = vcosq.f32 %v4253_v55  ;;  %v4258_v27 = vadd.s32 3, %v4254_v14  ;;  %v8647_v47 = vpop.eup %8646  ;;  %v742_v8 = vxor.u32 2147483648, %v8645_v31  ;;  %v840_v18 = vand.u32 3, %v839_v41 }
 0x339   : > { %8654 = vsinq.f32 %v4253_v55  ;;  %v11196_v39 = vand.u32 3, %v4254_v14  ;;  %v739_v43 = vxor.u32 2147483648, %v8647_v47  ;;  %vm2402_vm9 = vcmp.eq.s32.totalorder %v2397_v12, 2  ;;  %v12533_v14 = vld [vmem:[#allocation25_spill] sm:$0xff] }
 0x33a   : > { %v11198_v58 = vand.u32 3, %v4258_v27  ;;  %v12524_v21 = vand.u32 2147483647, %v12523_v56  ;;  %v2404_v13 = vsel %vm2402_vm9, %v742_v8, %v8647_v47  ;;  %v743_v30 = vsel %vm741_vm10, %v742_v8, %v8647_v47 }
 0x33b   : > { %vm2501_vm15 = vcmp.lt.s32.totalorder %v11194_v22, 2  ;;  %vm2502_vm12 = vcmp.eq.s32.totalorder %v11194_v22, 0  ;;  %vm2505_vm1 = vcmp.eq.s32.totalorder %v11194_v22, 2  ;;  %v2401_v52 = vsel %vm2399_vm8, %v8645_v31, %v739_v43 }
 0x33c   : > { %vm11202_vm14 = vcmp.le.f32.partialorder %v12524_v21, 0.7853982  ;;  %v740_v48 = vsel %vm738_vm3, %v8645_v31, %v739_v43  ;;  %vm838_vm5 = vweird.f32 %v12517_v32  ;;  %vm841_vm11 = vcmp.lt.s32.totalorder %v840_v18, 2  ;;  %v12535_v43 = vld [vmem:[#allocation38_spill] sm:$0xff] }
 0x33d   : > { %vm842_vm0 = vcmp.eq.s32.totalorder %v840_v18, 0  ;;  %v2405_v35 = vsel %vm2398_vm4, %v2401_v52, %v2404_v13  ;;  %v744_v33 = vsel %vm737_vm6, %v740_v48, %v743_v30  ;;  %vm845_vm9 = vcmp.eq.s32.totalorder %v840_v18, 2 }
 0x33e   : > { %v2406_v1 = vsel %vm734_vm7, nan, %v2405_v35  ;;  %v11220_v59 = vsel %vm734_vm7, nan, %v744_v33  ;;  %vm4261_vm8 = vcmp.eq.s32.totalorder %v11198_v58, 0  ;;  %vm4264_vm3 = vcmp.eq.s32.totalorder %v11198_v58, 2 }
 0x33f   : > { %vm5207_vm4 = vcmp.lt.s32.totalorder %v10619_v46, 0  ;;  %3766 = vrot.lane.b32.xlu0 %v2406_v1, %s8830_s17  ;;  %vm5922_vm10 = vcmp.eq.s32.totalorder %v11196_v39, 0  ;;  %vm5925_vm13 = vcmp.eq.s32.totalorder %v11196_v39, 2  ;;  %v4355_v17 = vsub.s32 4, %v12527_v24 }
 0x340   : > { %v8649_v12 = vpop.eup %8648  ;;  %v4357_v0 = vsel %vm11202_vm14, %v12523_v56, %v12528_v34  ;;  %vm5519_vm7 = vcmp.lt.s32.totalorder %v10707_v53, 0  ;;  %v12530_v38 = vand.u32 2147483647, %v12529_v63  ;;  %v936_v31 = vsub.s32 4, %v12533_v14 }
 0x341   : > { %v8651_v3 = vpop.eup %8650  ;;  %v846_v55 = vxor.u32 2147483648, %v8649_v12  ;;  %8656 = vcosq.f32 %v4357_v0  ;;  %vm12534_vm6 = vcmp.lt.s32.totalorder %v12523_v56, 0 }
 0x342   : > { %vm11238_vm2 = vcmp.le.f32.partialorder %v12530_v38, 0.7853982  ;;  %v8653_v27 = vpop.eup %8652  ;;  %v843_v47 = vxor.u32 2147483648, %v8651_v3  ;;  %v4356_v8 = vsel %vm12534_vm6, %v4355_v17, %v12527_v24  ;;  %8658 = vsinq.f32 %v4357_v0 }
 0x343   : > { %v938_v21 = vsel %vm11238_vm2, %v12529_v63, %v12535_v43  ;;  %v8655_v13 = vpop.eup %8654  ;;  %v847_v30 = vsel %vm845_vm9, %v846_v55, %v8651_v3  ;;  %v2507_v52 = vsel %vm2505_vm1, %v846_v55, %v8651_v3  ;;  %v4265_v48 = vxor.u32 2147483648, %v8653_v27 }
 0x344   : > { %v4358_v35 = vsel %vm11202_vm14, 0, %v4356_v8  ;;  %v844_v33 = vsel %vm842_vm0, %v8649_v12, %v843_v47  ;;  %v2504_v1 = vsel %vm2502_vm12, %v8649_v12, %v843_v47  ;;  %v4262_v24 = vxor.u32 2147483648, %v8655_v13 }
 0x345   : > { %v4362_v17 = vadd.s32 3, %v4358_v35  ;;  %v848_v34 = vsel %vm841_vm11, %v844_v33, %v847_v30  ;;  %v2508_v0 = vsel %vm2501_vm15, %v2504_v1, %v2507_v52  ;;  %v5927_v38 = vsel %vm5925_vm13, %v4265_v48, %v8655_v13 }
 0x346   : > { %v4266_v3 = vsel %vm4264_vm3, %v4265_v48, %v8655_v13  ;;  %v11267_v37 = vsel %vm838_vm5, nan, %v848_v34  ;;  %v2509_v12 = vsel %vm838_vm5, nan, %v2508_v0  ;;  %v5924_v18 = vsel %vm5922_vm10, %v8653_v27, %v4262_v24  ;;  %v12545_v48 = vld [vmem:[#allocation37_spill] sm:$0xff] }
 0x347   : > { %v4263_v22 = vsel %vm4261_vm8, %v8653_v27, %v4262_v24  ;;  %3768 = vrot.lane.b32.xlu1 %v2509_v12, %s8830_s17  ;;  %vm4257_vm13 = vweird.f32 %v9222_v44  ;;  %vm12536_vm14 = vcmp.lt.s32.totalorder %v11196_v39, 2  ;;  %vm12537_vm15 = vcmp.lt.s32.totalorder %v11198_v58, 2 }
 0x348   : > { %v5928_v55 = vsel %vm12536_vm14, %v5924_v18, %v5927_v38  ;;  %v4267_v47 = vsel %vm12537_vm15, %v4263_v22, %v4266_v3  ;;  %v4363_v8 = vand.u32 3, %v4362_v17  ;;  %vm12538_vm12 = vcmp.lt.s32.totalorder %v12529_v63, 0  ;;  %v12546_v18 = vld [vmem:[#allocation20_spill] sm:$0xff] }
 0x349   : > { %v5929_v43 = vsel %vm4257_vm13, nan, %v5928_v55  ;;  %v11281_v32 = vsel %vm4257_vm13, nan, %v4267_v47  ;;  %v937_v13 = vsel %vm12538_vm12, %v936_v31, %v12533_v14  ;;  %8660 = vcosq.f32 %v938_v21 }
 0x34a   : > { %v11291_v44 = vsel %vm5207_vm4, %v5289_v51, %v11060_v23  ;;  %vm12539_vm1 = vcmp.lt.s32.totalorder %v10661_v62, 0  ;;  %vm12540_vm5 = vcmp.lt.s32.totalorder %v10666_v5, 0  ;;  %7289 = vrot.lane.b32.xlu0 %v5929_v43, %s8830_s17  ;;  %v6023_v14 = vand.u32 3, %v4358_v35 }
 0x34b   : > { %v11298_v39 = vsel %vm12539_vm1, %v2078_v15, %v11072_v6  ;;  %v11305_v58 = vsel %vm12540_vm5, %v1974_v61, %v11102_v2  ;;  %v11313_v23 = vsel %vm5519_vm7, %v5601_v45, %v11130_v36  ;;  %v11317_v6 = vor.u32 4788187, %v5491_v40  ;;  %v8657_v15 = vpop.eup %8656  ;;  %v12541_v61 = vld [vmem:[#allocation19_spill] sm:$0xff]  ;;  %v12542_v40 = vld [vmem:[#allocation14_spill] sm:$0xff] }
 0x34c   : > { %v939_v51 = vsel %vm11238_vm2, 0, %v937_v13  ;;  %8662 = vsinq.f32 %v938_v21  ;;  %vm4361_vm11 = vweird.f32 %v12523_v56  ;;  %vm4364_vm0 = vcmp.lt.s32.totalorder %v4363_v8, 2  ;;  %v8659_v27 = vpop.eup %8658  ;;  %v12551_v13 = vld [vmem:[#allocation42_spill] sm:$0xff] }
 0x34d   : > { %v1040_v31 = vsub.s32 4, %v12541_v61  ;;  %vm4365_vm9 = vcmp.eq.s32.totalorder %v4363_v8, 0  ;;  %vm4368_vm10 = vcmp.eq.s32.totalorder %v4363_v8, 2  ;;  %v4369_v36 = vxor.u32 2147483648, %v8657_v15  ;;  %v12550_v8 = vld [vmem:[#allocation29_spill] sm:$0xff] }
 0x34e   : > { %v943_v45 = vadd.s32 3, %v939_v51  ;;  %v4366_v7 = vxor.u32 2147483648, %v8659_v27  ;;  %vm6025_vm8 = vcmp.eq.s32.totalorder %v6023_v14, 0  ;;  %vm6028_vm3 = vcmp.eq.s32.totalorder %v6023_v14, 2 }
 0x34f   : > { %v12543_v41 = vand.u32 2147483647, %v12542_v40  ;;  %v4370_v21 = vsel %vm4368_vm10, %v4369_v36, %v8659_v27  ;;  %v6030_v30 = vsel %vm6028_vm3, %v4369_v36, %v8659_v27  ;;  %vm12544_vm6 = vcmp.lt.s32.totalorder %v12542_v40, 0 }
 0x350   : > { %v1041_v52 = vsel %vm12544_vm6, %v1040_v31, %v12541_v61  ;;  %v4367_v33 = vsel %vm4365_vm9, %v8657_v15, %v4366_v7  ;;  %vm6024_vm13 = vcmp.lt.s32.totalorder %v6023_v14, 2  ;;  %v6027_v1 = vsel %vm6025_vm8, %v8657_v15, %v4366_v7 }
 0x351   : > { %vm955_vm2 = vcmp.le.f32.partialorder %v12543_v41, 0.7853982  ;;  %v2603_v24 = vand.u32 3, %v939_v51  ;;  %v4371_v17 = vsel %vm4364_vm0, %v4367_v33, %v4370_v21  ;;  %v6031_v34 = vsel %vm6024_vm13, %v6027_v1, %v6030_v30  ;;  %v12553_v33 = vld [vmem:[#allocation27_spill] sm:$0xff] }
 0x352   : > { %v1042_v35 = vsel %vm955_vm2, %v12542_v40, %v12545_v48  ;;  %v944_v0 = vand.u32 3, %v943_v45  ;;  %v1043_v38 = vsel %vm955_vm2, 0, %v1041_v52  ;;  %v11334_v3 = vsel %vm4361_vm11, nan, %v4371_v17 }
 0x353   : > { %v6032_v12 = vsel %vm4361_vm11, nan, %v6031_v34  ;;  %8664 = vcosq.f32 %v1042_v35  ;;  %v12547_v22 = vand.u32 2147483647, %v12546_v18  ;;  %v8661_v47 = vpop.eup %8660  ;;  %vm942_vm15 = vweird.f32 %v12529_v63 }
 0x354   : > { %7291 = vrot.lane.b32.xlu1 %v6032_v12, %s8830_s17  ;;  %8666 = vsinq.f32 %v1042_v35  ;;  %v4459_v43 = vsub.s32 4, %v12550_v8  ;;  %v950_v14 = vxor.u32 2147483648, %v8661_v47  ;;  %vm2604_vm12 = vcmp.lt.s32.totalorder %v2603_v24, 2 }
 0x355   : > { %vm11340_vm14 = vcmp.le.f32.partialorder %v12547_v22, 0.7853982  ;;  %v1047_v51 = vadd.s32 3, %v1043_v38  ;;  %vm949_vm1 = vcmp.eq.s32.totalorder %v944_v0, 2  ;;  %vm2605_vm5 = vcmp.eq.s32.totalorder %v2603_v24, 0  ;;  %v12557_v22 = vld [vmem:[#allocation40_spill] sm:$0xff] }
 0x356   : > { %v4461_v56 = vsel %vm11340_vm14, %v12546_v18, %v12551_v13  ;;  %v8663_v15 = vpop.eup %8662  ;;  %vm2608_vm11 = vcmp.eq.s32.totalorder %v2603_v24, 2  ;;  %vm12552_vm0 = vcmp.lt.s32.totalorder %v12546_v18, 0  ;;  %vm945_vm9 = vcmp.lt.s32.totalorder %v944_v0, 2 }
 0x357   : > { %8668 = vcosq.f32 %v4461_v56  ;;  %v4460_v61 = vsel %vm12552_vm0, %v4459_v43, %v12550_v8  ;;  %v947_v31 = vxor.u32 2147483648, %v8663_v15  ;;  %v2610_v27 = vsel %vm2608_vm11, %v950_v14, %v8663_v15 }
 0x358   : > { %v951_v36 = vsel %vm949_vm1, %v950_v14, %v8663_v15  ;;  %vm946_vm10 = vcmp.eq.s32.totalorder %v944_v0, 0  ;;  %v2706_v45 = vand.u32 3, %v1043_v38  ;;  %v4462_v7 = vsel %vm11340_vm14, 0, %v4460_v61  ;;  %v12554_v38 = vld [vmem:[#allocation18_spill] sm:$0xff] }
 0x359   : > { %8670 = vsinq.f32 %v4461_v56  ;;  %v2607_v41 = vsel %vm2605_vm5, %v8661_v47, %v947_v31  ;;  %v948_v21 = vsel %vm946_vm10, %v8661_v47, %v947_v31  ;;  %v1048_v30 = vand.u32 3, %v1047_v51 }
 0x35a   : > { %v4466_v52 = vadd.s32 3, %v4462_v7  ;;  %v2611_v48 = vsel %vm2604_vm12, %v2607_v41, %v2610_v27  ;;  %v952_v35 = vsel %vm945_vm9, %v948_v21, %v951_v36  ;;  %vm1046_vm8 = vweird.f32 %v12542_v40 }
 0x35b   : > { %v4563_v1 = vsub.s32 4, %v12553_v33  ;;  %v2612_v17 = vsel %vm942_vm15, nan, %v2611_v48  ;;  %v11363_v34 = vsel %vm942_vm15, nan, %v952_v35  ;;  %v6126_v0 = vand.u32 3, %v4462_v7 }
 0x35c   : > { %v12555_v12 = vand.u32 2147483647, %v12554_v38  ;;  %3770 = vrot.lane.b32.xlu0 %v2612_v17, %s8830_s17  ;;  %vm2707_vm2 = vcmp.lt.s32.totalorder %v2706_v45, 2  ;;  %vm2708_vm6 = vcmp.eq.s32.totalorder %v2706_v45, 0  ;;  %vm12556_vm13 = vcmp.lt.s32.totalorder %v12554_v38, 0 }
 0x35d   : > { %v4564_v24 = vsel %vm12556_vm13, %v4563_v1, %v12553_v33  ;;  %v8665_v47 = vpop.eup %8664  ;;  %vm1049_vm14 = vcmp.lt.s32.totalorder %v1048_v30, 2  ;;  %vm1050_vm12 = vcmp.eq.s32.totalorder %v1048_v30, 0  ;;  %vm2711_vm15 = vcmp.eq.s32.totalorder %v2706_v45, 2  ;;  %v12560_v45 = vld [vmem:[#allocation35_spill] sm:$0xff] }
 0x35e   : > { %vm4478_vm3 = vcmp.le.f32.partialorder %v12555_v12, 0.7853982  ;;  %v4467_v63 = vand.u32 3, %v4466_v52  ;;  %v8667_v8 = vpop.eup %8666  ;;  %vm1053_vm1 = vcmp.eq.s32.totalorder %v1048_v30, 2  ;;  %v1054_v43 = vxor.u32 2147483648, %v8665_v47  ;;  %v12558_v12 = vld [vmem:[#allocation28_spill] sm:$0xff] }
 0x35f   : > { %v4565_v55 = vsel %vm4478_vm3, %v12554_v38, %v12557_v22  ;;  %vm4465_vm5 = vweird.f32 %v12546_v18  ;;  %v4566_v13 = vsel %vm4478_vm3, 0, %v4564_v24  ;;  %v1051_v14 = vxor.u32 2147483648, %v8667_v8  ;;  %v12564_v18 = vld [vmem:[#allocation26_spill] sm:$0xff] }
 0x360   : > { %8672 = vcosq.f32 %v4565_v55  ;;  %vm6127_vm11 = vcmp.lt.s32.totalorder %v6126_v0, 2  ;;  %vm6128_vm0 = vcmp.eq.s32.totalorder %v6126_v0, 0  ;;  %v1055_v51 = vsel %vm1053_vm1, %v1054_v43, %v8667_v8 }
 0x361   : > { %v8669_v56 = vpop.eup %8668  ;;  %8674 = vsinq.f32 %v4565_v55  ;;  %v2713_v15 = vsel %vm2711_vm15, %v1054_v43, %v8667_v8  ;;  %vm6131_vm9 = vcmp.eq.s32.totalorder %v6126_v0, 2  ;;  %v1052_v31 = vsel %vm1050_vm12, %v8665_v47, %v1051_v14  ;;  %v12561_v8 = vld [vmem:[#allocation50_spill] sm:$0xff]  ;;  %v12563_v0 = vld [vmem:[#allocation32_spill] sm:$0xff] }
 0x362   : > { %v4473_v61 = vxor.u32 2147483648, %v8669_v56  ;;  %v2710_v27 = vsel %vm2708_vm6, %v8665_v47, %v1051_v14  ;;  %vm4468_vm10 = vcmp.lt.s32.totalorder %v4467_v63, 2  ;;  %v4570_v36 = vadd.s32 3, %v4566_v13 }
 0x363   : > { %v8671_v7 = vpop.eup %8670  ;;  %v1056_v41 = vsel %vm1049_vm14, %v1052_v31, %v1055_v51  ;;  %v2714_v21 = vsel %vm2707_vm2, %v2710_v27, %v2713_v15  ;;  %vm4469_vm3 = vcmp.eq.s32.totalorder %v4467_v63, 0  ;;  %vm4472_vm13 = vcmp.eq.s32.totalorder %v4467_v63, 2 }
 0x364   : > { %v11380_v52 = vsel %vm1046_vm8, nan, %v1056_v41  ;;  %v2715_v48 = vsel %vm1046_vm8, nan, %v2714_v21  ;;  %v4470_v35 = vxor.u32 2147483648, %v8671_v7  ;;  %v6133_v33 = vsel %vm6131_vm9, %v4473_v61, %v8671_v7 }
 0x365   : > { %3772 = vrot.lane.b32.xlu1 %v2715_v48, %s8830_s17  ;;  %v4474_v1 = vsel %vm4472_vm13, %v4473_v61, %v8671_v7  ;;  %v6229_v17 = vand.u32 3, %v4566_v13  ;;  %v12559_v30 = vand.u32 2147483647, %v12558_v12  ;;  %v1144_v24 = vsub.s32 4, %v12560_v45 }
 0x366   : > { %v6130_v22 = vsel %vm6128_vm0, %v8669_v56, %v4470_v35  ;;  %v4471_v55 = vsel %vm4469_vm3, %v8669_v56, %v4470_v35  ;;  %v4571_v47 = vand.u32 3, %v4570_v36  ;;  %vm12562_vm8 = vcmp.lt.s32.totalorder %v12558_v12, 0 }
 0x367   : > { %vm1059_vm6 = vcmp.le.f32.partialorder %v12559_v30, 0.7853982  ;;  %v6134_v40 = vsel %vm6127_vm11, %v6130_v22, %v6133_v33  ;;  %v4475_v14 = vsel %vm4468_vm10, %v4471_v55, %v4474_v1  ;;  %v1145_v13 = vsel %vm12562_vm8, %v1144_v24, %v12560_v45  ;;  %v12567_v33 = vld [vmem:[#allocation45_spill] sm:$0xff] }
 0x368   : > { %v1146_v43 = vsel %vm1059_vm6, %v12558_v12, %v12561_v8  ;;  %v6135_v51 = vsel %vm4465_vm5, nan, %v6134_v40  ;;  %v11400_v15 = vsel %vm4465_vm5, nan, %v4475_v14  ;;  %v1147_v56 = vsel %vm1059_vm6, 0, %v1145_v13  ;;  %v12568_v22 = vld [vmem:[#allocation33_spill] sm:$0xff] }
 0x369   : > { %8676 = vcosq.f32 %v1146_v43  ;;  %7293 = vrot.lane.b32.xlu0 %v6135_v51, %s8830_s17  ;;  %vm4569_vm2 = vweird.f32 %v12554_v38  ;;  %vm6230_vm14 = vcmp.lt.s32.totalorder %v6229_v17, 2  ;;  %vm6231_vm12 = vcmp.eq.s32.totalorder %v6229_v17, 0 }
 0x36a   : > { %8678 = vsinq.f32 %v1146_v43  ;;  %v8673_v61 = vpop.eup %8672  ;;  %v1248_v63 = vsub.s32 4, %v12563_v0  ;;  %vm4572_vm15 = vcmp.lt.s32.totalorder %v4571_v47, 2  ;;  %vm4573_vm1 = vcmp.eq.s32.totalorder %v4571_v47, 0 }
 0x36b   : > { %v8675_v31 = vpop.eup %8674  ;;  %v4577_v27 = vxor.u32 2147483648, %v8673_v61  ;;  %v1151_v36 = vadd.s32 3, %v1147_v56  ;;  %vm4576_vm11 = vcmp.eq.s32.totalorder %v4571_v47, 2  ;;  %vm6234_vm5 = vcmp.eq.s32.totalorder %v6229_v17, 2  ;;  %v12572_v47 = vld [vmem:[#allocation41_spill] sm:$0xff]  ;;  %v12573_v17 = vld [vmem:[#allocation56_spill] sm:$0xff] }
 0x36c   : > { %v4574_v7 = vxor.u32 2147483648, %v8675_v31  ;;  %v12565_v41 = vand.u32 2147483647, %v12564_v18  ;;  %vm12566_vm9 = vcmp.lt.s32.totalorder %v12564_v18, 0  ;;  %v2809_v24 = vand.u32 3, %v1147_v56 }
 0x36d   : > { %v4578_v21 = vsel %vm4576_vm11, %v4577_v27, %v8675_v31  ;;  %v6236_v48 = vsel %vm6234_vm5, %v4577_v27, %v8675_v31  ;;  %v1249_v35 = vsel %vm12566_vm9, %v1248_v63, %v12563_v0  ;;  %v12569_v55 = vand.u32 2147483647, %v12568_v22 }
 0x36e   : > { %vm1163_vm0 = vcmp.le.f32.partialorder %v12565_v41, 0.7853982  ;;  %v4575_v30 = vsel %vm4573_vm1, %v8673_v61, %v4574_v7  ;;  %v6233_v45 = vsel %vm6231_vm12, %v8673_v61, %v4574_v7  ;;  %v1152_v14 = vand.u32 3, %v1151_v36 }
 0x36f   : > { %v1250_v1 = vsel %vm1163_vm0, %v12564_v18, %v12567_v33  ;;  %vm11415_vm10 = vcmp.le.f32.partialorder %v12569_v55, 0.7853982  ;;  %v4579_v43 = vsel %vm4572_vm15, %v4575_v30, %v4578_v21  ;;  %v6237_v40 = vsel %vm6230_vm14, %v6233_v45, %v6236_v48  ;;  %v12574_v21 = vld [vmem:[#allocation31_spill] sm:$0xff] }
 0x370   : > { %v1251_v13 = vsel %vm1163_vm0, 0, %v1249_v35  ;;  %v11423_v51 = vsel %vm4569_vm2, nan, %v4579_v43  ;;  %v6238_v61 = vsel %vm4569_vm2, nan, %v6237_v40  ;;  %8680 = vcosq.f32 %v1250_v1  ;;  %v12579_v40 = vld [vmem:[#allocation36_spill] sm:$0xff] }
 0x371   : > { %v1255_v56 = vadd.s32 3, %v1251_v13  ;;  %7295 = vrot.lane.b32.xlu1 %v6238_v61, %s8830_s17  ;;  %vm1150_vm3 = vweird.f32 %v12558_v12  ;;  %8682 = vsinq.f32 %v1250_v1  ;;  %v4667_v0 = vsub.s32 4, %v12572_v47 }
 0x372   : > { %v4669_v63 = vsel %vm11415_vm10, %v12568_v22, %v12573_v17  ;;  %vm2810_vm13 = vcmp.lt.s32.totalorder %v2809_v24, 2  ;;  %vm2811_vm6 = vcmp.eq.s32.totalorder %v2809_v24, 0  ;;  %vm2814_vm8 = vcmp.eq.s32.totalorder %v2809_v24, 2 }
 0x373   : > { %v8677_v31 = vpop.eup %8676  ;;  %8684 = vcosq.f32 %v4669_v63  ;;  %vm1153_vm2 = vcmp.lt.s32.totalorder %v1152_v14, 2  ;;  %vm1154_vm14 = vcmp.eq.s32.totalorder %v1152_v14, 0  ;;  %vm1157_vm12 = vcmp.eq.s32.totalorder %v1152_v14, 2 }
 0x374   : > { %v8679_v38 = vpop.eup %8678  ;;  %v1158_v27 = vxor.u32 2147483648, %v8677_v31  ;;  %v1256_v7 = vand.u32 3, %v1255_v56  ;;  %v2912_v41 = vand.u32 3, %v1251_v13  ;;  %v12575_v48 = vand.u32 2147483647, %v12574_v21 }
 0x375   : > { %v1155_v36 = vxor.u32 2147483648, %v8679_v38  ;;  %vm12578_vm1 = vcmp.lt.s32.totalorder %v12568_v22, 0  ;;  %8686 = vsinq.f32 %v4669_v63  ;;  %v4771_v13 = vsub.s32 4, %v12579_v40 }
 0x376   : > { %vm11436_vm15 = vcmp.le.f32.partialorder %v12575_v48, 0.7853982  ;;  %v2816_v33 = vsel %vm2814_vm8, %v1158_v27, %v8679_v38  ;;  %v1159_v1 = vsel %vm1157_vm12, %v1158_v27, %v8679_v38  ;;  %v4668_v30 = vsel %vm12578_vm1, %v4667_v0, %v12572_v47  ;;  %v12581_v0 = vld [vmem:[#allocation51_spill] sm:$0xff] }
 0x377   : > { %v2813_v45 = vsel %vm2811_vm6, %v8677_v31, %v1155_v36  ;;  %v1156_v55 = vsel %vm1154_vm14, %v8677_v31, %v1155_v36  ;;  %v4670_v43 = vsel %vm11415_vm10, 0, %v4668_v30  ;;  %vm12580_vm11 = vcmp.lt.s32.totalorder %v12574_v21, 0 }
 0x378   : > { %v2817_v61 = vsel %vm2810_vm13, %v2813_v45, %v2816_v33  ;;  %v1160_v56 = vsel %vm1153_vm2, %v1156_v55, %v1159_v1  ;;  %v4674_v17 = vadd.s32 3, %v4670_v43  ;;  %v6332_v48 = vand.u32 3, %v4670_v43 }
 0x379   : > { %v2818_v38 = vsel %vm1150_vm3, nan, %v2817_v61  ;;  %v11453_v47 = vsel %vm1150_vm3, nan, %v1160_v56  ;;  %v4772_v8 = vsel %vm12580_vm11, %v4771_v13, %v12579_v40  ;;  %v4773_v24 = vsel %vm11436_vm15, %v12574_v21, %v12581_v0  ;;  %v12582_v40 = vld [vmem:[#allocation39_spill] sm:$0xff] }
 0x37a   : > { %3774 = vrot.lane.b32.xlu0 %v2818_v38, %s8830_s17  ;;  %vm1254_vm5 = vweird.f32 %v12564_v18  ;;  %vm2913_vm0 = vcmp.lt.s32.totalorder %v2912_v41, 2  ;;  %vm2914_vm9 = vcmp.eq.s32.totalorder %v2912_v41, 0  ;;  %vm2917_vm10 = vcmp.eq.s32.totalorder %v2912_v41, 2  ;;  %v8681_v14 = vpop.eup %8680  ;;  %v12586_v56 = vld [vmem:[#allocation47_spill] sm:$0xff] }
 0x37b   : > { %vm1257_vm13 = vcmp.lt.s32.totalorder %v1256_v7, 2  ;;  %vm1258_vm3 = vcmp.eq.s32.totalorder %v1256_v7, 0  ;;  %v4774_v12 = vsel %vm11436_vm15, 0, %v4772_v8  ;;  %8688 = vcosq.f32 %v4773_v24  ;;  %v8683_v63 = vpop.eup %8682 }
 0x37c   : > { %vm1261_vm6 = vcmp.eq.s32.totalorder %v1256_v7, 2  ;;  %v1262_v31 = vxor.u32 2147483648, %v8681_v14  ;;  %vm4673_vm8 = vweird.f32 %v12568_v22  ;;  %v4675_v27 = vand.u32 3, %v4674_v17  ;;  %v12592_v22 = vld [vmem:[#allocation34_spill] sm:$0xff] }
 0x37d   : > { %vm6333_vm2 = vcmp.lt.s32.totalorder %v6332_v48, 2  ;;  %v8685_v36 = vpop.eup %8684  ;;  %v1259_v33 = vxor.u32 2147483648, %v8683_v63  ;;  %vm6334_vm14 = vcmp.eq.s32.totalorder %v6332_v48, 0  ;;  %vm6337_vm12 = vcmp.eq.s32.totalorder %v6332_v48, 2 }
 0x37e   : > { %8690 = vsinq.f32 %v4773_v24  ;;  %v1263_v1 = vsel %vm1261_vm6, %v1262_v31, %v8683_v63  ;;  %v2919_v30 = vsel %vm2917_vm10, %v1262_v31, %v8683_v63  ;;  %v4681_v45 = vxor.u32 2147483648, %v8685_v36 }
 0x37f   : > { %v4778_v55 = vadd.s32 3, %v4774_v12  ;;  %v1260_v35 = vsel %vm1258_vm3, %v8681_v14, %v1259_v33  ;;  %v2916_v43 = vsel %vm2914_vm9, %v8681_v14, %v1259_v33  ;;  %v12583_v13 = vand.u32 2147483647, %v12582_v40  ;;  %v8687_v38 = vpop.eup %8686 }
 0x380   : > { %v1352_v17 = vsub.s32 4, %v12586_v56  ;;  %v1264_v8 = vsel %vm1257_vm13, %v1260_v35, %v1263_v1  ;;  %v2920_v0 = vsel %vm2913_vm0, %v2916_v43, %v2919_v30  ;;  %vm4676_vm1 = vcmp.lt.s32.totalorder %v4675_v27, 2  ;;  %v12589_v43 = vld [vmem:[#allocation59_spill] sm:$0xff] }
 0x381   : > { %vm11472_vm15 = vcmp.le.f32.partialorder %v12583_v13, 0.7853982  ;;  %vm4680_vm11 = vcmp.eq.s32.totalorder %v4675_v27, 2  ;;  %v11481_v24 = vsel %vm1254_vm5, nan, %v1264_v8  ;;  %v2921_v14 = vsel %vm1254_vm5, nan, %v2920_v0 }
 0x382   : > { %12587 = vst [vmem:[#allocation10_spill] sm:$0xff] %v11481_v24  ;;  %v4678_v63 = vxor.u32 2147483648, %v8687_v38  ;;  %v6339_v31 = vsel %vm6337_vm12, %v4681_v45, %v8687_v38  ;;  %3776 = vrot.lane.b32.xlu1 %v2921_v14, %s8830_s17  ;;  %vm4677_vm9 = vcmp.eq.s32.totalorder %v4675_v27, 0  ;;  %v4682_v33 = vsel %vm4680_vm11, %v4681_v45, %v8687_v38 }
 0x383   : > { %v4779_v7 = vand.u32 3, %v4778_v55  ;;  %v6435_v1 = vand.u32 3, %v4774_v12  ;;  %vm12588_vm0 = vcmp.lt.s32.totalorder %v12582_v40, 0  ;;  %v1354_v18 = vsel %vm11472_vm15, %v12582_v40, %v12589_v43 }
 0x384   : > { %v6336_v41 = vsel %vm6334_vm14, %v8685_v36, %v4678_v63  ;;  %v4679_v30 = vsel %vm4677_vm9, %v8685_v36, %v4678_v63  ;;  %v1353_v35 = vsel %vm12588_vm0, %v1352_v17, %v12586_v56  ;;  %8692 = vcosq.f32 %v1354_v18  ;;  %v12591_v17 = vld [vmem:[#allocation44_spill] sm:$0xff] }
 0x385   : > { %v6340_v13 = vsel %vm6333_vm2, %v6336_v41, %v6339_v31  ;;  %v4683_v8 = vsel %vm4676_vm1, %v4679_v30, %v4682_v33  ;;  %v1355_v45 = vsel %vm11472_vm15, 0, %v1353_v35  ;;  %v8689_v12 = vpop.eup %8688  ;;  %8694 = vsinq.f32 %v1354_v18  ;;  %v12595_v41 = vld [vmem:[#allocation58_spill] sm:$0xff] }
 0x386   : > { %v6341_v55 = vsel %vm4673_vm8, nan, %v6340_v13  ;;  %v11504_v56 = vsel %vm4673_vm8, nan, %v4683_v8  ;;  %vm4777_vm5 = vweird.f32 %v12574_v21  ;;  %v4785_v48 = vxor.u32 2147483648, %v8689_v12  ;;  %v12596_v13 = vld [vmem:[#allocation46_spill] sm:$0xff] }
 0x387   : > { %12590 = vst [vmem:[#allocation6_spill] sm:$0xff] %v11504_v56  ;;  %7297 = vrot.lane.b32.xlu0 %v6341_v55, %s8830_s17  ;;  %vm6436_vm10 = vcmp.lt.s32.totalorder %v6435_v1, 2  ;;  %vm6437_vm13 = vcmp.eq.s32.totalorder %v6435_v1, 0  ;;  %vm4784_vm3 = vcmp.eq.s32.totalorder %v4779_v7, 2  ;;  %vm6440_vm6 = vcmp.eq.s32.totalorder %v6435_v1, 2  ;;  %v12602_v1 = vld [vmem:[#allocation64_spill] sm:$0xff] }
 0x388   : > { %v8691_v27 = vpop.eup %8690  ;;  %v1359_v61 = vadd.s32 3, %v1355_v45  ;;  %v1456_v38 = vsub.s32 4, %v12591_v17  ;;  %v12593_v31 = vand.u32 2147483647, %v12592_v22  ;;  %vm4780_vm2 = vcmp.lt.s32.totalorder %v4779_v7, 2 }
 0x389   : > { %v4782_v0 = vxor.u32 2147483648, %v8691_v27  ;;  %v4786_v14 = vsel %vm4784_vm3, %v4785_v48, %v8691_v27  ;;  %v6442_v63 = vsel %vm6440_vm6, %v4785_v48, %v8691_v27  ;;  %vm4781_vm14 = vcmp.eq.s32.totalorder %v4779_v7, 0 }
 0x38a   : > { %vm1371_vm8 = vcmp.le.f32.partialorder %v12593_v31, 0.7853982  ;;  %vm12594_vm12 = vcmp.lt.s32.totalorder %v12592_v22, 0  ;;  %v3015_v18 = vand.u32 3, %v1355_v45  ;;  %v12597_v8 = vand.u32 2147483647, %v12596_v13 }
 0x38b   : > { %v1457_v33 = vsel %vm12594_vm12, %v1456_v38, %v12591_v17  ;;  %v1458_v30 = vsel %vm1371_vm8, %v12592_v22, %v12595_v41  ;;  %v4783_v35 = vsel %vm4781_vm14, %v8689_v12, %v4782_v0  ;;  %v6439_v43 = vsel %vm6437_vm13, %v8689_v12, %v4782_v0  ;;  %v12601_v12 = vld [vmem:[#allocation53_spill] sm:$0xff] }
 0x38c   : > { %vm11518_vm15 = vcmp.le.f32.partialorder %v12597_v8, 0.7853982  ;;  %v4787_v48 = vsel %vm4780_vm2, %v4783_v35, %v4786_v14  ;;  %v6443_v27 = vsel %vm6436_vm10, %v6439_v43, %v6442_v63  ;;  %v1360_v7 = vand.u32 3, %v1359_v61  ;;  %v12603_v35 = vld [vmem:[#allocation43_spill] sm:$0xff] }
 0x38d   : > { %v1459_v31 = vsel %vm1371_vm8, 0, %v1457_v33  ;;  %v11525_v17 = vsel %vm4777_vm5, nan, %v4787_v48  ;;  %v6444_v38 = vsel %vm4777_vm5, nan, %v6443_v27  ;;  %8696 = vcosq.f32 %v1458_v30 }
 0x38e   : > { %12600 = vst [vmem:[#allocation22_spill] sm:$0xff] %v11525_v17  ;;  %v1463_v45 = vadd.s32 3, %v1459_v31  ;;  %7299 = vrot.lane.b32.xlu1 %v6444_v38, %s8830_s17  ;;  %vm1358_vm1 = vweird.f32 %v12582_v40  ;;  %8698 = vsinq.f32 %v1458_v30  ;;  %v4875_v0 = vsub.s32 4, %v12601_v12  ;;  %v8693_v14 = vpop.eup %8692 }
 0x38f   : > { %v4877_v61 = vsel %vm11518_vm15, %v12596_v13, %v12602_v1  ;;  %vm3016_vm11 = vcmp.lt.s32.totalorder %v3015_v18, 2  ;;  %vm3017_vm9 = vcmp.eq.s32.totalorder %v3015_v18, 0  ;;  %vm3020_vm0 = vcmp.eq.s32.totalorder %v3015_v18, 2  ;;  %v8695_v21 = vpop.eup %8694 }
 0x390   : > { %8700 = vcosq.f32 %v4877_v61  ;;  %vm1361_vm5 = vcmp.lt.s32.totalorder %v1360_v7, 2  ;;  %vm1362_vm10 = vcmp.eq.s32.totalorder %v1360_v7, 0  ;;  %vm1365_vm13 = vcmp.eq.s32.totalorder %v1360_v7, 2 }
 0x391   : > { %v1366_v63 = vxor.u32 2147483648, %v8693_v14  ;;  %v1363_v33 = vxor.u32 2147483648, %v8695_v21  ;;  %v1464_v41 = vand.u32 3, %v1463_v45  ;;  %v3118_v30 = vand.u32 3, %v1459_v31  ;;  %v12608_v31 = vld [vmem:[#allocation49_spill] sm:$0xff] }
 0x392   : > { %v12604_v43 = vand.u32 2147483647, %v12603_v35  ;;  %vm12607_vm6 = vcmp.lt.s32.totalorder %v12596_v13, 0  ;;  %8702 = vsinq.f32 %v4877_v61  ;;  %v4979_v36 = vsub.s32 4, %v12608_v31 }
 0x393   : > { %v3022_v48 = vsel %vm3020_vm0, %v1366_v63, %v8695_v21  ;;  %v1367_v27 = vsel %vm1365_vm13, %v1366_v63, %v8695_v21  ;;  %v4876_v38 = vsel %vm12607_vm6, %v4875_v0, %v12601_v12  ;;  %v3019_v1 = vsel %vm3017_vm9, %v8693_v14, %v1363_v33  ;;  %v12610_v0 = vld [vmem:[#allocation60_spill] sm:$0xff] }
 0x394   : > { %vm11538_vm3 = vcmp.le.f32.partialorder %v12604_v43, 0.7853982  ;;  %v1364_v2 = vsel %vm1362_vm10, %v8693_v14, %v1363_v33  ;;  %v4878_v45 = vsel %vm11518_vm15, 0, %v4876_v38  ;;  %v3023_v43 = vsel %vm3016_vm11, %v3019_v1, %v3022_v48  ;;  %v12611_v1 = vld [vmem:[#allocation52_spill] sm:$0xff] }
 0x395   : > { %v1368_v17 = vsel %vm1361_vm5, %v1364_v2, %v1367_v27  ;;  %v4882_v56 = vadd.s32 3, %v4878_v45  ;;  %v6538_v24 = vand.u32 3, %v4878_v45  ;;  %v3024_v21 = vsel %vm1358_vm1, nan, %v3023_v43 }
 0x396   : > { %v11555_v12 = vsel %vm1358_vm1, nan, %v1368_v17  ;;  %vm12609_vm8 = vcmp.lt.s32.totalorder %v12603_v35, 0  ;;  %v4981_v18 = vsel %vm11538_vm3, %v12603_v35, %v12610_v0  ;;  %3778 = vrot.lane.b32.xlu0 %v3024_v21, %s8830_s17  ;;  %vm1462_vm2 = vweird.f32 %v12592_v22 }
 0x397   : > { %v4980_v55 = vsel %vm12609_vm8, %v4979_v36, %v12608_v31  ;;  %vm3119_vm14 = vcmp.lt.s32.totalorder %v3118_v30, 2  ;;  %vm3120_vm12 = vcmp.eq.s32.totalorder %v3118_v30, 0  ;;  %vm3123_vm15 = vcmp.eq.s32.totalorder %v3118_v30, 2  ;;  %v8697_v2 = vpop.eup %8696  ;;  %v12620_v31 = vld [vmem:[#allocation55_spill] sm:$0xff] }
 0x398   : > { %vm1465_vm11 = vcmp.lt.s32.totalorder %v1464_v41, 2  ;;  %vm1466_vm1 = vcmp.eq.s32.totalorder %v1464_v41, 0  ;;  %v4982_v40 = vsel %vm11538_vm3, 0, %v4980_v55  ;;  %8704 = vcosq.f32 %v4981_v18  ;;  %v8699_v36 = vpop.eup %8698 }
 0x399   : > { %vm1469_vm9 = vcmp.eq.s32.totalorder %v1464_v41, 2  ;;  %v1470_v7 = vxor.u32 2147483648, %v8697_v2  ;;  %vm4881_vm0 = vweird.f32 %v12596_v13  ;;  %v4883_v17 = vand.u32 3, %v4882_v56  ;;  %v12615_v56 = vld [vmem:[#allocation57_spill] sm:$0xff]  ;;  %v12621_v13 = vld [vmem:[#allocation48_spill] sm:$0xff] }
 0x39a   : > { %vm6539_vm5 = vcmp.lt.s32.totalorder %v6538_v24, 2  ;;  %v8701_v61 = vpop.eup %8700  ;;  %v1467_v14 = vxor.u32 2147483648, %v8699_v36  ;;  %vm6540_vm10 = vcmp.eq.s32.totalorder %v6538_v24, 0  ;;  %vm6543_vm13 = vcmp.eq.s32.totalorder %v6538_v24, 2 }
 0x39b   : > { %8706 = vsinq.f32 %v4981_v18  ;;  %v1471_v63 = vsel %vm1469_vm9, %v1470_v7, %v8699_v36  ;;  %v3125_v33 = vsel %vm3123_vm15, %v1470_v7, %v8699_v36  ;;  %v4889_v48 = vxor.u32 2147483648, %v8701_v61 }
 0x39c   : > { %v4986_v27 = vadd.s32 3, %v4982_v40  ;;  %v1468_v8 = vsel %vm1466_vm1, %v8697_v2, %v1467_v14  ;;  %v3122_v38 = vsel %vm3120_vm12, %v8697_v2, %v1467_v14  ;;  %v12612_v45 = vand.u32 2147483647, %v12611_v1  ;;  %v8703_v21 = vpop.eup %8702 }
 0x39d   : > { %v1560_v43 = vsub.s32 4, %v12615_v56  ;;  %v1472_v55 = vsel %vm1465_vm11, %v1468_v8, %v1471_v63  ;;  %v3126_v0 = vsel %vm3119_vm14, %v3122_v38, %v3125_v33  ;;  %vm4884_vm6 = vcmp.lt.s32.totalorder %v4883_v17, 2  ;;  %v12617_v38 = vld [vmem:[#allocation66_spill] sm:$0xff] }
 0x39e   : > { %vm11574_vm3 = vcmp.le.f32.partialorder %v12612_v45, 0.7853982  ;;  %vm4888_vm8 = vcmp.eq.s32.totalorder %v4883_v17, 2  ;;  %v11583_v18 = vsel %vm1462_vm2, nan, %v1472_v55  ;;  %v3127_v2 = vsel %vm1462_vm2, nan, %v3126_v0 }
 0x39f   : > { %v4886_v36 = vxor.u32 2147483648, %v8703_v21  ;;  %v6545_v7 = vsel %vm6543_vm13, %v4889_v48, %v8703_v21  ;;  %3780 = vrot.lane.b32.xlu1 %v3127_v2, %s8830_s17  ;;  %vm4885_vm12 = vcmp.eq.s32.totalorder %v4883_v17, 0  ;;  %v4890_v14 = vsel %vm4888_vm8, %v4889_v48, %v8703_v21 }
 0x3a0   : > { %v4987_v41 = vand.u32 3, %v4986_v27  ;;  %v6641_v63 = vand.u32 3, %v4982_v40  ;;  %vm12616_vm14 = vcmp.lt.s32.totalorder %v12611_v1, 0  ;;  %v1562_v22 = vsel %vm11574_vm3, %v12611_v1, %v12617_v38 }
 0x3a1   : > { %v6542_v30 = vsel %vm6540_vm10, %v8701_v61, %v4886_v36  ;;  %v4887_v33 = vsel %vm4885_vm12, %v8701_v61, %v4886_v36  ;;  %v1561_v8 = vsel %vm12616_vm14, %v1560_v43, %v12615_v56  ;;  %8708 = vcosq.f32 %v1562_v22 }
 0x3a2   : > { %v6546_v45 = vsel %vm6539_vm5, %v6542_v30, %v6545_v7  ;;  %v4891_v55 = vsel %vm4884_vm6, %v4887_v33, %v4890_v14  ;;  %v1563_v48 = vsel %vm11574_vm3, 0, %v1561_v8  ;;  %v8705_v40 = vpop.eup %8704  ;;  %v12618_v61 = vand.u32 2147483647, %v11317_v6  ;;  %v12624_v30 = vld [vmem:[#allocation65_spill] sm:$0xff] }
 0x3a3   : > { %v12619_v27 = vcvt.s32.f32 %v11173_v49  ;;  %v6547_v56 = vsel %vm4881_vm0, nan, %v6546_v45  ;;  %v11611_v24 = vsel %vm4881_vm0, nan, %v4891_v55  ;;  %8710 = vsinq.f32 %v1562_v22 }
 0x3a4   : > { %7301 = vrot.lane.b32.xlu0 %v6547_v56, %s8830_s17  ;;  %vm4985_vm2 = vweird.f32 %v12603_v35  ;;  %v4993_v17 = vxor.u32 2147483648, %v8705_v40  ;;  %vm6642_vm15 = vcmp.lt.s32.totalorder %v6641_v63, 2  ;;  %vm6643_vm11 = vcmp.eq.s32.totalorder %v6641_v63, 0 }
 0x3a5   : > { %v11605_v21 = vmul.f32 %v12619_v27, %v12618_v61  ;;  %v8707_v6 = vpop.eup %8706  ;;  %vm4992_vm1 = vcmp.eq.s32.totalorder %v4987_v41, 2  ;;  %vm6646_vm9 = vcmp.eq.s32.totalorder %v6641_v63, 2  ;;  %v1567_v49 = vadd.s32 3, %v1563_v48 }
 0x3a6   : > { %v1664_v43 = vsub.s32 4, %v12620_v31  ;;  %v4990_v0 = vxor.u32 2147483648, %v8707_v6  ;;  %v4994_v2 = vsel %vm4992_vm1, %v4993_v17, %v8707_v6  ;;  %v6648_v36 = vsel %vm6646_vm9, %v4993_v17, %v8707_v6 }
 0x3a7   : > { %v12622_v7 = vand.u32 2147483647, %v12621_v13  ;;  %vm4988_vm5 = vcmp.lt.s32.totalorder %v4987_v41, 2  ;;  %vm4989_vm10 = vcmp.eq.s32.totalorder %v4987_v41, 0  ;;  %vm12623_vm13 = vcmp.lt.s32.totalorder %v12621_v13, 0 }
 0x3a8   : > { %v1665_v14 = vsel %vm12623_vm13, %v1664_v43, %v12620_v31  ;;  %v4991_v8 = vsel %vm4989_vm10, %v8705_v40, %v4990_v0  ;;  %v6645_v38 = vsel %vm6643_vm11, %v8705_v40, %v4990_v0  ;;  %v3221_v22 = vand.u32 3, %v1563_v48  ;;  %v12629_v40 = vld [vmem:[#allocation62_spill] sm:$0xff] }
 0x3a9   : > { %vm1579_vm0 = vcmp.le.f32.partialorder %v12622_v7, 0.7853982  ;;  %v12625_v45 = vand.u32 2147483647, %v10319_v11  ;;  %v4995_v61 = vsel %vm4988_vm5, %v4991_v8, %v4994_v2  ;;  %v6649_v27 = vsel %vm6642_vm15, %v6645_v38, %v6648_v36  ;;  %v12630_v7 = vld [vmem:[#allocation54_spill] sm:$0xff] }
 0x3aa   : > { %v1666_v33 = vsel %vm1579_vm0, %v12621_v13, %v12624_v30  ;;  %v1568_v41 = vand.u32 3, %v1567_v49  ;;  %v1667_v56 = vsel %vm1579_vm0, 0, %v1665_v14  ;;  %v11632_v17 = vsel %vm4985_vm2, nan, %v4995_v61 }
 0x3ab   : > { %vm11625_vm3 = vcmp.le.f32.partialorder %v12625_v45, 0.7853982  ;;  %12628 = vst [vmem:[#allocation8_spill] sm:$0xff] %v11632_v17  ;;  %v6650_v6 = vsel %vm4985_vm2, nan, %v6649_v27  ;;  %8712 = vcosq.f32 %v1666_v33  ;;  %v1671_v48 = vadd.s32 3, %v1667_v56  ;;  %v8709_v49 = vpop.eup %8708  ;;  %v12635_v27 = vld [vmem:[#allocation61_spill] sm:$0xff] }
 0x3ac   : > { %7303 = vrot.lane.b32.xlu1 %v6650_v6, %s8830_s17  ;;  %vm1566_vm6 = vweird.f32 %v12611_v1  ;;  %8714 = vsinq.f32 %v1666_v33  ;;  %v5083_v31 = vsub.s32 4, %v12629_v40  ;;  %v5085_v63 = vsel %vm11625_vm3, %v10319_v11, %v10838_v19 }
 0x3ad   : > { %vm3222_vm8 = vcmp.lt.s32.totalorder %v3221_v22, 2  ;;  %vm3223_vm12 = vcmp.eq.s32.totalorder %v3221_v22, 0  ;;  %vm3226_vm14 = vcmp.eq.s32.totalorder %v3221_v22, 2  ;;  %8716 = vcosq.f32 %v5085_v63  ;;  %v8711_v35 = vpop.eup %8710 }
 0x3ae   : > { %vm1569_vm2 = vcmp.lt.s32.totalorder %v1568_v41, 2  ;;  %vm1570_vm15 = vcmp.eq.s32.totalorder %v1568_v41, 0  ;;  %vm1573_vm11 = vcmp.eq.s32.totalorder %v1568_v41, 2  ;;  %v1574_v43 = vxor.u32 2147483648, %v8709_v49 }
 0x3af   : > { %v1571_v0 = vxor.u32 2147483648, %v8711_v35  ;;  %v1672_v2 = vand.u32 3, %v1671_v48  ;;  %v3324_v36 = vand.u32 3, %v1667_v56  ;;  %v12631_v14 = vand.u32 2147483647, %v12630_v7 }
 0x3b0   : > { %v3228_v19 = vsel %vm3226_vm14, %v1574_v43, %v8711_v35  ;;  %v1575_v33 = vsel %vm1573_vm11, %v1574_v43, %v8711_v35  ;;  %vm12634_vm9 = vcmp.lt.s32.totalorder %v10319_v11, 0  ;;  %8718 = vsinq.f32 %v5085_v63 }
 0x3b1   : > { %vm11645_vm1 = vcmp.le.f32.partialorder %v12631_v14, 0.7853982  ;;  %v5084_v8 = vsel %vm12634_vm9, %v5083_v31, %v12629_v40  ;;  %v3225_v38 = vsel %vm3223_vm12, %v8709_v49, %v1571_v0  ;;  %v1572_v45 = vsel %vm1570_vm15, %v8709_v49, %v1571_v0  ;;  %v12637_v31 = vld [vmem:[#allocation67_spill] sm:$0xff] }
 0x3b2   : > { %v5086_v61 = vsel %vm11625_vm3, 0, %v5084_v8  ;;  %v5187_v56 = vsub.s32 4, %v12635_v27  ;;  %v3229_v6 = vsel %vm3222_vm8, %v3225_v38, %v3228_v19  ;;  %v1576_v48 = vsel %vm1569_vm2, %v1572_v45, %v1575_v33 }
 0x3b3   : > { %v5090_v14 = vadd.s32 3, %v5086_v61  ;;  %v6744_v17 = vand.u32 3, %v5086_v61  ;;  %v3230_v35 = vsel %vm1566_vm6, nan, %v3229_v6  ;;  %v11662_v40 = vsel %vm1566_vm6, nan, %v1576_v48  ;;  %v12641_v6 = vld [vmem:[#allocation68_spill] sm:$0xff] }
 0x3b4   : > { %vm12636_vm0 = vcmp.lt.s32.totalorder %v12630_v7, 0  ;;  %v5189_v22 = vsel %vm11645_vm1, %v12630_v7, %v12637_v31  ;;  %3782 = vrot.lane.b32.xlu0 %v3230_v35, %s8830_s17  ;;  %vm1670_vm5 = vweird.f32 %v12621_v13  ;;  %vm3325_vm10 = vcmp.lt.s32.totalorder %v3324_v36, 2 }
 0x3b5   : > { %v5188_v55 = vsel %vm12636_vm0, %v5187_v56, %v12635_v27  ;;  %vm3326_vm13 = vcmp.eq.s32.totalorder %v3324_v36, 0  ;;  %vm3329_vm3 = vcmp.eq.s32.totalorder %v3324_v36, 2  ;;  %v8713_v41 = vpop.eup %8712  ;;  %vm1673_vm8 = vcmp.lt.s32.totalorder %v1672_v2, 2  ;;  %v12643_v56 = vld [vmem:[#allocation63_spill] sm:$0xff] }
 0x3b6   : > { %vm1674_vm6 = vcmp.eq.s32.totalorder %v1672_v2, 0  ;;  %v5190_v1 = vsel %vm11645_vm1, 0, %v5188_v55  ;;  %8720 = vcosq.f32 %v5189_v22  ;;  %v8715_v63 = vpop.eup %8714  ;;  %vm1677_vm12 = vcmp.eq.s32.totalorder %v1672_v2, 2 }
 0x3b7   : > { %v1678_v49 = vxor.u32 2147483648, %v8713_v41  ;;  %vm5089_vm14 = vweird.f32 %v10319_v11  ;;  %v5091_v43 = vand.u32 3, %v5090_v14  ;;  %vm6745_vm2 = vcmp.lt.s32.totalorder %v6744_v17, 2  ;;  %v8717_v0 = vpop.eup %8716 }
 0x3b8   : > { %v1675_v19 = vxor.u32 2147483648, %v8715_v63  ;;  %vm6746_vm15 = vcmp.eq.s32.totalorder %v6744_v17, 0  ;;  %vm6749_vm11 = vcmp.eq.s32.totalorder %v6744_v17, 2  ;;  %8722 = vsinq.f32 %v5189_v22 }
 0x3b9   : > { %v1679_v33 = vsel %vm1677_vm12, %v1678_v49, %v8715_v63  ;;  %v3331_v8 = vsel %vm3329_vm3, %v1678_v49, %v8715_v63  ;;  %v5097_v38 = vxor.u32 2147483648, %v8717_v0  ;;  %v5194_v45 = vadd.s32 3, %v5190_v1 }
 0x3ba   : > { %v1676_v30 = vsel %vm1674_vm6, %v8713_v41, %v1675_v19  ;;  %v3328_v61 = vsel %vm3326_vm13, %v8713_v41, %v1675_v19  ;;  %v12638_v27 = vand.u32 2147483647, %v10505_v57  ;;  %v1768_v48 = vsub.s32 4, %v12641_v6  ;;  %v8719_v14 = vpop.eup %8718 }
 0x3bb   : > { %v1680_v35 = vsel %vm1673_vm8, %v1676_v30, %v1679_v33  ;;  %v3332_v55 = vsel %vm3325_vm10, %v3328_v61, %v3331_v8  ;;  %vm5092_vm9 = vcmp.lt.s32.totalorder %v5091_v43, 2  ;;  %vm5096_vm0 = vcmp.eq.s32.totalorder %v5091_v43, 2 }
 0x3bc   : > { %vm11681_vm1 = vcmp.le.f32.partialorder %v12638_v27, 0.7853982  ;;  %v11690_v31 = vsel %vm1670_vm5, nan, %v1680_v35  ;;  %v3333_v22 = vsel %vm1670_vm5, nan, %v3332_v55  ;;  %v5094_v41 = vxor.u32 2147483648, %v8719_v14 }
 0x3bd   : > { %v6751_v63 = vsel %vm6749_vm11, %v5097_v38, %v8719_v14  ;;  %3784 = vrot.lane.b32.xlu1 %v3333_v22, %s8830_s17  ;;  %vm5093_vm13 = vcmp.eq.s32.totalorder %v5091_v43, 0  ;;  %v5098_v49 = vsel %vm5096_vm0, %v5097_v38, %v8719_v14  ;;  %v5195_v2 = vand.u32 3, %v5194_v45 }
 0x3be   : > { %v6847_v19 = vand.u32 3, %v5190_v1  ;;  %v6748_v36 = vsel %vm6746_vm15, %v8717_v0, %v5094_v41  ;;  %v5095_v33 = vsel %vm5093_vm13, %v8717_v0, %v5094_v41  ;;  %vm12642_vm10 = vcmp.lt.s32.totalorder %v10505_v57, 0 }
 0x3bf   : > { %v1769_v8 = vsel %vm12642_vm10, %v1768_v48, %v12641_v6  ;;  %v1770_v13 = vsel %vm11681_vm1, %v10505_v57, %v11080_v50  ;;  %v6752_v30 = vsel %vm6745_vm2, %v6748_v36, %v6751_v63  ;;  %v5099_v61 = vsel %vm5092_vm9, %v5095_v33, %v5098_v49 }
 0x3c0   : > { %v1771_v38 = vsel %vm11681_vm1, 0, %v1769_v8  ;;  %8724 = vcosq.f32 %v1770_v13  ;;  %v8721_v1 = vpop.eup %8720  ;;  %v5497_v0 = vxor.u32 2147483648, %v11605_v21  ;;  %v6753_v45 = vsel %vm5089_vm14, nan, %v6752_v30 }
 0x3c1   : > { %v11713_v27 = vsel %vm5089_vm14, nan, %v5099_v61  ;;  %8726 = vsinq.f32 %v1770_v13  ;;  %7305 = vrot.lane.b32.xlu0 %v6753_v45, %s8830_s17  ;;  %vm5193_vm5 = vweird.f32 %v12630_v7  ;;  %v5201_v50 = vxor.u32 2147483648, %v8721_v1 }
 0x3c2   : > { %vm6848_vm3 = vcmp.lt.s32.totalorder %v6847_v19, 2  ;;  %vm6849_vm8 = vcmp.eq.s32.totalorder %v6847_v19, 0  ;;  %v8723_v17 = vpop.eup %8722  ;;  %vm5200_vm6 = vcmp.eq.s32.totalorder %v5195_v2, 2  ;;  %vm6852_vm12 = vcmp.eq.s32.totalorder %v6847_v19, 2 }
 0x3c3   : > { %v1775_v43 = vadd.s32 3, %v1771_v38  ;;  %v1872_v6 = vsub.s32 4, %v12643_v56  ;;  %v5198_v48 = vxor.u32 2147483648, %v8723_v17  ;;  %v5202_v14 = vsel %vm5200_vm6, %v5201_v50, %v8723_v17 }
 0x3c4   : > { %v6854_v35 = vsel %vm6852_vm12, %v5201_v50, %v8723_v17  ;;  %v12644_v11 = vand.u32 2147483647, %v10463_v26  ;;  %vm5196_vm2 = vcmp.lt.s32.totalorder %v5195_v2, 2  ;;  %vm5197_vm15 = vcmp.eq.s32.totalorder %v5195_v2, 0 }
 0x3c5   : > { %vm12645_vm11 = vcmp.lt.s32.totalorder %v10463_v26, 0  ;;  %v5199_v41 = vsel %vm5197_vm15, %v8721_v1, %v5198_v48  ;;  %v6851_v63 = vsel %vm6849_vm8, %v8721_v1, %v5198_v48  ;;  %v3427_v49 = vand.u32 3, %v1771_v38  ;;  %v12649_v1 = vld [vmem:[#allocation70_spill] sm:$0xff] }
 0x3c6   : > { %vm1787_vm14 = vcmp.le.f32.partialorder %v12644_v11, 0.7853982  ;;  %v1873_v55 = vsel %vm12645_vm11, %v1872_v6, %v12643_v56  ;;  %v12646_v36 = vand.u32 2147483647, %v10619_v46  ;;  %v5203_v8 = vsel %vm5196_vm2, %v5199_v41, %v5202_v14 }
 0x3c7   : > { %v1874_v22 = vsel %vm1787_vm14, %v10463_v26, %v10891_v25  ;;  %v6855_v13 = vsel %vm6848_vm3, %v6851_v63, %v6854_v35  ;;  %v1776_v2 = vand.u32 3, %v1775_v43  ;;  %v1875_v30 = vsel %vm1787_vm14, 0, %v1873_v55  ;;  %v12653_v63 = vld [vmem:[#allocation69_spill] sm:$0xff] }
 0x3c8   : > { %vm11727_vm1 = vcmp.le.f32.partialorder %v12646_v36, 0.7853982  ;;  %v11734_v61 = vsel %vm5193_vm5, nan, %v5203_v8  ;;  %v6856_v25 = vsel %vm5193_vm5, nan, %v6855_v13  ;;  %8728 = vcosq.f32 %v1874_v22 }
 0x3c9   : > { %v1879_v38 = vadd.s32 3, %v1875_v30  ;;  %7307 = vrot.lane.b32.xlu1 %v6856_v25, %s8830_s17  ;;  %vm1774_vm9 = vweird.f32 %v10505_v57  ;;  %8730 = vsinq.f32 %v1874_v22  ;;  %v5291_v45 = vsub.s32 4, %v12649_v1 }
 0x3ca   : > { %v5293_v19 = vsel %vm11727_vm1, %v10619_v46, %v11291_v44  ;;  %v8725_v50 = vpop.eup %8724  ;;  %vm3428_vm0 = vcmp.lt.s32.totalorder %v3427_v49, 2  ;;  %vm3429_vm13 = vcmp.eq.s32.totalorder %v3427_v49, 0  ;;  %vm3432_vm10 = vcmp.eq.s32.totalorder %v3427_v49, 2 }
 0x3cb   : > { %8732 = vcosq.f32 %v5293_v19  ;;  %v8727_v7 = vpop.eup %8726  ;;  %vm1777_vm5 = vcmp.lt.s32.totalorder %v1776_v2, 2  ;;  %vm1778_vm3 = vcmp.eq.s32.totalorder %v1776_v2, 0  ;;  %vm1781_vm8 = vcmp.eq.s32.totalorder %v1776_v2, 2 }
 0x3cc   : > { %v1782_v17 = vxor.u32 2147483648, %v8725_v50  ;;  %v1779_v43 = vxor.u32 2147483648, %v8727_v7  ;;  %v1880_v56 = vand.u32 3, %v1879_v38  ;;  %v3530_v6 = vand.u32 3, %v1875_v30 }
 0x3cd   : > { %v12650_v48 = vand.u32 2147483647, %v10582_v60  ;;  %v5292_v11 = vsel %vm5207_vm4, %v5291_v45, %v12649_v1  ;;  %8734 = vsinq.f32 %v5293_v19  ;;  %v5395_v36 = vsub.s32 4, %v12653_v63 }
 0x3ce   : > { %v3434_v44 = vsel %vm3432_vm10, %v1782_v17, %v8727_v7  ;;  %v1783_v35 = vsel %vm1781_vm8, %v1782_v17, %v8727_v7  ;;  %v3431_v55 = vsel %vm3429_vm13, %v8725_v50, %v1779_v43  ;;  %v1780_v22 = vsel %vm1778_vm3, %v8725_v50, %v1779_v43 }
 0x3cf   : > { %vm11747_vm6 = vcmp.le.f32.partialorder %v12650_v48, 0.7853982  ;;  %v5294_v41 = vsel %vm11727_vm1, 0, %v5292_v11  ;;  %v3435_v8 = vsel %vm3428_vm0, %v3431_v55, %v3434_v44  ;;  %v1784_v13 = vsel %vm1777_vm5, %v1780_v22, %v1783_v35 }
 0x3d0   : > { %v5298_v30 = vadd.s32 3, %v5294_v41  ;;  %v6950_v25 = vand.u32 3, %v5294_v41  ;;  %v3436_v38 = vsel %vm1774_vm9, nan, %v3435_v8  ;;  %v11764_v1 = vsel %vm1774_vm9, nan, %v1784_v13 }
 0x3d1   : > { %vm12654_vm4 = vcmp.lt.s32.totalorder %v10582_v60, 0  ;;  %v5397_v49 = vsel %vm11747_vm6, %v10582_v60, %v11098_v16  ;;  %3786 = vrot.lane.b32.xlu0 %v3436_v38, %s8830_s17  ;;  %vm1878_vm12 = vweird.f32 %v10463_v26  ;;  %vm3531_vm14 = vcmp.lt.s32.totalorder %v3530_v6, 2 }
 0x3d2   : > { %v5396_v33 = vsel %vm12654_vm4, %v5395_v36, %v12653_v63  ;;  %vm3532_vm2 = vcmp.eq.s32.totalorder %v3530_v6, 0  ;;  %vm3535_vm15 = vcmp.eq.s32.totalorder %v3530_v6, 2  ;;  %v8729_v2 = vpop.eup %8728  ;;  %vm1881_vm11 = vcmp.lt.s32.totalorder %v1880_v56, 2 }
 0x3d3   : > { %vm1882_vm1 = vcmp.eq.s32.totalorder %v1880_v56, 0  ;;  %v5398_v57 = vsel %vm11747_vm6, 0, %v5396_v33  ;;  %8736 = vcosq.f32 %v5397_v49  ;;  %v8731_v45 = vpop.eup %8730  ;;  %vm5415_vm9 = vcmp.lt.s32.totalorder %v10897_v4, 0  ;;  %v11798_v33 = vpop.permute.xlu0 %3762 }
 0x3d4   : > { %vm1885_vm0 = vcmp.eq.s32.totalorder %v1880_v56, 2  ;;  %v1886_v19 = vxor.u32 2147483648, %v8729_v2  ;;  %vm5297_vm13 = vweird.f32 %v10619_v46  ;;  %v5299_v16 = vand.u32 3, %v5298_v30 }
 0x3d5   : > { %vm6951_vm10 = vcmp.lt.s32.totalorder %v6950_v25, 2  ;;  %v8733_v50 = vpop.eup %8732  ;;  %v1883_v7 = vxor.u32 2147483648, %v8731_v45  ;;  %vm6952_vm5 = vcmp.eq.s32.totalorder %v6950_v25, 0  ;;  %vm6955_vm3 = vcmp.eq.s32.totalorder %v6950_v25, 2 }
 0x3d6   : > { %8738 = vsinq.f32 %v5397_v49  ;;  %v1887_v17 = vsel %vm1885_vm0, %v1886_v19, %v8731_v45  ;;  %v3537_v43 = vsel %vm3535_vm15, %v1886_v19, %v8731_v45  ;;  %v5305_v48 = vxor.u32 2147483648, %v8733_v50  ;;  %v11800_v49 = vpop.permute.xlu1 %3764 }
 0x3d7   : > { %v5402_v14 = vadd.s32 3, %v5398_v57  ;;  %v1884_v44 = vsel %vm1882_vm1, %v8729_v2, %v1883_v7  ;;  %v3534_v35 = vsel %vm3532_vm2, %v8729_v2, %v1883_v7  ;;  %v12655_v11 = vand.u32 2147483647, %v10666_v5  ;;  %v8735_v41 = vpop.eup %8734 }
 0x3d8   : > { %v1976_v22 = vsub.s32 4, %v10930_v28  ;;  %v1888_v63 = vsel %vm1881_vm11, %v1884_v44, %v1887_v17  ;;  %v3538_v36 = vsel %vm3531_vm14, %v3534_v35, %v3537_v43  ;;  %vm5300_vm6 = vcmp.lt.s32.totalorder %v5299_v16, 2  ;;  %v11829_v44 = vpop.permute.xlu0 %7285 }
 0x3d9   : > { %vm11784_vm8 = vcmp.le.f32.partialorder %v12655_v11, 0.7853982  ;;  %vm5304_vm4 = vcmp.eq.s32.totalorder %v5299_v16, 2  ;;  %v11793_v8 = vsel %vm1878_vm12, nan, %v1888_v63  ;;  %v3539_v13 = vsel %vm1878_vm12, nan, %v3538_v36 }
 0x3da   : > { %v5302_v30 = vxor.u32 2147483648, %v8735_v41  ;;  %v6957_v38 = vsel %vm6955_vm3, %v5305_v48, %v8735_v41  ;;  %3788 = vrot.lane.b32.xlu1 %v3539_v13, %s8830_s17  ;;  %vm5301_vm2 = vcmp.eq.s32.totalorder %v5299_v16, 0  ;;  %v5306_v56 = vsel %vm5304_vm4, %v5305_v48, %v8735_v41  ;;  %v11831_v35 = vpop.permute.xlu1 %7287 }
 0x3db   : > { %v5403_v6 = vand.u32 3, %v5402_v14  ;;  %v7053_v2 = vand.u32 3, %v5398_v57  ;;  %vm12658_vm14 = vcmp.lt.s32.totalorder %v10666_v5, 0  ;;  %v1978_v7 = vsel %vm11784_vm8, %v10666_v5, %v11305_v58 }
 0x3dc   : > { %v6954_v45 = vsel %vm6952_vm5, %v8733_v50, %v5302_v30  ;;  %v5303_v19 = vsel %vm5301_vm2, %v8733_v50, %v5302_v30  ;;  %v1977_v26 = vsel %vm12658_vm14, %v1976_v22, %v10930_v28  ;;  %8740 = vcosq.f32 %v1978_v7 }
 0x3dd   : > { %v6958_v17 = vsel %vm6951_vm10, %v6954_v45, %v6957_v38  ;;  %v5307_v43 = vsel %vm5300_vm6, %v5303_v19, %v5306_v56  ;;  %v1979_v48 = vsel %vm11784_vm8, 0, %v1977_v26  ;;  %v8737_v57 = vpop.eup %8736  ;;  %v5498_v28 = vsel %vm5415_vm9, %v5497_v0, %v11605_v21  ;;  %v12659_v21 = vld [vmem:[#allocation71_spill] sm:$0xff] }
 0x3de   : > { %v6959_v50 = vsel %vm5297_vm13, nan, %v6958_v17  ;;  %v11824_v58 = vsel %vm5297_vm13, nan, %v5307_v43  ;;  %8742 = vsinq.f32 %v1978_v7  ;;  %vm5401_vm12 = vweird.f32 %v10582_v60 }
 0x3df   : > { %7309 = vrot.lane.b32.xlu0 %v6959_v50, %s8830_s17  ;;  %v5409_v25 = vxor.u32 2147483648, %v8737_v57  ;;  %vm7054_vm15 = vcmp.lt.s32.totalorder %v7053_v2, 2  ;;  %vm7055_vm11 = vcmp.eq.s32.totalorder %v7053_v2, 0  ;;  %vm5408_vm1 = vcmp.eq.s32.totalorder %v5403_v6, 2  ;;  %v11863_v50 = vpop.permute.xlu1 %3768 }
 0x3e0   : > { %v8739_v16 = vpop.eup %8738  ;;  %vm7058_vm0 = vcmp.eq.s32.totalorder %v7053_v2, 2  ;;  %v1983_v14 = vadd.s32 3, %v1979_v48  ;;  %v2080_v0 = vsub.s32 4, %v12659_v21  ;;  %v12660_v22 = vand.u32 2147483647, %v10661_v62 }
 0x3e1   : > { %v5406_v46 = vxor.u32 2147483648, %v8739_v16  ;;  %v5410_v11 = vsel %vm5408_vm1, %v5409_v25, %v8739_v16  ;;  %v7060_v55 = vsel %vm7058_vm0, %v5409_v25, %v8739_v16  ;;  %vm5404_vm10 = vcmp.lt.s32.totalorder %v5403_v6, 2 }
 0x3e2   : > { %vm1995_vm13 = vcmp.le.f32.partialorder %v12660_v22, 0.7853982  ;;  %vm5405_vm5 = vcmp.eq.s32.totalorder %v5403_v6, 0  ;;  %vm12661_vm3 = vcmp.lt.s32.totalorder %v10661_v62, 0  ;;  %v3633_v30 = vand.u32 3, %v1979_v48 }
 0x3e3   : > { %v2081_v41 = vsel %vm12661_vm3, %v2080_v0, %v12659_v21  ;;  %v2082_v63 = vsel %vm1995_vm13, %v10661_v62, %v11298_v39  ;;  %v5407_v36 = vsel %vm5405_vm5, %v8737_v57, %v5406_v46  ;;  %v7057_v13 = vsel %vm7055_vm11, %v8737_v57, %v5406_v46  ;;  %v11861_v57 = vpop.permute.xlu0 %3766 }
 0x3e4   : > { %v12662_v38 = vand.u32 2147483647, %v10897_v4  ;;  %v5411_v45 = vsel %vm5404_vm10, %v5407_v36, %v5410_v11  ;;  %v7061_v6 = vsel %vm7054_vm15, %v7057_v13, %v7060_v55  ;;  %v1984_v19 = vand.u32 3, %v1983_v14 }
 0x3e5   : > { %v2083_v26 = vsel %vm1995_vm13, 0, %v2081_v41  ;;  %v11850_v7 = vsel %vm5401_vm12, nan, %v5411_v45  ;;  %v7062_v39 = vsel %vm5401_vm12, nan, %v7061_v6  ;;  %8744 = vcosq.f32 %v2082_v63 }
 0x3e6   : > { %vm11843_vm8 = vcmp.le.f32.partialorder %v12662_v38, 0.7853982  ;;  %v2087_v17 = vadd.s32 3, %v2083_v26  ;;  %7311 = vrot.lane.b32.xlu1 %v7062_v39, %s8830_s17  ;;  %8746 = vsinq.f32 %v2082_v63  ;;  %v11855_v43 = vand.u32 3, %v2083_v26  ;;  %v8741_v25 = vpop.eup %8740  ;;  %v11888_v26 = vpop.permute.xlu1 %7291 }
 0x3e7   : > { %v5499_v48 = vsub.s32 4, %v11082_v9  ;;  %v5501_v2 = vsel %vm11843_vm8, %v10897_v4, %v5498_v28  ;;  %vm1982_vm6 = vweird.f32 %v10666_v5  ;;  %vm3634_vm4 = vcmp.lt.s32.totalorder %v3633_v30, 2 }
 0x3e8   : > { %vm3635_vm2 = vcmp.eq.s32.totalorder %v3633_v30, 0  ;;  %8748 = vcosq.f32 %v5501_v2  ;;  %v8743_v60 = vpop.eup %8742  ;;  %vm1985_vm14 = vcmp.lt.s32.totalorder %v1984_v19, 2  ;;  %vm1986_vm12 = vcmp.eq.s32.totalorder %v1984_v19, 0 }
 0x3e9   : > { %v1990_v16 = vxor.u32 2147483648, %v8741_v25  ;;  %vm3638_vm15 = vcmp.eq.s32.totalorder %v3633_v30, 2  ;;  %v1987_v14 = vxor.u32 2147483648, %v8743_v60  ;;  %vm1989_vm11 = vcmp.eq.s32.totalorder %v1984_v19, 2 }
 0x3ea   : > { %v2088_v21 = vand.u32 3, %v2087_v17  ;;  %v12665_v28 = vand.u32 2147483647, %v10707_v53  ;;  %vm3738_vm0 = vcmp.eq.s32.totalorder %v11855_v43, 0  ;;  %v5500_v55 = vsel %vm5415_vm9, %v5499_v48, %v11082_v9  ;;  %v11886_v9 = vpop.permute.xlu0 %7289 }
 0x3eb   : > { %v3640_v46 = vsel %vm3638_vm15, %v1990_v16, %v8743_v60  ;;  %v1991_v11 = vsel %vm1989_vm11, %v1990_v16, %v8743_v60  ;;  %8750 = vsinq.f32 %v5501_v2  ;;  %v3637_v22 = vsel %vm3635_vm2, %v8741_v25, %v1987_v14 }
 0x3ec   : > { %vm11868_vm1 = vcmp.le.f32.partialorder %v12665_v28, 0.7853982  ;;  %v1988_v41 = vsel %vm1986_vm12, %v8741_v25, %v1987_v14  ;;  %vm3737_vm13 = vcmp.lt.s32.totalorder %v11855_v43, 2  ;;  %v5502_v63 = vsel %vm11843_vm8, 0, %v5500_v55 }
 0x3ed   : > { %v5603_v36 = vsub.s32 4, %v11002_v29  ;;  %v3641_v13 = vsel %vm3634_vm4, %v3637_v22, %v3640_v46  ;;  %v1992_v38 = vsel %vm1985_vm14, %v1988_v41, %v1991_v11  ;;  %vm2086_vm10 = vweird.f32 %v10661_v62  ;;  %v11917_v11 = vpop.permute.xlu1 %3772  ;;  %v7351_v62 = vld [vmem:[%s12223_s3 + $0x10] sm:$0xff] }
 0x3ee   : > { %v5506_v45 = vadd.s32 3, %v5502_v63  ;;  %v11884_v6 = vand.u32 3, %v5502_v63  ;;  %v3642_v39 = vsel %vm1982_vm6, nan, %v3641_v13  ;;  %v11894_v56 = vsel %vm1982_vm6, nan, %v1992_v38  ;;  %v11915_v46 = vpop.permute.xlu0 %3770 }
 0x3ef   : > { %v5604_v30 = vsel %vm5519_vm7, %v5603_v36, %v11002_v29  ;;  %v5605_v19 = vsel %vm11868_vm1, %v10707_v53, %v11313_v23  ;;  %3790 = vrot.lane.b32.xlu0 %v3642_v39, %s8830_s17  ;;  %vm2089_vm9 = vcmp.lt.s32.totalorder %v2088_v21, 2  ;;  %vm2090_vm5 = vcmp.eq.s32.totalorder %v2088_v21, 0  ;;  %v8745_v48 = vpop.eup %8744 }
 0x3f0   : > { %vm3741_vm3 = vcmp.eq.s32.totalorder %v11855_v43, 2  ;;  %v5507_v17 = vand.u32 3, %v5506_v45  ;;  %vm2093_vm8 = vcmp.eq.s32.totalorder %v2088_v21, 2  ;;  %vm7157_vm6 = vcmp.lt.s32.totalorder %v11884_v6, 2  ;;  %v8747_v29 = vpop.eup %8746  ;;  %v7349_v43 = vld [vmem:[%s12223_s3] sm:$0xff] }
 0x3f1   : > { %v5606_v5 = vsel %vm11868_vm1, 0, %v5604_v30  ;;  %8752 = vcosq.f32 %v5605_v19  ;;  %v2094_v2 = vxor.u32 2147483648, %v8745_v48  ;;  %vm5505_vm7 = vweird.f32 %v10897_v4  ;;  %v7509_v4 = vld [vmem:[%s12225_s5 + $0x18] sm:$0xff] }
 0x3f2   : > { %vm7158_vm4 = vcmp.eq.s32.totalorder %v11884_v6, 0  ;;  %vm7161_vm2 = vcmp.eq.s32.totalorder %v11884_v6, 2  ;;  %vm3810_vm14 = vcmask 130048   ;;  %v8749_v23 = vpop.eup %8748  ;;  %v2091_v25 = vxor.u32 2147483648, %v8747_v29 }
 0x3f3   : > { %vm5508_vm12 = vcmp.lt.s32.totalorder %v5507_v17, 2  ;;  %8754 = vsinq.f32 %v5605_v19  ;;  %v5610_v60 = vadd.s32 3, %v5606_v5  ;;  %v2095_v16 = vsel %vm2093_vm8, %v2094_v2, %v8747_v29  ;;  %v7350_v19 = vld [vmem:[%s12223_s3 + $0x8] sm:$0xff] }
 0x3f4   : > { %v3743_v14 = vsel %vm3741_vm3, %v2094_v2, %v8747_v29  ;;  %v5513_v28 = vxor.u32 2147483648, %v8749_v23  ;;  %v11913_v0 = vand.u32 3, %v5606_v5  ;;  %v2092_v55 = vsel %vm2090_vm5, %v8745_v48, %v2091_v25  ;;  %v7352_v2 = vld [vmem:[%s12223_s3 + $0x18] sm:$0xff] }
 0x3f5   : > { %v3740_v22 = vsel %vm3738_vm0, %v8745_v48, %v2091_v25  ;;  %vm5509_vm15 = vcmp.eq.s32.totalorder %v5507_v17, 0  ;;  %v11922_v41 = vand.u32 3, %v5610_v60  ;;  %v8751_v63 = vpop.eup %8750  ;;  %v2096_v36 = vsel %vm2089_vm9, %v2092_v55, %v2095_v16  ;;  %v7506_v25 = vld [vmem:[%s12225_s5] sm:$0xff]  ;;  %v7296_v16 = vpop.permute.xlu1 %7295 }
 0x3f6   : > { %v3744_v13 = vsel %vm3737_vm13, %v3740_v22, %v3743_v14  ;;  %vm5512_vm11 = vcmp.eq.s32.totalorder %v5507_v17, 2  ;;  %v3811_v38 = vsel %vm3810_vm14, %v11064_v54, %v11798_v33  ;;  %v11932_v45 = vsel %vm2086_vm10, nan, %v2096_v36 }
 0x3f7   : > { %v3745_v39 = vsel %vm2086_vm10, nan, %v3744_v13  ;;  %v5510_v30 = vxor.u32 2147483648, %v8751_v63  ;;  %v7163_v21 = vsel %vm7161_vm2, %v5513_v28, %v8751_v63  ;;  %v5514_v54 = vsel %vm5512_vm11, %v5513_v28, %v8751_v63  ;;  %v7508_v63 = vld [vmem:[%s12225_s5 + $0x10] sm:$0xff] }
 0x3f8   : > { %3792 = vrot.lane.b32.xlu1 %v3745_v39, %s8830_s17  ;;  %vm5612_vm1 = vcmp.lt.s32.totalorder %v11922_v41, 2  ;;  %vm7260_vm0 = vcmp.lt.s32.totalorder %v11913_v0, 2  ;;  %vm7261_vm13 = vcmp.eq.s32.totalorder %v11913_v0, 0  ;;  %vm7264_vm10 = vcmp.eq.s32.totalorder %v11913_v0, 2 }
 0x3f9   : > { %v7160_v33 = vsel %vm7158_vm4, %v8749_v23, %v5510_v30  ;;  %v5511_v48 = vsel %vm5509_vm15, %v8749_v23, %v5510_v30  ;;  %v3812_v5 = vsel %vm3810_vm14, %v11149_v20, %v11800_v49  ;;  %v7333_v29 = vsel %vm3810_vm14, %v11137_v10, %v11829_v44  ;;  %v7507_v23 = vld [vmem:[%s12225_s5 + $0x8] sm:$0xff]  ;;  %v7294_v44 = vpop.permute.xlu0 %7293 }
 0x3fa   : > { %v7164_v60 = vsel %vm7157_vm6, %v7160_v33, %v7163_v21  ;;  %v5515_v20 = vsel %vm5508_vm12, %v5511_v48, %v5514_v54  ;;  %v8436_v49 = vpack.c.bf16 %v7350_v19, %v7349_v43  ;;  %v7334_v10 = vsel %vm3810_vm14, %v11169_v42, %v11831_v35  ;;  %v3777_v33 = vpop.permute.xlu1 %3776 }
 0x3fb   : > { %v8753_v14 = vpop.eup %8752  ;;  %v7165_v28 = vsel %vm5505_vm7, nan, %v7164_v60  ;;  %v11980_v55 = vsel %vm5505_vm7, nan, %v5515_v20  ;;  %v7376_v22 = vcombine.low %v3811_v38, %v3812_v5  ;;  %vm7384_vm9 = vcmask 261120  }
 0x3fc   : > { %7313 = vrot.lane.b32.xlu0 %v7165_v28, %s8830_s17  ;;  %v5617_v6 = vxor.u32 2147483648, %v8753_v14  ;;  %8437 = vmatprep.subr.bf16.mxu0 %v8436_v49  ;;  %v3813_v42 = vsel %vm3810_vm14, %v11220_v59, %v11861_v57  ;;  %v8440_v35 = vpack.c.bf16 %v7352_v2, %v7351_v62  ;;  %v8444_v17 = vpack.c.bf16 %v7507_v23, %v7506_v25  ;;  %v12669_v2 = vld [vmem:[#allocation6_spill] sm:$0xff] }
 0x3fd   : > { %v8755_v36 = vpop.eup %8754  ;;  %vm5616_vm5 = vcmp.eq.s32.totalorder %v11922_v41, 2  ;;  %8404 = vmatprep.mubr.msk.f32.mxu0 %vm7384_vm9, %v7376_v22  ;;  %8439 = vmatpush3.bf16.msra.mxu0 %v8436_v49  ;;  %v3814_v59 = vsel %vm3810_vm14, %v11267_v37, %v11863_v50  ;;  %v7533_v57 = vcombine.low %v7333_v29, %v7334_v10  ;;  %v7335_v13 = vsel %vm3810_vm14, %v11281_v32, %v11886_v9  ;;  %v3775_v62 = vpop.permute.xlu0 %3774 }
 0x3fe   : > { %v5614_v38 = vxor.u32 2147483648, %v8755_v36  ;;  %v5618_v39 = vsel %vm5616_vm5, %v5617_v6, %v8755_v36  ;;  %v7266_v30 = vsel %vm7264_vm10, %v5617_v6, %v8755_v36  ;;  %8441 = vmatprep.subr.bf16.mxu0 %v8440_v35  ;;  %8445 = vmatprep.subr.bf16.mxu1 %v8444_v17  ;;  %v7377_v21 = vcombine.low %v3813_v42, %v3814_v59  ;;  %v12671_v6 = vld [vmem:[#allocation8_spill] sm:$0xff] }
 0x3ff   : > { %vm5613_vm3 = vcmp.eq.s32.totalorder %v11922_v41, 0  ;;  %8424 = vmatprep.mubr.msk.f32.mxu1 %vm7384_vm9, %v7533_v57  ;;  %8447 = vmatpush3.bf16.msra.mxu1 %v8444_v17  ;;  %v8448_v43 = vpack.c.bf16 %v7509_v4, %v7508_v63  ;;  %v7336_v37 = vsel %vm3810_vm14, %v11334_v3, %v11888_v26  ;;  %v3815_v32 = vsel %vm3810_vm14, %v11363_v34, %v11915_v46 }
 0x400   : > { %v5615_v50 = vsel %vm5613_vm3, %v8753_v14, %v5614_v38  ;;  %v7263_v9 = vsel %vm7261_vm13, %v8753_v14, %v5614_v38  ;;  %v7534_v19 = vcombine.low %v7335_v13, %v7336_v37  ;;  %v3816_v54 = vsel %vm3810_vm14, %v11380_v52, %v11917_v11  ;;  %v12668_v11 = vld [vmem:[#allocation10_spill] sm:$0xff] }
 0x401   : > { %vm5609_vm8 = vweird.f32 %v10707_v53  ;;  %v5619_v3 = vsel %vm5612_vm1, %v5615_v50, %v5618_v39  ;;  %v7267_v26 = vsel %vm7260_vm0, %v7263_v9, %v7266_v30  ;;  %8443 = vmatpush3.bf16.msra.mxu0 %v8440_v35  ;;  %8449 = vmatprep.subr.bf16.mxu1 %v8448_v43  ;;  %v7378_v34 = vcombine.low %v3815_v32, %v3816_v54 }
 0x402   : > { %v12020_v46 = vsel %vm5609_vm8, nan, %v5619_v3  ;;  %v7268_v48 = vsel %vm5609_vm8, nan, %v7267_v26  ;;  %v7337_v5 = vsel %vm3810_vm14, %v11400_v15, %v7294_v44  ;;  %v7338_v52 = vsel %vm3810_vm14, %v11423_v51, %v7296_v16  ;;  %v7298_v15 = vpop.permute.xlu0 %7297  ;;  %v7300_v51 = vpop.permute.xlu1 %7299 }
 0x403   : > { %7315 = vrot.lane.b32.xlu1 %v7268_v48, %s8830_s17  ;;  %8451 = vmatpush3.bf16.msra.mxu1 %v8448_v43  ;;  %v7535_v53 = vcombine.low %v7337_v5, %v7338_v52  ;;  %v3817_v0 = vsel %vm3810_vm14, %v11453_v47, %v3775_v62  ;;  %v3818_v41 = vsel %vm3810_vm14, %v12668_v11, %v3777_v33  ;;  %v12670_v47 = vld [vmem:[#allocation22_spill] sm:$0xff]  ;;  %vm7686_vm6 = vcmask 257024   ;;  %v12089_v33 = vld [vmem:[%s12226_s6] ss:$0 sm:$0xff]  ;;  %s8764_s17 = sshll.u32 %s8831_s20, 4  ;;  %s8765_s17 = int_to_ptr.vmem [resolvable:$false] %s8764_s17 }
 0x404   : > { %8405 = vmatmul.mubr.msk.f32.vlgmr.msra.gmra.mrb[0].mxu0 %vm7384_vm9, %v7377_v21  ;;  %v7379_v29 = vcombine.low %v3817_v0, %v3818_v41  ;;  %v7339_v25 = vsel %vm3810_vm14, %v12669_v2, %v7298_v15  ;;  %v7340_v23 = vsel %vm3810_vm14, %v12670_v47, %v7300_v51  ;;  %vm7967_vm7 = vcmask 1041409   ;;  %s8766_s21 = scalar_lea.vmem %s8765_s17, 512  ;;  %p8767_p0 = scmp.lt.s32.totalorder %s12171_s14, %s8765_s17 }
 0x405   : > { %8407 = vmatprep.mubr.msk.f32.mxu0 %vm7384_vm9, %v7378_v34  ;;  %v7536_v60 = vcombine.low %v7339_v25, %v7340_v23  ;;  %vm7969_vm4 = vcmask 1042434   ;;  %vm7971_vm2 = vcmask 1043459   ;;  %vm7975_vm12 = vcmask 1045509   ;;  %p8768_p1 = scmp.lt.s32.totalorder %s8766_s21, %s8760_s19 }
 0x406   : > { %8425 = vmatmul.mubr.msk.f32.vlgmr.msra.gmra.mrb[0].mxu1 %vm7384_vm9, %v7534_v19  ;;  %vm7977_vm15 = vcmask 1046534   ;;  %vm7979_vm11 = vcmask 1047559  }
 0x407   : > { %8427 = vmatprep.mubr.msk.f32.mxu1 %vm7384_vm9, %v7535_v53  ;;  %p8769_p2 = por %p8768_p1, %p8767_p0 }
 0x408   : > { %8408 = vmatmul.mubr.msk.f32.gmra.mrb[2].mxu0 %vm7384_vm9, %v7379_v29  ;;  %v3779_v20 = vpop.permute.xlu0 %3778 }
 0x409   : > { %v3819_v10 = vsel %vm3810_vm14, %v11555_v12, %v3779_v20  ;;  %p8770_p3 = pnand %p8769_p2, %p8763_p13 }
 0x40a   : > { %8428 = vmatmul.mubr.msk.f32.gmra.mrb[2].mxu1 %vm7384_vm9, %v7536_v60 }
 0x411   : > { %v3781_v49 = vpop.permute.xlu1 %3780 }
 0x412   : > { %v3820_v44 = vsel %vm3810_vm14, %v11583_v18, %v3781_v49 }
 0x413   : > { %v7380_v16 = vcombine.low %v3819_v10, %v3820_v44 }
 0x415   : > { %8410 = vmatprep.mubr.msk.f32.mxu0 %vm7384_vm9, %v7380_v16 }
 0x416   : > { %v7302_v14 = vpop.permute.xlu0 %7301 }
 0x417   : > { %v7341_v22 = vsel %vm3810_vm14, %v11611_v24, %v7302_v14 }
 0x41e   : > { %v7304_v28 = vpop.permute.xlu1 %7303 }
 0x41f   : > { %v7342_v42 = vsel %vm3810_vm14, %v12671_v6, %v7304_v28 }
 0x420   : > { %v7537_v35 = vcombine.low %v7341_v22, %v7342_v42 }
 0x422   : > { %8430 = vmatprep.mubr.msk.f32.mxu1 %vm7384_vm9, %v7537_v35 }
 0x426   : > { %v3783_v17 = vpop.permute.xlu0 %3782 }
 0x427   : > { %v3821_v12 = vsel %vm3810_vm14, %v11662_v40, %v3783_v17 }
 0x42f   : > { %v3785_v63 = vpop.permute.xlu1 %3784 }
 0x430   : > { %v3822_v18 = vsel %vm3810_vm14, %v11690_v31, %v3785_v63 }
 0x431   : > { %v7381_v4 = vcombine.low %v3821_v12, %v3822_v18 }
 0x433   : > { %8411 = vmatmul.mubr.msk.f32.gmra.mrb[4].mxu0 %vm7384_vm9, %v7381_v4  ;;  %v7306_v36 = vpop.permute.xlu0 %7305 }
 0x434   : > { %v7343_v24 = vsel %vm3810_vm14, %v11713_v27, %v7306_v36 }
 0x43b   : > { %v7308_v59 = vpop.permute.xlu1 %7307 }
 0x43c   : > { %v7344_v57 = vsel %vm3810_vm14, %v11734_v61, %v7308_v59 }
 0x43d   : > { %v7538_v13 = vcombine.low %v7343_v24, %v7344_v57 }
 0x43f   : > { %8431 = vmatmul.mubr.msk.f32.gmra.mrb[4].mxu1 %vm7384_vm9, %v7538_v13 }
 0x443   : > { %v3787_v38 = vpop.permute.xlu0 %3786 }
 0x444   : > { %v3823_v40 = vsel %vm3810_vm14, %v11764_v1, %v3787_v38 }
 0x44c   : > { %v3789_v39 = vpop.permute.xlu1 %3788 }
 0x44d   : > { %v3824_v31 = vsel %vm3810_vm14, %v11793_v8, %v3789_v39 }
 0x44e   : > { %v7382_v30 = vcombine.low %v3823_v40, %v3824_v31 }
 0x450   : > { %8413 = vmatprep.mubr.msk.f32.mxu0 %vm7384_vm9, %v7382_v30 }
 0x451   : > { %v7310_v21 = vpop.permute.xlu0 %7309 }
 0x452   : > { %v7345_v27 = vsel %vm3810_vm14, %v11824_v58, %v7310_v21 }
 0x458   : > { %v7312_v43 = vpop.permute.xlu1 %7311 }
 0x459   : > { %v7346_v61 = vsel %vm3810_vm14, %v11850_v7, %v7312_v43 }
 0x45a   : > { %v7539_v37 = vcombine.low %v7345_v27, %v7346_v61 }
 0x45c   : > { %8433 = vmatprep.mubr.msk.f32.mxu1 %vm7384_vm9, %v7539_v37 }
 0x461   : > { %v3791_v32 = vpop.permute.xlu0 %3790 }
 0x462   : > { %v3825_v1 = vsel %vm3810_vm14, %v11894_v56, %v3791_v32  ;;  %v12084_v56 = vld [vmem:[%s12224_s4] ss:$0 sm:$0xff] }
 0x46a   : > { %v3793_v50 = vpop.permute.xlu1 %3792 }
 0x46b   : > { %v3826_v8 = vsel %vm3810_vm14, %v11932_v45, %v3793_v50 }
 0x46c   : > { %v7383_v9 = vcombine.low %v3825_v1, %v3826_v8 }
 0x46e   : > { %8414 = vmatmul.mubr.msk.f32.gmra.mrb[6].mxu0 %vm7384_vm9, %v7383_v9  ;;  %v7314_v19 = vpop.permute.xlu0 %7313 }
 0x46f   : > { %v7347_v58 = vsel %vm3810_vm14, %v11980_v55, %v7314_v19 }
 0x475   : > { %v7316_v54 = vpop.permute.xlu1 %7315 }
 0x476   : > { %v7348_v7 = vsel %vm3810_vm14, %v12020_v46, %v7316_v54  ;;  %vm7973_vm14 = vcmask 1044484  }
 0x477   : > { %v7540_v62 = vcombine.low %v7347_v58, %v7348_v7 }
 0x479   : > { %8434 = vmatmul.mubr.msk.f32.gmra.mrb[6].mxu1 %vm7384_vm9, %v7540_v62 }
 0x4d7   : > { %v8406_v45 = vpop.f32.mrb[0].mxu0 }
 0x4d8   : > { %v7473_v55 = vadd.f32 %v8406_v45, %v12084_v56  ;;  %v7467_v3 = vpop.f32.mrb[1].mxu0 }
 0x4d9   : > { %v7468_v26 = vadd.f32 %v12084_v56, %v7467_v3  ;;  %v8426_v34 = vpop.f32.mrb[0].mxu1 }
 0x4da   : > { %v7671_v46 = vcombine.high %v7473_v55, %v7473_v55  ;;  %v7701_v48 = vsel %vm7686_vm6, %v7473_v55, -inf  ;;  %v7629_v5 = vadd.f32 %v8426_v34, %v12089_v33  ;;  %v7623_v52 = vpop.f32.mrb[1].mxu1 }
 0x4db   : > { %v7702_v53 = vrot.slane %v7701_v48, 4  ;;  %v7670_v0 = vcombine.high %v7468_v26, %v7468_v26  ;;  %v7687_v11 = vsel %vm7686_vm6, %v7468_v26, -inf  ;;  %v7624_v41 = vadd.f32 %v12089_v33, %v7623_v52  ;;  %v8409_v29 = vpop.f32.mrb[2].mxu0 }
 0x4dc   : > { %v7708_v15 = vsel %vm7686_vm6, %v7671_v46, -inf  ;;  %v7688_v51 = vrot.slane %v7687_v11, 4  ;;  %v7808_v2 = vcombine.high %v7629_v5, %v7629_v5  ;;  %v7837_v25 = vsel %vm7686_vm6, %v7629_v5, -inf  ;;  %v7477_v47 = vpop.f32.mrb[3].mxu0 }
 0x4dd   : > { %v7703_v23 = vmax.f32 %v7701_v48, %v7702_v53  ;;  %v7709_v60 = vrot.slane %v7708_v15, 4  ;;  %v7694_v20 = vsel %vm7686_vm6, %v7670_v0, -inf  ;;  %v7838_v49 = vrot.slane %v7837_v25, 4  ;;  %v8429_v18 = vpop.f32.mrb[2].mxu1 }
 0x4de   : > { %v7689_v10 = vmax.f32 %v7687_v11, %v7688_v51  ;;  %v7695_v44 = vrot.slane %v7694_v20, 4  ;;  %v7844_v16 = vsel %vm7686_vm6, %v7808_v2, -inf  ;;  %v7807_v14 = vcombine.high %v7624_v41, %v7624_v41  ;;  %v12103_v57 = vpop.f32.mrb[3].mxu1 }
 0x4df   : > { %v7704_v28 = vrot.slane %v7703_v23, 2  ;;  %v7710_v22 = vmax.f32 %v7708_v15, %v7709_v60  ;;  %v7839_v6 = vmax.f32 %v7837_v25, %v7838_v49  ;;  %v7845_v42 = vrot.slane %v7844_v16, 4 }
 0x4e0   : > { %v7690_v35 = vrot.slane %v7689_v10, 2  ;;  %v7696_v17 = vmax.f32 %v7694_v20, %v7695_v44  ;;  %v7823_v63 = vsel %vm7686_vm6, %v7624_v41, -inf  ;;  %v7830_v12 = vsel %vm7686_vm6, %v7807_v14, -inf }
 0x4e1   : > { %v7705_v4 = vmax.f32 %v7703_v23, %v7704_v28  ;;  %v7711_v36 = vrot.slane %v7710_v22, 2  ;;  %v7840_v59 = vrot.slane %v7839_v6, 2  ;;  %v7846_v24 = vmax.f32 %v7844_v16, %v7845_v42 }
 0x4e2   : > { %v7691_v13 = vmax.f32 %v7689_v10, %v7690_v35  ;;  %v7697_v38 = vrot.slane %v7696_v17, 2  ;;  %v7824_v39 = vrot.slane %v7823_v63, 4  ;;  %v7831_v40 = vrot.slane %v7830_v12, 4 }
 0x4e3   : > { %v7706_v31 = vrot.slane %v7705_v4, 1  ;;  %v7712_v30 = vmax.f32 %v7710_v22, %v7711_v36  ;;  %v7841_v21 = vmax.f32 %v7839_v6, %v7840_v59  ;;  %v7847_v43 = vrot.slane %v7846_v24, 2 }
 0x4e4   : > { %v7692_v27 = vrot.slane %v7691_v13, 1  ;;  %v7698_v61 = vmax.f32 %v7696_v17, %v7697_v38  ;;  %v7825_v37 = vmax.f32 %v7823_v63, %v7824_v39  ;;  %v7832_v32 = vmax.f32 %v7830_v12, %v7831_v40 }
 0x4e5   : > { %v7707_v50 = vmax.f32 %v7705_v4, %v7706_v31  ;;  %v7713_v1 = vrot.slane %v7712_v30, 1  ;;  %v7842_v8 = vrot.slane %v7841_v21, 1  ;;  %v7848_v9 = vmax.f32 %v7846_v24, %v7847_v43 }
 0x4e6   : > { %v7693_v19 = vmax.f32 %v7691_v13, %v7692_v27  ;;  %v7699_v54 = vrot.slane %v7698_v61, 1  ;;  %v7826_v58 = vrot.slane %v7825_v37, 2  ;;  %v7833_v7 = vrot.slane %v7832_v32, 2 }
 0x4e7   : > { %v7714_v62 = vmax.f32 %v7712_v30, %v7713_v1  ;;  %v7843_v45 = vmax.f32 %v7841_v21, %v7842_v8  ;;  %v7849_v55 = vrot.slane %v7848_v9, 1  ;;  %v7483_v3 = vadd.f32 %v8409_v29, %v12084_v56 }
 0x4e8   : > { %v7700_v26 = vmax.f32 %v7698_v61, %v7699_v54  ;;  %v7827_v34 = vmax.f32 %v7825_v37, %v7826_v58  ;;  %v7834_v46 = vmax.f32 %v7832_v32, %v7833_v7  ;;  %v7478_v48 = vadd.f32 %v12084_v56, %v7477_v47 }
 0x4e9   : > { %v7850_v5 = vmax.f32 %v7848_v9, %v7849_v55  ;;  %v7937_v52 = vadd.f32 %v7843_v45, %v7707_v50  ;;  %v7673_v53 = vcombine.high %v7483_v3, %v7483_v3  ;;  %v7729_v0 = vsel %vm7686_vm6, %v7483_v3, -inf }
 0x4ea   : > { %v7828_v11 = vrot.slane %v7827_v34, 1  ;;  %v7835_v41 = vrot.slane %v7834_v46, 1  ;;  %v7730_v15 = vrot.slane %v7729_v0, 4  ;;  %v7672_v51 = vcombine.high %v7478_v48, %v7478_v48 }
 0x4eb   : > { %v7938_v2 = vadd.f32 %v7850_v5, %v7714_v62  ;;  %v7736_v25 = vsel %vm7686_vm6, %v7673_v53, -inf  ;;  %v7715_v23 = vsel %vm7686_vm6, %v7478_v48, -inf  ;;  %v7639_v29 = vadd.f32 %v8429_v18, %v12089_v33 }
 0x4ec   : > { %v7829_v60 = vmax.f32 %v7827_v34, %v7828_v11  ;;  %v7836_v20 = vmax.f32 %v7834_v46, %v7835_v41  ;;  %v7731_v49 = vmax.f32 %v7729_v0, %v7730_v15  ;;  %v7737_v47 = vrot.slane %v7736_v25, 4 }
 0x4ed   : > { %v7716_v10 = vrot.slane %v7715_v23, 4  ;;  %v7722_v44 = vsel %vm7686_vm6, %v7672_v51, -inf  ;;  %v7810_v16 = vcombine.high %v7639_v29, %v7639_v29  ;;  %v7865_v14 = vsel %vm7686_vm6, %v7639_v29, -inf }
 0x4ee   : > { %v7935_v28 = vadd.f32 %v7829_v60, %v7693_v19  ;;  %v7936_v22 = vadd.f32 %v7836_v20, %v7700_v26  ;;  %v7732_v6 = vrot.slane %v7731_v49, 2  ;;  %v7738_v42 = vmax.f32 %v7736_v25, %v7737_v47 }
 0x4ef   : > { %v7723_v35 = vrot.slane %v7722_v44, 4  ;;  %v7866_v17 = vrot.slane %v7865_v14, 4  ;;  %v7872_v63 = vsel %vm7686_vm6, %v7810_v16, -inf  ;;  %v7717_v4 = vmax.f32 %v7715_v23, %v7716_v10 }
 0x4f0   : > { %v7968_v12 = vsel %vm7967_vm7, %v7936_v22, %v7935_v28  ;;  %v7739_v18 = vrot.slane %v7738_v42, 2  ;;  %v7873_v36 = vrot.slane %v7872_v63, 4  ;;  %v7733_v24 = vmax.f32 %v7731_v49, %v7732_v6 }
 0x4f1   : > { %v7970_v59 = vsel %vm7969_vm4, %v7937_v52, %v7968_v12  ;;  %v7724_v13 = vmax.f32 %v7722_v44, %v7723_v35  ;;  %v7867_v38 = vmax.f32 %v7865_v14, %v7866_v17  ;;  %v7634_v31 = vadd.f32 %v12089_v33, %v12103_v57 }
 0x4f2   : > { %v7740_v39 = vmax.f32 %v7738_v42, %v7739_v18  ;;  %v7874_v40 = vmax.f32 %v7872_v63, %v7873_v36  ;;  %v7972_v21 = vsel %vm7971_vm2, %v7938_v2, %v7970_v59  ;;  %v7718_v43 = vrot.slane %v7717_v4, 2 }
 0x4f3   : > { %v7868_v30 = vrot.slane %v7867_v38, 2  ;;  %v7809_v61 = vcombine.high %v7634_v31, %v7634_v31  ;;  %v7734_v37 = vrot.slane %v7733_v24, 1  ;;  %v7725_v32 = vrot.slane %v7724_v13, 2 }
 0x4f4   : > { %v7875_v27 = vrot.slane %v7874_v40, 2  ;;  %v7851_v1 = vsel %vm7686_vm6, %v7634_v31, -inf  ;;  %v7741_v8 = vrot.slane %v7740_v39, 1  ;;  %v7719_v62 = vmax.f32 %v7717_v4, %v7718_v43 }
 0x4f5   : > { %v7869_v50 = vmax.f32 %v7867_v38, %v7868_v30  ;;  %v7852_v19 = vrot.slane %v7851_v1, 4  ;;  %v7858_v54 = vsel %vm7686_vm6, %v7809_v61, -inf  ;;  %v7735_v55 = vmax.f32 %v7733_v24, %v7734_v37 }
 0x4f6   : > { %v7876_v9 = vmax.f32 %v7874_v40, %v7875_v27  ;;  %v7859_v7 = vrot.slane %v7858_v54, 4  ;;  %v7726_v3 = vmax.f32 %v7724_v13, %v7725_v32  ;;  %v7742_v46 = vmax.f32 %v7740_v39, %v7741_v8 }
 0x4f7   : > { %v7870_v58 = vrot.slane %v7869_v50, 1  ;;  %v7853_v45 = vmax.f32 %v7851_v1, %v7852_v19  ;;  %v7720_v0 = vrot.slane %v7719_v62, 1 }
 0x4f8   : > { %v7877_v57 = vrot.slane %v7876_v9, 1  ;;  %v7860_v34 = vmax.f32 %v7858_v54, %v7859_v7  ;;  %v7727_v15 = vrot.slane %v7726_v3, 1 }
 0x4f9   : > { %v7871_v26 = vmax.f32 %v7869_v50, %v7870_v58  ;;  %v7854_v5 = vrot.slane %v7853_v45, 2  ;;  %v7721_v23 = vmax.f32 %v7719_v62, %v7720_v0 }
 0x4fa   : > { %v7878_v48 = vmax.f32 %v7876_v9, %v7877_v57  ;;  %v7861_v53 = vrot.slane %v7860_v34, 2  ;;  %v7728_v60 = vmax.f32 %v7726_v3, %v7727_v15 }
 0x4fb   : > { %v7941_v52 = vadd.f32 %v7871_v26, %v7735_v55  ;;  %v7855_v41 = vmax.f32 %v7853_v45, %v7854_v5 }
 0x4fc   : > { %v7942_v11 = vadd.f32 %v7878_v48, %v7742_v46  ;;  %v7862_v51 = vmax.f32 %v7860_v34, %v7861_v53 }
 0x4fd   : > { %v7856_v2 = vrot.slane %v7855_v41, 1 }
 0x4fe   : > { %v7863_v25 = vrot.slane %v7862_v51, 1 }
 0x4ff   : > { %v7857_v29 = vmax.f32 %v7855_v41, %v7856_v2 }
 0x500   : > { %v7864_v20 = vmax.f32 %v7862_v51, %v7863_v25 }
 0x501   : > { %v7939_v49 = vadd.f32 %v7857_v29, %v7721_v23 }
 0x502   : > { %v7940_v47 = vadd.f32 %v7864_v20, %v7728_v60 }
 0x503   : > { %v7974_v10 = vsel %vm7973_vm14, %v7939_v49, %v7972_v21 }
 0x504   : > { %v7976_v44 = vsel %vm7975_vm12, %v7940_v47, %v7974_v10 }
 0x505   : > { %v7978_v16 = vsel %vm7977_vm15, %v7941_v52, %v7976_v44 }
 0x506   : > { %v7980_v14 = vsel %vm7979_vm11, %v7942_v11, %v7978_v16  ;;  %v8412_v28 = vpop.f32.mrb[4].mxu0 }
 0x507   : > { %7990 = vst.msk [vmem:[%s12128_s9] sm:$0xff] %vm7384_vm9, %v7980_v14  ;;  %v7493_v22 = vadd.f32 %v8412_v28, %v12084_v56  ;;  %v7487_v6 = vpop.f32.mrb[5].mxu0 }
 0x508   : > { %v7488_v42 = vadd.f32 %v12084_v56, %v7487_v6 }
 0x509   : > { %v7675_v35 = vcombine.high %v7493_v22, %v7493_v22  ;;  %v7757_v17 = vsel %vm7686_vm6, %v7493_v22, -inf }
 0x50a   : > { %v7758_v63 = vrot.slane %v7757_v17, 4  ;;  %v7674_v12 = vcombine.high %v7488_v42, %v7488_v42  ;;  %v7743_v18 = vsel %vm7686_vm6, %v7488_v42, -inf }
 0x50b   : > { %v7764_v4 = vsel %vm7686_vm6, %v7675_v35, -inf  ;;  %v7744_v59 = vrot.slane %v7743_v18, 4 }
 0x50c   : > { %v7765_v36 = vrot.slane %v7764_v4, 4  ;;  %v7750_v24 = vsel %vm7686_vm6, %v7674_v12, -inf  ;;  %v7759_v13 = vmax.f32 %v7757_v17, %v7758_v63 }
 0x50d   : > { %v7751_v38 = vrot.slane %v7750_v24, 4  ;;  %v7745_v40 = vmax.f32 %v7743_v18, %v7744_v59 }
 0x50e   : > { %v7766_v39 = vmax.f32 %v7764_v4, %v7765_v36  ;;  %v7760_v30 = vrot.slane %v7759_v13, 2 }
 0x50f   : > { %v7752_v21 = vmax.f32 %v7750_v24, %v7751_v38  ;;  %v7746_v32 = vrot.slane %v7745_v40, 2 }
 0x510   : > { %v7767_v37 = vrot.slane %v7766_v39, 2  ;;  %v7761_v19 = vmax.f32 %v7759_v13, %v7760_v30 }
 0x511   : > { %v7753_v54 = vrot.slane %v7752_v21, 2  ;;  %v7747_v3 = vmax.f32 %v7745_v40, %v7746_v32 }
 0x512   : > { %v8432_v31 = vpop.f32.mrb[4].mxu1  ;;  %v7768_v55 = vmax.f32 %v7766_v39, %v7767_v37  ;;  %v7762_v52 = vrot.slane %v7761_v19, 1 }
 0x513   : > { %v7649_v43 = vadd.f32 %v8432_v31, %v12089_v33  ;;  %v7643_v27 = vpop.f32.mrb[5].mxu1  ;;  %v7754_v53 = vmax.f32 %v7752_v21, %v7753_v54  ;;  %v7748_v2 = vrot.slane %v7747_v3, 1 }
 0x514   : > { %v7644_v61 = vadd.f32 %v12089_v33, %v7643_v27  ;;  %v7769_v51 = vrot.slane %v7768_v55, 1  ;;  %v7763_v20 = vmax.f32 %v7761_v19, %v7762_v52 }
 0x515   : > { %v7812_v50 = vcombine.high %v7649_v43, %v7649_v43  ;;  %v7893_v1 = vsel %vm7686_vm6, %v7649_v43, -inf  ;;  %v7755_v49 = vrot.slane %v7754_v53, 1  ;;  %v7749_v28 = vmax.f32 %v7747_v3, %v7748_v2 }
 0x516   : > { %v7894_v8 = vrot.slane %v7893_v1, 4  ;;  %v7811_v9 = vcombine.high %v7644_v61, %v7644_v61  ;;  %v7879_v7 = vsel %vm7686_vm6, %v7644_v61, -inf  ;;  %v7770_v14 = vmax.f32 %v7768_v55, %v7769_v51 }
 0x517   : > { %v7900_v58 = vsel %vm7686_vm6, %v7812_v50, -inf  ;;  %v7880_v45 = vrot.slane %v7879_v7, 4  ;;  %v7756_v17 = vmax.f32 %v7754_v53, %v7755_v49 }
 0x518   : > { %v7895_v62 = vmax.f32 %v7893_v1, %v7894_v8  ;;  %v7901_v57 = vrot.slane %v7900_v58, 4  ;;  %v7886_v26 = vsel %vm7686_vm6, %v7811_v9, -inf }
 0x519   : > { %v7881_v48 = vmax.f32 %v7879_v7, %v7880_v45  ;;  %v7887_v5 = vrot.slane %v7886_v26, 4 }
 0x51a   : > { %v7896_v34 = vrot.slane %v7895_v62, 2  ;;  %v7902_v46 = vmax.f32 %v7900_v58, %v7901_v57 }
 0x51b   : > { %v7882_v41 = vrot.slane %v7881_v48, 2  ;;  %v7888_v15 = vmax.f32 %v7886_v26, %v7887_v5 }
 0x51c   : > { %v7897_v0 = vmax.f32 %v7895_v62, %v7896_v34  ;;  %v7903_v11 = vrot.slane %v7902_v46, 2 }
 0x51d   : > { %v7883_v29 = vmax.f32 %v7881_v48, %v7882_v41  ;;  %v7889_v60 = vrot.slane %v7888_v15, 2 }
 0x51e   : > { %v7898_v25 = vrot.slane %v7897_v0, 1  ;;  %v7904_v23 = vmax.f32 %v7902_v46, %v7903_v11 }
 0x51f   : > { %v7884_v44 = vrot.slane %v7883_v29, 1  ;;  %v7890_v16 = vmax.f32 %v7888_v15, %v7889_v60 }
 0x520   : > { %v7899_v47 = vmax.f32 %v7897_v0, %v7898_v25  ;;  %v7905_v10 = vrot.slane %v7904_v23, 1 }
 0x521   : > { %v7885_v42 = vmax.f32 %v7883_v29, %v7884_v44  ;;  %v7891_v35 = vrot.slane %v7890_v16, 1 }
 0x522   : > { %v7906_v22 = vmax.f32 %v7904_v23, %v7905_v10  ;;  %v7945_v6 = vadd.f32 %v7899_v47, %v7763_v20 }
 0x523   : > { %v7892_v12 = vmax.f32 %v7890_v16, %v7891_v35  ;;  %v7943_v18 = vadd.f32 %v7885_v42, %v7749_v28 }
 0x524   : > { %v7946_v63 = vadd.f32 %v7906_v22, %v7770_v14 }
 0x525   : > { %v7944_v4 = vadd.f32 %v7892_v12, %v7756_v17 }
 0x527   : > { %v7981_v36 = vsel %vm7967_vm7, %v7944_v4, %v7943_v18 }
 0x528   : > { %v7982_v59 = vsel %vm7969_vm4, %v7945_v6, %v7981_v36 }
 0x529   : > { %v12147_v24 = vsel %vm7971_vm2, %v7946_v63, %v7982_v59 }
 0x541   : > { %v8415_v13 = vpop.f32.mrb[6].mxu0 }
 0x542   : > { %v7503_v38 = vadd.f32 %v8415_v13, %v12084_v56  ;;  %v7497_v39 = vpop.f32.mrb[7].mxu0 }
 0x543   : > { %v7498_v40 = vadd.f32 %v12084_v56, %v7497_v39 }
 0x544   : > { %v7677_v31 = vcombine.high %v7503_v38, %v7503_v38  ;;  %v7785_v30 = vsel %vm7686_vm6, %v7503_v38, -inf }
 0x545   : > { %v7786_v21 = vrot.slane %v7785_v30, 4  ;;  %v7676_v43 = vcombine.high %v7498_v40, %v7498_v40  ;;  %v7771_v27 = vsel %vm7686_vm6, %v7498_v40, -inf }
 0x546   : > { %v7792_v61 = vsel %vm7686_vm6, %v7677_v31, -inf  ;;  %v7772_v32 = vrot.slane %v7771_v27, 4 }
 0x547   : > { %v7793_v37 = vrot.slane %v7792_v61, 4  ;;  %v7778_v50 = vsel %vm7686_vm6, %v7676_v43, -inf  ;;  %v7787_v1 = vmax.f32 %v7785_v30, %v7786_v21 }
 0x548   : > { %v7779_v8 = vrot.slane %v7778_v50, 4  ;;  %v7773_v19 = vmax.f32 %v7771_v27, %v7772_v32 }
 0x549   : > { %v7794_v9 = vmax.f32 %v7792_v61, %v7793_v37  ;;  %v7788_v58 = vrot.slane %v7787_v1, 2 }
 0x54a   : > { %v7780_v56 = vmax.f32 %v7778_v50, %v7779_v8  ;;  %v7774_v55 = vrot.slane %v7773_v19, 2 }
 0x54b   : > { %v7795_v45 = vrot.slane %v7794_v9, 2  ;;  %v7789_v48 = vmax.f32 %v7787_v1, %v7788_v58 }
 0x54c   : > { %v8435_v54 = vpop.f32.mrb[6].mxu1  ;;  %v7781_v5 = vrot.slane %v7780_v56, 2  ;;  %v7775_v51 = vmax.f32 %v7773_v19, %v7774_v55 }
 0x54d   : > { %v7659_v7 = vadd.f32 %v8435_v54, %v12089_v33  ;;  %v7653_v62 = vpop.f32.mrb[7].mxu1  ;;  %v7796_v15 = vmax.f32 %v7794_v9, %v7795_v45  ;;  %v7790_v60 = vrot.slane %v7789_v48, 1 }
 0x54e   : > { %v7654_v57 = vadd.f32 %v12089_v33, %v7653_v62  ;;  %v7782_v20 = vmax.f32 %v7780_v56, %v7781_v5  ;;  %v7776_v14 = vrot.slane %v7775_v51, 1 }
 0x54f   : > { %v7814_v3 = vcombine.high %v7659_v7, %v7659_v7  ;;  %v7921_v26 = vsel %vm7686_vm6, %v7659_v7, -inf  ;;  %v7797_v16 = vrot.slane %v7796_v15, 1  ;;  %v7791_v35 = vmax.f32 %v7789_v48, %v7790_v60 }
 0x550   : > { %v7922_v34 = vrot.slane %v7921_v26, 4  ;;  %v7813_v46 = vcombine.high %v7654_v57, %v7654_v57  ;;  %v7907_v53 = vsel %vm7686_vm6, %v7654_v57, -inf  ;;  %v7783_v17 = vrot.slane %v7782_v20, 1 }
 0x551   : > { %v7928_v52 = vsel %vm7686_vm6, %v7814_v3, -inf  ;;  %v7908_v41 = vrot.slane %v7907_v53, 4  ;;  %v7798_v36 = vmax.f32 %v7796_v15, %v7797_v16  ;;  %v7777_v59 = vmax.f32 %v7775_v51, %v7776_v14 }
 0x552   : > { %v7923_v0 = vmax.f32 %v7921_v26, %v7922_v34  ;;  %v7929_v11 = vrot.slane %v7928_v52, 4  ;;  %v7914_v33 = vsel %vm7686_vm6, %v7813_v46, -inf  ;;  %v7784_v31 = vmax.f32 %v7782_v20, %v7783_v17 }
 0x553   : > { %v7909_v23 = vmax.f32 %v7907_v53, %v7908_v41  ;;  %v7915_v29 = vrot.slane %v7914_v33, 4 }
 0x554   : > { %v7924_v2 = vrot.slane %v7923_v0, 2  ;;  %v7930_v25 = vmax.f32 %v7928_v52, %v7929_v11 }
 0x555   : > { %v7910_v10 = vrot.slane %v7909_v23, 2  ;;  %v7916_v44 = vmax.f32 %v7914_v33, %v7915_v29 }
 0x556   : > { %v7925_v49 = vmax.f32 %v7923_v0, %v7924_v2  ;;  %v7931_v47 = vrot.slane %v7930_v25, 2 }
 0x557   : > { %v7911_v6 = vmax.f32 %v7909_v23, %v7910_v10  ;;  %v7917_v42 = vrot.slane %v7916_v44, 2 }
 0x558   : > { %v7926_v28 = vrot.slane %v7925_v49, 1  ;;  %v7932_v22 = vmax.f32 %v7930_v25, %v7931_v47 }
 0x559   : > { %v7912_v18 = vrot.slane %v7911_v6, 1  ;;  %v7918_v4 = vmax.f32 %v7916_v44, %v7917_v42 }
 0x55a   : > { %v7927_v63 = vmax.f32 %v7925_v49, %v7926_v28  ;;  %v7933_v12 = vrot.slane %v7932_v22, 1 }
 0x55b   : > { %v7913_v39 = vmax.f32 %v7911_v6, %v7912_v18  ;;  %v7919_v40 = vrot.slane %v7918_v4, 1 }
 0x55c   : > { %v7934_v13 = vmax.f32 %v7932_v22, %v7933_v12  ;;  %v7949_v38 = vadd.f32 %v7927_v63, %v7791_v35 }
 0x55d   : > { %v7920_v21 = vmax.f32 %v7918_v4, %v7919_v40  ;;  %v7947_v43 = vadd.f32 %v7913_v39, %v7777_v59 }
 0x55e   : > { %v7950_v30 = vadd.f32 %v7934_v13, %v7798_v36 }
 0x55f   : > { %v7948_v27 = vadd.f32 %v7920_v21, %v7784_v31  ;;  %v7984_v61 = vsel %vm7973_vm14, %v7947_v43, %v12147_v24 }
 0x561   : > { %v7985_v37 = vsel %vm7975_vm12, %v7948_v27, %v7984_v61 }
 0x562   : > { %v7986_v32 = vsel %vm7977_vm15, %v7949_v38, %v7985_v37 }
 0x563   : > { %v7987_v50 = vsel %vm7979_vm11, %v7950_v30, %v7986_v32 }
 0x564   : > { %7991 = vst.msk [vmem:[%s12128_s9 + $0x8] sm:$0xff] %vm7384_vm9, %v7987_v50 }
 0x565   : > { %8773 = shalt.err (!%p8770_p3)
}
 0x566   : > { %s8774_s22 = scalar_lea.hbm %s12169_s18, 256  ;;  %s8778_s8 = scalar_lea.hbm %s12227_s7, 512 }
 0x567   : > { %p8775_p4 = scmp.ne.s32.totalorder %s12169_s18, %s8774_s22  ;;  %p8779_p9 = scmp.lt.u32.totalorder %s12169_s18, %s12227_s7 }
 0x568   : > { %p8780_p10 = scmp.lt.u32.totalorder %s8778_s8, %s8774_s22  ;;  %p8782_p12 = scmp.lt.u32.totalorder %s8774_s22, %s12169_s18 }
 0x569   : > { %p8776_p7 = pnand %p8775_p4, %p8912_p5 }
 0x56a   : > { %p8781_p11 = por %p8780_p10, %p8779_p9 }
 0x56b   : > { %p8777_p8 = pneg %p8776_p7 }
 0x56c   : > { %p8783_p13 = por %p8782_p12, %p8781_p11 }
 0x56e   : > { %p8784_p0 = pnand %p8783_p13, %p8777_p8 }
 0x570   : > { %8787 = shalt.err (!%p8784_p0)
}
 0x571   : > { %s8832_s15 = smov 128   ;;  %s8833_s16 = smov 8  }
 0x572   : > { %8580 = dma.vmem_to_hbm [thread:$0]  (%p8912_p5), %s12171_s14, 256, %s12169_s18, %s12179_s28, %s8832_s15, %s8832_s15, %s8833_s16  }
 0x573 PF: > { %p8586_p1 = scmp.ge.s32.totalorder %s8822_s27, 2  ;;  %s8021_s19 = sand.u32 1, %s8810_s24  }
 0x574   : > { %s8022_s20 = scalar_lea.sflag [#allocation3], %s8021_s19 }
 0x575   : > { %p8583_p2 = pnand %p8586_p1, %p8916_p6 }
 0x577   : > { %8805 = dma.done.wait (!%p8583_p2), %s8022_s20, 256  }
 0x578   : > { %8807 = vsyncadd (!%p8583_p2), %s8022_s20, 4294967040  ;;  %p17_p3 = scmp.ge.s32.totalorder %s8899_s30, 4   ;;  %s12672_s24 = smov %s8814_s25 }
 0x579   : > { %s12673_s25 = smov %s8818_s26  ;;  %s12674_s26 = smov %s8910_s10 }
 0x57a   : > { %s12675_s27 = smov %s8899_s30  ;;  %19 = sbr.rel (!%p17_p3) target bundleno = 3 (0x3), region = 86 }
 0x581   :  { %8027 = vsyncpa [#allocation3], 1 }
 0x582   :  { %8029 = vsyncpa [#allocation3 + $0x1], 1 }

</bundles_post_ra>
